<compile_context>
chip_gen: v5e
topology: v5e:2x2
jax: 0.10.0
libtpu: 0.0.40
codegen_flags: <defaults>
</compile_context>

<pallas_src>
import math

import jax
import jax.numpy as jnp
from jax.experimental import pallas as pl
from jax.experimental.pallas import tpu as pltpu


def _round_up(x, m):
    return (x + m - 1) // m * m


# ----------------------------------------------------------------------------- kernels
def _make_matmul_bn_kernel(relu, has_residual):
    """Tiled matmul + folded-BN (+residual) (+ReLU).

    Grid is (M/tm, N/tn, K/tk); axis 2 (K) is the reduction axis.  The f32 accumulator
    lives in VMEM scratch; the scale/shift/residual/ReLU epilogue runs only on the final
    K step so the (1, tn) broadcasts are not redone every K iteration.
    """
    def kernel(*refs):
        if has_residual:
            p_ref, w_ref, s_ref, b_ref, r_ref, o_ref, acc_ref = refs
        else:
            p_ref, w_ref, s_ref, b_ref, o_ref, acc_ref = refs

        @pl.when(pl.program_id(2) == 0)
        def _():
            acc_ref[...] = jnp.zeros_like(acc_ref)

        acc_ref[...] += jnp.dot(p_ref[...], w_ref[...],
                                preferred_element_type=jnp.float32)

        @pl.when(pl.program_id(2) == pl.num_programs(2) - 1)
        def _():
            y = acc_ref[...] * s_ref[...] + b_ref[...]
            if has_residual:
                y = y + r_ref[...]
            if relu:
                y = jnp.maximum(y, 0.0)
            o_ref[...] = y

    return kernel


def _head_kernel(x_ref, w_ref, b_ref, o_ref):
    # x_ref: [N, H*W, C] -> adaptive avg pool (1,1) + linear (out dim padded to 128).
    pooled = jnp.mean(x_ref[...], axis=1)                        # [N, C] f32
    o_ref[...] = jnp.dot(pooled.astype(jnp.bfloat16), w_ref[...],
                         preferred_element_type=jnp.float32) + b_ref[...]


# ----------------------------------------------------------------------------- pallas wrappers
def _fused_matmul_bn(patches, wmat, scale, shift, *, relu, residual=None):
    """(M,K)@(K,N) * scale + shift [+residual] [ReLU], tiled over an (M,N,K) grid."""
    m, k = patches.shape
    _, n_out = wmat.shape

    # Pad to MXU/lane friendly sizes (K, N -> multiples of 128; M -> sublane tile).
    mp = _round_up(m, 8)
    kp = _round_up(k, 128)
    np_ = _round_up(n_out, 128)

    tm = min(256, mp)
    tn = min(256, np_)
    mp = _round_up(mp, tm)
    np_ = _round_up(np_, tn)
    if kp % 512 == 0:
        tk = 512
    elif kp % 256 == 0:
        tk = 256
    else:
        tk = 128

    p_pad = jnp.pad(patches.astype(jnp.bfloat16), ((0, mp - m), (0, kp - k)))
    w_pad = jnp.pad(wmat.astype(jnp.bfloat16), ((0, kp - k), (0, np_ - n_out)))
    s_pad = jnp.pad(scale.astype(jnp.float32), (0, np_ - n_out)).reshape(1, np_)
    b_pad = jnp.pad(shift.astype(jnp.float32), (0, np_ - n_out)).reshape(1, np_)

    args = [p_pad, w_pad, s_pad, b_pad]
    in_specs = [
        pl.BlockSpec((tm, tk), lambda i, j, kk: (i, kk)),
        pl.BlockSpec((tk, tn), lambda i, j, kk: (kk, j)),
        pl.BlockSpec((1, tn), lambda i, j, kk: (0, j)),
        pl.BlockSpec((1, tn), lambda i, j, kk: (0, j)),
    ]
    if residual is not None:
        r_pad = jnp.pad(residual.astype(jnp.float32),
                        ((0, mp - m), (0, np_ - n_out)))
        args.append(r_pad)
        in_specs.append(pl.BlockSpec((tm, tn), lambda i, j, kk: (i, j)))

    grid = (mp // tm, np_ // tn, kp // tk)
    flops = 2 * mp * np_ * kp
    bytes_accessed = (mp * kp * 2 + kp * np_ * 2 + mp * np_ * 4
                      + (mp * np_ * 4 if residual is not None else 0))

    out = pl.pallas_call(
        _make_matmul_bn_kernel(relu, residual is not None),
        out_shape=jax.ShapeDtypeStruct((mp, np_), jnp.float32),
        grid=grid,
        in_specs=in_specs,
        out_specs=pl.BlockSpec((tm, tn), lambda i, j, kk: (i, j)),
        scratch_shapes=[pltpu.VMEM((tm, tn), jnp.float32)],
        compiler_params=pltpu.CompilerParams(
            dimension_semantics=("parallel", "parallel", "arbitrary"),
            vmem_limit_bytes=32 * 1024 * 1024),
        cost_estimate=pl.CostEstimate(flops=flops, transcendentals=0,
                                      bytes_accessed=bytes_accessed),
    )(*args)
    return out[:m, :n_out]


def _im2col(x, kh, kw, stride, padding):
    """NHWC -> bf16 patches [N*OH*OW, kh*kw*C] (row order matches HWIO weights)."""
    n, h, w, c = x.shape
    x = x.astype(jnp.bfloat16)
    oh = (h + 2 * padding - kh) // stride + 1
    ow = (w + 2 * padding - kw) // stride + 1
    if kh == 1 and kw == 1 and padding == 0:          # 1x1 conv: no patch inflation
        p = x[:, ::stride, ::stride, :]
        return p.reshape(n * oh * ow, c), oh, ow
    xp = jnp.pad(x, ((0, 0), (padding, padding), (padding, padding), (0, 0)))
    cols = []
    for i in range(kh):
        for j in range(kw):
            cols.append(jax.lax.slice(
                xp, (0, i, j, 0),
                (n, i + (oh - 1) * stride + 1, j + (ow - 1) * stride + 1, c),
                (1, stride, stride, 1)))
    p = jnp.stack(cols, axis=3)                        # [N, OH, OW, kh*kw, C]
    return p.reshape(n * oh * ow, kh * kw * c), oh, ow


def conv_bn(x, w_hwio, bn_scale, bn_shift, *, stride, padding, relu=True, residual=None):
    kh, kw, ic, oc = w_hwio.shape
    patches, oh, ow = _im2col(x, kh, kw, stride, padding)
    m = patches.shape[0]
    res2d = residual.reshape(m, oc) if residual is not None else None
    out = _fused_matmul_bn(patches, w_hwio.reshape(kh * kw * ic, oc),
                           bn_scale, bn_shift, relu=relu, residual=res2d)
    return out.reshape(x.shape[0], oh, ow, oc)


def maxpool2d(x, k=3, stride=2):
    # nn.MaxPool2d(kernel_size=3, stride=2), no padding (as in the reference module).
    # Fused elementwise max over the k*k strided window slices (XLA reads x once);
    # avoids materializing a [k*k, M, C] stack in HBM (perf-review recommendation).
    n, h, w, c = x.shape
    oh = (h - k) // stride + 1
    ow = (w - k) // stride + 1
    out = None
    for i in range(k):
        for j in range(k):
            win = jax.lax.slice(
                x, (0, i, j, 0),
                (n, i + (oh - 1) * stride + 1, j + (ow - 1) * stride + 1, c),
                (1, stride, stride, 1))
            out = win if out is None else jnp.maximum(out, win)
    return out


def fc_head(x, fc_w, fc_b):
    n, h, w, c = x.shape
    num_classes = fc_w.shape[1]
    ncp = _round_up(num_classes, 128)                  # lane-dense output, unmasked stores
    w_pad = jnp.pad(fc_w.astype(jnp.bfloat16), ((0, 0), (0, ncp - num_classes)))
    b_pad = jnp.pad(fc_b.astype(jnp.float32), (0, ncp - num_classes)).reshape(1, ncp)
    vmem = pl.BlockSpec(memory_space=pltpu.MemorySpace.VMEM)
    logits = pl.pallas_call(
        _head_kernel,
        out_shape=jax.ShapeDtypeStruct((n, ncp), jnp.float32),
        in_specs=[vmem, vmem, vmem],
        out_specs=vmem,
    )(x.reshape(n, h * w, c), w_pad, b_pad)
    return logits[:, :num_classes]


# ----------------------------------------------------------------------------- params
def _kaiming(key, kh, kw, ic, oc):
    # kaiming_normal, mode='fan_out' (fan_out = oc*kh*kw), gain sqrt(2)
    std = math.sqrt(2.0 / (oc * kh * kw))
    return jax.random.normal(key, (kh, kw, ic, oc), jnp.float32) * std


def _make_bn(c, eps=1e-5):
    gamma, beta = jnp.ones((c,), jnp.float32), jnp.zeros((c,), jnp.float32)
    mean, var = jnp.zeros((c,), jnp.float32), jnp.ones((c,), jnp.float32)
    scale = gamma / jnp.sqrt(var + eps)
    shift = beta - mean * scale
    return scale, shift


def init_resnet(key, blocks_nums=(1, 1, 1, 1), num_classes=10):
    params = {}
    key, k = jax.random.split(key)
    params['conv1_w'] = _kaiming(k, 7, 7, 3, 64)
    params['bn1'] = _make_bn(64)

    in_c = 64
    layers, strides_cfg = [], []
    for ch, nblk, stride0 in zip((64, 128, 256, 512), blocks_nums, (1, 2, 2, 2)):
        blk_params, blk_strides = [], []
        for bi in range(nblk):
            stride = stride0 if bi == 0 else 1
            key, k1, k2, k3 = jax.random.split(key, 4)
            bp = {'w1': _kaiming(k1, 3, 3, in_c, ch), 'bn1': _make_bn(ch),
                  'w2': _kaiming(k2, 3, 3, ch, ch), 'bn2': _make_bn(ch)}
            if stride != 1 or in_c != ch:              # BasicBlock expansion = 1
                bp['ds_w'] = _kaiming(k3, 1, 1, in_c, ch)
                bp['ds_bn'] = _make_bn(ch)
            blk_params.append(bp)
            blk_strides.append(stride)
            in_c = ch
        layers.append(blk_params)
        strides_cfg.append(blk_strides)
    params['layers'] = layers

    key, kw, kb = jax.random.split(key, 3)
    bound = 1.0 / math.sqrt(512)
    params['fc_w'] = jax.random.uniform(kw, (512, num_classes), jnp.float32, -bound, bound)
    params['fc_b'] = jax.random.uniform(kb, (num_classes,), jnp.float32, -bound, bound)
    return params, strides_cfg


# ----------------------------------------------------------------------------- forward
def resnet_forward(params, strides_cfg, x_nhwc):
    s1, b1 = params['bn1']
    x = conv_bn(x_nhwc, params['conv1_w'], s1, b1, stride=2, padding=3, relu=True)
    x = maxpool2d(x, k=3, stride=2)

    for blk_params, blk_strides in zip(params['layers'], strides_cfg):
        for bp, stride in zip(blk_params, blk_strides):
            identity = x
            if 'ds_w' in bp:
                ds_s, ds_b = bp['ds_bn']
                identity = conv_bn(x, bp['ds_w'], ds_s, ds_b,
                                   stride=stride, padding=0, relu=False)
            c1s, c1b = bp['bn1']
            c2s, c2b = bp['bn2']
            out = conv_bn(x, bp['w1'], c1s, c1b, stride=stride, padding=1, relu=True)
            x = conv_bn(out, bp['w2'], c2s, c2b, stride=1, padding=1, relu=True,
                        residual=identity)

    return fc_head(x, params['fc_w'], params['fc_b'])


# ----------------------------------------------------------------------------- main
if __name__ == "__main__":
    key = jax.random.PRNGKey(0)
    key, pkey, xkey = jax.random.split(key, 3)

    # ResNet(BasicBlock, [1,1,1,1], num_classes=10)
    params, strides_cfg = init_resnet(pkey, blocks_nums=(1, 1, 1, 1), num_classes=10)

    # PyTorch-style NCHW input, small shapes: batch=2, 3 channels, 64x64.
    x_nchw = jax.random.normal(xkey, (2, 3, 64, 64), jnp.float32)
    x_nhwc = jnp.transpose(x_nchw, (0, 2, 3, 1))

    fwd = jax.jit(lambda p, xx: resnet_forward(p, strides_cfg, xx))
    logits = fwd(params, x_nhwc)
    jax.block_until_ready(logits)

    assert logits.shape == (2, 10), logits.shape
    assert bool(jnp.all(jnp.isfinite(logits)))
    print("KERNEL_OK")
</pallas_src>

<mosaic_0001>
module attributes {stable_mosaic.version = 11 : i64} {
  func.func @kernel(%arg0: i32, %arg1: i32, %arg2: i32, %arg3: memref<256x256xbf16, #tpu.memory_space<vmem>>, %arg4: memref<256x128xbf16, #tpu.memory_space<vmem>>, %arg5: memref<1x128xf32, #tpu.memory_space<vmem>>, %arg6: memref<1x128xf32, #tpu.memory_space<vmem>>, %arg7: memref<256x128xf32, #tpu.memory_space<vmem>>, %arg8: memref<256x128xf32, #tpu.memory_space<vmem>>) attributes {dimension_semantics = [#tpu.dimension_semantics<parallel>, #tpu.dimension_semantics<parallel>, #tpu.dimension_semantics<arbitrary>], iteration_bounds = array<i64: 8, 1, 1>, scalar_prefetch = 0 : i64, scratch_operands = 1 : i64, tpu.core_type = #tpu.core_type<tc>, window_params = [{transform_indices = @transform_0, window_bounds = array<i64: 256, 256>}, {transform_indices = @transform_1, window_bounds = array<i64: 256, 128>}, {transform_indices = @transform_2, window_bounds = array<i64: 1, 128>}, {transform_indices = @transform_3, window_bounds = array<i64: 1, 128>}, {transform_indices = @transform_4, window_bounds = array<i64: 256, 128>}]} {
    %c0_i32 = arith.constant 0 : i32
    %0 = arith.cmpi eq, %arg2, %c0_i32 : i32
    %1 = arith.extui %0 : i1 to i32
    %c0_i32_0 = arith.constant 0 : i32
    %2 = arith.cmpi ne, %1, %c0_i32_0 : i32
    scf.if %2 {
      %cst_10 = arith.constant 0.000000e+00 : f32
      %12 = vector.broadcast %cst_10 : f32 to vector<256x128xf32>
      %c0_11 = arith.constant 0 : index
      %c0_12 = arith.constant 0 : index
      %13 = vector.load %arg8[%c0_11, %c0_12] : memref<256x128xf32, #tpu.memory_space<vmem>>, vector<256x128xf32>
      tpu.vector_store %arg8[%c0_11, %c0_12], %12 {strides = array<i32>} : memref<256x128xf32, #tpu.memory_space<vmem>>, vector<256x128xf32>,
    } else {
    }
    %c0 = arith.constant 0 : index
    %c0_1 = arith.constant 0 : index
    %3 = vector.load %arg8[%c0, %c0_1] : memref<256x128xf32, #tpu.memory_space<vmem>>, vector<256x128xf32>
    %c0_2 = arith.constant 0 : index
    %c0_3 = arith.constant 0 : index
    %4 = vector.load %arg3[%c0_2, %c0_3] : memref<256x256xbf16, #tpu.memory_space<vmem>>, vector<256x256xbf16>
    %c0_4 = arith.constant 0 : index
    %c0_5 = arith.constant 0 : index
    %5 = vector.load %arg4[%c0_4, %c0_5] : memref<256x128xbf16, #tpu.memory_space<vmem>>, vector<256x128xbf16>
    %cst = arith.constant dense<0.000000e+00> : vector<256x128xf32>
    %6 = tpu.matmul %4, %5, %cst {dimension_numbers = #tpu.dot_dimension_numbers<[1], [0], [0], [1], [0, 0, 1, 1], [], []>} : vector<256x256xbf16>, vector<256x128xbf16>, vector<256x128xf32> -> vector<256x128xf32>
    %7 = arith.addf %3, %6 : vector<256x128xf32>
    %c0_6 = arith.constant 0 : index
    %c0_7 = arith.constant 0 : index
    %8 = vector.load %arg8[%c0_6, %c0_7] : memref<256x128xf32, #tpu.memory_space<vmem>>, vector<256x128xf32>
    tpu.vector_store %arg8[%c0_6, %c0_7], %7 {strides = array<i32>} : memref<256x128xf32, #tpu.memory_space<vmem>>, vector<256x128xf32>,
    %c0_i32_8 = arith.constant 0 : i32
    %9 = arith.cmpi eq, %arg2, %c0_i32_8 : i32
    %10 = arith.extui %9 : i1 to i32
    %c0_i32_9 = arith.constant 0 : i32
    %11 = arith.cmpi ne, %10, %c0_i32_9 : i32
    scf.if %11 {
      %c0_10 = arith.constant 0 : index
      %c0_11 = arith.constant 0 : index
      %12 = vector.load %arg8[%c0_10, %c0_11] : memref<256x128xf32, #tpu.memory_space<vmem>>, vector<256x128xf32>
      %c0_12 = arith.constant 0 : index
      %c0_13 = arith.constant 0 : index
      %13 = vector.load %arg5[%c0_12, %c0_13] : memref<1x128xf32, #tpu.memory_space<vmem>>, vector<1x128xf32>
      %14 = vector.broadcast %13 : vector<1x128xf32> to vector<256x128xf32>
      %15 = arith.mulf %12, %14 : vector<256x128xf32>
      %c0_14 = arith.constant 0 : index
      %c0_15 = arith.constant 0 : index
      %16 = vector.load %arg6[%c0_14, %c0_15] : memref<1x128xf32, #tpu.memory_space<vmem>>, vector<1x128xf32>
      %17 = vector.broadcast %16 : vector<1x128xf32> to vector<256x128xf32>
      %18 = arith.addf %15, %17 : vector<256x128xf32>
      %cst_16 = arith.constant 0.000000e+00 : f32
      %19 = vector.broadcast %cst_16 : f32 to vector<256x128xf32>
      %20 = arith.maximumf %18, %19 : vector<256x128xf32>
      %c0_17 = arith.constant 0 : index
      %c0_18 = arith.constant 0 : index
      %21 = vector.load %arg7[%c0_17, %c0_18] : memref<256x128xf32, #tpu.memory_space<vmem>>, vector<256x128xf32>
      tpu.vector_store %arg7[%c0_17, %c0_18], %20 {strides = array<i32>} : memref<256x128xf32, #tpu.memory_space<vmem>>, vector<256x128xf32>,
    } else {
    }
    return
  }
  func.func @transform_0(%arg0: i32, %arg1: i32, %arg2: i32) -> (i32, i32) {
    %c0_i32 = arith.constant 0 : i32
    return %arg0, %arg2 : i32, i32
  }
  func.func @transform_1(%arg0: i32, %arg1: i32, %arg2: i32) -> (i32, i32) {
    %c0_i32 = arith.constant 0 : i32
    return %arg2, %arg1 : i32, i32
  }
  func.func @transform_2(%arg0: i32, %arg1: i32, %arg2: i32) -> (i32, i32) {
    %c0_i32 = arith.constant 0 : i32
    %c0_i32_0 = arith.constant 0 : i32
    return %c0_i32, %arg1 : i32, i32
  }
  func.func @transform_3(%arg0: i32, %arg1: i32, %arg2: i32) -> (i32, i32) {
    %c0_i32 = arith.constant 0 : i32
    %c0_i32_0 = arith.constant 0 : i32
    return %c0_i32, %arg1 : i32, i32
  }
  func.func @transform_4(%arg0: i32, %arg1: i32, %arg2: i32) -> (i32, i32) {
    %c0_i32 = arith.constant 0 : i32
    return %arg0, %arg1 : i32, i32
  }
}

module attributes {stable_mosaic.version = 11 : i64} {
  func.func @kernel(%arg0: i32, %arg1: i32, %arg2: i32, %arg3: memref<256x128xbf16, #tpu.memory_space<vmem>>, %arg4: memref<128x128xbf16, #tpu.memory_space<vmem>>, %arg5: memref<1x128xf32, #tpu.memory_space<vmem>>, %arg6: memref<1x128xf32, #tpu.memory_space<vmem>>, %arg7: memref<256x128xf32, #tpu.memory_space<vmem>>, %arg8: memref<256x128xf32, #tpu.memory_space<vmem>>) attributes {dimension_semantics = [#tpu.dimension_semantics<parallel>, #tpu.dimension_semantics<parallel>, #tpu.dimension_semantics<arbitrary>], iteration_bounds = array<i64: 2, 1, 5>, scalar_prefetch = 0 : i64, scratch_operands = 1 : i64, tpu.core_type = #tpu.core_type<tc>, window_params = [{transform_indices = @transform_0, window_bounds = array<i64: 256, 128>}, {transform_indices = @transform_1, window_bounds = array<i64: 128, 128>}, {transform_indices = @transform_2, window_bounds = array<i64: 1, 128>}, {transform_indices = @transform_3, window_bounds = array<i64: 1, 128>}, {transform_indices = @transform_4, window_bounds = array<i64: 256, 128>}]} {
    %c0_i32 = arith.constant 0 : i32
    %0 = arith.cmpi eq, %arg2, %c0_i32 : i32
    %1 = arith.extui %0 : i1 to i32
    %c0_i32_0 = arith.constant 0 : i32
    %2 = arith.cmpi ne, %1, %c0_i32_0 : i32
    scf.if %2 {
      %cst_9 = arith.constant 0.000000e+00 : f32
      %12 = vector.broadcast %cst_9 : f32 to vector<256x128xf32>
      %c0_10 = arith.constant 0 : index
      %c0_11 = arith.constant 0 : index
      %13 = vector.load %arg8[%c0_10, %c0_11] : memref<256x128xf32, #tpu.memory_space<vmem>>, vector<256x128xf32>
      tpu.vector_store %arg8[%c0_10, %c0_11], %12 {strides = array<i32>} : memref<256x128xf32, #tpu.memory_space<vmem>>, vector<256x128xf32>,
    } else {
    }
    %c0 = arith.constant 0 : index
    %c0_1 = arith.constant 0 : index
    %3 = vector.load %arg8[%c0, %c0_1] : memref<256x128xf32, #tpu.memory_space<vmem>>, vector<256x128xf32>
    %c0_2 = arith.constant 0 : index
    %c0_3 = arith.constant 0 : index
    %4 = vector.load %arg3[%c0_2, %c0_3] : memref<256x128xbf16, #tpu.memory_space<vmem>>, vector<256x128xbf16>
    %c0_4 = arith.constant 0 : index
    %c0_5 = arith.constant 0 : index
    %5 = vector.load %arg4[%c0_4, %c0_5] : memref<128x128xbf16, #tpu.memory_space<vmem>>, vector<128x128xbf16>
    %cst = arith.constant dense<0.000000e+00> : vector<256x128xf32>
    %6 = tpu.matmul %4, %5, %cst {dimension_numbers = #tpu.dot_dimension_numbers<[1], [0], [0], [1], [0, 0, 1, 1], [], []>} : vector<256x128xbf16>, vector<128x128xbf16>, vector<256x128xf32> -> vector<256x128xf32>
    %7 = arith.addf %3, %6 : vector<256x128xf32>
    %c0_6 = arith.constant 0 : index
    %c0_7 = arith.constant 0 : index
    %8 = vector.load %arg8[%c0_6, %c0_7] : memref<256x128xf32, #tpu.memory_space<vmem>>, vector<256x128xf32>
    tpu.vector_store %arg8[%c0_6, %c0_7], %7 {strides = array<i32>} : memref<256x128xf32, #tpu.memory_space<vmem>>, vector<256x128xf32>,
    %c4_i32 = arith.constant 4 : i32
    %9 = arith.cmpi eq, %arg2, %c4_i32 : i32
    %10 = arith.extui %9 : i1 to i32
    %c0_i32_8 = arith.constant 0 : i32
    %11 = arith.cmpi ne, %10, %c0_i32_8 : i32
    scf.if %11 {
      %c0_9 = arith.constant 0 : index
      %c0_10 = arith.constant 0 : index
      %12 = vector.load %arg8[%c0_9, %c0_10] : memref<256x128xf32, #tpu.memory_space<vmem>>, vector<256x128xf32>
      %c0_11 = arith.constant 0 : index
      %c0_12 = arith.constant 0 : index
      %13 = vector.load %arg5[%c0_11, %c0_12] : memref<1x128xf32, #tpu.memory_space<vmem>>, vector<1x128xf32>
      %14 = vector.broadcast %13 : vector<1x128xf32> to vector<256x128xf32>
      %15 = arith.mulf %12, %14 : vector<256x128xf32>
      %c0_13 = arith.constant 0 : index
      %c0_14 = arith.constant 0 : index
      %16 = vector.load %arg6[%c0_13, %c0_14] : memref<1x128xf32, #tpu.memory_space<vmem>>, vector<1x128xf32>
      %17 = vector.broadcast %16 : vector<1x128xf32> to vector<256x128xf32>
      %18 = arith.addf %15, %17 : vector<256x128xf32>
      %cst_15 = arith.constant 0.000000e+00 : f32
      %19 = vector.broadcast %cst_15 : f32 to vector<256x128xf32>
      %20 = arith.maximumf %18, %19 : vector<256x128xf32>
      %c0_16 = arith.constant 0 : index
      %c0_17 = arith.constant 0 : index
      %21 = vector.load %arg7[%c0_16, %c0_17] : memref<256x128xf32, #tpu.memory_space<vmem>>, vector<256x128xf32>
      tpu.vector_store %arg7[%c0_16, %c0_17], %20 {strides = array<i32>} : memref<256x128xf32, #tpu.memory_space<vmem>>, vector<256x128xf32>,
    } else {
    }
    return
  }
  func.func @transform_0(%arg0: i32, %arg1: i32, %arg2: i32) -> (i32, i32) {
    %c0_i32 = arith.constant 0 : i32
    return %arg0, %arg2 : i32, i32
  }
  func.func @transform_1(%arg0: i32, %arg1: i32, %arg2: i32) -> (i32, i32) {
    %c0_i32 = arith.constant 0 : i32
    return %arg2, %arg1 : i32, i32
  }
  func.func @transform_2(%arg0: i32, %arg1: i32, %arg2: i32) -> (i32, i32) {
    %c0_i32 = arith.constant 0 : i32
    %c0_i32_0 = arith.constant 0 : i32
    return %c0_i32, %arg1 : i32, i32
  }
  func.func @transform_3(%arg0: i32, %arg1: i32, %arg2: i32) -> (i32, i32) {
    %c0_i32 = arith.constant 0 : i32
    %c0_i32_0 = arith.constant 0 : i32
    return %c0_i32, %arg1 : i32, i32
  }
  func.func @transform_4(%arg0: i32, %arg1: i32, %arg2: i32) -> (i32, i32) {
    %c0_i32 = arith.constant 0 : i32
    return %arg0, %arg1 : i32, i32
  }
}

module attributes {stable_mosaic.version = 11 : i64} {
  func.func @kernel(%arg0: i32, %arg1: i32, %arg2: i32, %arg3: memref<256x128xbf16, #tpu.memory_space<vmem>>, %arg4: memref<128x128xbf16, #tpu.memory_space<vmem>>, %arg5: memref<1x128xf32, #tpu.memory_space<vmem>>, %arg6: memref<1x128xf32, #tpu.memory_space<vmem>>, %arg7: memref<256x128xf32, #tpu.memory_space<vmem>>, %arg8: memref<256x128xf32, #tpu.memory_space<vmem>>, %arg9: memref<256x128xf32, #tpu.memory_space<vmem>>) attributes {dimension_semantics = [#tpu.dimension_semantics<parallel>, #tpu.dimension_semantics<parallel>, #tpu.dimension_semantics<arbitrary>], iteration_bounds = array<i64: 2, 1, 5>, scalar_prefetch = 0 : i64, scratch_operands = 1 : i64, tpu.core_type = #tpu.core_type<tc>, window_params = [{transform_indices = @transform_0, window_bounds = array<i64: 256, 128>}, {transform_indices = @transform_1, window_bounds = array<i64: 128, 128>}, {transform_indices = @transform_2, window_bounds = array<i64: 1, 128>}, {transform_indices = @transform_3, window_bounds = array<i64: 1, 128>}, {transform_indices = @transform_4, window_bounds = array<i64: 256, 128>}, {transform_indices = @transform_5, window_bounds = array<i64: 256, 128>}]} {
    %c0_i32 = arith.constant 0 : i32
    %0 = arith.cmpi eq, %arg2, %c0_i32 : i32
    %1 = arith.extui %0 : i1 to i32
    %c0_i32_0 = arith.constant 0 : i32
    %2 = arith.cmpi ne, %1, %c0_i32_0 : i32
    scf.if %2 {
      %cst_9 = arith.constant 0.000000e+00 : f32
      %12 = vector.broadcast %cst_9 : f32 to vector<256x128xf32>
      %c0_10 = arith.constant 0 : index
      %c0_11 = arith.constant 0 : index
      %13 = vector.load %arg9[%c0_10, %c0_11] : memref<256x128xf32, #tpu.memory_space<vmem>>, vector<256x128xf32>
      tpu.vector_store %arg9[%c0_10, %c0_11], %12 {strides = array<i32>} : memref<256x128xf32, #tpu.memory_space<vmem>>, vector<256x128xf32>,
    } else {
    }
    %c0 = arith.constant 0 : index
    %c0_1 = arith.constant 0 : index
    %3 = vector.load %arg9[%c0, %c0_1] : memref<256x128xf32, #tpu.memory_space<vmem>>, vector<256x128xf32>
    %c0_2 = arith.constant 0 : index
    %c0_3 = arith.constant 0 : index
    %4 = vector.load %arg3[%c0_2, %c0_3] : memref<256x128xbf16, #tpu.memory_space<vmem>>, vector<256x128xbf16>
    %c0_4 = arith.constant 0 : index
    %c0_5 = arith.constant 0 : index
    %5 = vector.load %arg4[%c0_4, %c0_5] : memref<128x128xbf16, #tpu.memory_space<vmem>>, vector<128x128xbf16>
    %cst = arith.constant dense<0.000000e+00> : vector<256x128xf32>
    %6 = tpu.matmul %4, %5, %cst {dimension_numbers = #tpu.dot_dimension_numbers<[1], [0], [0], [1], [0, 0, 1, 1], [], []>} : vector<256x128xbf16>, vector<128x128xbf16>, vector<256x128xf32> -> vector<256x128xf32>
    %7 = arith.addf %3, %6 : vector<256x128xf32>
    %c0_6 = arith.constant 0 : index
    %c0_7 = arith.constant 0 : index
    %8 = vector.load %arg9[%c0_6, %c0_7] : memref<256x128xf32, #tpu.memory_space<vmem>>, vector<256x128xf32>
    tpu.vector_store %arg9[%c0_6, %c0_7], %7 {strides = array<i32>} : memref<256x128xf32, #tpu.memory_space<vmem>>, vector<256x128xf32>,
    %c4_i32 = arith.constant 4 : i32
    %9 = arith.cmpi eq, %arg2, %c4_i32 : i32
    %10 = arith.extui %9 : i1 to i32
    %c0_i32_8 = arith.constant 0 : i32
    %11 = arith.cmpi ne, %10, %c0_i32_8 : i32
    scf.if %11 {
      %c0_9 = arith.constant 0 : index
      %c0_10 = arith.constant 0 : index
      %12 = vector.load %arg9[%c0_9, %c0_10] : memref<256x128xf32, #tpu.memory_space<vmem>>, vector<256x128xf32>
      %c0_11 = arith.constant 0 : index
      %c0_12 = arith.constant 0 : index
      %13 = vector.load %arg5[%c0_11, %c0_12] : memref<1x128xf32, #tpu.memory_space<vmem>>, vector<1x128xf32>
      %14 = vector.broadcast %13 : vector<1x128xf32> to vector<256x128xf32>
      %15 = arith.mulf %12, %14 : vector<256x128xf32>
      %c0_13 = arith.constant 0 : index
      %c0_14 = arith.constant 0 : index
      %16 = vector.load %arg6[%c0_13, %c0_14] : memref<1x128xf32, #tpu.memory_space<vmem>>, vector<1x128xf32>
      %17 = vector.broadcast %16 : vector<1x128xf32> to vector<256x128xf32>
      %18 = arith.addf %15, %17 : vector<256x128xf32>
      %c0_15 = arith.constant 0 : index
      %c0_16 = arith.constant 0 : index
      %19 = vector.load %arg7[%c0_15, %c0_16] : memref<256x128xf32, #tpu.memory_space<vmem>>, vector<256x128xf32>
      %20 = arith.addf %18, %19 : vector<256x128xf32>
      %cst_17 = arith.constant 0.000000e+00 : f32
      %21 = vector.broadcast %cst_17 : f32 to vector<256x128xf32>
      %22 = arith.maximumf %20, %21 : vector<256x128xf32>
      %c0_18 = arith.constant 0 : index
      %c0_19 = arith.constant 0 : index
      %23 = vector.load %arg8[%c0_18, %c0_19] : memref<256x128xf32, #tpu.memory_space<vmem>>, vector<256x128xf32>
      tpu.vector_store %arg8[%c0_18, %c0_19], %22 {strides = array<i32>} : memref<256x128xf32, #tpu.memory_space<vmem>>, vector<256x128xf32>,
    } else {
    }
    return
  }
  func.func @transform_0(%arg0: i32, %arg1: i32, %arg2: i32) -> (i32, i32) {
    %c0_i32 = arith.constant 0 : i32
    return %arg0, %arg2 : i32, i32
  }
  func.func @transform_1(%arg0: i32, %arg1: i32, %arg2: i32) -> (i32, i32) {
    %c0_i32 = arith.constant 0 : i32
    return %arg2, %arg1 : i32, i32
  }
  func.func @transform_2(%arg0: i32, %arg1: i32, %arg2: i32) -> (i32, i32) {
    %c0_i32 = arith.constant 0 : i32
    %c0_i32_0 = arith.constant 0 : i32
    return %c0_i32, %arg1 : i32, i32
  }
  func.func @transform_3(%arg0: i32, %arg1: i32, %arg2: i32) -> (i32, i32) {
    %c0_i32 = arith.constant 0 : i32
    %c0_i32_0 = arith.constant 0 : i32
    return %c0_i32, %arg1 : i32, i32
  }
  func.func @transform_4(%arg0: i32, %arg1: i32, %arg2: i32) -> (i32, i32) {
    %c0_i32 = arith.constant 0 : i32
    return %arg0, %arg1 : i32, i32
  }
  func.func @transform_5(%arg0: i32, %arg1: i32, %arg2: i32) -> (i32, i32) {
    %c0_i32 = arith.constant 0 : i32
    return %arg0, %arg1 : i32, i32
  }
}

module attributes {stable_mosaic.version = 11 : i64} {
  func.func @kernel(%arg0: i32, %arg1: i32, %arg2: i32, %arg3: memref<128x128xbf16, #tpu.memory_space<vmem>>, %arg4: memref<128x128xbf16, #tpu.memory_space<vmem>>, %arg5: memref<1x128xf32, #tpu.memory_space<vmem>>, %arg6: memref<1x128xf32, #tpu.memory_space<vmem>>, %arg7: memref<128x128xf32, #tpu.memory_space<vmem>>, %arg8: memref<128x128xf32, #tpu.memory_space<vmem>>) attributes {dimension_semantics = [#tpu.dimension_semantics<parallel>, #tpu.dimension_semantics<parallel>, #tpu.dimension_semantics<arbitrary>], iteration_bounds = array<i64: 1, 1, 5>, scalar_prefetch = 0 : i64, scratch_operands = 1 : i64, tpu.core_type = #tpu.core_type<tc>, window_params = [{transform_indices = @transform_0, window_bounds = array<i64: 128, 128>}, {transform_indices = @transform_1, window_bounds = array<i64: 128, 128>}, {transform_indices = @transform_2, window_bounds = array<i64: 1, 128>}, {transform_indices = @transform_3, window_bounds = array<i64: 1, 128>}, {transform_indices = @transform_4, window_bounds = array<i64: 128, 128>}]} {
    %c0_i32 = arith.constant 0 : i32
    %0 = arith.cmpi eq, %arg2, %c0_i32 : i32
    %1 = arith.extui %0 : i1 to i32
    %c0_i32_0 = arith.constant 0 : i32
    %2 = arith.cmpi ne, %1, %c0_i32_0 : i32
    scf.if %2 {
      %cst_9 = arith.constant 0.000000e+00 : f32
      %12 = vector.broadcast %cst_9 : f32 to vector<128x128xf32>
      %c0_10 = arith.constant 0 : index
      %c0_11 = arith.constant 0 : index
      %13 = vector.load %arg8[%c0_10, %c0_11] : memref<128x128xf32, #tpu.memory_space<vmem>>, vector<128x128xf32>
      tpu.vector_store %arg8[%c0_10, %c0_11], %12 {strides = array<i32>} : memref<128x128xf32, #tpu.memory_space<vmem>>, vector<128x128xf32>,
    } else {
    }
    %c0 = arith.constant 0 : index
    %c0_1 = arith.constant 0 : index
    %3 = vector.load %arg8[%c0, %c0_1] : memref<128x128xf32, #tpu.memory_space<vmem>>, vector<128x128xf32>
    %c0_2 = arith.constant 0 : index
    %c0_3 = arith.constant 0 : index
    %4 = vector.load %arg3[%c0_2, %c0_3] : memref<128x128xbf16, #tpu.memory_space<vmem>>, vector<128x128xbf16>
    %c0_4 = arith.constant 0 : index
    %c0_5 = arith.constant 0 : index
    %5 = vector.load %arg4[%c0_4, %c0_5] : memref<128x128xbf16, #tpu.memory_space<vmem>>, vector<128x128xbf16>
    %cst = arith.constant dense<0.000000e+00> : vector<128x128xf32>
    %6 = tpu.matmul %4, %5, %cst {dimension_numbers = #tpu.dot_dimension_numbers<[1], [0], [0], [1], [0, 0, 1, 1], [], []>} : vector<128x128xbf16>, vector<128x128xbf16>, vector<128x128xf32> -> vector<128x128xf32>
    %7 = arith.addf %3, %6 : vector<128x128xf32>
    %c0_6 = arith.constant 0 : index
    %c0_7 = arith.constant 0 : index
    %8 = vector.load %arg8[%c0_6, %c0_7] : memref<128x128xf32, #tpu.memory_space<vmem>>, vector<128x128xf32>
    tpu.vector_store %arg8[%c0_6, %c0_7], %7 {strides = array<i32>} : memref<128x128xf32, #tpu.memory_space<vmem>>, vector<128x128xf32>,
    %c4_i32 = arith.constant 4 : i32
    %9 = arith.cmpi eq, %arg2, %c4_i32 : i32
    %10 = arith.extui %9 : i1 to i32
    %c0_i32_8 = arith.constant 0 : i32
    %11 = arith.cmpi ne, %10, %c0_i32_8 : i32
    scf.if %11 {
      %c0_9 = arith.constant 0 : index
      %c0_10 = arith.constant 0 : index
      %12 = vector.load %arg8[%c0_9, %c0_10] : memref<128x128xf32, #tpu.memory_space<vmem>>, vector<128x128xf32>
      %c0_11 = arith.constant 0 : index
      %c0_12 = arith.constant 0 : index
      %13 = vector.load %arg5[%c0_11, %c0_12] : memref<1x128xf32, #tpu.memory_space<vmem>>, vector<1x128xf32>
      %14 = vector.broadcast %13 : vector<1x128xf32> to vector<128x128xf32>
      %15 = arith.mulf %12, %14 : vector<128x128xf32>
      %c0_13 = arith.constant 0 : index
      %c0_14 = arith.constant 0 : index
      %16 = vector.load %arg6[%c0_13, %c0_14] : memref<1x128xf32, #tpu.memory_space<vmem>>, vector<1x128xf32>
      %17 = vector.broadcast %16 : vector<1x128xf32> to vector<128x128xf32>
      %18 = arith.addf %15, %17 : vector<128x128xf32>
      %cst_15 = arith.constant 0.000000e+00 : f32
      %19 = vector.broadcast %cst_15 : f32 to vector<128x128xf32>
      %20 = arith.maximumf %18, %19 : vector<128x128xf32>
      %c0_16 = arith.constant 0 : index
      %c0_17 = arith.constant 0 : index
      %21 = vector.load %arg7[%c0_16, %c0_17] : memref<128x128xf32, #tpu.memory_space<vmem>>, vector<128x128xf32>
      tpu.vector_store %arg7[%c0_16, %c0_17], %20 {strides = array<i32>} : memref<128x128xf32, #tpu.memory_space<vmem>>, vector<128x128xf32>,
    } else {
    }
    return
  }
  func.func @transform_0(%arg0: i32, %arg1: i32, %arg2: i32) -> (i32, i32) {
    %c0_i32 = arith.constant 0 : i32
    return %arg0, %arg2 : i32, i32
  }
  func.func @transform_1(%arg0: i32, %arg1: i32, %arg2: i32) -> (i32, i32) {
    %c0_i32 = arith.constant 0 : i32
    return %arg2, %arg1 : i32, i32
  }
  func.func @transform_2(%arg0: i32, %arg1: i32, %arg2: i32) -> (i32, i32) {
    %c0_i32 = arith.constant 0 : i32
    %c0_i32_0 = arith.constant 0 : i32
    return %c0_i32, %arg1 : i32, i32
  }
  func.func @transform_3(%arg0: i32, %arg1: i32, %arg2: i32) -> (i32, i32) {
    %c0_i32 = arith.constant 0 : i32
    %c0_i32_0 = arith.constant 0 : i32
    return %c0_i32, %arg1 : i32, i32
  }
  func.func @transform_4(%arg0: i32, %arg1: i32, %arg2: i32) -> (i32, i32) {
    %c0_i32 = arith.constant 0 : i32
    return %arg0, %arg1 : i32, i32
  }
}

module attributes {stable_mosaic.version = 11 : i64} {
  func.func @kernel(%arg0: i32, %arg1: i32, %arg2: i32, %arg3: memref<128x128xbf16, #tpu.memory_space<vmem>>, %arg4: memref<128x128xbf16, #tpu.memory_space<vmem>>, %arg5: memref<1x128xf32, #tpu.memory_space<vmem>>, %arg6: memref<1x128xf32, #tpu.memory_space<vmem>>, %arg7: memref<128x128xf32, #tpu.memory_space<vmem>>, %arg8: memref<128x128xf32, #tpu.memory_space<vmem>>) attributes {dimension_semantics = [#tpu.dimension_semantics<parallel>, #tpu.dimension_semantics<parallel>, #tpu.dimension_semantics<arbitrary>], iteration_bounds = array<i64: 1, 1, 1>, scalar_prefetch = 0 : i64, scratch_operands = 1 : i64, tpu.core_type = #tpu.core_type<tc>, window_params = [{transform_indices = @transform_0, window_bounds = array<i64: 128, 128>}, {transform_indices = @transform_1, window_bounds = array<i64: 128, 128>}, {transform_indices = @transform_2, window_bounds = array<i64: 1, 128>}, {transform_indices = @transform_3, window_bounds = array<i64: 1, 128>}, {transform_indices = @transform_4, window_bounds = array<i64: 128, 128>}]} {
    %c0_i32 = arith.constant 0 : i32
    %0 = arith.cmpi eq, %arg2, %c0_i32 : i32
    %1 = arith.extui %0 : i1 to i32
    %c0_i32_0 = arith.constant 0 : i32
    %2 = arith.cmpi ne, %1, %c0_i32_0 : i32
    scf.if %2 {
      %cst_10 = arith.constant 0.000000e+00 : f32
      %12 = vector.broadcast %cst_10 : f32 to vector<128x128xf32>
      %c0_11 = arith.constant 0 : index
      %c0_12 = arith.constant 0 : index
      %13 = vector.load %arg8[%c0_11, %c0_12] : memref<128x128xf32, #tpu.memory_space<vmem>>, vector<128x128xf32>
      tpu.vector_store %arg8[%c0_11, %c0_12], %12 {strides = array<i32>} : memref<128x128xf32, #tpu.memory_space<vmem>>, vector<128x128xf32>,
    } else {
    }
    %c0 = arith.constant 0 : index
    %c0_1 = arith.constant 0 : index
    %3 = vector.load %arg8[%c0, %c0_1] : memref<128x128xf32, #tpu.memory_space<vmem>>, vector<128x128xf32>
    %c0_2 = arith.constant 0 : index
    %c0_3 = arith.constant 0 : index
    %4 = vector.load %arg3[%c0_2, %c0_3] : memref<128x128xbf16, #tpu.memory_space<vmem>>, vector<128x128xbf16>
    %c0_4 = arith.constant 0 : index
    %c0_5 = arith.constant 0 : index
    %5 = vector.load %arg4[%c0_4, %c0_5] : memref<128x128xbf16, #tpu.memory_space<vmem>>, vector<128x128xbf16>
    %cst = arith.constant dense<0.000000e+00> : vector<128x128xf32>
    %6 = tpu.matmul %4, %5, %cst {dimension_numbers = #tpu.dot_dimension_numbers<[1], [0], [0], [1], [0, 0, 1, 1], [], []>} : vector<128x128xbf16>, vector<128x128xbf16>, vector<128x128xf32> -> vector<128x128xf32>
    %7 = arith.addf %3, %6 : vector<128x128xf32>
    %c0_6 = arith.constant 0 : index
    %c0_7 = arith.constant 0 : index
    %8 = vector.load %arg8[%c0_6, %c0_7] : memref<128x128xf32, #tpu.memory_space<vmem>>, vector<128x128xf32>
    tpu.vector_store %arg8[%c0_6, %c0_7], %7 {strides = array<i32>} : memref<128x128xf32, #tpu.memory_space<vmem>>, vector<128x128xf32>,
    %c0_i32_8 = arith.constant 0 : i32
    %9 = arith.cmpi eq, %arg2, %c0_i32_8 : i32
    %10 = arith.extui %9 : i1 to i32
    %c0_i32_9 = arith.constant 0 : i32
    %11 = arith.cmpi ne, %10, %c0_i32_9 : i32
    scf.if %11 {
      %c0_10 = arith.constant 0 : index
      %c0_11 = arith.constant 0 : index
      %12 = vector.load %arg8[%c0_10, %c0_11] : memref<128x128xf32, #tpu.memory_space<vmem>>, vector<128x128xf32>
      %c0_12 = arith.constant 0 : index
      %c0_13 = arith.constant 0 : index
      %13 = vector.load %arg5[%c0_12, %c0_13] : memref<1x128xf32, #tpu.memory_space<vmem>>, vector<1x128xf32>
      %14 = vector.broadcast %13 : vector<1x128xf32> to vector<128x128xf32>
      %15 = arith.mulf %12, %14 : vector<128x128xf32>
      %c0_14 = arith.constant 0 : index
      %c0_15 = arith.constant 0 : index
      %16 = vector.load %arg6[%c0_14, %c0_15] : memref<1x128xf32, #tpu.memory_space<vmem>>, vector<1x128xf32>
      %17 = vector.broadcast %16 : vector<1x128xf32> to vector<128x128xf32>
      %18 = arith.addf %15, %17 : vector<128x128xf32>
      %c0_16 = arith.constant 0 : index
      %c0_17 = arith.constant 0 : index
      %19 = vector.load %arg7[%c0_16, %c0_17] : memref<128x128xf32, #tpu.memory_space<vmem>>, vector<128x128xf32>
      tpu.vector_store %arg7[%c0_16, %c0_17], %18 {strides = array<i32>} : memref<128x128xf32, #tpu.memory_space<vmem>>, vector<128x128xf32>,
    } else {
    }
    return
  }
  func.func @transform_0(%arg0: i32, %arg1: i32, %arg2: i32) -> (i32, i32) {
    %c0_i32 = arith.constant 0 : i32
    return %arg0, %arg2 : i32, i32
  }
  func.func @transform_1(%arg0: i32, %arg1: i32, %arg2: i32) -> (i32, i32) {
    %c0_i32 = arith.constant 0 : i32
    return %arg2, %arg1 : i32, i32
  }
  func.func @transform_2(%arg0: i32, %arg1: i32, %arg2: i32) -> (i32, i32) {
    %c0_i32 = arith.constant 0 : i32
    %c0_i32_0 = arith.constant 0 : i32
    return %c0_i32, %arg1 : i32, i32
  }
  func.func @transform_3(%arg0: i32, %arg1: i32, %arg2: i32) -> (i32, i32) {
    %c0_i32 = arith.constant 0 : i32
    %c0_i32_0 = arith.constant 0 : i32
    return %c0_i32, %arg1 : i32, i32
  }
  func.func @transform_4(%arg0: i32, %arg1: i32, %arg2: i32) -> (i32, i32) {
    %c0_i32 = arith.constant 0 : i32
    return %arg0, %arg1 : i32, i32
  }
}

module attributes {stable_mosaic.version = 11 : i64} {
  func.func @kernel(%arg0: i32, %arg1: i32, %arg2: i32, %arg3: memref<128x128xbf16, #tpu.memory_space<vmem>>, %arg4: memref<128x128xbf16, #tpu.memory_space<vmem>>, %arg5: memref<1x128xf32, #tpu.memory_space<vmem>>, %arg6: memref<1x128xf32, #tpu.memory_space<vmem>>, %arg7: memref<128x128xf32, #tpu.memory_space<vmem>>, %arg8: memref<128x128xf32, #tpu.memory_space<vmem>>, %arg9: memref<128x128xf32, #tpu.memory_space<vmem>>) attributes {dimension_semantics = [#tpu.dimension_semantics<parallel>, #tpu.dimension_semantics<parallel>, #tpu.dimension_semantics<arbitrary>], iteration_bounds = array<i64: 1, 1, 9>, scalar_prefetch = 0 : i64, scratch_operands = 1 : i64, tpu.core_type = #tpu.core_type<tc>, window_params = [{transform_indices = @transform_0, window_bounds = array<i64: 128, 128>}, {transform_indices = @transform_1, window_bounds = array<i64: 128, 128>}, {transform_indices = @transform_2, window_bounds = array<i64: 1, 128>}, {transform_indices = @transform_3, window_bounds = array<i64: 1, 128>}, {transform_indices = @transform_4, window_bounds = array<i64: 128, 128>}, {transform_indices = @transform_5, window_bounds = array<i64: 128, 128>}]} {
    %c0_i32 = arith.constant 0 : i32
    %0 = arith.cmpi eq, %arg2, %c0_i32 : i32
    %1 = arith.extui %0 : i1 to i32
    %c0_i32_0 = arith.constant 0 : i32
    %2 = arith.cmpi ne, %1, %c0_i32_0 : i32
    scf.if %2 {
      %cst_9 = arith.constant 0.000000e+00 : f32
      %12 = vector.broadcast %cst_9 : f32 to vector<128x128xf32>
      %c0_10 = arith.constant 0 : index
      %c0_11 = arith.constant 0 : index
      %13 = vector.load %arg9[%c0_10, %c0_11] : memref<128x128xf32, #tpu.memory_space<vmem>>, vector<128x128xf32>
      tpu.vector_store %arg9[%c0_10, %c0_11], %12 {strides = array<i32>} : memref<128x128xf32, #tpu.memory_space<vmem>>, vector<128x128xf32>,
    } else {
    }
    %c0 = arith.constant 0 : index
    %c0_1 = arith.constant 0 : index
    %3 = vector.load %arg9[%c0, %c0_1] : memref<128x128xf32, #tpu.memory_space<vmem>>, vector<128x128xf32>
    %c0_2 = arith.constant 0 : index
    %c0_3 = arith.constant 0 : index
    %4 = vector.load %arg3[%c0_2, %c0_3] : memref<128x128xbf16, #tpu.memory_space<vmem>>, vector<128x128xbf16>
    %c0_4 = arith.constant 0 : index
    %c0_5 = arith.constant 0 : index
    %5 = vector.load %arg4[%c0_4, %c0_5] : memref<128x128xbf16, #tpu.memory_space<vmem>>, vector<128x128xbf16>
    %cst = arith.constant dense<0.000000e+00> : vector<128x128xf32>
    %6 = tpu.matmul %4, %5, %cst {dimension_numbers = #tpu.dot_dimension_numbers<[1], [0], [0], [1], [0, 0, 1, 1], [], []>} : vector<128x128xbf16>, vector<128x128xbf16>, vector<128x128xf32> -> vector<128x128xf32>
    %7 = arith.addf %3, %6 : vector<128x128xf32>
    %c0_6 = arith.constant 0 : index
    %c0_7 = arith.constant 0 : index
    %8 = vector.load %arg9[%c0_6, %c0_7] : memref<128x128xf32, #tpu.memory_space<vmem>>, vector<128x128xf32>
    tpu.vector_store %arg9[%c0_6, %c0_7], %7 {strides = array<i32>} : memref<128x128xf32, #tpu.memory_space<vmem>>, vector<128x128xf32>,
    %c8_i32 = arith.constant 8 : i32
    %9 = arith.cmpi eq, %arg2, %c8_i32 : i32
    %10 = arith.extui %9 : i1 to i32
    %c0_i32_8 = arith.constant 0 : i32
    %11 = arith.cmpi ne, %10, %c0_i32_8 : i32
    scf.if %11 {
      %c0_9 = arith.constant 0 : index
      %c0_10 = arith.constant 0 : index
      %12 = vector.load %arg9[%c0_9, %c0_10] : memref<128x128xf32, #tpu.memory_space<vmem>>, vector<128x128xf32>
      %c0_11 = arith.constant 0 : index
      %c0_12 = arith.constant 0 : index
      %13 = vector.load %arg5[%c0_11, %c0_12] : memref<1x128xf32, #tpu.memory_space<vmem>>, vector<1x128xf32>
      %14 = vector.broadcast %13 : vector<1x128xf32> to vector<128x128xf32>
      %15 = arith.mulf %12, %14 : vector<128x128xf32>
      %c0_13 = arith.constant 0 : index
      %c0_14 = arith.constant 0 : index
      %16 = vector.load %arg6[%c0_13, %c0_14] : memref<1x128xf32, #tpu.memory_space<vmem>>, vector<1x128xf32>
      %17 = vector.broadcast %16 : vector<1x128xf32> to vector<128x128xf32>
      %18 = arith.addf %15, %17 : vector<128x128xf32>
      %c0_15 = arith.constant 0 : index
      %c0_16 = arith.constant 0 : index
      %19 = vector.load %arg7[%c0_15, %c0_16] : memref<128x128xf32, #tpu.memory_space<vmem>>, vector<128x128xf32>
      %20 = arith.addf %18, %19 : vector<128x128xf32>
      %cst_17 = arith.constant 0.000000e+00 : f32
      %21 = vector.broadcast %cst_17 : f32 to vector<128x128xf32>
      %22 = arith.maximumf %20, %21 : vector<128x128xf32>
      %c0_18 = arith.constant 0 : index
      %c0_19 = arith.constant 0 : index
      %23 = vector.load %arg8[%c0_18, %c0_19] : memref<128x128xf32, #tpu.memory_space<vmem>>, vector<128x128xf32>
      tpu.vector_store %arg8[%c0_18, %c0_19], %22 {strides = array<i32>} : memref<128x128xf32, #tpu.memory_space<vmem>>, vector<128x128xf32>,
    } else {
    }
    return
  }
  func.func @transform_0(%arg0: i32, %arg1: i32, %arg2: i32) -> (i32, i32) {
    %c0_i32 = arith.constant 0 : i32
    return %arg0, %arg2 : i32, i32
  }
  func.func @transform_1(%arg0: i32, %arg1: i32, %arg2: i32) -> (i32, i32) {
    %c0_i32 = arith.constant 0 : i32
    return %arg2, %arg1 : i32, i32
  }
  func.func @transform_2(%arg0: i32, %arg1: i32, %arg2: i32) -> (i32, i32) {
    %c0_i32 = arith.constant 0 : i32
    %c0_i32_0 = arith.constant 0 : i32
    return %c0_i32, %arg1 : i32, i32
  }
  func.func @transform_3(%arg0: i32, %arg1: i32, %arg2: i32) -> (i32, i32) {
    %c0_i32 = arith.constant 0 : i32
    %c0_i32_0 = arith.constant 0 : i32
    return %c0_i32, %arg1 : i32, i32
  }
  func.func @transform_4(%arg0: i32, %arg1: i32, %arg2: i32) -> (i32, i32) {
    %c0_i32 = arith.constant 0 : i32
    return %arg0, %arg1 : i32, i32
  }
  func.func @transform_5(%arg0: i32, %arg1: i32, %arg2: i32) -> (i32, i32) {
    %c0_i32 = arith.constant 0 : i32
    return %arg0, %arg1 : i32, i32
  }
}

module attributes {stable_mosaic.version = 11 : i64} {
  func.func @kernel(%arg0: i32, %arg1: i32, %arg2: i32, %arg3: memref<32x128xbf16, #tpu.memory_space<vmem>>, %arg4: memref<128x256xbf16, #tpu.memory_space<vmem>>, %arg5: memref<1x256xf32, #tpu.memory_space<vmem>>, %arg6: memref<1x256xf32, #tpu.memory_space<vmem>>, %arg7: memref<32x256xf32, #tpu.memory_space<vmem>>, %arg8: memref<32x256xf32, #tpu.memory_space<vmem>>) attributes {dimension_semantics = [#tpu.dimension_semantics<parallel>, #tpu.dimension_semantics<parallel>, #tpu.dimension_semantics<arbitrary>], iteration_bounds = array<i64: 1, 1, 9>, scalar_prefetch = 0 : i64, scratch_operands = 1 : i64, tpu.core_type = #tpu.core_type<tc>, window_params = [{transform_indices = @transform_0, window_bounds = array<i64: 32, 128>}, {transform_indices = @transform_1, window_bounds = array<i64: 128, 256>}, {transform_indices = @transform_2, window_bounds = array<i64: 1, 256>}, {transform_indices = @transform_3, window_bounds = array<i64: 1, 256>}, {transform_indices = @transform_4, window_bounds = array<i64: 32, 256>}]} {
    %c0_i32 = arith.constant 0 : i32
    %0 = arith.cmpi eq, %arg2, %c0_i32 : i32
    %1 = arith.extui %0 : i1 to i32
    %c0_i32_0 = arith.constant 0 : i32
    %2 = arith.cmpi ne, %1, %c0_i32_0 : i32
    scf.if %2 {
      %cst_9 = arith.constant 0.000000e+00 : f32
      %12 = vector.broadcast %cst_9 : f32 to vector<32x256xf32>
      %c0_10 = arith.constant 0 : index
      %c0_11 = arith.constant 0 : index
      %13 = vector.load %arg8[%c0_10, %c0_11] : memref<32x256xf32, #tpu.memory_space<vmem>>, vector<32x256xf32>
      tpu.vector_store %arg8[%c0_10, %c0_11], %12 {strides = array<i32>} : memref<32x256xf32, #tpu.memory_space<vmem>>, vector<32x256xf32>,
    } else {
    }
    %c0 = arith.constant 0 : index
    %c0_1 = arith.constant 0 : index
    %3 = vector.load %arg8[%c0, %c0_1] : memref<32x256xf32, #tpu.memory_space<vmem>>, vector<32x256xf32>
    %c0_2 = arith.constant 0 : index
    %c0_3 = arith.constant 0 : index
    %4 = vector.load %arg3[%c0_2, %c0_3] : memref<32x128xbf16, #tpu.memory_space<vmem>>, vector<32x128xbf16>
    %c0_4 = arith.constant 0 : index
    %c0_5 = arith.constant 0 : index
    %5 = vector.load %arg4[%c0_4, %c0_5] : memref<128x256xbf16, #tpu.memory_space<vmem>>, vector<128x256xbf16>
    %cst = arith.constant dense<0.000000e+00> : vector<32x256xf32>
    %6 = tpu.matmul %4, %5, %cst {dimension_numbers = #tpu.dot_dimension_numbers<[1], [0], [0], [1], [0, 0, 1, 1], [], []>} : vector<32x128xbf16>, vector<128x256xbf16>, vector<32x256xf32> -> vector<32x256xf32>
    %7 = arith.addf %3, %6 : vector<32x256xf32>
    %c0_6 = arith.constant 0 : index
    %c0_7 = arith.constant 0 : index
    %8 = vector.load %arg8[%c0_6, %c0_7] : memref<32x256xf32, #tpu.memory_space<vmem>>, vector<32x256xf32>
    tpu.vector_store %arg8[%c0_6, %c0_7], %7 {strides = array<i32>} : memref<32x256xf32, #tpu.memory_space<vmem>>, vector<32x256xf32>,
    %c8_i32 = arith.constant 8 : i32
    %9 = arith.cmpi eq, %arg2, %c8_i32 : i32
    %10 = arith.extui %9 : i1 to i32
    %c0_i32_8 = arith.constant 0 : i32
    %11 = arith.cmpi ne, %10, %c0_i32_8 : i32
    scf.if %11 {
      %c0_9 = arith.constant 0 : index
      %c0_10 = arith.constant 0 : index
      %12 = vector.load %arg8[%c0_9, %c0_10] : memref<32x256xf32, #tpu.memory_space<vmem>>, vector<32x256xf32>
      %c0_11 = arith.constant 0 : index
      %c0_12 = arith.constant 0 : index
      %13 = vector.load %arg5[%c0_11, %c0_12] : memref<1x256xf32, #tpu.memory_space<vmem>>, vector<1x256xf32>
      %14 = vector.broadcast %13 : vector<1x256xf32> to vector<32x256xf32>
      %15 = arith.mulf %12, %14 : vector<32x256xf32>
      %c0_13 = arith.constant 0 : index
      %c0_14 = arith.constant 0 : index
      %16 = vector.load %arg6[%c0_13, %c0_14] : memref<1x256xf32, #tpu.memory_space<vmem>>, vector<1x256xf32>
      %17 = vector.broadcast %16 : vector<1x256xf32> to vector<32x256xf32>
      %18 = arith.addf %15, %17 : vector<32x256xf32>
      %cst_15 = arith.constant 0.000000e+00 : f32
      %19 = vector.broadcast %cst_15 : f32 to vector<32x256xf32>
      %20 = arith.maximumf %18, %19 : vector<32x256xf32>
      %c0_16 = arith.constant 0 : index
      %c0_17 = arith.constant 0 : index
      %21 = vector.load %arg7[%c0_16, %c0_17] : memref<32x256xf32, #tpu.memory_space<vmem>>, vector<32x256xf32>
      tpu.vector_store %arg7[%c0_16, %c0_17], %20 {strides = array<i32>} : memref<32x256xf32, #tpu.memory_space<vmem>>, vector<32x256xf32>,
    } else {
    }
    return
  }
  func.func @transform_0(%arg0: i32, %arg1: i32, %arg2: i32) -> (i32, i32) {
    %c0_i32 = arith.constant 0 : i32
    return %arg0, %arg2 : i32, i32
  }
  func.func @transform_1(%arg0: i32, %arg1: i32, %arg2: i32) -> (i32, i32) {
    %c0_i32 = arith.constant 0 : i32
    return %arg2, %arg1 : i32, i32
  }
  func.func @transform_2(%arg0: i32, %arg1: i32, %arg2: i32) -> (i32, i32) {
    %c0_i32 = arith.constant 0 : i32
    %c0_i32_0 = arith.constant 0 : i32
    return %c0_i32, %arg1 : i32, i32
  }
  func.func @transform_3(%arg0: i32, %arg1: i32, %arg2: i32) -> (i32, i32) {
    %c0_i32 = arith.constant 0 : i32
    %c0_i32_0 = arith.constant 0 : i32
    return %c0_i32, %arg1 : i32, i32
  }
  func.func @transform_4(%arg0: i32, %arg1: i32, %arg2: i32) -> (i32, i32) {
    %c0_i32 = arith.constant 0 : i32
    return %arg0, %arg1 : i32, i32
  }
}

module attributes {stable_mosaic.version = 11 : i64} {
  func.func @kernel(%arg0: i32, %arg1: i32, %arg2: i32, %arg3: memref<32x128xbf16, #tpu.memory_space<vmem>>, %arg4: memref<128x256xbf16, #tpu.memory_space<vmem>>, %arg5: memref<1x256xf32, #tpu.memory_space<vmem>>, %arg6: memref<1x256xf32, #tpu.memory_space<vmem>>, %arg7: memref<32x256xf32, #tpu.memory_space<vmem>>, %arg8: memref<32x256xf32, #tpu.memory_space<vmem>>) attributes {dimension_semantics = [#tpu.dimension_semantics<parallel>, #tpu.dimension_semantics<parallel>, #tpu.dimension_semantics<arbitrary>], iteration_bounds = array<i64: 1, 1, 1>, scalar_prefetch = 0 : i64, scratch_operands = 1 : i64, tpu.core_type = #tpu.core_type<tc>, window_params = [{transform_indices = @transform_0, window_bounds = array<i64: 32, 128>}, {transform_indices = @transform_1, window_bounds = array<i64: 128, 256>}, {transform_indices = @transform_2, window_bounds = array<i64: 1, 256>}, {transform_indices = @transform_3, window_bounds = array<i64: 1, 256>}, {transform_indices = @transform_4, window_bounds = array<i64: 32, 256>}]} {
    %c0_i32 = arith.constant 0 : i32
    %0 = arith.cmpi eq, %arg2, %c0_i32 : i32
    %1 = arith.extui %0 : i1 to i32
    %c0_i32_0 = arith.constant 0 : i32
    %2 = arith.cmpi ne, %1, %c0_i32_0 : i32
    scf.if %2 {
      %cst_10 = arith.constant 0.000000e+00 : f32
      %12 = vector.broadcast %cst_10 : f32 to vector<32x256xf32>
      %c0_11 = arith.constant 0 : index
      %c0_12 = arith.constant 0 : index
      %13 = vector.load %arg8[%c0_11, %c0_12] : memref<32x256xf32, #tpu.memory_space<vmem>>, vector<32x256xf32>
      tpu.vector_store %arg8[%c0_11, %c0_12], %12 {strides = array<i32>} : memref<32x256xf32, #tpu.memory_space<vmem>>, vector<32x256xf32>,
    } else {
    }
    %c0 = arith.constant 0 : index
    %c0_1 = arith.constant 0 : index
    %3 = vector.load %arg8[%c0, %c0_1] : memref<32x256xf32, #tpu.memory_space<vmem>>, vector<32x256xf32>
    %c0_2 = arith.constant 0 : index
    %c0_3 = arith.constant 0 : index
    %4 = vector.load %arg3[%c0_2, %c0_3] : memref<32x128xbf16, #tpu.memory_space<vmem>>, vector<32x128xbf16>
    %c0_4 = arith.constant 0 : index
    %c0_5 = arith.constant 0 : index
    %5 = vector.load %arg4[%c0_4, %c0_5] : memref<128x256xbf16, #tpu.memory_space<vmem>>, vector<128x256xbf16>
    %cst = arith.constant dense<0.000000e+00> : vector<32x256xf32>
    %6 = tpu.matmul %4, %5, %cst {dimension_numbers = #tpu.dot_dimension_numbers<[1], [0], [0], [1], [0, 0, 1, 1], [], []>} : vector<32x128xbf16>, vector<128x256xbf16>, vector<32x256xf32> -> vector<32x256xf32>
    %7 = arith.addf %3, %6 : vector<32x256xf32>
    %c0_6 = arith.constant 0 : index
    %c0_7 = arith.constant 0 : index
    %8 = vector.load %arg8[%c0_6, %c0_7] : memref<32x256xf32, #tpu.memory_space<vmem>>, vector<32x256xf32>
    tpu.vector_store %arg8[%c0_6, %c0_7], %7 {strides = array<i32>} : memref<32x256xf32, #tpu.memory_space<vmem>>, vector<32x256xf32>,
    %c0_i32_8 = arith.constant 0 : i32
    %9 = arith.cmpi eq, %arg2, %c0_i32_8 : i32
    %10 = arith.extui %9 : i1 to i32
    %c0_i32_9 = arith.constant 0 : i32
    %11 = arith.cmpi ne, %10, %c0_i32_9 : i32
    scf.if %11 {
      %c0_10 = arith.constant 0 : index
      %c0_11 = arith.constant 0 : index
      %12 = vector.load %arg8[%c0_10, %c0_11] : memref<32x256xf32, #tpu.memory_space<vmem>>, vector<32x256xf32>
      %c0_12 = arith.constant 0 : index
      %c0_13 = arith.constant 0 : index
      %13 = vector.load %arg5[%c0_12, %c0_13] : memref<1x256xf32, #tpu.memory_space<vmem>>, vector<1x256xf32>
      %14 = vector.broadcast %13 : vector<1x256xf32> to vector<32x256xf32>
      %15 = arith.mulf %12, %14 : vector<32x256xf32>
      %c0_14 = arith.constant 0 : index
      %c0_15 = arith.constant 0 : index
      %16 = vector.load %arg6[%c0_14, %c0_15] : memref<1x256xf32, #tpu.memory_space<vmem>>, vector<1x256xf32>
      %17 = vector.broadcast %16 : vector<1x256xf32> to vector<32x256xf32>
      %18 = arith.addf %15, %17 : vector<32x256xf32>
      %c0_16 = arith.constant 0 : index
      %c0_17 = arith.constant 0 : index
      %19 = vector.load %arg7[%c0_16, %c0_17] : memref<32x256xf32, #tpu.memory_space<vmem>>, vector<32x256xf32>
      tpu.vector_store %arg7[%c0_16, %c0_17], %18 {strides = array<i32>} : memref<32x256xf32, #tpu.memory_space<vmem>>, vector<32x256xf32>,
    } else {
    }
    return
  }
  func.func @transform_0(%arg0: i32, %arg1: i32, %arg2: i32) -> (i32, i32) {
    %c0_i32 = arith.constant 0 : i32
    return %arg0, %arg2 : i32, i32
  }
  func.func @transform_1(%arg0: i32, %arg1: i32, %arg2: i32) -> (i32, i32) {
    %c0_i32 = arith.constant 0 : i32
    return %arg2, %arg1 : i32, i32
  }
  func.func @transform_2(%arg0: i32, %arg1: i32, %arg2: i32) -> (i32, i32) {
    %c0_i32 = arith.constant 0 : i32
    %c0_i32_0 = arith.constant 0 : i32
    return %c0_i32, %arg1 : i32, i32
  }
  func.func @transform_3(%arg0: i32, %arg1: i32, %arg2: i32) -> (i32, i32) {
    %c0_i32 = arith.constant 0 : i32
    %c0_i32_0 = arith.constant 0 : i32
    return %c0_i32, %arg1 : i32, i32
  }
  func.func @transform_4(%arg0: i32, %arg1: i32, %arg2: i32) -> (i32, i32) {
    %c0_i32 = arith.constant 0 : i32
    return %arg0, %arg1 : i32, i32
  }
}

module attributes {stable_mosaic.version = 11 : i64} {
  func.func @kernel(%arg0: i32, %arg1: i32, %arg2: i32, %arg3: memref<32x256xbf16, #tpu.memory_space<vmem>>, %arg4: memref<256x256xbf16, #tpu.memory_space<vmem>>, %arg5: memref<1x256xf32, #tpu.memory_space<vmem>>, %arg6: memref<1x256xf32, #tpu.memory_space<vmem>>, %arg7: memref<32x256xf32, #tpu.memory_space<vmem>>, %arg8: memref<32x256xf32, #tpu.memory_space<vmem>>, %arg9: memref<32x256xf32, #tpu.memory_space<vmem>>) attributes {dimension_semantics = [#tpu.dimension_semantics<parallel>, #tpu.dimension_semantics<parallel>, #tpu.dimension_semantics<arbitrary>], iteration_bounds = array<i64: 1, 1, 9>, scalar_prefetch = 0 : i64, scratch_operands = 1 : i64, tpu.core_type = #tpu.core_type<tc>, window_params = [{transform_indices = @transform_0, window_bounds = array<i64: 32, 256>}, {transform_indices = @transform_1, window_bounds = array<i64: 256, 256>}, {transform_indices = @transform_2, window_bounds = array<i64: 1, 256>}, {transform_indices = @transform_3, window_bounds = array<i64: 1, 256>}, {transform_indices = @transform_4, window_bounds = array<i64: 32, 256>}, {transform_indices = @transform_5, window_bounds = array<i64: 32, 256>}]} {
    %c0_i32 = arith.constant 0 : i32
    %0 = arith.cmpi eq, %arg2, %c0_i32 : i32
    %1 = arith.extui %0 : i1 to i32
    %c0_i32_0 = arith.constant 0 : i32
    %2 = arith.cmpi ne, %1, %c0_i32_0 : i32
    scf.if %2 {
      %cst_9 = arith.constant 0.000000e+00 : f32
      %12 = vector.broadcast %cst_9 : f32 to vector<32x256xf32>
      %c0_10 = arith.constant 0 : index
      %c0_11 = arith.constant 0 : index
      %13 = vector.load %arg9[%c0_10, %c0_11] : memref<32x256xf32, #tpu.memory_space<vmem>>, vector<32x256xf32>
      tpu.vector_store %arg9[%c0_10, %c0_11], %12 {strides = array<i32>} : memref<32x256xf32, #tpu.memory_space<vmem>>, vector<32x256xf32>,
    } else {
    }
    %c0 = arith.constant 0 : index
    %c0_1 = arith.constant 0 : index
    %3 = vector.load %arg9[%c0, %c0_1] : memref<32x256xf32, #tpu.memory_space<vmem>>, vector<32x256xf32>
    %c0_2 = arith.constant 0 : index
    %c0_3 = arith.constant 0 : index
    %4 = vector.load %arg3[%c0_2, %c0_3] : memref<32x256xbf16, #tpu.memory_space<vmem>>, vector<32x256xbf16>
    %c0_4 = arith.constant 0 : index
    %c0_5 = arith.constant 0 : index
    %5 = vector.load %arg4[%c0_4, %c0_5] : memref<256x256xbf16, #tpu.memory_space<vmem>>, vector<256x256xbf16>
    %cst = arith.constant dense<0.000000e+00> : vector<32x256xf32>
    %6 = tpu.matmul %4, %5, %cst {dimension_numbers = #tpu.dot_dimension_numbers<[1], [0], [0], [1], [0, 0, 1, 1], [], []>} : vector<32x256xbf16>, vector<256x256xbf16>, vector<32x256xf32> -> vector<32x256xf32>
    %7 = arith.addf %3, %6 : vector<32x256xf32>
    %c0_6 = arith.constant 0 : index
    %c0_7 = arith.constant 0 : index
    %8 = vector.load %arg9[%c0_6, %c0_7] : memref<32x256xf32, #tpu.memory_space<vmem>>, vector<32x256xf32>
    tpu.vector_store %arg9[%c0_6, %c0_7], %7 {strides = array<i32>} : memref<32x256xf32, #tpu.memory_space<vmem>>, vector<32x256xf32>,
    %c8_i32 = arith.constant 8 : i32
    %9 = arith.cmpi eq, %arg2, %c8_i32 : i32
    %10 = arith.extui %9 : i1 to i32
    %c0_i32_8 = arith.constant 0 : i32
    %11 = arith.cmpi ne, %10, %c0_i32_8 : i32
    scf.if %11 {
      %c0_9 = arith.constant 0 : index
      %c0_10 = arith.constant 0 : index
      %12 = vector.load %arg9[%c0_9, %c0_10] : memref<32x256xf32, #tpu.memory_space<vmem>>, vector<32x256xf32>
      %c0_11 = arith.constant 0 : index
      %c0_12 = arith.constant 0 : index
      %13 = vector.load %arg5[%c0_11, %c0_12] : memref<1x256xf32, #tpu.memory_space<vmem>>, vector<1x256xf32>
      %14 = vector.broadcast %13 : vector<1x256xf32> to vector<32x256xf32>
      %15 = arith.mulf %12, %14 : vector<32x256xf32>
      %c0_13 = arith.constant 0 : index
      %c0_14 = arith.constant 0 : index
      %16 = vector.load %arg6[%c0_13, %c0_14] : memref<1x256xf32, #tpu.memory_space<vmem>>, vector<1x256xf32>
      %17 = vector.broadcast %16 : vector<1x256xf32> to vector<32x256xf32>
      %18 = arith.addf %15, %17 : vector<32x256xf32>
      %c0_15 = arith.constant 0 : index
      %c0_16 = arith.constant 0 : index
      %19 = vector.load %arg7[%c0_15, %c0_16] : memref<32x256xf32, #tpu.memory_space<vmem>>, vector<32x256xf32>
      %20 = arith.addf %18, %19 : vector<32x256xf32>
      %cst_17 = arith.constant 0.000000e+00 : f32
      %21 = vector.broadcast %cst_17 : f32 to vector<32x256xf32>
      %22 = arith.maximumf %20, %21 : vector<32x256xf32>
      %c0_18 = arith.constant 0 : index
      %c0_19 = arith.constant 0 : index
      %23 = vector.load %arg8[%c0_18, %c0_19] : memref<32x256xf32, #tpu.memory_space<vmem>>, vector<32x256xf32>
      tpu.vector_store %arg8[%c0_18, %c0_19], %22 {strides = array<i32>} : memref<32x256xf32, #tpu.memory_space<vmem>>, vector<32x256xf32>,
    } else {
    }
    return
  }
  func.func @transform_0(%arg0: i32, %arg1: i32, %arg2: i32) -> (i32, i32) {
    %c0_i32 = arith.constant 0 : i32
    return %arg0, %arg2 : i32, i32
  }
  func.func @transform_1(%arg0: i32, %arg1: i32, %arg2: i32) -> (i32, i32) {
    %c0_i32 = arith.constant 0 : i32
    return %arg2, %arg1 : i32, i32
  }
  func.func @transform_2(%arg0: i32, %arg1: i32, %arg2: i32) -> (i32, i32) {
    %c0_i32 = arith.constant 0 : i32
    %c0_i32_0 = arith.constant 0 : i32
    return %c0_i32, %arg1 : i32, i32
  }
  func.func @transform_3(%arg0: i32, %arg1: i32, %arg2: i32) -> (i32, i32) {
    %c0_i32 = arith.constant 0 : i32
    %c0_i32_0 = arith.constant 0 : i32
    return %c0_i32, %arg1 : i32, i32
  }
  func.func @transform_4(%arg0: i32, %arg1: i32, %arg2: i32) -> (i32, i32) {
    %c0_i32 = arith.constant 0 : i32
    return %arg0, %arg1 : i32, i32
  }
  func.func @transform_5(%arg0: i32, %arg1: i32, %arg2: i32) -> (i32, i32) {
    %c0_i32 = arith.constant 0 : i32
    return %arg0, %arg1 : i32, i32
  }
}

module attributes {stable_mosaic.version = 11 : i64} {
  func.func @kernel(%arg0: i32, %arg1: i32, %arg2: i32, %arg3: memref<8x256xbf16, #tpu.memory_space<vmem>>, %arg4: memref<256x256xbf16, #tpu.memory_space<vmem>>, %arg5: memref<1x256xf32, #tpu.memory_space<vmem>>, %arg6: memref<1x256xf32, #tpu.memory_space<vmem>>, %arg7: memref<8x256xf32, #tpu.memory_space<vmem>>, %arg8: memref<8x256xf32, #tpu.memory_space<vmem>>) attributes {dimension_semantics = [#tpu.dimension_semantics<parallel>, #tpu.dimension_semantics<parallel>, #tpu.dimension_semantics<arbitrary>], iteration_bounds = array<i64: 1, 2, 9>, scalar_prefetch = 0 : i64, scratch_operands = 1 : i64, tpu.core_type = #tpu.core_type<tc>, window_params = [{transform_indices = @transform_0, window_bounds = array<i64: 8, 256>}, {transform_indices = @transform_1, window_bounds = array<i64: 256, 256>}, {transform_indices = @transform_2, window_bounds = array<i64: 1, 256>}, {transform_indices = @transform_3, window_bounds = array<i64: 1, 256>}, {transform_indices = @transform_4, window_bounds = array<i64: 8, 256>}]} {
    %c0_i32 = arith.constant 0 : i32
    %0 = arith.cmpi eq, %arg2, %c0_i32 : i32
    %1 = arith.extui %0 : i1 to i32
    %c0_i32_0 = arith.constant 0 : i32
    %2 = arith.cmpi ne, %1, %c0_i32_0 : i32
    scf.if %2 {
      %cst_9 = arith.constant 0.000000e+00 : f32
      %12 = vector.broadcast %cst_9 : f32 to vector<8x256xf32>
      %c0_10 = arith.constant 0 : index
      %c0_11 = arith.constant 0 : index
      %13 = vector.load %arg8[%c0_10, %c0_11] : memref<8x256xf32, #tpu.memory_space<vmem>>, vector<8x256xf32>
      tpu.vector_store %arg8[%c0_10, %c0_11], %12 {strides = array<i32>} : memref<8x256xf32, #tpu.memory_space<vmem>>, vector<8x256xf32>,
    } else {
    }
    %c0 = arith.constant 0 : index
    %c0_1 = arith.constant 0 : index
    %3 = vector.load %arg8[%c0, %c0_1] : memref<8x256xf32, #tpu.memory_space<vmem>>, vector<8x256xf32>
    %c0_2 = arith.constant 0 : index
    %c0_3 = arith.constant 0 : index
    %4 = vector.load %arg3[%c0_2, %c0_3] : memref<8x256xbf16, #tpu.memory_space<vmem>>, vector<8x256xbf16>
    %c0_4 = arith.constant 0 : index
    %c0_5 = arith.constant 0 : index
    %5 = vector.load %arg4[%c0_4, %c0_5] : memref<256x256xbf16, #tpu.memory_space<vmem>>, vector<256x256xbf16>
    %cst = arith.constant dense<0.000000e+00> : vector<8x256xf32>
    %6 = tpu.matmul %4, %5, %cst {dimension_numbers = #tpu.dot_dimension_numbers<[1], [0], [0], [1], [0, 0, 1, 1], [], []>} : vector<8x256xbf16>, vector<256x256xbf16>, vector<8x256xf32> -> vector<8x256xf32>
    %7 = arith.addf %3, %6 : vector<8x256xf32>
    %c0_6 = arith.constant 0 : index
    %c0_7 = arith.constant 0 : index
    %8 = vector.load %arg8[%c0_6, %c0_7] : memref<8x256xf32, #tpu.memory_space<vmem>>, vector<8x256xf32>
    tpu.vector_store %arg8[%c0_6, %c0_7], %7 {strides = array<i32>} : memref<8x256xf32, #tpu.memory_space<vmem>>, vector<8x256xf32>,
    %c8_i32 = arith.constant 8 : i32
    %9 = arith.cmpi eq, %arg2, %c8_i32 : i32
    %10 = arith.extui %9 : i1 to i32
    %c0_i32_8 = arith.constant 0 : i32
    %11 = arith.cmpi ne, %10, %c0_i32_8 : i32
    scf.if %11 {
      %c0_9 = arith.constant 0 : index
      %c0_10 = arith.constant 0 : index
      %12 = vector.load %arg8[%c0_9, %c0_10] : memref<8x256xf32, #tpu.memory_space<vmem>>, vector<8x256xf32>
      %c0_11 = arith.constant 0 : index
      %c0_12 = arith.constant 0 : index
      %13 = vector.load %arg5[%c0_11, %c0_12] : memref<1x256xf32, #tpu.memory_space<vmem>>, vector<1x256xf32>
      %14 = vector.broadcast %13 : vector<1x256xf32> to vector<8x256xf32>
      %15 = arith.mulf %12, %14 : vector<8x256xf32>
      %c0_13 = arith.constant 0 : index
      %c0_14 = arith.constant 0 : index
      %16 = vector.load %arg6[%c0_13, %c0_14] : memref<1x256xf32, #tpu.memory_space<vmem>>, vector<1x256xf32>
      %17 = vector.broadcast %16 : vector<1x256xf32> to vector<8x256xf32>
      %18 = arith.addf %15, %17 : vector<8x256xf32>
      %cst_15 = arith.constant 0.000000e+00 : f32
      %19 = vector.broadcast %cst_15 : f32 to vector<8x256xf32>
      %20 = arith.maximumf %18, %19 : vector<8x256xf32>
      %c0_16 = arith.constant 0 : index
      %c0_17 = arith.constant 0 : index
      %21 = vector.load %arg7[%c0_16, %c0_17] : memref<8x256xf32, #tpu.memory_space<vmem>>, vector<8x256xf32>
      tpu.vector_store %arg7[%c0_16, %c0_17], %20 {strides = array<i32>} : memref<8x256xf32, #tpu.memory_space<vmem>>, vector<8x256xf32>,
    } else {
    }
    return
  }
  func.func @transform_0(%arg0: i32, %arg1: i32, %arg2: i32) -> (i32, i32) {
    %c0_i32 = arith.constant 0 : i32
    return %arg0, %arg2 : i32, i32
  }
  func.func @transform_1(%arg0: i32, %arg1: i32, %arg2: i32) -> (i32, i32) {
    %c0_i32 = arith.constant 0 : i32
    return %arg2, %arg1 : i32, i32
  }
  func.func @transform_2(%arg0: i32, %arg1: i32, %arg2: i32) -> (i32, i32) {
    %c0_i32 = arith.constant 0 : i32
    %c0_i32_0 = arith.constant 0 : i32
    return %c0_i32, %arg1 : i32, i32
  }
  func.func @transform_3(%arg0: i32, %arg1: i32, %arg2: i32) -> (i32, i32) {
    %c0_i32 = arith.constant 0 : i32
    %c0_i32_0 = arith.constant 0 : i32
    return %c0_i32, %arg1 : i32, i32
  }
  func.func @transform_4(%arg0: i32, %arg1: i32, %arg2: i32) -> (i32, i32) {
    %c0_i32 = arith.constant 0 : i32
    return %arg0, %arg1 : i32, i32
  }
}

module attributes {stable_mosaic.version = 11 : i64} {
  func.func @kernel(%arg0: i32, %arg1: i32, %arg2: i32, %arg3: memref<8x256xbf16, #tpu.memory_space<vmem>>, %arg4: memref<256x256xbf16, #tpu.memory_space<vmem>>, %arg5: memref<1x256xf32, #tpu.memory_space<vmem>>, %arg6: memref<1x256xf32, #tpu.memory_space<vmem>>, %arg7: memref<8x256xf32, #tpu.memory_space<vmem>>, %arg8: memref<8x256xf32, #tpu.memory_space<vmem>>) attributes {dimension_semantics = [#tpu.dimension_semantics<parallel>, #tpu.dimension_semantics<parallel>, #tpu.dimension_semantics<arbitrary>], iteration_bounds = array<i64: 1, 2, 1>, scalar_prefetch = 0 : i64, scratch_operands = 1 : i64, tpu.core_type = #tpu.core_type<tc>, window_params = [{transform_indices = @transform_0, window_bounds = array<i64: 8, 256>}, {transform_indices = @transform_1, window_bounds = array<i64: 256, 256>}, {transform_indices = @transform_2, window_bounds = array<i64: 1, 256>}, {transform_indices = @transform_3, window_bounds = array<i64: 1, 256>}, {transform_indices = @transform_4, window_bounds = array<i64: 8, 256>}]} {
    %c0_i32 = arith.constant 0 : i32
    %0 = arith.cmpi eq, %arg2, %c0_i32 : i32
    %1 = arith.extui %0 : i1 to i32
    %c0_i32_0 = arith.constant 0 : i32
    %2 = arith.cmpi ne, %1, %c0_i32_0 : i32
    scf.if %2 {
      %cst_10 = arith.constant 0.000000e+00 : f32
      %12 = vector.broadcast %cst_10 : f32 to vector<8x256xf32>
      %c0_11 = arith.constant 0 : index
      %c0_12 = arith.constant 0 : index
      %13 = vector.load %arg8[%c0_11, %c0_12] : memref<8x256xf32, #tpu.memory_space<vmem>>, vector<8x256xf32>
      tpu.vector_store %arg8[%c0_11, %c0_12], %12 {strides = array<i32>} : memref<8x256xf32, #tpu.memory_space<vmem>>, vector<8x256xf32>,
    } else {
    }
    %c0 = arith.constant 0 : index
    %c0_1 = arith.constant 0 : index
    %3 = vector.load %arg8[%c0, %c0_1] : memref<8x256xf32, #tpu.memory_space<vmem>>, vector<8x256xf32>
    %c0_2 = arith.constant 0 : index
    %c0_3 = arith.constant 0 : index
    %4 = vector.load %arg3[%c0_2, %c0_3] : memref<8x256xbf16, #tpu.memory_space<vmem>>, vector<8x256xbf16>
    %c0_4 = arith.constant 0 : index
    %c0_5 = arith.constant 0 : index
    %5 = vector.load %arg4[%c0_4, %c0_5] : memref<256x256xbf16, #tpu.memory_space<vmem>>, vector<256x256xbf16>
    %cst = arith.constant dense<0.000000e+00> : vector<8x256xf32>
    %6 = tpu.matmul %4, %5, %cst {dimension_numbers = #tpu.dot_dimension_numbers<[1], [0], [0], [1], [0, 0, 1, 1], [], []>} : vector<8x256xbf16>, vector<256x256xbf16>, vector<8x256xf32> -> vector<8x256xf32>
    %7 = arith.addf %3, %6 : vector<8x256xf32>
    %c0_6 = arith.constant 0 : index
    %c0_7 = arith.constant 0 : index
    %8 = vector.load %arg8[%c0_6, %c0_7] : memref<8x256xf32, #tpu.memory_space<vmem>>, vector<8x256xf32>
    tpu.vector_store %arg8[%c0_6, %c0_7], %7 {strides = array<i32>} : memref<8x256xf32, #tpu.memory_space<vmem>>, vector<8x256xf32>,
    %c0_i32_8 = arith.constant 0 : i32
    %9 = arith.cmpi eq, %arg2, %c0_i32_8 : i32
    %10 = arith.extui %9 : i1 to i32
    %c0_i32_9 = arith.constant 0 : i32
    %11 = arith.cmpi ne, %10, %c0_i32_9 : i32
    scf.if %11 {
      %c0_10 = arith.constant 0 : index
      %c0_11 = arith.constant 0 : index
      %12 = vector.load %arg8[%c0_10, %c0_11] : memref<8x256xf32, #tpu.memory_space<vmem>>, vector<8x256xf32>
      %c0_12 = arith.constant 0 : index
      %c0_13 = arith.constant 0 : index
      %13 = vector.load %arg5[%c0_12, %c0_13] : memref<1x256xf32, #tpu.memory_space<vmem>>, vector<1x256xf32>
      %14 = vector.broadcast %13 : vector<1x256xf32> to vector<8x256xf32>
      %15 = arith.mulf %12, %14 : vector<8x256xf32>
      %c0_14 = arith.constant 0 : index
      %c0_15 = arith.constant 0 : index
      %16 = vector.load %arg6[%c0_14, %c0_15] : memref<1x256xf32, #tpu.memory_space<vmem>>, vector<1x256xf32>
      %17 = vector.broadcast %16 : vector<1x256xf32> to vector<8x256xf32>
      %18 = arith.addf %15, %17 : vector<8x256xf32>
      %c0_16 = arith.constant 0 : index
      %c0_17 = arith.constant 0 : index
      %19 = vector.load %arg7[%c0_16, %c0_17] : memref<8x256xf32, #tpu.memory_space<vmem>>, vector<8x256xf32>
      tpu.vector_store %arg7[%c0_16, %c0_17], %18 {strides = array<i32>} : memref<8x256xf32, #tpu.memory_space<vmem>>, vector<8x256xf32>,
    } else {
    }
    return
  }
  func.func @transform_0(%arg0: i32, %arg1: i32, %arg2: i32) -> (i32, i32) {
    %c0_i32 = arith.constant 0 : i32
    return %arg0, %arg2 : i32, i32
  }
  func.func @transform_1(%arg0: i32, %arg1: i32, %arg2: i32) -> (i32, i32) {
    %c0_i32 = arith.constant 0 : i32
    return %arg2, %arg1 : i32, i32
  }
  func.func @transform_2(%arg0: i32, %arg1: i32, %arg2: i32) -> (i32, i32) {
    %c0_i32 = arith.constant 0 : i32
    %c0_i32_0 = arith.constant 0 : i32
    return %c0_i32, %arg1 : i32, i32
  }
  func.func @transform_3(%arg0: i32, %arg1: i32, %arg2: i32) -> (i32, i32) {
    %c0_i32 = arith.constant 0 : i32
    %c0_i32_0 = arith.constant 0 : i32
    return %c0_i32, %arg1 : i32, i32
  }
  func.func @transform_4(%arg0: i32, %arg1: i32, %arg2: i32) -> (i32, i32) {
    %c0_i32 = arith.constant 0 : i32
    return %arg0, %arg1 : i32, i32
  }
}

module attributes {stable_mosaic.version = 11 : i64} {
  func.func @kernel(%arg0: i32, %arg1: i32, %arg2: i32, %arg3: memref<8x512xbf16, #tpu.memory_space<vmem>>, %arg4: memref<512x256xbf16, #tpu.memory_space<vmem>>, %arg5: memref<1x256xf32, #tpu.memory_space<vmem>>, %arg6: memref<1x256xf32, #tpu.memory_space<vmem>>, %arg7: memref<8x256xf32, #tpu.memory_space<vmem>>, %arg8: memref<8x256xf32, #tpu.memory_space<vmem>>, %arg9: memref<8x256xf32, #tpu.memory_space<vmem>>) attributes {dimension_semantics = [#tpu.dimension_semantics<parallel>, #tpu.dimension_semantics<parallel>, #tpu.dimension_semantics<arbitrary>], iteration_bounds = array<i64: 1, 2, 9>, scalar_prefetch = 0 : i64, scratch_operands = 1 : i64, tpu.core_type = #tpu.core_type<tc>, window_params = [{transform_indices = @transform_0, window_bounds = array<i64: 8, 512>}, {transform_indices = @transform_1, window_bounds = array<i64: 512, 256>}, {transform_indices = @transform_2, window_bounds = array<i64: 1, 256>}, {transform_indices = @transform_3, window_bounds = array<i64: 1, 256>}, {transform_indices = @transform_4, window_bounds = array<i64: 8, 256>}, {transform_indices = @transform_5, window_bounds = array<i64: 8, 256>}]} {
    %c0_i32 = arith.constant 0 : i32
    %0 = arith.cmpi eq, %arg2, %c0_i32 : i32
    %1 = arith.extui %0 : i1 to i32
    %c0_i32_0 = arith.constant 0 : i32
    %2 = arith.cmpi ne, %1, %c0_i32_0 : i32
    scf.if %2 {
      %cst_9 = arith.constant 0.000000e+00 : f32
      %12 = vector.broadcast %cst_9 : f32 to vector<8x256xf32>
      %c0_10 = arith.constant 0 : index
      %c0_11 = arith.constant 0 : index
      %13 = vector.load %arg9[%c0_10, %c0_11] : memref<8x256xf32, #tpu.memory_space<vmem>>, vector<8x256xf32>
      tpu.vector_store %arg9[%c0_10, %c0_11], %12 {strides = array<i32>} : memref<8x256xf32, #tpu.memory_space<vmem>>, vector<8x256xf32>,
    } else {
    }
    %c0 = arith.constant 0 : index
    %c0_1 = arith.constant 0 : index
    %3 = vector.load %arg9[%c0, %c0_1] : memref<8x256xf32, #tpu.memory_space<vmem>>, vector<8x256xf32>
    %c0_2 = arith.constant 0 : index
    %c0_3 = arith.constant 0 : index
    %4 = vector.load %arg3[%c0_2, %c0_3] : memref<8x512xbf16, #tpu.memory_space<vmem>>, vector<8x512xbf16>
    %c0_4 = arith.constant 0 : index
    %c0_5 = arith.constant 0 : index
    %5 = vector.load %arg4[%c0_4, %c0_5] : memref<512x256xbf16, #tpu.memory_space<vmem>>, vector<512x256xbf16>
    %cst = arith.constant dense<0.000000e+00> : vector<8x256xf32>
    %6 = tpu.matmul %4, %5, %cst {dimension_numbers = #tpu.dot_dimension_numbers<[1], [0], [0], [1], [0, 0, 1, 1], [], []>} : vector<8x512xbf16>, vector<512x256xbf16>, vector<8x256xf32> -> vector<8x256xf32>
    %7 = arith.addf %3, %6 : vector<8x256xf32>
    %c0_6 = arith.constant 0 : index
    %c0_7 = arith.constant 0 : index
    %8 = vector.load %arg9[%c0_6, %c0_7] : memref<8x256xf32, #tpu.memory_space<vmem>>, vector<8x256xf32>
    tpu.vector_store %arg9[%c0_6, %c0_7], %7 {strides = array<i32>} : memref<8x256xf32, #tpu.memory_space<vmem>>, vector<8x256xf32>,
    %c8_i32 = arith.constant 8 : i32
    %9 = arith.cmpi eq, %arg2, %c8_i32 : i32
    %10 = arith.extui %9 : i1 to i32
    %c0_i32_8 = arith.constant 0 : i32
    %11 = arith.cmpi ne, %10, %c0_i32_8 : i32
    scf.if %11 {
      %c0_9 = arith.constant 0 : index
      %c0_10 = arith.constant 0 : index
      %12 = vector.load %arg9[%c0_9, %c0_10] : memref<8x256xf32, #tpu.memory_space<vmem>>, vector<8x256xf32>
      %c0_11 = arith.constant 0 : index
      %c0_12 = arith.constant 0 : index
      %13 = vector.load %arg5[%c0_11, %c0_12] : memref<1x256xf32, #tpu.memory_space<vmem>>, vector<1x256xf32>
      %14 = vector.broadcast %13 : vector<1x256xf32> to vector<8x256xf32>
      %15 = arith.mulf %12, %14 : vector<8x256xf32>
      %c0_13 = arith.constant 0 : index
      %c0_14 = arith.constant 0 : index
      %16 = vector.load %arg6[%c0_13, %c0_14] : memref<1x256xf32, #tpu.memory_space<vmem>>, vector<1x256xf32>
      %17 = vector.broadcast %16 : vector<1x256xf32> to vector<8x256xf32>
      %18 = arith.addf %15, %17 : vector<8x256xf32>
      %c0_15 = arith.constant 0 : index
      %c0_16 = arith.constant 0 : index
      %19 = vector.load %arg7[%c0_15, %c0_16] : memref<8x256xf32, #tpu.memory_space<vmem>>, vector<8x256xf32>
      %20 = arith.addf %18, %19 : vector<8x256xf32>
      %cst_17 = arith.constant 0.000000e+00 : f32
      %21 = vector.broadcast %cst_17 : f32 to vector<8x256xf32>
      %22 = arith.maximumf %20, %21 : vector<8x256xf32>
      %c0_18 = arith.constant 0 : index
      %c0_19 = arith.constant 0 : index
      %23 = vector.load %arg8[%c0_18, %c0_19] : memref<8x256xf32, #tpu.memory_space<vmem>>, vector<8x256xf32>
      tpu.vector_store %arg8[%c0_18, %c0_19], %22 {strides = array<i32>} : memref<8x256xf32, #tpu.memory_space<vmem>>, vector<8x256xf32>,
    } else {
    }
    return
  }
  func.func @transform_0(%arg0: i32, %arg1: i32, %arg2: i32) -> (i32, i32) {
    %c0_i32 = arith.constant 0 : i32
    return %arg0, %arg2 : i32, i32
  }
  func.func @transform_1(%arg0: i32, %arg1: i32, %arg2: i32) -> (i32, i32) {
    %c0_i32 = arith.constant 0 : i32
    return %arg2, %arg1 : i32, i32
  }
  func.func @transform_2(%arg0: i32, %arg1: i32, %arg2: i32) -> (i32, i32) {
    %c0_i32 = arith.constant 0 : i32
    %c0_i32_0 = arith.constant 0 : i32
    return %c0_i32, %arg1 : i32, i32
  }
  func.func @transform_3(%arg0: i32, %arg1: i32, %arg2: i32) -> (i32, i32) {
    %c0_i32 = arith.constant 0 : i32
    %c0_i32_0 = arith.constant 0 : i32
    return %c0_i32, %arg1 : i32, i32
  }
  func.func @transform_4(%arg0: i32, %arg1: i32, %arg2: i32) -> (i32, i32) {
    %c0_i32 = arith.constant 0 : i32
    return %arg0, %arg1 : i32, i32
  }
  func.func @transform_5(%arg0: i32, %arg1: i32, %arg2: i32) -> (i32, i32) {
    %c0_i32 = arith.constant 0 : i32
    return %arg0, %arg1 : i32, i32
  }
}

module attributes {stable_mosaic.version = 11 : i64} {
  func.func @_head_kernel(%arg0: memref<2x4x512xf32, #tpu.memory_space<vmem>>, %arg1: memref<512x128xbf16, #tpu.memory_space<vmem>>, %arg2: memref<1x128xf32, #tpu.memory_space<vmem>>, %arg3: memref<2x128xf32, #tpu.memory_space<vmem>>) attributes {dimension_semantics = [], scalar_prefetch = 0 : i64, scratch_operands = 0 : i64, tpu.core_type = #tpu.core_type<tc>} {
    %c0 = arith.constant 0 : index
    %c0_0 = arith.constant 0 : index
    %c0_1 = arith.constant 0 : index
    %0 = vector.load %arg0[%c0, %c0_0, %c0_1] : memref<2x4x512xf32, #tpu.memory_space<vmem>>, vector<2x4x512xf32>
    %cst = arith.constant dense<0.000000e+00> : vector<2x512xf32>
    %1 = vector.multi_reduction <add>, %0, %cst [1] : vector<2x4x512xf32> to vector<2x512xf32>
    %cst_2 = arith.constant 4.000000e+00 : f32
    %2 = vector.broadcast %cst_2 : f32 to vector<2x512xf32>
    %3 = arith.divf %1, %2 : vector<2x512xf32>
    %4 = arith.truncf %3 : vector<2x512xf32> to vector<2x512xbf16>
    %c0_3 = arith.constant 0 : index
    %c0_4 = arith.constant 0 : index
    %5 = vector.load %arg1[%c0_3, %c0_4] : memref<512x128xbf16, #tpu.memory_space<vmem>>, vector<512x128xbf16>
    %cst_5 = arith.constant dense<0.000000e+00> : vector<2x128xf32>
    %6 = tpu.matmul %4, %5, %cst_5 {dimension_numbers = #tpu.dot_dimension_numbers<[1], [0], [0], [1], [0, 0, 1, 1], [], []>} : vector<2x512xbf16>, vector<512x128xbf16>, vector<2x128xf32> -> vector<2x128xf32>
    %c0_6 = arith.constant 0 : index
    %c0_7 = arith.constant 0 : index
    %7 = vector.load %arg2[%c0_6, %c0_7] : memref<1x128xf32, #tpu.memory_space<vmem>>, vector<1x128xf32>
    %8 = vector.broadcast %7 : vector<1x128xf32> to vector<2x128xf32>
    %9 = arith.addf %6, %8 : vector<2x128xf32>
    %c0_8 = arith.constant 0 : index
    %c0_9 = arith.constant 0 : index
    %10 = vector.load %arg3[%c0_8, %c0_9] : memref<2x128xf32, #tpu.memory_space<vmem>>, vector<2x128xf32>
    tpu.vector_store %arg3[%c0_8, %c0_9], %9 {strides = array<i32>} : memref<2x128xf32, #tpu.memory_space<vmem>>, vector<2x128xf32>,
    return
  }
}

</mosaic_0001>

<bundles_post_ra>
// kernel: _lambda_.13
= control target key start
LH: loop header
LB: loop body
LE: loop exit
PB: predicated region body
PF: predicated region fallthrough
CT: control target
= control target key end

     0   :  { %s1582_s15 = smov 0   ;;  %s1584_s16 = smov 0   ;;  %s1847_s0 = inlined_call_operand.vmem [shape: bf16[2048,256], index: 0, kind: input, shape index: {}]   ;;  %s1848_s1 = inlined_call_operand.vmem [shape: bf16[256,128], index: 1, kind: input, shape index: {}]   ;;  %s1849_s2 = inlined_call_operand.vmem [shape: f32[1,128], index: 2, kind: input, shape index: {}]   ;;  %s1850_s3 = inlined_call_operand.vmem [shape: f32[1,128], index: 3, kind: input, shape index: {}]   ;;  %s1851_s4 = inlined_call_operand.vmem [shape: f32[2048,128], index: 4, kind: output, shape index: {}]  }
   0x1   :  { %s1586_s17 = smov 0  }
   0x2 LB: > { %s33_s18 = sadd.s32 1, %s1551_s16  ;;  %p1242_p0 = scmp.ge.s32.totalorder %s1555_s17, 1  ;;  %s1555_s17 = sphi %s1586_s17, %s14_s17   ;;  %s1551_s16 = sphi %s1584_s16, %s1853_s16   ;;  %s1547_s15 = sphi %s1582_s15, %s1852_s15  }
   0x3   : > { %p35_p1 = scmp.ge.s32.totalorder %s33_s18, 8  ;;  %p224_p2 = scmp.lt.s32.totalorder %s1555_s17, 9 }
   0x5   : > { %s1855_s18 = smov (%p35_p1, %s33_s18), 0  ;;  %p225_p3 = pnand %p1242_p0, %p224_p2 }
   0x6   : > { %s1243_s5 = sshll.u32 (!%p225_p3), %s1547_s15, 5 }
   0x7   : > { %228 = sbr.rel (%p225_p3) target bundleno = 306 (0x132), region = 36  ;;  %p274_p4 = scmp.lt.s32.totalorder (!%p225_p3), %s1243_s5, 255 }
   0xc   : > { %v1482_v0 = vld [vmem:[%s1848_s1 + $0x38] sm:$0xff]  ;;  %v1481_v2 = vld [vmem:[%s1848_s1 + $0x30] sm:$0xff]  ;;  %v1480_v4 = vld [vmem:[%s1848_s1 + $0x28] sm:$0xff]  ;;  %s1857_s5 = smov (!%p274_p4, %s1243_s5), 255 }
   0xd   : > { %v1490_v1 = vld [vmem:[%s1848_s1 + $0x78] sm:$0xff]  ;;  %696 = vmatpush.bf16.msra.mxu0 %v1482_v0  ;;  %1491 = vmatpush.bf16.msra.mxu2 %v1482_v0  ;;  %v1489_v3 = vld [vmem:[%s1848_s1 + $0x70] sm:$0xff]  ;;  %v1488_v5 = vld [vmem:[%s1848_s1 + $0x68] sm:$0xff]  ;;  %s1442_s21 = sshll.u32 %s1857_s5, 3 }
   0xe   : > { %785 = vmatpush.bf16.msra.mxu1 %v1490_v1  ;;  %1499 = vmatpush.bf16.msra.mxu3 %v1490_v1  ;;  %v1479_v6 = vld [vmem:[%s1848_s1 + $0x20] sm:$0xff]  ;;  %v1478_v8 = vld [vmem:[%s1848_s1 + $0x18] sm:$0xff]  ;;  %v1477_v10 = vld [vmem:[%s1848_s1 + $0x10] sm:$0xff]  ;;  %s1650_s26 = scalar_lea.vmem %s1847_s0, %s1442_s21  ;;  %s1742_s14 = scalar_lea.vmem %s1851_s4, %s1442_s21 }
   0xf   : > { %v1487_v7 = vld [vmem:[%s1848_s1 + $0x60] sm:$0xff]  ;;  %v1486_v9 = vld [vmem:[%s1848_s1 + $0x58] sm:$0xff]  ;;  %v1485_v11 = vld [vmem:[%s1848_s1 + $0x50] sm:$0xff] }
  0x10   : > { %v1476_v12 = vld [vmem:[%s1848_s1 + $0x8] sm:$0xff]  ;;  %v1475_v14 = vld [vmem:[%s1848_s1] sm:$0xff]  ;;  %v1258_v28 = vld [vmem:[%s1650_s26 + $0x10] sm:$0xf] }
  0x11   : > { %697 = vmatpush.bf16.msra.mxu0 %v1481_v2  ;;  %1492 = vmatpush.bf16.msra.mxu2 %v1481_v2  ;;  %v1484_v13 = vld [vmem:[%s1848_s1 + $0x48] sm:$0xff]  ;;  %v1483_v15 = vld [vmem:[%s1848_s1 + $0x40] sm:$0xff]  ;;  %v1446_v29 = vld [vmem:[%s1650_s26 + $0x14] sm:$0xf0] }
  0x12   : > { %786 = vmatpush.bf16.msra.mxu1 %v1489_v3  ;;  %1500 = vmatpush.bf16.msra.mxu3 %v1489_v3  ;;  %v1250_v16 = vld [vmem:[%s1650_s26] sm:$0xf]  ;;  %v1444_v17 = vld [vmem:[%s1650_s26 + $0x4] sm:$0xf0]  ;;  %v1443_v20 = vld [vmem:[%s1650_s26 + $0x4] sm:$0xf]  ;;  %v1259_v36 = vor.u32 %v1446_v29, %v1258_v28 }
  0x13   : > { %v1314_v18 = vld [vmem:[%s1650_s26 + $0x80] sm:$0xf]  ;;  %v1460_v19 = vld [vmem:[%s1650_s26 + $0x84] sm:$0xf0]  ;;  %v1252_v21 = vld [vmem:[%s1650_s26 + $0x8] sm:$0xf0]  ;;  %v1251_v24 = vor.u32 %v1444_v17, %v1250_v16 }
  0x14   : > { %v1459_v22 = vld [vmem:[%s1650_s26 + $0x84] sm:$0xf]  ;;  %v1316_v23 = vld [vmem:[%s1650_s26 + $0x88] sm:$0xf0]  ;;  %v1315_v25 = vor.u32 %v1460_v19, %v1314_v18  ;;  %v1255_v26 = vor.u32 %v1443_v20, %v1252_v21  ;;  %v1322_v30 = vld [vmem:[%s1650_s26 + $0x90] sm:$0xf] }
  0x15   : > { %698 = vmatpush.bf16.msra.mxu0 %v1480_v4  ;;  %1493 = vmatpush.bf16.msra.mxu2 %v1480_v4  ;;  %v1319_v27 = vor.u32 %v1459_v22, %v1316_v23  ;;  %v1462_v31 = vld [vmem:[%s1650_s26 + $0x94] sm:$0xf0]  ;;  %v1445_v32 = vld [vmem:[%s1650_s26 + $0x14] sm:$0xf]  ;;  %v1260_v33 = vld [vmem:[%s1650_s26 + $0x18] sm:$0xf0] }
  0x16   : > { %787 = vmatpush.bf16.msra.mxu1 %v1488_v5  ;;  %1501 = vmatpush.bf16.msra.mxu3 %v1488_v5  ;;  %v1461_v34 = vld [vmem:[%s1650_s26 + $0x94] sm:$0xf]  ;;  %v1324_v35 = vld [vmem:[%s1650_s26 + $0x98] sm:$0xf0]  ;;  %v1323_v37 = vor.u32 %v1462_v31, %v1322_v30  ;;  %v1263_v38 = vor.u32 %v1445_v32, %v1260_v33  ;;  %v1266_v40 = vld [vmem:[%s1650_s26 + $0x20] sm:$0xf] }
  0x17   : > { %v1327_v39 = vor.u32 %v1461_v34, %v1324_v35  ;;  %v1448_v41 = vld [vmem:[%s1650_s26 + $0x24] sm:$0xf0]  ;;  %v1330_v42 = vld [vmem:[%s1650_s26 + $0xa0] sm:$0xf]  ;;  %v1447_v44 = vld [vmem:[%s1650_s26 + $0x24] sm:$0xf] }
  0x18   : > { %v1464_v43 = vld [vmem:[%s1650_s26 + $0xa4] sm:$0xf0]  ;;  %v1268_v45 = vld [vmem:[%s1650_s26 + $0x28] sm:$0xf0]  ;;  %v1463_v46 = vld [vmem:[%s1650_s26 + $0xa4] sm:$0xf]  ;;  %v1267_v48 = vor.u32 %v1448_v41, %v1266_v40 }
  0x19   : > { %699 = vmatpush.bf16.msra.mxu0 %v1479_v6  ;;  %1494 = vmatpush.bf16.msra.mxu2 %v1479_v6  ;;  %v1332_v47 = vld [vmem:[%s1650_s26 + $0xa8] sm:$0xf0]  ;;  %v1331_v49 = vor.u32 %v1464_v43, %v1330_v42  ;;  %v1271_v50 = vor.u32 %v1447_v44, %v1268_v45  ;;  %v1274_v52 = vld [vmem:[%s1650_s26 + $0x30] sm:$0xf]  ;;  %v1450_v53 = vld [vmem:[%s1650_s26 + $0x34] sm:$0xf0] }
  0x1a   : > { %788 = vmatpush.bf16.msra.mxu1 %v1487_v7  ;;  %1502 = vmatpush.bf16.msra.mxu3 %v1487_v7  ;;  %v1335_v51 = vor.u32 %v1463_v46, %v1332_v47  ;;  %v1338_v54 = vld [vmem:[%s1650_s26 + $0xb0] sm:$0xf]  ;;  %v1466_v55 = vld [vmem:[%s1650_s26 + $0xb4] sm:$0xf0]  ;;  %v1449_v56 = vld [vmem:[%s1650_s26 + $0x34] sm:$0xf]  ;;  %v1275_v60 = vor.u32 %v1450_v53, %v1274_v52 }
  0x1b   : > { %v1276_v57 = vld [vmem:[%s1650_s26 + $0x38] sm:$0xf0]  ;;  %v1465_v58 = vld [vmem:[%s1650_s26 + $0xb4] sm:$0xf]  ;;  %v1339_v61 = vor.u32 %v1466_v55, %v1338_v54  ;;  %v1282_v0 = vld [vmem:[%s1650_s26 + $0x40] sm:$0xf] }
  0x1c   : > { %v1340_v59 = vld [vmem:[%s1650_s26 + $0xb8] sm:$0xf0]  ;;  %v1279_v62 = vor.u32 %v1449_v56, %v1276_v57  ;;  %v1452_v1 = vld [vmem:[%s1650_s26 + $0x44] sm:$0xf0]  ;;  %v1346_v2 = vld [vmem:[%s1650_s26 + $0xc0] sm:$0xf] }
  0x1d   : > { %700 = vmatpush.bf16.msra.mxu0 %v1478_v8  ;;  %1495 = vmatpush.bf16.msra.mxu2 %v1478_v8  ;;  %v1343_v63 = vor.u32 %v1465_v58, %v1340_v59  ;;  %v1468_v3 = vld [vmem:[%s1650_s26 + $0xc4] sm:$0xf0]  ;;  %v1451_v4 = vld [vmem:[%s1650_s26 + $0x44] sm:$0xf]  ;;  %v1284_v5 = vld [vmem:[%s1650_s26 + $0x48] sm:$0xf0]  ;;  %v1283_v8 = vor.u32 %v1452_v1, %v1282_v0 }
  0x1e   : > { %789 = vmatpush.bf16.msra.mxu1 %v1486_v9  ;;  %1503 = vmatpush.bf16.msra.mxu3 %v1486_v9  ;;  %v1467_v6 = vld [vmem:[%s1650_s26 + $0xc4] sm:$0xf]  ;;  %v1348_v7 = vld [vmem:[%s1650_s26 + $0xc8] sm:$0xf0]  ;;  %v1347_v9 = vor.u32 %v1468_v3, %v1346_v2  ;;  %v1453_v16 = vld [vmem:[%s1650_s26 + $0x54] sm:$0xf] }
  0x1f   : > { %v1292_v17 = vld [vmem:[%s1650_s26 + $0x58] sm:$0xf0]  ;;  %v1469_v18 = vld [vmem:[%s1650_s26 + $0xd4] sm:$0xf]  ;;  %v1455_v28 = vld [vmem:[%s1650_s26 + $0x64] sm:$0xf] }
  0x20   : > { %v1356_v19 = vld [vmem:[%s1650_s26 + $0xd8] sm:$0xf0]  ;;  %v1295_v22 = vor.u32 %v1453_v16, %v1292_v17  ;;  %v1300_v29 = vld [vmem:[%s1650_s26 + $0x68] sm:$0xf0]  ;;  %v1471_v30 = vld [vmem:[%s1650_s26 + $0xe4] sm:$0xf] }
  0x21   : > { %701 = vmatpush.bf16.msra.mxu0 %v1477_v10  ;;  %1496 = vmatpush.bf16.msra.mxu2 %v1477_v10  ;;  %v1287_v10 = vor.u32 %v1451_v4, %v1284_v5  ;;  %v1359_v23 = vor.u32 %v1469_v18, %v1356_v19  ;;  %v1364_v31 = vld [vmem:[%s1650_s26 + $0xe8] sm:$0xf0]  ;;  %v1303_v34 = vor.u32 %v1455_v28, %v1300_v29  ;;  %v1457_v40 = vld [vmem:[%s1650_s26 + $0x74] sm:$0xf]  ;;  %v1308_v41 = vld [vmem:[%s1650_s26 + $0x78] sm:$0xf0] }
  0x22   : > { %790 = vmatpush.bf16.msra.mxu1 %v1485_v11  ;;  %1504 = vmatpush.bf16.msra.mxu3 %v1485_v11  ;;  %v1351_v11 = vor.u32 %v1467_v6, %v1348_v7  ;;  %v1367_v35 = vor.u32 %v1471_v30, %v1364_v31  ;;  %v1473_v42 = vld [vmem:[%s1650_s26 + $0xf4] sm:$0xf]  ;;  %v1372_v43 = vld [vmem:[%s1650_s26 + $0xf8] sm:$0xf0]  ;;  %v1311_v46 = vor.u32 %v1457_v40, %v1308_v41  ;;  %v1733_v52 = vld [vmem:[%s1850_s3] ss:$0 sm:$0xff] }
  0x23   : > { %v1375_v47 = vor.u32 %v1473_v42, %v1372_v43 }
  0x25   : > { %702 = vmatpush.bf16.msra.mxu0 %v1476_v12  ;;  %1497 = vmatpush.bf16.msra.mxu2 %v1476_v12  ;;  %v1290_v12 = vld [vmem:[%s1650_s26 + $0x50] sm:$0xf] }
  0x26   : > { %791 = vmatpush.bf16.msra.mxu1 %v1484_v13  ;;  %1505 = vmatpush.bf16.msra.mxu3 %v1484_v13  ;;  %v1454_v13 = vld [vmem:[%s1650_s26 + $0x54] sm:$0xf0] }
  0x27   : > { %v1291_v20 = vor.u32 %v1454_v13, %v1290_v12 }
  0x29   : > { %703 = vmatpush.bf16.msra.mxu0 %v1475_v14  ;;  %1498 = vmatpush.bf16.msra.mxu2 %v1475_v14  ;;  %v1354_v14 = vld [vmem:[%s1650_s26 + $0xd0] sm:$0xf] }
  0x2a   : > { %792 = vmatpush.bf16.msra.mxu1 %v1483_v15  ;;  %1506 = vmatpush.bf16.msra.mxu3 %v1483_v15  ;;  %v1470_v15 = vld [vmem:[%s1650_s26 + $0xd4] sm:$0xf0] }
  0x2b   : > { %v1355_v21 = vor.u32 %v1470_v15, %v1354_v14 }
  0x2c   : > { %704 = vmatmul.bf16.vlgmr.msra.gmra.mxu0 %v1251_v24  ;;  %744 = vmatmul.bf16.vlgmr.msra.gmra.mxu2 %v1315_v25  ;;  %v1298_v24 = vld [vmem:[%s1650_s26 + $0x60] sm:$0xf]  ;;  %v1456_v25 = vld [vmem:[%s1650_s26 + $0x64] sm:$0xf0] }
  0x2d   : > { %793 = vmatmul.bf16.vlgmr.msra.gmra.mxu1 %v1255_v26  ;;  %833 = vmatmul.bf16.vlgmr.msra.gmra.mxu3 %v1319_v27  ;;  %v1362_v26 = vld [vmem:[%s1650_s26 + $0xe0] sm:$0xf]  ;;  %v1472_v27 = vld [vmem:[%s1650_s26 + $0xe4] sm:$0xf0]  ;;  %v1299_v32 = vor.u32 %v1456_v25, %v1298_v24 }
  0x2e   : > { %v1363_v33 = vor.u32 %v1472_v27, %v1362_v26 }
  0x3c   : > { %709 = vmatmul.bf16.gmra.mxu0 %v1259_v36  ;;  %749 = vmatmul.bf16.gmra.mxu2 %v1323_v37  ;;  %v1306_v36 = vld [vmem:[%s1650_s26 + $0x70] sm:$0xf]  ;;  %v1458_v37 = vld [vmem:[%s1650_s26 + $0x74] sm:$0xf0] }
  0x3d   : > { %798 = vmatmul.bf16.gmra.mxu1 %v1263_v38  ;;  %838 = vmatmul.bf16.gmra.mxu3 %v1327_v39  ;;  %v1370_v38 = vld [vmem:[%s1650_s26 + $0xf0] sm:$0xf]  ;;  %v1474_v39 = vld [vmem:[%s1650_s26 + $0xf4] sm:$0xf0]  ;;  %v1307_v44 = vor.u32 %v1458_v37, %v1306_v36 }
  0x3e   : > { %v1371_v45 = vor.u32 %v1474_v39, %v1370_v38 }
  0x4c   : > { %714 = vmatmul.bf16.gmra.mxu0 %v1267_v48  ;;  %754 = vmatmul.bf16.gmra.mxu2 %v1331_v49  ;;  %v1728_v49 = vld [vmem:[%s1849_s2] ss:$0 sm:$0xff] }
  0x4d   : > { %803 = vmatmul.bf16.gmra.mxu1 %v1271_v50  ;;  %843 = vmatmul.bf16.gmra.mxu3 %v1335_v51 }
  0x5c   : > { %719 = vmatmul.bf16.gmra.mxu0 %v1275_v60  ;;  %759 = vmatmul.bf16.gmra.mxu2 %v1339_v61 }
  0x5d   : > { %808 = vmatmul.bf16.gmra.mxu1 %v1279_v62  ;;  %848 = vmatmul.bf16.gmra.mxu3 %v1343_v63 }
  0x6c   : > { %724 = vmatmul.bf16.gmra.mxu0 %v1283_v8  ;;  %764 = vmatmul.bf16.gmra.mxu2 %v1347_v9 }
  0x6d   : > { %813 = vmatmul.bf16.gmra.mxu1 %v1287_v10  ;;  %853 = vmatmul.bf16.gmra.mxu3 %v1351_v11 }
  0x7c   : > { %729 = vmatmul.bf16.gmra.mxu0 %v1291_v20  ;;  %769 = vmatmul.bf16.gmra.mxu2 %v1355_v21 }
  0x7d   : > { %818 = vmatmul.bf16.gmra.mxu1 %v1295_v22  ;;  %858 = vmatmul.bf16.gmra.mxu3 %v1359_v23 }
  0x8c   : > { %734 = vmatmul.bf16.gmra.mxu0 %v1299_v32  ;;  %774 = vmatmul.bf16.gmra.mxu2 %v1363_v33 }
  0x8d   : > { %823 = vmatmul.bf16.gmra.mxu1 %v1303_v34  ;;  %863 = vmatmul.bf16.gmra.mxu3 %v1367_v35 }
  0x9c   : > { %739 = vmatmul.bf16.gmra.mxu0 %v1307_v44  ;;  %779 = vmatmul.bf16.gmra.mxu2 %v1371_v45 }
  0x9d   : > { %828 = vmatmul.bf16.gmra.mxu1 %v1311_v46  ;;  %868 = vmatmul.bf16.gmra.mxu3 %v1375_v47 }
  0xa9   : > { %v705_v48 = vpop.f32.mrf.mxu0 }
  0xaa   : > { %v794_v50 = vpop.f32.mrf.mxu1 }
  0xab   : > { %v795_v51 = vadd.f32 %v794_v50, %v705_v48 }
  0xad   : > { %v977_v53 = vmul.f32 %v1728_v49, %v795_v51 }
  0xaf   : > { %v1013_v54 = vadd.f32 %v1733_v52, %v977_v53  ;;  %v745_v55 = vpop.f32.mrf.mxu2 }
  0xb0   : > { %v834_v56 = vpop.f32.mrf.mxu3 }
  0xb1   : > { %v1045_v57 = vmax.f32 %v1013_v54, 0.0  ;;  %v835_v58 = vadd.f32 %v834_v56, %v745_v55  ;;  %v707_v59 = vpop.f32.mrf.mxu0 }
  0xb2   : > { %v796_v60 = vpop.f32.mrf.mxu1 }
  0xb3   : > { %1077 = vst [vmem:[%s1742_s14] sm:$0xff] %v1045_v57  ;;  %v993_v61 = vmul.f32 %v1728_v49, %v835_v58  ;;  %v797_v62 = vadd.f32 %v796_v60, %v707_v59 }
  0xb5   : > { %v1029_v63 = vadd.f32 %v1733_v52, %v993_v61  ;;  %v978_v0 = vmul.f32 %v1728_v49, %v797_v62 }
  0xb7   : > { %v1061_v1 = vmax.f32 %v1029_v63, 0.0  ;;  %v1014_v2 = vadd.f32 %v1733_v52, %v978_v0  ;;  %v747_v3 = vpop.f32.mrf.mxu2 }
  0xb8   : > { %v836_v4 = vpop.f32.mrf.mxu3 }
  0xb9   : > { %1093 = vst [vmem:[%s1742_s14 + $0x80] sm:$0xff] %v1061_v1  ;;  %v1046_v5 = vmax.f32 %v1014_v2, 0.0  ;;  %v837_v6 = vadd.f32 %v836_v4, %v747_v3  ;;  %v710_v7 = vpop.f32.mrf.mxu0 }
  0xba   : > { %v799_v8 = vpop.f32.mrf.mxu1 }
  0xbb   : > { %1078 = vst [vmem:[%s1742_s14 + $0x8] sm:$0xff] %v1046_v5  ;;  %v994_v9 = vmul.f32 %v1728_v49, %v837_v6  ;;  %v800_v10 = vadd.f32 %v799_v8, %v710_v7 }
  0xbd   : > { %v1030_v11 = vadd.f32 %v1733_v52, %v994_v9  ;;  %v979_v12 = vmul.f32 %v1728_v49, %v800_v10 }
  0xbf   : > { %v1062_v13 = vmax.f32 %v1030_v11, 0.0  ;;  %v1015_v14 = vadd.f32 %v1733_v52, %v979_v12  ;;  %v750_v15 = vpop.f32.mrf.mxu2 }
  0xc0   : > { %v839_v16 = vpop.f32.mrf.mxu3 }
  0xc1   : > { %1094 = vst [vmem:[%s1742_s14 + $0x88] sm:$0xff] %v1062_v13  ;;  %v1047_v17 = vmax.f32 %v1015_v14, 0.0  ;;  %v840_v18 = vadd.f32 %v839_v16, %v750_v15  ;;  %v712_v19 = vpop.f32.mrf.mxu0 }
  0xc2   : > { %v801_v20 = vpop.f32.mrf.mxu1 }
  0xc3   : > { %1079 = vst [vmem:[%s1742_s14 + $0x10] sm:$0xff] %v1047_v17  ;;  %v995_v21 = vmul.f32 %v1728_v49, %v840_v18  ;;  %v802_v22 = vadd.f32 %v801_v20, %v712_v19 }
  0xc5   : > { %v1031_v23 = vadd.f32 %v1733_v52, %v995_v21  ;;  %v980_v24 = vmul.f32 %v1728_v49, %v802_v22 }
  0xc7   : > { %v1063_v25 = vmax.f32 %v1031_v23, 0.0  ;;  %v1016_v26 = vadd.f32 %v1733_v52, %v980_v24  ;;  %v752_v27 = vpop.f32.mrf.mxu2 }
  0xc8   : > { %v841_v28 = vpop.f32.mrf.mxu3 }
  0xc9   : > { %1095 = vst [vmem:[%s1742_s14 + $0x90] sm:$0xff] %v1063_v25  ;;  %v1048_v29 = vmax.f32 %v1016_v26, 0.0  ;;  %v842_v30 = vadd.f32 %v841_v28, %v752_v27  ;;  %v715_v31 = vpop.f32.mrf.mxu0 }
  0xca   : > { %v804_v32 = vpop.f32.mrf.mxu1 }
  0xcb   : > { %1080 = vst [vmem:[%s1742_s14 + $0x18] sm:$0xff] %v1048_v29  ;;  %v996_v33 = vmul.f32 %v1728_v49, %v842_v30  ;;  %v805_v34 = vadd.f32 %v804_v32, %v715_v31 }
  0xcd   : > { %v1032_v35 = vadd.f32 %v1733_v52, %v996_v33  ;;  %v981_v36 = vmul.f32 %v1728_v49, %v805_v34 }
  0xcf   : > { %v1064_v37 = vmax.f32 %v1032_v35, 0.0  ;;  %v1017_v38 = vadd.f32 %v1733_v52, %v981_v36  ;;  %v755_v39 = vpop.f32.mrf.mxu2 }
  0xd0   : > { %v844_v40 = vpop.f32.mrf.mxu3 }
  0xd1   : > { %1096 = vst [vmem:[%s1742_s14 + $0x98] sm:$0xff] %v1064_v37  ;;  %v1049_v41 = vmax.f32 %v1017_v38, 0.0  ;;  %v845_v42 = vadd.f32 %v844_v40, %v755_v39  ;;  %v717_v43 = vpop.f32.mrf.mxu0 }
  0xd2   : > { %v806_v44 = vpop.f32.mrf.mxu1 }
  0xd3   : > { %1081 = vst [vmem:[%s1742_s14 + $0x20] sm:$0xff] %v1049_v41  ;;  %v997_v45 = vmul.f32 %v1728_v49, %v845_v42  ;;  %v807_v46 = vadd.f32 %v806_v44, %v717_v43 }
  0xd5   : > { %v1033_v47 = vadd.f32 %v1733_v52, %v997_v45  ;;  %v982_v48 = vmul.f32 %v1728_v49, %v807_v46 }
  0xd7   : > { %v1065_v50 = vmax.f32 %v1033_v47, 0.0  ;;  %v1018_v51 = vadd.f32 %v1733_v52, %v982_v48  ;;  %v757_v53 = vpop.f32.mrf.mxu2 }
  0xd8   : > { %v846_v54 = vpop.f32.mrf.mxu3 }
  0xd9   : > { %1097 = vst [vmem:[%s1742_s14 + $0xa0] sm:$0xff] %v1065_v50  ;;  %v1050_v55 = vmax.f32 %v1018_v51, 0.0  ;;  %v847_v56 = vadd.f32 %v846_v54, %v757_v53  ;;  %v720_v57 = vpop.f32.mrf.mxu0 }
  0xda   : > { %v809_v58 = vpop.f32.mrf.mxu1 }
  0xdb   : > { %1082 = vst [vmem:[%s1742_s14 + $0x28] sm:$0xff] %v1050_v55  ;;  %v998_v59 = vmul.f32 %v1728_v49, %v847_v56  ;;  %v810_v60 = vadd.f32 %v809_v58, %v720_v57 }
  0xdd   : > { %v1034_v61 = vadd.f32 %v1733_v52, %v998_v59  ;;  %v983_v62 = vmul.f32 %v1728_v49, %v810_v60 }
  0xdf   : > { %v1066_v63 = vmax.f32 %v1034_v61, 0.0  ;;  %v1019_v0 = vadd.f32 %v1733_v52, %v983_v62  ;;  %v760_v1 = vpop.f32.mrf.mxu2 }
  0xe0   : > { %v849_v2 = vpop.f32.mrf.mxu3 }
  0xe1   : > { %1098 = vst [vmem:[%s1742_s14 + $0xa8] sm:$0xff] %v1066_v63  ;;  %v1051_v3 = vmax.f32 %v1019_v0, 0.0  ;;  %v850_v4 = vadd.f32 %v849_v2, %v760_v1  ;;  %v722_v5 = vpop.f32.mrf.mxu0 }
  0xe2   : > { %v811_v6 = vpop.f32.mrf.mxu1 }
  0xe3   : > { %1083 = vst [vmem:[%s1742_s14 + $0x30] sm:$0xff] %v1051_v3  ;;  %v999_v7 = vmul.f32 %v1728_v49, %v850_v4  ;;  %v812_v8 = vadd.f32 %v811_v6, %v722_v5 }
  0xe5   : > { %v1035_v9 = vadd.f32 %v1733_v52, %v999_v7  ;;  %v984_v10 = vmul.f32 %v1728_v49, %v812_v8 }
  0xe7   : > { %v1067_v11 = vmax.f32 %v1035_v9, 0.0  ;;  %v1020_v12 = vadd.f32 %v1733_v52, %v984_v10  ;;  %v762_v13 = vpop.f32.mrf.mxu2 }
  0xe8   : > { %v851_v14 = vpop.f32.mrf.mxu3 }
  0xe9   : > { %1099 = vst [vmem:[%s1742_s14 + $0xb0] sm:$0xff] %v1067_v11  ;;  %v1052_v15 = vmax.f32 %v1020_v12, 0.0  ;;  %v852_v16 = vadd.f32 %v851_v14, %v762_v13  ;;  %v725_v17 = vpop.f32.mrf.mxu0 }
  0xea   : > { %v814_v18 = vpop.f32.mrf.mxu1 }
  0xeb   : > { %1084 = vst [vmem:[%s1742_s14 + $0x38] sm:$0xff] %v1052_v15  ;;  %v1000_v19 = vmul.f32 %v1728_v49, %v852_v16  ;;  %v815_v20 = vadd.f32 %v814_v18, %v725_v17 }
  0xed   : > { %v1036_v21 = vadd.f32 %v1733_v52, %v1000_v19  ;;  %v985_v22 = vmul.f32 %v1728_v49, %v815_v20 }
  0xef   : > { %v1068_v23 = vmax.f32 %v1036_v21, 0.0  ;;  %v1021_v24 = vadd.f32 %v1733_v52, %v985_v22  ;;  %v765_v25 = vpop.f32.mrf.mxu2 }
  0xf0   : > { %v854_v26 = vpop.f32.mrf.mxu3 }
  0xf1   : > { %1100 = vst [vmem:[%s1742_s14 + $0xb8] sm:$0xff] %v1068_v23  ;;  %v1053_v27 = vmax.f32 %v1021_v24, 0.0  ;;  %v855_v28 = vadd.f32 %v854_v26, %v765_v25  ;;  %v727_v29 = vpop.f32.mrf.mxu0 }
  0xf2   : > { %v816_v30 = vpop.f32.mrf.mxu1 }
  0xf3   : > { %1085 = vst [vmem:[%s1742_s14 + $0x40] sm:$0xff] %v1053_v27  ;;  %v1001_v31 = vmul.f32 %v1728_v49, %v855_v28  ;;  %v817_v32 = vadd.f32 %v816_v30, %v727_v29 }
  0xf5   : > { %v1037_v33 = vadd.f32 %v1733_v52, %v1001_v31  ;;  %v986_v34 = vmul.f32 %v1728_v49, %v817_v32 }
  0xf7   : > { %v1069_v35 = vmax.f32 %v1037_v33, 0.0  ;;  %v1022_v36 = vadd.f32 %v1733_v52, %v986_v34  ;;  %v767_v37 = vpop.f32.mrf.mxu2 }
  0xf8   : > { %v856_v38 = vpop.f32.mrf.mxu3 }
  0xf9   : > { %1101 = vst [vmem:[%s1742_s14 + $0xc0] sm:$0xff] %v1069_v35  ;;  %v1054_v39 = vmax.f32 %v1022_v36, 0.0  ;;  %v857_v40 = vadd.f32 %v856_v38, %v767_v37  ;;  %v730_v41 = vpop.f32.mrf.mxu0 }
  0xfa   : > { %v819_v42 = vpop.f32.mrf.mxu1 }
  0xfb   : > { %1086 = vst [vmem:[%s1742_s14 + $0x48] sm:$0xff] %v1054_v39  ;;  %v1002_v43 = vmul.f32 %v1728_v49, %v857_v40  ;;  %v820_v44 = vadd.f32 %v819_v42, %v730_v41 }
  0xfd   : > { %v1038_v45 = vadd.f32 %v1733_v52, %v1002_v43  ;;  %v987_v46 = vmul.f32 %v1728_v49, %v820_v44 }
  0xff   : > { %v1070_v47 = vmax.f32 %v1038_v45, 0.0  ;;  %v1023_v48 = vadd.f32 %v1733_v52, %v987_v46  ;;  %v770_v50 = vpop.f32.mrf.mxu2 }
 0x100   : > { %v859_v51 = vpop.f32.mrf.mxu3 }
 0x101   : > { %1102 = vst [vmem:[%s1742_s14 + $0xc8] sm:$0xff] %v1070_v47  ;;  %v1055_v53 = vmax.f32 %v1023_v48, 0.0  ;;  %v860_v54 = vadd.f32 %v859_v51, %v770_v50  ;;  %v732_v55 = vpop.f32.mrf.mxu0 }
 0x102   : > { %v821_v56 = vpop.f32.mrf.mxu1 }
 0x103   : > { %1087 = vst [vmem:[%s1742_s14 + $0x50] sm:$0xff] %v1055_v53  ;;  %v1003_v57 = vmul.f32 %v1728_v49, %v860_v54  ;;  %v822_v58 = vadd.f32 %v821_v56, %v732_v55 }
 0x105   : > { %v1039_v59 = vadd.f32 %v1733_v52, %v1003_v57  ;;  %v988_v60 = vmul.f32 %v1728_v49, %v822_v58 }
 0x107   : > { %v1071_v61 = vmax.f32 %v1039_v59, 0.0  ;;  %v1024_v62 = vadd.f32 %v1733_v52, %v988_v60  ;;  %v772_v63 = vpop.f32.mrf.mxu2 }
 0x108   : > { %v861_v0 = vpop.f32.mrf.mxu3 }
 0x109   : > { %1103 = vst [vmem:[%s1742_s14 + $0xd0] sm:$0xff] %v1071_v61  ;;  %v1056_v1 = vmax.f32 %v1024_v62, 0.0  ;;  %v862_v2 = vadd.f32 %v861_v0, %v772_v63  ;;  %v735_v3 = vpop.f32.mrf.mxu0 }
 0x10a   : > { %v824_v4 = vpop.f32.mrf.mxu1 }
 0x10b   : > { %1088 = vst [vmem:[%s1742_s14 + $0x58] sm:$0xff] %v1056_v1  ;;  %v1004_v5 = vmul.f32 %v1728_v49, %v862_v2  ;;  %v825_v6 = vadd.f32 %v824_v4, %v735_v3 }
 0x10d   : > { %v1040_v7 = vadd.f32 %v1733_v52, %v1004_v5  ;;  %v989_v8 = vmul.f32 %v1728_v49, %v825_v6 }
 0x10f   : > { %v1072_v9 = vmax.f32 %v1040_v7, 0.0  ;;  %v1025_v10 = vadd.f32 %v1733_v52, %v989_v8  ;;  %v775_v11 = vpop.f32.mrf.mxu2 }
 0x110   : > { %v864_v12 = vpop.f32.mrf.mxu3 }
 0x111   : > { %1104 = vst [vmem:[%s1742_s14 + $0xd8] sm:$0xff] %v1072_v9  ;;  %v1057_v13 = vmax.f32 %v1025_v10, 0.0  ;;  %v865_v14 = vadd.f32 %v864_v12, %v775_v11  ;;  %v737_v15 = vpop.f32.mrf.mxu0 }
 0x112   : > { %v826_v16 = vpop.f32.mrf.mxu1 }
 0x113   : > { %1089 = vst [vmem:[%s1742_s14 + $0x60] sm:$0xff] %v1057_v13  ;;  %v1005_v17 = vmul.f32 %v1728_v49, %v865_v14  ;;  %v827_v18 = vadd.f32 %v826_v16, %v737_v15 }
 0x115   : > { %v1041_v19 = vadd.f32 %v1733_v52, %v1005_v17  ;;  %v990_v20 = vmul.f32 %v1728_v49, %v827_v18 }
 0x117   : > { %v1073_v21 = vmax.f32 %v1041_v19, 0.0  ;;  %v1026_v22 = vadd.f32 %v1733_v52, %v990_v20  ;;  %v777_v23 = vpop.f32.mrf.mxu2 }
 0x118   : > { %v866_v24 = vpop.f32.mrf.mxu3 }
 0x119   : > { %1105 = vst [vmem:[%s1742_s14 + $0xe0] sm:$0xff] %v1073_v21  ;;  %v1058_v25 = vmax.f32 %v1026_v22, 0.0  ;;  %v867_v26 = vadd.f32 %v866_v24, %v777_v23  ;;  %v740_v27 = vpop.f32.mrf.mxu0 }
 0x11a   : > { %v829_v28 = vpop.f32.mrf.mxu1 }
 0x11b   : > { %1090 = vst [vmem:[%s1742_s14 + $0x68] sm:$0xff] %v1058_v25  ;;  %v1006_v29 = vmul.f32 %v1728_v49, %v867_v26  ;;  %v830_v30 = vadd.f32 %v829_v28, %v740_v27 }
 0x11d   : > { %v1042_v31 = vadd.f32 %v1733_v52, %v1006_v29  ;;  %v991_v32 = vmul.f32 %v1728_v49, %v830_v30 }
 0x11f   : > { %v1074_v33 = vmax.f32 %v1042_v31, 0.0  ;;  %v1027_v34 = vadd.f32 %v1733_v52, %v991_v32  ;;  %v780_v35 = vpop.f32.mrf.mxu2 }
 0x120   : > { %v869_v36 = vpop.f32.mrf.mxu3 }
 0x121   : > { %1106 = vst [vmem:[%s1742_s14 + $0xe8] sm:$0xff] %v1074_v33  ;;  %v1059_v37 = vmax.f32 %v1027_v34, 0.0  ;;  %v870_v38 = vadd.f32 %v869_v36, %v780_v35  ;;  %v742_v39 = vpop.f32.mrf.mxu0 }
 0x122   : > { %v831_v40 = vpop.f32.mrf.mxu1 }
 0x123   : > { %1091 = vst [vmem:[%s1742_s14 + $0x70] sm:$0xff] %v1059_v37  ;;  %v1007_v41 = vmul.f32 %v1728_v49, %v870_v38  ;;  %v832_v42 = vadd.f32 %v831_v40, %v742_v39 }
 0x125   : > { %v1043_v43 = vadd.f32 %v1733_v52, %v1007_v41  ;;  %v992_v44 = vmul.f32 %v1728_v49, %v832_v42 }
 0x127   : > { %v1075_v45 = vmax.f32 %v1043_v43, 0.0  ;;  %v1028_v46 = vadd.f32 %v1733_v52, %v992_v44  ;;  %v782_v47 = vpop.f32.mrf.mxu2 }
 0x128   : > { %v871_v48 = vpop.f32.mrf.mxu3 }
 0x129   : > { %1107 = vst [vmem:[%s1742_s14 + $0xf0] sm:$0xff] %v1075_v45  ;;  %v1060_v50 = vmax.f32 %v1028_v46, 0.0  ;;  %v872_v51 = vadd.f32 %v871_v48, %v782_v47 }
 0x12b   : > { %1092 = vst [vmem:[%s1742_s14 + $0x78] sm:$0xff] %v1060_v50  ;;  %v1008_v53 = vmul.f32 %v1728_v49, %v872_v51 }
 0x12d   : > { %v1044_v54 = vadd.f32 %v1733_v52, %v1008_v53 }
 0x12f   : > { %v1076_v55 = vmax.f32 %v1044_v54, 0.0 }
 0x131   : > { %1108 = vst [vmem:[%s1742_s14 + $0xf8] sm:$0xff] %v1076_v55 }
 0x132 PF: > { %s14_s17 = sadd.s32 1, %s1555_s17   ;;  %s1852_s15 = smov %s1551_s16 }
 0x133   : > { %p11_p5 = scmp.ge.s32.totalorder %s14_s17, 10   ;;  %s1853_s16 = smov %s1855_s18 }
 0x135   :  { %13 = sbr.rel (!%p11_p5) target bundleno = 2 (0x2), region = 83 }

// kernel: _lambda_.14
= control target key start
LH: loop header
LB: loop body
LE: loop exit
PB: predicated region body
PF: predicated region fallthrough
CT: control target
= control target key end

     0   :  { %s1479_s15 = smov 0   ;;  %s1481_s16 = smov 0   ;;  %s1777_s0 = inlined_call_operand.vmem [shape: bf16[512,640], index: 0, kind: input, shape index: {}]   ;;  %s1778_s1 = inlined_call_operand.vmem [shape: bf16[640,128], index: 1, kind: input, shape index: {}]   ;;  %s1779_s2 = inlined_call_operand.vmem [shape: f32[1,128], index: 2, kind: input, shape index: {}]   ;;  %s1780_s3 = inlined_call_operand.vmem [shape: f32[1,128], index: 3, kind: input, shape index: {}]   ;;  %s1781_s4 = inlined_call_operand.vmem [shape: f32[512,128], index: 4, kind: output, shape index: {}]  }
   0x1   :  { %s1483_s17 = smov 0   ;;  %s1485_s18 = smov 0  }
   0x2   :  { %s1487_s19 = smov 0   ;;  %s1489_s20 = smov 0  }
   0x3   :  { %s1491_s21 = smov 0  }
   0x4 LB: > { %s26_s22 = sadd.s32 1, %s1443_s19  ;;  %s33_s23 = sadd.s32 1, %s1447_s20  ;;  %s1451_s21 = sphi %s1491_s21, %s14_s21   ;;  %s1447_s20 = sphi %s1489_s20, %s1787_s20   ;;  %s1443_s19 = sphi %s1487_s19, %s1786_s19   ;;  %s1439_s18 = sphi %s1485_s18, %s1785_s18   ;;  %s1435_s17 = sphi %s1483_s17, %s1784_s17   ;;  %s1431_s16 = sphi %s1481_s16, %s1783_s16   ;;  %s1427_s15 = sphi %s1479_s15, %s1782_s15  }
   0x5   : > { %p27_p0 = scmp.ge.s32.totalorder %s26_s22, 5  ;;  %p49_p1 = scmp.ne.s32.totalorder %s1431_s16, %s1427_s15 }
   0x6   : > { %p50_p2 = scmp.eq.s32.totalorder %s1451_s21, 0  ;;  %s42_s27 = sadd.s32 1, %s1431_s16 }
   0x7   : > { %s1789_s22 = smov (%p27_p0, %s26_s22), 0  ;;  %s1791_s23 = smov (!%p27_p0, %s33_s23), %s1447_s20 }
   0x8   : > { %p51_p3 = por %p50_p2, %p49_p1  ;;  %p35_p4 = scmp.ge.s32.totalorder %s1791_s23, 2 }
   0x9   : > { %s38_s24 = ssub.s32 %s1443_s19, %s1789_s22  ;;  %p1178_p6 = scmp.ge.s32.totalorder %s1451_s21, 10 }
   0xa   : > { %s1793_s23 = smov (%p35_p4, %s1791_s23), 0 }
   0xb   : > { %s37_s25 = ssub.s32 %s1447_s20, %s1793_s23  ;;  %195 = sbr.rel (%p1178_p6) target bundleno = 55 (0x37), region = 24 }
   0xc   : > { %s39_s26 = sor.u32 %s38_s24, %s37_s25 }
   0xd   : > { %p40_p5 = scmp.eq.s32.totalorder %s39_s26, 0 }
   0xf   : > { %s1530_s28 = scalar_select %p40_p5, %s1431_s16, %s42_s27  }
  0x10   : > { %198 = sbr.rel (!%p51_p3) target bundleno = 55 (0x37), region = 28  ;;  %s200_s29 = sand.u32 (%p51_p3), 1, %s1431_s16  }
  0x11   : > { %s1337_s30 = smul.u32 (%p51_p3), 160, %s1447_s20  ;;  %s1179_s5 = sshll.u32 (%p51_p3), %s200_s29, 7 }
  0x12   : > { %s1544_s11 = scalar_lea.vmem (%p51_p3), [#allocation3], %s1179_s5 }
  0x13   : > { %s205_s6 = sadd.s32 (%p51_p3), %s1443_s19, %s1337_s30 }
  0x14   : > { %s1182_s7 = sshll.u32 (%p51_p3), %s205_s6, 2 }
  0x15   : > { %s1539_s10 = scalar_lea.vmem %s1777_s0, %s1182_s7 }
  0x16   : > { %v224_v0 = vld [vmem:[%s1539_s10] sm:$0xf]  ;;  %v226_v1 = vld [vmem:[%s1539_s10 + $0x14] sm:$0xf]  ;;  %v228_v2 = vld [vmem:[%s1539_s10 + $0x28] sm:$0xf] }
  0x17   : > { %225 = vst [vmem:[%s1544_s11] sm:$0xf] %v224_v0  ;;  %v230_v3 = vld [vmem:[%s1539_s10 + $0x3c] sm:$0xf]  ;;  %v232_v4 = vld [vmem:[%s1539_s10 + $0x50] sm:$0xf] }
  0x18   : > { %227 = vst [vmem:[%s1544_s11 + $0x4] sm:$0xf] %v226_v1  ;;  %v234_v5 = vld [vmem:[%s1539_s10 + $0x64] sm:$0xf]  ;;  %v236_v6 = vld [vmem:[%s1539_s10 + $0x78] sm:$0xf] }
  0x19   : > { %229 = vst [vmem:[%s1544_s11 + $0x8] sm:$0xf] %v228_v2  ;;  %v238_v7 = vld [vmem:[%s1539_s10 + $0x8c] sm:$0xf]  ;;  %v240_v8 = vld [vmem:[%s1539_s10 + $0xa0] sm:$0xf] }
  0x1a   : > { %231 = vst [vmem:[%s1544_s11 + $0xc] sm:$0xf] %v230_v3  ;;  %v242_v9 = vld [vmem:[%s1539_s10 + $0xb4] sm:$0xf]  ;;  %v244_v10 = vld [vmem:[%s1539_s10 + $0xc8] sm:$0xf] }
  0x1b   : > { %233 = vst [vmem:[%s1544_s11 + $0x10] sm:$0xf] %v232_v4  ;;  %v246_v11 = vld [vmem:[%s1539_s10 + $0xdc] sm:$0xf]  ;;  %v248_v12 = vld [vmem:[%s1539_s10 + $0xf0] sm:$0xf] }
  0x1c   : > { %235 = vst [vmem:[%s1544_s11 + $0x14] sm:$0xf] %v234_v5  ;;  %v250_v13 = vld [vmem:[%s1539_s10 + $0x104] sm:$0xf]  ;;  %v252_v14 = vld [vmem:[%s1539_s10 + $0x118] sm:$0xf] }
  0x1d   : > { %237 = vst [vmem:[%s1544_s11 + $0x18] sm:$0xf] %v236_v6  ;;  %v254_v15 = vld [vmem:[%s1539_s10 + $0x12c] sm:$0xf]  ;;  %v256_v16 = vld [vmem:[%s1539_s10 + $0x140] sm:$0xf] }
  0x1e   : > { %239 = vst [vmem:[%s1544_s11 + $0x1c] sm:$0xf] %v238_v7  ;;  %v258_v17 = vld [vmem:[%s1539_s10 + $0x154] sm:$0xf]  ;;  %v260_v18 = vld [vmem:[%s1539_s10 + $0x168] sm:$0xf] }
  0x1f   : > { %241 = vst [vmem:[%s1544_s11 + $0x20] sm:$0xf] %v240_v8  ;;  %v262_v19 = vld [vmem:[%s1539_s10 + $0x17c] sm:$0xf]  ;;  %v264_v20 = vld [vmem:[%s1539_s10 + $0x190] sm:$0xf] }
  0x20   : > { %243 = vst [vmem:[%s1544_s11 + $0x24] sm:$0xf] %v242_v9  ;;  %v266_v21 = vld [vmem:[%s1539_s10 + $0x1a4] sm:$0xf]  ;;  %v268_v22 = vld [vmem:[%s1539_s10 + $0x1b8] sm:$0xf] }
  0x21   : > { %245 = vst [vmem:[%s1544_s11 + $0x28] sm:$0xf] %v244_v10  ;;  %v270_v23 = vld [vmem:[%s1539_s10 + $0x1cc] sm:$0xf]  ;;  %v272_v24 = vld [vmem:[%s1539_s10 + $0x1e0] sm:$0xf] }
  0x22   : > { %247 = vst [vmem:[%s1544_s11 + $0x2c] sm:$0xf] %v246_v11  ;;  %v274_v25 = vld [vmem:[%s1539_s10 + $0x1f4] sm:$0xf]  ;;  %v276_v26 = vld [vmem:[%s1539_s10 + $0x208] sm:$0xf] }
  0x23   : > { %249 = vst [vmem:[%s1544_s11 + $0x30] sm:$0xf] %v248_v12  ;;  %v278_v27 = vld [vmem:[%s1539_s10 + $0x21c] sm:$0xf]  ;;  %v280_v28 = vld [vmem:[%s1539_s10 + $0x230] sm:$0xf] }
  0x24   : > { %251 = vst [vmem:[%s1544_s11 + $0x34] sm:$0xf] %v250_v13  ;;  %v282_v29 = vld [vmem:[%s1539_s10 + $0x244] sm:$0xf]  ;;  %v284_v30 = vld [vmem:[%s1539_s10 + $0x258] sm:$0xf] }
  0x25   : > { %253 = vst [vmem:[%s1544_s11 + $0x38] sm:$0xf] %v252_v14  ;;  %v286_v31 = vld [vmem:[%s1539_s10 + $0x26c] sm:$0xf] }
  0x26   : > { %255 = vst [vmem:[%s1544_s11 + $0x3c] sm:$0xf] %v254_v15 }
  0x27   : > { %257 = vst [vmem:[%s1544_s11 + $0x40] sm:$0xf] %v256_v16 }
  0x28   : > { %259 = vst [vmem:[%s1544_s11 + $0x44] sm:$0xf] %v258_v17 }
  0x29   : > { %261 = vst [vmem:[%s1544_s11 + $0x48] sm:$0xf] %v260_v18 }
  0x2a   : > { %263 = vst [vmem:[%s1544_s11 + $0x4c] sm:$0xf] %v262_v19 }
  0x2b   : > { %265 = vst [vmem:[%s1544_s11 + $0x50] sm:$0xf] %v264_v20 }
  0x2c   : > { %267 = vst [vmem:[%s1544_s11 + $0x54] sm:$0xf] %v266_v21 }
  0x2d   : > { %269 = vst [vmem:[%s1544_s11 + $0x58] sm:$0xf] %v268_v22 }
  0x2e   : > { %271 = vst [vmem:[%s1544_s11 + $0x5c] sm:$0xf] %v270_v23 }
  0x2f   : > { %273 = vst [vmem:[%s1544_s11 + $0x60] sm:$0xf] %v272_v24 }
  0x30   : > { %275 = vst [vmem:[%s1544_s11 + $0x64] sm:$0xf] %v274_v25 }
  0x31   : > { %277 = vst [vmem:[%s1544_s11 + $0x68] sm:$0xf] %v276_v26 }
  0x32   : > { %279 = vst [vmem:[%s1544_s11 + $0x6c] sm:$0xf] %v278_v27 }
  0x33   : > { %281 = vst [vmem:[%s1544_s11 + $0x70] sm:$0xf] %v280_v28 }
  0x34   : > { %283 = vst [vmem:[%s1544_s11 + $0x74] sm:$0xf] %v282_v29 }
  0x35   : > { %285 = vst [vmem:[%s1544_s11 + $0x78] sm:$0xf] %v284_v30 }
  0x36   : > { %287 = vst [vmem:[%s1544_s11 + $0x7c] sm:$0xf] %v286_v31 }
  0x37 PF: > { %p1183_p7 = scmp.ge.s32.totalorder %s1451_s21, 1  ;;  %p386_p8 = scmp.lt.s32.totalorder %s1451_s21, 11 }
  0x39   : > { %p387_p9 = pnand %p1183_p7, %p386_p8 }
  0x3a   : > { %s393_s12 = sand.u32 (!%p387_p9), 1, %s1427_s15   ;;  %s1185_s13 = sshll.u32 (!%p387_p9), %s1435_s17, 4 }
  0x3b   : > { %390 = sbr.rel (%p387_p9) target bundleno = 369 (0x171), region = 73  ;;  %s1184_s14 = sshll.u32 (!%p387_p9), %s393_s12, 7 }
  0x3c   : > { %p437_p10 = scmp.lt.s32.totalorder (!%p387_p9), %s1185_s13, 79  ;;  %s1187_s24 = sshll.u32 (!%p387_p9), %s1439_s18, 5 }
  0x3d   : > { %p452_p11 = scmp.lt.s32.totalorder (!%p387_p9), %s1187_s24, 63  ;;  %s1622_s15 = scalar_lea.vmem (!%p387_p9), [#allocation3], %s1184_s14 }
  0x3e   : > { %p1189_p12 = scmp.ne.s32.totalorder (!%p387_p9), %s1435_s17, 0 }
  0x40   : > { %s1795_s13 = smov (!%p437_p10, %s1185_s13), 79  ;;  %s1797_s24 = smov (!%p452_p11, %s1187_s24), 63 }
  0x41   : > { %s1186_s25 = sshll.u32 %s1795_s13, 2  ;;  %s1188_s30 = sshll.u32 %s1797_s24, 3 }
  0x42   : > { %s1615_s29 = scalar_lea.vmem %s1778_s1, %s1186_s25  ;;  %s1620_s7 = scalar_lea.vmem %s1781_s4, %s1188_s30 }
  0x43   : > { %463 = sbr.rel (%p1189_p12) target bundleno = 105 (0x69), region = 81 }
  0x48   : > { %v1453_v32 = vmov 0.0  }
  0x49   : > { %464 = vst [vmem:[#allocation2 + $0xb0] sm:$0xff] %v1453_v32 }
  0x4a   : > { %465 = vst [vmem:[#allocation2] sm:$0xff] %v1453_v32 }
  0x4b   : > { %466 = vst [vmem:[#allocation2 + $0xd8] sm:$0xff] %v1453_v32 }
  0x4c   : > { %467 = vst [vmem:[#allocation2 + $0x18] sm:$0xff] %v1453_v32 }
  0x4d   : > { %468 = vst [vmem:[#allocation2 + $0x50] sm:$0xff] %v1453_v32 }
  0x4e   : > { %469 = vst [vmem:[#allocation2 + $0x68] sm:$0xff] %v1453_v32 }
  0x4f   : > { %470 = vst [vmem:[#allocation2 + $0x30] sm:$0xff] %v1453_v32 }
  0x50   : > { %471 = vst [vmem:[#allocation2 + $0x48] sm:$0xff] %v1453_v32 }
  0x51   : > { %472 = vst [vmem:[#allocation2 + $0x80] sm:$0xff] %v1453_v32 }
  0x52   : > { %473 = vst [vmem:[#allocation2 + $0x88] sm:$0xff] %v1453_v32 }
  0x53   : > { %474 = vst [vmem:[#allocation2 + $0xe8] sm:$0xff] %v1453_v32 }
  0x54   : > { %475 = vst [vmem:[#allocation2 + $0xb8] sm:$0xff] %v1453_v32 }
  0x55   : > { %476 = vst [vmem:[#allocation2 + $0x60] sm:$0xff] %v1453_v32 }
  0x56   : > { %477 = vst [vmem:[#allocation2 + $0xf0] sm:$0xff] %v1453_v32 }
  0x57   : > { %478 = vst [vmem:[#allocation2 + $0x8] sm:$0xff] %v1453_v32 }
  0x58   : > { %479 = vst [vmem:[#allocation2 + $0x78] sm:$0xff] %v1453_v32 }
  0x59   : > { %480 = vst [vmem:[#allocation2 + $0x38] sm:$0xff] %v1453_v32 }
  0x5a   : > { %481 = vst [vmem:[#allocation2 + $0x58] sm:$0xff] %v1453_v32 }
  0x5b   : > { %482 = vst [vmem:[#allocation2 + $0x40] sm:$0xff] %v1453_v32 }
  0x5c   : > { %483 = vst [vmem:[#allocation2 + $0xc8] sm:$0xff] %v1453_v32 }
  0x5d   : > { %484 = vst [vmem:[#allocation2 + $0xe0] sm:$0xff] %v1453_v32 }
  0x5e   : > { %485 = vst [vmem:[#allocation2 + $0x90] sm:$0xff] %v1453_v32 }
  0x5f   : > { %486 = vst [vmem:[#allocation2 + $0x70] sm:$0xff] %v1453_v32 }
  0x60   : > { %487 = vst [vmem:[#allocation2 + $0xc0] sm:$0xff] %v1453_v32 }
  0x61   : > { %488 = vst [vmem:[#allocation2 + $0xa8] sm:$0xff] %v1453_v32 }
  0x62   : > { %489 = vst [vmem:[#allocation2 + $0xd0] sm:$0xff] %v1453_v32 }
  0x63   : > { %490 = vst [vmem:[#allocation2 + $0x10] sm:$0xff] %v1453_v32 }
  0x64   : > { %491 = vst [vmem:[#allocation2 + $0x28] sm:$0xff] %v1453_v32 }
  0x65   : > { %492 = vst [vmem:[#allocation2 + $0xa0] sm:$0xff] %v1453_v32 }
  0x66   : > { %493 = vst [vmem:[#allocation2 + $0xf8] sm:$0xff] %v1453_v32 }
  0x67   : > { %494 = vst [vmem:[#allocation2 + $0x20] sm:$0xff] %v1453_v32 }
  0x68   : > { %495 = vst [vmem:[#allocation2 + $0x98] sm:$0xff] %v1453_v32 }
  0x69 PF: > { %v1312_v33 = vld [vmem:[%s1615_s29 + $0x38] sm:$0xff]  ;;  %v1311_v34 = vld [vmem:[%s1615_s29 + $0x30] sm:$0xff]  ;;  %v1310_v35 = vld [vmem:[%s1615_s29 + $0x28] sm:$0xff]  ;;  %p1286_p13 = scmp.ne.s32.totalorder %s1435_s17, 4 }
  0x6a   : > { %720 = vmatpush.bf16.msra.mxu0 %v1312_v33  ;;  %1313 = vmatpush.bf16.msra.mxu1 %v1312_v33  ;;  %v1309_v36 = vld [vmem:[%s1615_s29 + $0x20] sm:$0xff]  ;;  %v1308_v37 = vld [vmem:[%s1615_s29 + $0x18] sm:$0xff]  ;;  %v1307_v38 = vld [vmem:[%s1615_s29 + $0x10] sm:$0xff] }
  0x6b   : > { %1314 = vmatpush.bf16.msra.mxu2 %v1312_v33  ;;  %1315 = vmatpush.bf16.msra.mxu3 %v1312_v33  ;;  %v1306_v39 = vld [vmem:[%s1615_s29 + $0x8] sm:$0xff]  ;;  %v1305_v40 = vld [vmem:[%s1615_s29] sm:$0xff]  ;;  %v1291_v49 = vld [vmem:[%s1622_s15 + $0x10] sm:$0xff] }
  0x6c   : > { %v1289_v41 = vld [vmem:[%s1622_s15] sm:$0xff]  ;;  %v1290_v45 = vld [vmem:[%s1622_s15 + $0x8] sm:$0xff]  ;;  %v1295_v50 = vld [vmem:[%s1622_s15 + $0x30] sm:$0xff] }
  0x6d   : > { %v1293_v42 = vld [vmem:[%s1622_s15 + $0x20] sm:$0xff]  ;;  %v1294_v46 = vld [vmem:[%s1622_s15 + $0x28] sm:$0xff]  ;;  %v1299_v51 = vld [vmem:[%s1622_s15 + $0x50] sm:$0xff] }
  0x6e   : > { %721 = vmatpush.bf16.msra.mxu0 %v1311_v34  ;;  %1316 = vmatpush.bf16.msra.mxu1 %v1311_v34  ;;  %v1297_v43 = vld [vmem:[%s1622_s15 + $0x40] sm:$0xff]  ;;  %v1298_v47 = vld [vmem:[%s1622_s15 + $0x48] sm:$0xff]  ;;  %v1303_v52 = vld [vmem:[%s1622_s15 + $0x70] sm:$0xff] }
  0x6f   : > { %1317 = vmatpush.bf16.msra.mxu2 %v1311_v34  ;;  %1318 = vmatpush.bf16.msra.mxu3 %v1311_v34  ;;  %v1301_v44 = vld [vmem:[%s1622_s15 + $0x60] sm:$0xff]  ;;  %v1302_v48 = vld [vmem:[%s1622_s15 + $0x68] sm:$0xff]  ;;  %v1292_v53 = vld [vmem:[%s1622_s15 + $0x18] sm:$0xff] }
  0x70   : > { %v1296_v54 = vld [vmem:[%s1622_s15 + $0x38] sm:$0xff]  ;;  %v496_v57 = vld [vmem:[#allocation2 + $0xb0] sm:$0xff]  ;;  %v504_v58 = vld [vmem:[#allocation2 + $0x80] sm:$0xff] }
  0x71   : > { %v1300_v55 = vld [vmem:[%s1622_s15 + $0x58] sm:$0xff]  ;;  %v520_v0 = vld [vmem:[#allocation2 + $0xa8] sm:$0xff]  ;;  %v497_v1 = vld [vmem:[#allocation2] sm:$0xff] }
  0x72   : > { %722 = vmatpush.bf16.msra.mxu0 %v1310_v35  ;;  %1319 = vmatpush.bf16.msra.mxu1 %v1310_v35  ;;  %v1304_v56 = vld [vmem:[%s1622_s15 + $0x78] sm:$0xff]  ;;  %v505_v2 = vld [vmem:[#allocation2 + $0x88] sm:$0xff]  ;;  %v521_v12 = vld [vmem:[#allocation2 + $0xd0] sm:$0xff] }
  0x73   : > { %1320 = vmatpush.bf16.msra.mxu2 %v1310_v35  ;;  %1321 = vmatpush.bf16.msra.mxu3 %v1310_v35  ;;  %v512_v63 = vld [vmem:[#allocation2 + $0x38] sm:$0xff]  ;;  %v506_v14 = vld [vmem:[#allocation2 + $0xe8] sm:$0xff]  ;;  %v514_v23 = vld [vmem:[#allocation2 + $0x40] sm:$0xff] }
  0x74   : > { %v513_v11 = vld [vmem:[#allocation2 + $0x58] sm:$0xff]  ;;  %v522_v24 = vld [vmem:[#allocation2 + $0x10] sm:$0xff]  ;;  %v515_v35 = vld [vmem:[#allocation2 + $0xc8] sm:$0xff] }
  0x75   : > { %v498_v13 = vld [vmem:[#allocation2 + $0xd8] sm:$0xff] }
  0x76   : > { %723 = vmatpush.bf16.msra.mxu0 %v1309_v36  ;;  %1322 = vmatpush.bf16.msra.mxu1 %v1309_v36  ;;  %v499_v25 = vld [vmem:[#allocation2 + $0x18] sm:$0xff] }
  0x77   : > { %1323 = vmatpush.bf16.msra.mxu2 %v1309_v36  ;;  %1324 = vmatpush.bf16.msra.mxu3 %v1309_v36  ;;  %v507_v26 = vld [vmem:[#allocation2 + $0xb8] sm:$0xff]  ;;  %v523_v36 = vld [vmem:[#allocation2 + $0x28] sm:$0xff] }
  0x7a   : > { %724 = vmatpush.bf16.msra.mxu0 %v1308_v37  ;;  %1325 = vmatpush.bf16.msra.mxu1 %v1308_v37 }
  0x7b   : > { %1326 = vmatpush.bf16.msra.mxu2 %v1308_v37  ;;  %1327 = vmatpush.bf16.msra.mxu3 %v1308_v37  ;;  %v500_v37 = vld [vmem:[#allocation2 + $0x50] sm:$0xff] }
  0x7e   : > { %725 = vmatpush.bf16.msra.mxu0 %v1307_v38  ;;  %1328 = vmatpush.bf16.msra.mxu1 %v1307_v38 }
  0x7f   : > { %1329 = vmatpush.bf16.msra.mxu2 %v1307_v38  ;;  %1330 = vmatpush.bf16.msra.mxu3 %v1307_v38  ;;  %v508_v38 = vld [vmem:[#allocation2 + $0x60] sm:$0xff] }
  0x82   : > { %726 = vmatpush.bf16.msra.mxu0 %v1306_v39  ;;  %1331 = vmatpush.bf16.msra.mxu1 %v1306_v39 }
  0x83   : > { %1332 = vmatpush.bf16.msra.mxu2 %v1306_v39  ;;  %1333 = vmatpush.bf16.msra.mxu3 %v1306_v39 }
  0x86   : > { %727 = vmatpush.bf16.msra.mxu0 %v1305_v40  ;;  %1334 = vmatpush.bf16.msra.mxu1 %v1305_v40 }
  0x87   : > { %1335 = vmatpush.bf16.msra.mxu2 %v1305_v40  ;;  %1336 = vmatpush.bf16.msra.mxu3 %v1305_v40 }
  0x89   : > { %728 = vmatmul.bf16.vlgmr.msra.gmra.mxu0 %v1289_v41  ;;  %748 = vmatmul.bf16.vlgmr.msra.gmra.mxu1 %v1293_v42 }
  0x8a   : > { %768 = vmatmul.bf16.vlgmr.msra.gmra.mxu2 %v1297_v43  ;;  %788 = vmatmul.bf16.vlgmr.msra.gmra.mxu3 %v1301_v44 }
  0x99   : > { %733 = vmatmul.bf16.gmra.mxu0 %v1290_v45  ;;  %753 = vmatmul.bf16.gmra.mxu1 %v1294_v46 }
  0x9a   : > { %773 = vmatmul.bf16.gmra.mxu2 %v1298_v47  ;;  %793 = vmatmul.bf16.gmra.mxu3 %v1302_v48  ;;  %v516_v47 = vld [vmem:[#allocation2 + $0xe0] sm:$0xff] }
  0x9b   : > { %v524_v48 = vld [vmem:[#allocation2 + $0xa0] sm:$0xff] }
  0xa9   : > { %738 = vmatmul.bf16.gmra.mxu0 %v1291_v49  ;;  %758 = vmatmul.bf16.gmra.mxu1 %v1295_v50  ;;  %v501_v49 = vld [vmem:[#allocation2 + $0x68] sm:$0xff]  ;;  %v509_v50 = vld [vmem:[#allocation2 + $0xf0] sm:$0xff] }
  0xaa   : > { %778 = vmatmul.bf16.gmra.mxu2 %v1299_v51  ;;  %798 = vmatmul.bf16.gmra.mxu3 %v1303_v52 }
  0xb9   : > { %743 = vmatmul.bf16.gmra.mxu0 %v1292_v53  ;;  %763 = vmatmul.bf16.gmra.mxu1 %v1296_v54 }
  0xba   : > { %783 = vmatmul.bf16.gmra.mxu2 %v1300_v55  ;;  %803 = vmatmul.bf16.gmra.mxu3 %v1304_v56 }
 0x106   : > { %v729_v59 = vpop.f32.mrf.mxu0  ;;  %v749_v60 = vpop.f32.mrf.mxu1 }
 0x107   : > { %v809_v61 = vadd.f32 %v729_v59, %v496_v57  ;;  %v817_v62 = vadd.f32 %v749_v60, %v504_v58  ;;  %v517_v59 = vld [vmem:[#allocation2 + $0x90] sm:$0xff]  ;;  %v525_v60 = vld [vmem:[#allocation2 + $0xf8] sm:$0xff] }
 0x109   : > { %841 = vst [vmem:[#allocation2 + $0xb0] sm:$0xff] %v809_v61  ;;  %v502_v61 = vld [vmem:[#allocation2 + $0x30] sm:$0xff] }
 0x10a   : > { %849 = vst [vmem:[#allocation2 + $0x80] sm:$0xff] %v817_v62  ;;  %v510_v62 = vld [vmem:[#allocation2 + $0x8] sm:$0xff] }
 0x10d   : > { %v769_v3 = vpop.f32.mrf.mxu2  ;;  %v789_v4 = vpop.f32.mrf.mxu3 }
 0x10e   : > { %v825_v5 = vadd.f32 %v769_v3, %v512_v63  ;;  %v833_v6 = vadd.f32 %v789_v4, %v520_v0  ;;  %v731_v7 = vpop.f32.mrf.mxu0  ;;  %v751_v8 = vpop.f32.mrf.mxu1 }
 0x10f   : > { %v810_v9 = vadd.f32 %v731_v7, %v497_v1  ;;  %v818_v10 = vadd.f32 %v751_v8, %v505_v2  ;;  %v518_v7 = vld [vmem:[#allocation2 + $0x70] sm:$0xff]  ;;  %v526_v8 = vld [vmem:[#allocation2 + $0x20] sm:$0xff] }
 0x110   : > { %857 = vst [vmem:[#allocation2 + $0x38] sm:$0xff] %v825_v5 }
 0x111   : > { %865 = vst [vmem:[#allocation2 + $0xa8] sm:$0xff] %v833_v6 }
 0x112   : > { %842 = vst [vmem:[#allocation2] sm:$0xff] %v810_v9  ;;  %v503_v9 = vld [vmem:[#allocation2 + $0x48] sm:$0xff] }
 0x113   : > { %850 = vst [vmem:[#allocation2 + $0x88] sm:$0xff] %v818_v10  ;;  %v511_v10 = vld [vmem:[#allocation2 + $0x78] sm:$0xff] }
 0x115   : > { %v771_v15 = vpop.f32.mrf.mxu2  ;;  %v791_v16 = vpop.f32.mrf.mxu3 }
 0x116   : > { %v826_v17 = vadd.f32 %v771_v15, %v513_v11  ;;  %v834_v18 = vadd.f32 %v791_v16, %v521_v12  ;;  %v734_v19 = vpop.f32.mrf.mxu0  ;;  %v754_v20 = vpop.f32.mrf.mxu1 }
 0x117   : > { %v811_v21 = vadd.f32 %v734_v19, %v498_v13  ;;  %v819_v22 = vadd.f32 %v754_v20, %v506_v14  ;;  %v519_v19 = vld [vmem:[#allocation2 + $0xc0] sm:$0xff]  ;;  %v527_v20 = vld [vmem:[#allocation2 + $0x98] sm:$0xff] }
 0x118   : > { %858 = vst [vmem:[#allocation2 + $0x58] sm:$0xff] %v826_v17 }
 0x119   : > { %866 = vst [vmem:[#allocation2 + $0xd0] sm:$0xff] %v834_v18 }
 0x11a   : > { %843 = vst [vmem:[#allocation2 + $0xd8] sm:$0xff] %v811_v21 }
 0x11b   : > { %851 = vst [vmem:[#allocation2 + $0xe8] sm:$0xff] %v819_v22 }
 0x11d   : > { %v774_v27 = vpop.f32.mrf.mxu2  ;;  %v794_v28 = vpop.f32.mrf.mxu3 }
 0x11e   : > { %v827_v29 = vadd.f32 %v774_v27, %v514_v23  ;;  %v835_v30 = vadd.f32 %v794_v28, %v522_v24  ;;  %v736_v31 = vpop.f32.mrf.mxu0  ;;  %v756_v32 = vpop.f32.mrf.mxu1 }
 0x11f   : > { %v812_v33 = vadd.f32 %v736_v31, %v499_v25  ;;  %v820_v34 = vadd.f32 %v756_v32, %v507_v26 }
 0x120   : > { %859 = vst [vmem:[#allocation2 + $0x40] sm:$0xff] %v827_v29 }
 0x121   : > { %867 = vst [vmem:[#allocation2 + $0x10] sm:$0xff] %v835_v30 }
 0x122   : > { %844 = vst [vmem:[#allocation2 + $0x18] sm:$0xff] %v812_v33 }
 0x123   : > { %852 = vst [vmem:[#allocation2 + $0xb8] sm:$0xff] %v820_v34 }
 0x125   : > { %v776_v39 = vpop.f32.mrf.mxu2  ;;  %v796_v40 = vpop.f32.mrf.mxu3 }
 0x126   : > { %v828_v41 = vadd.f32 %v776_v39, %v515_v35  ;;  %v836_v42 = vadd.f32 %v796_v40, %v523_v36  ;;  %v739_v43 = vpop.f32.mrf.mxu0  ;;  %v759_v44 = vpop.f32.mrf.mxu1 }
 0x127   : > { %v813_v45 = vadd.f32 %v739_v43, %v500_v37  ;;  %v821_v46 = vadd.f32 %v759_v44, %v508_v38 }
 0x128   : > { %860 = vst [vmem:[#allocation2 + $0xc8] sm:$0xff] %v828_v41 }
 0x129   : > { %868 = vst [vmem:[#allocation2 + $0x28] sm:$0xff] %v836_v42 }
 0x12a   : > { %845 = vst [vmem:[#allocation2 + $0x50] sm:$0xff] %v813_v45 }
 0x12b   : > { %853 = vst [vmem:[#allocation2 + $0x60] sm:$0xff] %v821_v46 }
 0x12d   : > { %v779_v51 = vpop.f32.mrf.mxu2  ;;  %v799_v52 = vpop.f32.mrf.mxu3 }
 0x12e   : > { %v829_v53 = vadd.f32 %v779_v51, %v516_v47  ;;  %v837_v54 = vadd.f32 %v799_v52, %v524_v48  ;;  %v741_v55 = vpop.f32.mrf.mxu0  ;;  %v761_v56 = vpop.f32.mrf.mxu1 }
 0x12f   : > { %v814_v57 = vadd.f32 %v741_v55, %v501_v49  ;;  %v822_v58 = vadd.f32 %v761_v56, %v509_v50 }
 0x130   : > { %861 = vst [vmem:[#allocation2 + $0xe0] sm:$0xff] %v829_v53 }
 0x131   : > { %869 = vst [vmem:[#allocation2 + $0xa0] sm:$0xff] %v837_v54 }
 0x132   : > { %846 = vst [vmem:[#allocation2 + $0x68] sm:$0xff] %v814_v57 }
 0x133   : > { %854 = vst [vmem:[#allocation2 + $0xf0] sm:$0xff] %v822_v58 }
 0x135   : > { %v781_v63 = vpop.f32.mrf.mxu2  ;;  %v801_v0 = vpop.f32.mrf.mxu3 }
 0x136   : > { %v830_v1 = vadd.f32 %v781_v63, %v517_v59  ;;  %v838_v2 = vadd.f32 %v801_v0, %v525_v60  ;;  %v744_v3 = vpop.f32.mrf.mxu0  ;;  %v764_v4 = vpop.f32.mrf.mxu1 }
 0x137   : > { %v815_v5 = vadd.f32 %v744_v3, %v502_v61  ;;  %v823_v6 = vadd.f32 %v764_v4, %v510_v62 }
 0x138   : > { %862 = vst [vmem:[#allocation2 + $0x90] sm:$0xff] %v830_v1 }
 0x139   : > { %870 = vst [vmem:[#allocation2 + $0xf8] sm:$0xff] %v838_v2 }
 0x13a   : > { %847 = vst [vmem:[#allocation2 + $0x30] sm:$0xff] %v815_v5 }
 0x13b   : > { %855 = vst [vmem:[#allocation2 + $0x8] sm:$0xff] %v823_v6 }
 0x13d   : > { %v784_v11 = vpop.f32.mrf.mxu2  ;;  %v804_v12 = vpop.f32.mrf.mxu3 }
 0x13e   : > { %v831_v13 = vadd.f32 %v784_v11, %v518_v7  ;;  %v839_v14 = vadd.f32 %v804_v12, %v526_v8  ;;  %v746_v15 = vpop.f32.mrf.mxu0  ;;  %v766_v16 = vpop.f32.mrf.mxu1 }
 0x13f   : > { %v816_v17 = vadd.f32 %v746_v15, %v503_v9  ;;  %v824_v18 = vadd.f32 %v766_v16, %v511_v10 }
 0x140   : > { %863 = vst [vmem:[#allocation2 + $0x70] sm:$0xff] %v831_v13 }
 0x141   : > { %871 = vst [vmem:[#allocation2 + $0x20] sm:$0xff] %v839_v14 }
 0x142   : > { %848 = vst [vmem:[#allocation2 + $0x48] sm:$0xff] %v816_v17 }
 0x143   : > { %856 = vst [vmem:[#allocation2 + $0x78] sm:$0xff] %v824_v18 }
 0x145   : > { %v786_v21 = vpop.f32.mrf.mxu2  ;;  %v806_v22 = vpop.f32.mrf.mxu3  ;;  %876 = sbr.rel (%p1286_p13) target bundleno = 369 (0x171), region = 85 }
 0x146   : > { %v832_v23 = vadd.f32 %v786_v21, %v519_v19  ;;  %v840_v24 = vadd.f32 %v806_v22, %v527_v20 }
 0x148   : > { %864 = vst [vmem:[#allocation2 + $0xc0] sm:$0xff] %v832_v23 }
 0x149   : > { %872 = vst [vmem:[#allocation2 + $0x98] sm:$0xff] %v840_v24 }
 0x14a   : > { %v877_v25 = vld [vmem:[#allocation2 + $0xb0] sm:$0xff]  ;;  %v1653_v26 = vld [vmem:[%s1779_s2] ss:$0 sm:$0xff]  ;;  %v879_v31 = vld [vmem:[#allocation2 + $0xd8] sm:$0xff] }
 0x14b   : > { %v1658_v27 = vld [vmem:[%s1780_s3] ss:$0 sm:$0xff]  ;;  %v913_v29 = vmul.f32 %v1653_v26, %v877_v25  ;;  %v880_v32 = vld [vmem:[#allocation2 + $0x18] sm:$0xff]  ;;  %v881_v33 = vld [vmem:[#allocation2 + $0x50] sm:$0xff]  ;;  %v915_v34 = vmul.f32 %v1653_v26, %v879_v31 }
 0x14c   : > { %v878_v28 = vld [vmem:[#allocation2] sm:$0xff]  ;;  %v916_v35 = vmul.f32 %v1653_v26, %v880_v32  ;;  %v917_v36 = vmul.f32 %v1653_v26, %v881_v33  ;;  %v882_v37 = vld [vmem:[#allocation2 + $0x68] sm:$0xff]  ;;  %v883_v38 = vld [vmem:[#allocation2 + $0x30] sm:$0xff] }
 0x14d   : > { %v914_v30 = vmul.f32 %v1653_v26, %v878_v28  ;;  %v884_v39 = vld [vmem:[#allocation2 + $0x48] sm:$0xff]  ;;  %v949_v40 = vadd.f32 %v1658_v27, %v913_v29  ;;  %v918_v42 = vmul.f32 %v1653_v26, %v882_v37  ;;  %v919_v43 = vmul.f32 %v1653_v26, %v883_v38  ;;  %v885_v48 = vld [vmem:[#allocation2 + $0x80] sm:$0xff]  ;;  %v888_v55 = vld [vmem:[#allocation2 + $0xb8] sm:$0xff] }
 0x14e   : > { %v951_v44 = vadd.f32 %v1658_v27, %v915_v34  ;;  %v952_v45 = vadd.f32 %v1658_v27, %v916_v35  ;;  %v953_v46 = vadd.f32 %v1658_v27, %v917_v36  ;;  %v920_v47 = vmul.f32 %v1653_v26, %v884_v39  ;;  %v886_v49 = vld [vmem:[#allocation2 + $0x88] sm:$0xff]  ;;  %v889_v56 = vld [vmem:[#allocation2 + $0x60] sm:$0xff]  ;;  %v890_v60 = vld [vmem:[#allocation2 + $0xf0] sm:$0xff] }
 0x14f   : > { %v950_v41 = vadd.f32 %v1658_v27, %v914_v30  ;;  %v981_v50 = vmax.f32 %v949_v40, 0.0  ;;  %v954_v52 = vadd.f32 %v1658_v27, %v918_v42  ;;  %v955_v53 = vadd.f32 %v1658_v27, %v919_v43  ;;  %v887_v54 = vld [vmem:[#allocation2 + $0xe8] sm:$0xff]  ;;  %v892_v2 = vld [vmem:[#allocation2 + $0x78] sm:$0xff]  ;;  %v895_v19 = vld [vmem:[#allocation2 + $0x40] sm:$0xff] }
 0x150   : > { %v983_v57 = vmax.f32 %v951_v44, 0.0  ;;  %v984_v58 = vmax.f32 %v952_v45, 0.0  ;;  %v956_v59 = vadd.f32 %v1658_v27, %v920_v47  ;;  %v891_v61 = vld [vmem:[#allocation2 + $0x8] sm:$0xff]  ;;  %v985_v62 = vmax.f32 %v953_v46, 0.0  ;;  %v893_v15 = vld [vmem:[#allocation2 + $0x38] sm:$0xff]  ;;  %v897_v23 = vld [vmem:[#allocation2 + $0xe0] sm:$0xff] }
 0x151   : > { %v982_v51 = vmax.f32 %v950_v41, 0.0  ;;  %1013 = vst [vmem:[%s1620_s7] sm:$0xff] %v981_v50  ;;  %v986_v63 = vmax.f32 %v954_v52, 0.0  ;;  %v921_v0 = vmul.f32 %v1653_v26, %v885_v48  ;;  %v922_v1 = vmul.f32 %v1653_v26, %v886_v49  ;;  %v894_v16 = vld [vmem:[#allocation2 + $0x58] sm:$0xff]  ;;  %v896_v20 = vld [vmem:[#allocation2 + $0xc8] sm:$0xff]  ;;  %v898_v30 = vld [vmem:[#allocation2 + $0x90] sm:$0xff] }
 0x152   : > { %v987_v3 = vmax.f32 %v955_v53, 0.0  ;;  %v923_v4 = vmul.f32 %v1653_v26, %v887_v54  ;;  %v924_v5 = vmul.f32 %v1653_v26, %v888_v55  ;;  %v925_v6 = vmul.f32 %v1653_v26, %v889_v56  ;;  %1015 = vst [vmem:[%s1620_s7 + $0x10] sm:$0xff] %v983_v57  ;;  %v899_v35 = vld [vmem:[#allocation2 + $0x70] sm:$0xff]  ;;  %v900_v39 = vld [vmem:[#allocation2 + $0xc0] sm:$0xff]  ;;  %v901_v43 = vld [vmem:[#allocation2 + $0xa8] sm:$0xff] }
 0x153   : > { %1014 = vst [vmem:[%s1620_s7 + $0x8] sm:$0xff] %v982_v51  ;;  %v957_v7 = vadd.f32 %v1658_v27, %v921_v0  ;;  %v958_v8 = vadd.f32 %v1658_v27, %v922_v1  ;;  %v926_v9 = vmul.f32 %v1653_v26, %v890_v60  ;;  %v927_v10 = vmul.f32 %v1653_v26, %v891_v61  ;;  %v902_v47 = vld [vmem:[#allocation2 + $0xd0] sm:$0xff]  ;;  %v904_v55 = vld [vmem:[#allocation2 + $0x28] sm:$0xff] }
 0x154   : > { %1016 = vst [vmem:[%s1620_s7 + $0x18] sm:$0xff] %v984_v58  ;;  %v988_v11 = vmax.f32 %v956_v59, 0.0  ;;  %v959_v12 = vadd.f32 %v1658_v27, %v923_v4  ;;  %v960_v13 = vadd.f32 %v1658_v27, %v924_v5  ;;  %v928_v14 = vmul.f32 %v1653_v26, %v892_v2  ;;  %v903_v51 = vld [vmem:[#allocation2 + $0x10] sm:$0xff]  ;;  %v905_v59 = vld [vmem:[#allocation2 + $0xa0] sm:$0xff] }
 0x155   : > { %1017 = vst [vmem:[%s1620_s7 + $0x20] sm:$0xff] %v985_v62  ;;  %v989_v17 = vmax.f32 %v957_v7, 0.0  ;;  %v961_v18 = vadd.f32 %v1658_v27, %v925_v6  ;;  %v990_v21 = vmax.f32 %v958_v8, 0.0  ;;  %v962_v22 = vadd.f32 %v1658_v27, %v926_v9  ;;  %v908_v7 = vld [vmem:[#allocation2 + $0x98] sm:$0xff] }
 0x156   : > { %1018 = vst [vmem:[%s1620_s7 + $0x28] sm:$0xff] %v986_v63  ;;  %v991_v24 = vmax.f32 %v959_v12, 0.0  ;;  %v963_v25 = vadd.f32 %v1658_v27, %v927_v10  ;;  %v929_v28 = vmul.f32 %v1653_v26, %v893_v15  ;;  %v930_v29 = vmul.f32 %v1653_v26, %v894_v16  ;;  %v906_v63 = vld [vmem:[#allocation2 + $0xf8] sm:$0xff] }
 0x157   : > { %1019 = vst [vmem:[%s1620_s7 + $0x30] sm:$0xff] %v987_v3  ;;  %v992_v31 = vmax.f32 %v960_v13, 0.0  ;;  %v964_v32 = vadd.f32 %v1658_v27, %v928_v14  ;;  %v931_v33 = vmul.f32 %v1653_v26, %v895_v19  ;;  %v932_v34 = vmul.f32 %v1653_v26, %v896_v20  ;;  %v907_v3 = vld [vmem:[#allocation2 + $0x20] sm:$0xff] }
 0x158   : > { %1020 = vst [vmem:[%s1620_s7 + $0x38] sm:$0xff] %v988_v11  ;;  %v993_v36 = vmax.f32 %v961_v18, 0.0  ;;  %v965_v37 = vadd.f32 %v1658_v27, %v929_v28  ;;  %v933_v38 = vmul.f32 %v1653_v26, %v897_v23  ;;  %v994_v40 = vmax.f32 %v962_v22, 0.0 }
 0x159   : > { %1021 = vst [vmem:[%s1620_s7 + $0x40] sm:$0xff] %v989_v17  ;;  %v966_v41 = vadd.f32 %v1658_v27, %v930_v29  ;;  %v934_v42 = vmul.f32 %v1653_v26, %v898_v30  ;;  %v995_v44 = vmax.f32 %v963_v25, 0.0  ;;  %v967_v45 = vadd.f32 %v1658_v27, %v931_v33 }
 0x15a   : > { %1022 = vst [vmem:[%s1620_s7 + $0x48] sm:$0xff] %v990_v21  ;;  %v935_v46 = vmul.f32 %v1653_v26, %v899_v35  ;;  %v996_v48 = vmax.f32 %v964_v32, 0.0  ;;  %v968_v49 = vadd.f32 %v1658_v27, %v932_v34  ;;  %v936_v50 = vmul.f32 %v1653_v26, %v900_v39 }
 0x15b   : > { %1023 = vst [vmem:[%s1620_s7 + $0x50] sm:$0xff] %v991_v24  ;;  %v997_v52 = vmax.f32 %v965_v37, 0.0  ;;  %v969_v53 = vadd.f32 %v1658_v27, %v933_v38  ;;  %v937_v54 = vmul.f32 %v1653_v26, %v901_v43  ;;  %v998_v56 = vmax.f32 %v966_v41, 0.0 }
 0x15c   : > { %1024 = vst [vmem:[%s1620_s7 + $0x58] sm:$0xff] %v992_v31  ;;  %v970_v57 = vadd.f32 %v1658_v27, %v934_v42  ;;  %v938_v58 = vmul.f32 %v1653_v26, %v902_v47  ;;  %v999_v60 = vmax.f32 %v967_v45, 0.0  ;;  %v971_v61 = vadd.f32 %v1658_v27, %v935_v46 }
 0x15d   : > { %1025 = vst [vmem:[%s1620_s7 + $0x60] sm:$0xff] %v993_v36  ;;  %v939_v62 = vmul.f32 %v1653_v26, %v903_v51  ;;  %v1000_v0 = vmax.f32 %v968_v49, 0.0  ;;  %v972_v1 = vadd.f32 %v1658_v27, %v936_v50  ;;  %v940_v2 = vmul.f32 %v1653_v26, %v904_v55 }
 0x15e   : > { %1026 = vst [vmem:[%s1620_s7 + $0x68] sm:$0xff] %v994_v40  ;;  %v1001_v4 = vmax.f32 %v969_v53, 0.0  ;;  %v973_v5 = vadd.f32 %v1658_v27, %v937_v54  ;;  %v941_v6 = vmul.f32 %v1653_v26, %v905_v59  ;;  %v1002_v8 = vmax.f32 %v970_v57, 0.0 }
 0x15f   : > { %1027 = vst [vmem:[%s1620_s7 + $0x70] sm:$0xff] %v995_v44  ;;  %v974_v9 = vadd.f32 %v1658_v27, %v938_v58  ;;  %v942_v10 = vmul.f32 %v1653_v26, %v906_v63  ;;  %v1003_v11 = vmax.f32 %v971_v61, 0.0  ;;  %v975_v12 = vadd.f32 %v1658_v27, %v939_v62 }
 0x160   : > { %1028 = vst [vmem:[%s1620_s7 + $0x78] sm:$0xff] %v996_v48  ;;  %v943_v13 = vmul.f32 %v1653_v26, %v907_v3  ;;  %v1004_v14 = vmax.f32 %v972_v1, 0.0  ;;  %v976_v15 = vadd.f32 %v1658_v27, %v940_v2  ;;  %v944_v16 = vmul.f32 %v1653_v26, %v908_v7 }
 0x161   : > { %1029 = vst [vmem:[%s1620_s7 + $0x80] sm:$0xff] %v997_v52  ;;  %v1005_v17 = vmax.f32 %v973_v5, 0.0  ;;  %v977_v18 = vadd.f32 %v1658_v27, %v941_v6  ;;  %v1006_v19 = vmax.f32 %v974_v9, 0.0  ;;  %v978_v20 = vadd.f32 %v1658_v27, %v942_v10 }
 0x162   : > { %1030 = vst [vmem:[%s1620_s7 + $0x88] sm:$0xff] %v998_v56  ;;  %v1007_v21 = vmax.f32 %v975_v12, 0.0  ;;  %v979_v22 = vadd.f32 %v1658_v27, %v943_v13  ;;  %v1008_v26 = vmax.f32 %v976_v15, 0.0  ;;  %v980_v23 = vadd.f32 %v1658_v27, %v944_v16 }
 0x163   : > { %1031 = vst [vmem:[%s1620_s7 + $0x90] sm:$0xff] %v999_v60  ;;  %v1009_v24 = vmax.f32 %v977_v18, 0.0  ;;  %v1010_v25 = vmax.f32 %v978_v20, 0.0 }
 0x164   : > { %1032 = vst [vmem:[%s1620_s7 + $0x98] sm:$0xff] %v1000_v0  ;;  %v1011_v28 = vmax.f32 %v979_v22, 0.0  ;;  %v1012_v29 = vmax.f32 %v980_v23, 0.0 }
 0x165   : > { %1033 = vst [vmem:[%s1620_s7 + $0xa0] sm:$0xff] %v1001_v4 }
 0x166   : > { %1034 = vst [vmem:[%s1620_s7 + $0xa8] sm:$0xff] %v1002_v8 }
 0x167   : > { %1035 = vst [vmem:[%s1620_s7 + $0xb0] sm:$0xff] %v1003_v11 }
 0x168   : > { %1036 = vst [vmem:[%s1620_s7 + $0xb8] sm:$0xff] %v1004_v14 }
 0x169   : > { %1037 = vst [vmem:[%s1620_s7 + $0xc0] sm:$0xff] %v1005_v17 }
 0x16a   : > { %1038 = vst [vmem:[%s1620_s7 + $0xc8] sm:$0xff] %v1006_v19 }
 0x16b   : > { %1039 = vst [vmem:[%s1620_s7 + $0xd0] sm:$0xff] %v1007_v21 }
 0x16c   : > { %1040 = vst [vmem:[%s1620_s7 + $0xd8] sm:$0xff] %v1008_v26 }
 0x16d   : > { %1041 = vst [vmem:[%s1620_s7 + $0xe0] sm:$0xff] %v1009_v24 }
 0x16e   : > { %1042 = vst [vmem:[%s1620_s7 + $0xe8] sm:$0xff] %v1010_v25 }
 0x16f   : > { %1043 = vst [vmem:[%s1620_s7 + $0xf0] sm:$0xff] %v1011_v28 }
 0x170   : > { %1044 = vst [vmem:[%s1620_s7 + $0xf8] sm:$0xff] %v1012_v29 }
 0x171 PF: > { %s14_s21 = sadd.s32 1, %s1451_s21   ;;  %s1782_s15 = smov %s1431_s16 }
 0x172   : > { %p11_p0 = scmp.ge.s32.totalorder %s14_s21, 12   ;;  %s1783_s16 = smov %s1530_s28 }
 0x173   : > { %s1784_s17 = smov %s1443_s19  ;;  %s1785_s18 = smov %s1447_s20 }
 0x174   : > { %s1786_s19 = smov %s1789_s22  ;;  %s1787_s20 = smov %s1793_s23 }
 0x175   :  { %13 = sbr.rel (!%p11_p0) target bundleno = 4 (0x4), region = 129 }

// kernel: _lambda_.15
= control target key start
LH: loop header
LB: loop body
LE: loop exit
PB: predicated region body
PF: predicated region fallthrough
CT: control target
= control target key end

     0   :  { %s1625_s18 = smov 0   ;;  %s1627_s19 = smov 0   ;;  %s1960_s0 = inlined_call_operand.vmem [shape: bf16[512,640], index: 0, kind: input, shape index: {}]   ;;  %s1961_s1 = inlined_call_operand.vmem [shape: bf16[640,128], index: 1, kind: input, shape index: {}]   ;;  %s1962_s2 = inlined_call_operand.vmem [shape: f32[1,128], index: 2, kind: input, shape index: {}]   ;;  %s1963_s3 = inlined_call_operand.vmem [shape: f32[1,128], index: 3, kind: input, shape index: {}]   ;;  %s1964_s4 = inlined_call_operand.vmem [shape: f32[512,128], index: 4, kind: input, shape index: {}]   ;;  %s1965_s5 = inlined_call_operand.vmem [shape: f32[512,128], index: 5, kind: output, shape index: {}]  }
   0x1   :  { %s1629_s20 = smov 0   ;;  %s1631_s21 = smov 0  }
   0x2   :  { %s1633_s22 = smov 0   ;;  %s1635_s23 = smov 0  }
   0x3   :  { %s1637_s24 = smov 0  }
   0x4 LB: > { %s27_s25 = sadd.s32 1, %s1584_s22  ;;  %s34_s26 = sadd.s32 1, %s1588_s23  ;;  %s1592_s24 = sphi %s1637_s24, %s15_s24   ;;  %s1588_s23 = sphi %s1635_s23, %s1971_s23   ;;  %s1584_s22 = sphi %s1633_s22, %s1970_s22   ;;  %s1580_s21 = sphi %s1631_s21, %s1969_s21   ;;  %s1576_s20 = sphi %s1629_s20, %s1968_s20   ;;  %s1572_s19 = sphi %s1627_s19, %s1967_s19   ;;  %s1568_s18 = sphi %s1625_s18, %s1966_s18  }
   0x5   : > { %p28_p0 = scmp.ge.s32.totalorder %s27_s25, 5  ;;  %p50_p1 = scmp.ne.s32.totalorder %s1572_s19, %s1568_s18 }
   0x6   : > { %p51_p2 = scmp.eq.s32.totalorder %s1592_s24, 0  ;;  %s43_s30 = sadd.s32 1, %s1572_s19 }
   0x7   : > { %s1973_s25 = smov (%p28_p0, %s27_s25), 0  ;;  %s1975_s26 = smov (!%p28_p0, %s34_s26), %s1588_s23 }
   0x8   : > { %p52_p3 = por %p51_p2, %p50_p1  ;;  %p36_p4 = scmp.ge.s32.totalorder %s1975_s26, 2 }
   0x9   : > { %s39_s27 = ssub.s32 %s1584_s22, %s1973_s25  ;;  %p1317_p6 = scmp.ge.s32.totalorder %s1592_s24, 10 }
   0xa   : > { %s1977_s26 = smov (%p36_p4, %s1975_s26), 0 }
   0xb   : > { %s38_s28 = ssub.s32 %s1588_s23, %s1977_s26  ;;  %224 = sbr.rel (%p1317_p6) target bundleno = 55 (0x37), region = 24 }
   0xc   : > { %s40_s29 = sor.u32 %s39_s27, %s38_s28 }
   0xd   : > { %p41_p5 = scmp.eq.s32.totalorder %s40_s29, 0 }
   0xf   : > { %s1676_s6 = scalar_select %p41_p5, %s1572_s19, %s43_s30  }
  0x10   : > { %227 = sbr.rel (!%p52_p3) target bundleno = 55 (0x37), region = 28  ;;  %s229_s7 = sand.u32 (%p52_p3), 1, %s1572_s19  }
  0x11   : > { %s1478_s8 = smul.u32 (%p52_p3), 160, %s1588_s23  ;;  %s1318_s9 = sshll.u32 (%p52_p3), %s229_s7, 7 }
  0x12   : > { %s1690_s15 = scalar_lea.vmem (%p52_p3), [#allocation3], %s1318_s9 }
  0x13   : > { %s234_s10 = sadd.s32 (%p52_p3), %s1584_s22, %s1478_s8 }
  0x14   : > { %s1321_s11 = sshll.u32 (%p52_p3), %s234_s10, 2 }
  0x15   : > { %s1685_s14 = scalar_lea.vmem %s1960_s0, %s1321_s11 }
  0x16   : > { %v253_v0 = vld [vmem:[%s1685_s14] sm:$0xf]  ;;  %v255_v1 = vld [vmem:[%s1685_s14 + $0x14] sm:$0xf]  ;;  %v257_v2 = vld [vmem:[%s1685_s14 + $0x28] sm:$0xf] }
  0x17   : > { %254 = vst [vmem:[%s1690_s15] sm:$0xf] %v253_v0  ;;  %v259_v3 = vld [vmem:[%s1685_s14 + $0x3c] sm:$0xf]  ;;  %v261_v4 = vld [vmem:[%s1685_s14 + $0x50] sm:$0xf] }
  0x18   : > { %256 = vst [vmem:[%s1690_s15 + $0x4] sm:$0xf] %v255_v1  ;;  %v263_v5 = vld [vmem:[%s1685_s14 + $0x64] sm:$0xf]  ;;  %v265_v6 = vld [vmem:[%s1685_s14 + $0x78] sm:$0xf] }
  0x19   : > { %258 = vst [vmem:[%s1690_s15 + $0x8] sm:$0xf] %v257_v2  ;;  %v267_v7 = vld [vmem:[%s1685_s14 + $0x8c] sm:$0xf]  ;;  %v269_v8 = vld [vmem:[%s1685_s14 + $0xa0] sm:$0xf] }
  0x1a   : > { %260 = vst [vmem:[%s1690_s15 + $0xc] sm:$0xf] %v259_v3  ;;  %v271_v9 = vld [vmem:[%s1685_s14 + $0xb4] sm:$0xf]  ;;  %v273_v10 = vld [vmem:[%s1685_s14 + $0xc8] sm:$0xf] }
  0x1b   : > { %262 = vst [vmem:[%s1690_s15 + $0x10] sm:$0xf] %v261_v4  ;;  %v275_v11 = vld [vmem:[%s1685_s14 + $0xdc] sm:$0xf]  ;;  %v277_v12 = vld [vmem:[%s1685_s14 + $0xf0] sm:$0xf] }
  0x1c   : > { %264 = vst [vmem:[%s1690_s15 + $0x14] sm:$0xf] %v263_v5  ;;  %v279_v13 = vld [vmem:[%s1685_s14 + $0x104] sm:$0xf]  ;;  %v281_v14 = vld [vmem:[%s1685_s14 + $0x118] sm:$0xf] }
  0x1d   : > { %266 = vst [vmem:[%s1690_s15 + $0x18] sm:$0xf] %v265_v6  ;;  %v283_v15 = vld [vmem:[%s1685_s14 + $0x12c] sm:$0xf]  ;;  %v285_v16 = vld [vmem:[%s1685_s14 + $0x140] sm:$0xf] }
  0x1e   : > { %268 = vst [vmem:[%s1690_s15 + $0x1c] sm:$0xf] %v267_v7  ;;  %v287_v17 = vld [vmem:[%s1685_s14 + $0x154] sm:$0xf]  ;;  %v289_v18 = vld [vmem:[%s1685_s14 + $0x168] sm:$0xf] }
  0x1f   : > { %270 = vst [vmem:[%s1690_s15 + $0x20] sm:$0xf] %v269_v8  ;;  %v291_v19 = vld [vmem:[%s1685_s14 + $0x17c] sm:$0xf]  ;;  %v293_v20 = vld [vmem:[%s1685_s14 + $0x190] sm:$0xf] }
  0x20   : > { %272 = vst [vmem:[%s1690_s15 + $0x24] sm:$0xf] %v271_v9  ;;  %v295_v21 = vld [vmem:[%s1685_s14 + $0x1a4] sm:$0xf]  ;;  %v297_v22 = vld [vmem:[%s1685_s14 + $0x1b8] sm:$0xf] }
  0x21   : > { %274 = vst [vmem:[%s1690_s15 + $0x28] sm:$0xf] %v273_v10  ;;  %v299_v23 = vld [vmem:[%s1685_s14 + $0x1cc] sm:$0xf]  ;;  %v301_v24 = vld [vmem:[%s1685_s14 + $0x1e0] sm:$0xf] }
  0x22   : > { %276 = vst [vmem:[%s1690_s15 + $0x2c] sm:$0xf] %v275_v11  ;;  %v303_v25 = vld [vmem:[%s1685_s14 + $0x1f4] sm:$0xf]  ;;  %v305_v26 = vld [vmem:[%s1685_s14 + $0x208] sm:$0xf] }
  0x23   : > { %278 = vst [vmem:[%s1690_s15 + $0x30] sm:$0xf] %v277_v12  ;;  %v307_v27 = vld [vmem:[%s1685_s14 + $0x21c] sm:$0xf]  ;;  %v309_v28 = vld [vmem:[%s1685_s14 + $0x230] sm:$0xf] }
  0x24   : > { %280 = vst [vmem:[%s1690_s15 + $0x34] sm:$0xf] %v279_v13  ;;  %v311_v29 = vld [vmem:[%s1685_s14 + $0x244] sm:$0xf]  ;;  %v313_v30 = vld [vmem:[%s1685_s14 + $0x258] sm:$0xf] }
  0x25   : > { %282 = vst [vmem:[%s1690_s15 + $0x38] sm:$0xf] %v281_v14  ;;  %v315_v31 = vld [vmem:[%s1685_s14 + $0x26c] sm:$0xf] }
  0x26   : > { %284 = vst [vmem:[%s1690_s15 + $0x3c] sm:$0xf] %v283_v15 }
  0x27   : > { %286 = vst [vmem:[%s1690_s15 + $0x40] sm:$0xf] %v285_v16 }
  0x28   : > { %288 = vst [vmem:[%s1690_s15 + $0x44] sm:$0xf] %v287_v17 }
  0x29   : > { %290 = vst [vmem:[%s1690_s15 + $0x48] sm:$0xf] %v289_v18 }
  0x2a   : > { %292 = vst [vmem:[%s1690_s15 + $0x4c] sm:$0xf] %v291_v19 }
  0x2b   : > { %294 = vst [vmem:[%s1690_s15 + $0x50] sm:$0xf] %v293_v20 }
  0x2c   : > { %296 = vst [vmem:[%s1690_s15 + $0x54] sm:$0xf] %v295_v21 }
  0x2d   : > { %298 = vst [vmem:[%s1690_s15 + $0x58] sm:$0xf] %v297_v22 }
  0x2e   : > { %300 = vst [vmem:[%s1690_s15 + $0x5c] sm:$0xf] %v299_v23 }
  0x2f   : > { %302 = vst [vmem:[%s1690_s15 + $0x60] sm:$0xf] %v301_v24 }
  0x30   : > { %304 = vst [vmem:[%s1690_s15 + $0x64] sm:$0xf] %v303_v25 }
  0x31   : > { %306 = vst [vmem:[%s1690_s15 + $0x68] sm:$0xf] %v305_v26 }
  0x32   : > { %308 = vst [vmem:[%s1690_s15 + $0x6c] sm:$0xf] %v307_v27 }
  0x33   : > { %310 = vst [vmem:[%s1690_s15 + $0x70] sm:$0xf] %v309_v28 }
  0x34   : > { %312 = vst [vmem:[%s1690_s15 + $0x74] sm:$0xf] %v311_v29 }
  0x35   : > { %314 = vst [vmem:[%s1690_s15 + $0x78] sm:$0xf] %v313_v30 }
  0x36   : > { %316 = vst [vmem:[%s1690_s15 + $0x7c] sm:$0xf] %v315_v31 }
  0x37 PF: > { %p1322_p7 = scmp.ge.s32.totalorder %s1592_s24, 1  ;;  %p427_p8 = scmp.lt.s32.totalorder %s1592_s24, 11 }
  0x39   : > { %p428_p9 = pnand %p1322_p7, %p427_p8 }
  0x3a   : > { %s434_s16 = sand.u32 (!%p428_p9), 1, %s1568_s18   ;;  %s1324_s17 = sshll.u32 (!%p428_p9), %s1576_s20, 4 }
  0x3b   : > { %431 = sbr.rel (%p428_p9) target bundleno = 371 (0x173), region = 77  ;;  %s1323_s27 = sshll.u32 (!%p428_p9), %s434_s16, 7 }
  0x3c   : > { %p488_p10 = scmp.lt.s32.totalorder (!%p428_p9), %s1324_s17, 79  ;;  %s1326_s28 = sshll.u32 (!%p428_p9), %s1580_s21, 5 }
  0x3d   : > { %p503_p11 = scmp.lt.s32.totalorder (!%p428_p9), %s1326_s28, 63  ;;  %s1773_s21 = scalar_lea.vmem (!%p428_p9), [#allocation3], %s1323_s27 }
  0x3e   : > { %p1330_p12 = scmp.ne.s32.totalorder (!%p428_p9), %s1576_s20, 0 }
  0x40   : > { %s1979_s17 = smov (!%p488_p10, %s1324_s17), 79  ;;  %s1981_s28 = smov (!%p503_p11, %s1326_s28), 63 }
  0x41   : > { %s1325_s29 = sshll.u32 %s1979_s17, 2  ;;  %s1327_s9 = sshll.u32 %s1981_s28, 3 }
  0x42   : > { %s1761_s8 = scalar_lea.vmem %s1961_s1, %s1325_s29  ;;  %s1766_s12 = scalar_lea.vmem %s1964_s4, %s1327_s9 }
  0x43   : > { %s1771_s14 = scalar_lea.vmem %s1965_s5, %s1327_s9  ;;  %523 = sbr.rel (%p1330_p12) target bundleno = 105 (0x69), region = 85 }
  0x48   : > { %v1594_v32 = vmov 0.0  }
  0x49   : > { %524 = vst [vmem:[#allocation2 + $0xb0] sm:$0xff] %v1594_v32 }
  0x4a   : > { %525 = vst [vmem:[#allocation2] sm:$0xff] %v1594_v32 }
  0x4b   : > { %526 = vst [vmem:[#allocation2 + $0xd8] sm:$0xff] %v1594_v32 }
  0x4c   : > { %527 = vst [vmem:[#allocation2 + $0x18] sm:$0xff] %v1594_v32 }
  0x4d   : > { %528 = vst [vmem:[#allocation2 + $0x50] sm:$0xff] %v1594_v32 }
  0x4e   : > { %529 = vst [vmem:[#allocation2 + $0x68] sm:$0xff] %v1594_v32 }
  0x4f   : > { %530 = vst [vmem:[#allocation2 + $0x30] sm:$0xff] %v1594_v32 }
  0x50   : > { %531 = vst [vmem:[#allocation2 + $0x48] sm:$0xff] %v1594_v32 }
  0x51   : > { %532 = vst [vmem:[#allocation2 + $0x80] sm:$0xff] %v1594_v32 }
  0x52   : > { %533 = vst [vmem:[#allocation2 + $0x88] sm:$0xff] %v1594_v32 }
  0x53   : > { %534 = vst [vmem:[#allocation2 + $0xe8] sm:$0xff] %v1594_v32 }
  0x54   : > { %535 = vst [vmem:[#allocation2 + $0xb8] sm:$0xff] %v1594_v32 }
  0x55   : > { %536 = vst [vmem:[#allocation2 + $0x60] sm:$0xff] %v1594_v32 }
  0x56   : > { %537 = vst [vmem:[#allocation2 + $0xf0] sm:$0xff] %v1594_v32 }
  0x57   : > { %538 = vst [vmem:[#allocation2 + $0x8] sm:$0xff] %v1594_v32 }
  0x58   : > { %539 = vst [vmem:[#allocation2 + $0x78] sm:$0xff] %v1594_v32 }
  0x59   : > { %540 = vst [vmem:[#allocation2 + $0x38] sm:$0xff] %v1594_v32 }
  0x5a   : > { %541 = vst [vmem:[#allocation2 + $0x58] sm:$0xff] %v1594_v32 }
  0x5b   : > { %542 = vst [vmem:[#allocation2 + $0x40] sm:$0xff] %v1594_v32 }
  0x5c   : > { %543 = vst [vmem:[#allocation2 + $0xc8] sm:$0xff] %v1594_v32 }
  0x5d   : > { %544 = vst [vmem:[#allocation2 + $0xe0] sm:$0xff] %v1594_v32 }
  0x5e   : > { %545 = vst [vmem:[#allocation2 + $0x90] sm:$0xff] %v1594_v32 }
  0x5f   : > { %546 = vst [vmem:[#allocation2 + $0x70] sm:$0xff] %v1594_v32 }
  0x60   : > { %547 = vst [vmem:[#allocation2 + $0xc0] sm:$0xff] %v1594_v32 }
  0x61   : > { %548 = vst [vmem:[#allocation2 + $0xa8] sm:$0xff] %v1594_v32 }
  0x62   : > { %549 = vst [vmem:[#allocation2 + $0xd0] sm:$0xff] %v1594_v32 }
  0x63   : > { %550 = vst [vmem:[#allocation2 + $0x10] sm:$0xff] %v1594_v32 }
  0x64   : > { %551 = vst [vmem:[#allocation2 + $0x28] sm:$0xff] %v1594_v32 }
  0x65   : > { %552 = vst [vmem:[#allocation2 + $0xa0] sm:$0xff] %v1594_v32 }
  0x66   : > { %553 = vst [vmem:[#allocation2 + $0xf8] sm:$0xff] %v1594_v32 }
  0x67   : > { %554 = vst [vmem:[#allocation2 + $0x20] sm:$0xff] %v1594_v32 }
  0x68   : > { %555 = vst [vmem:[#allocation2 + $0x98] sm:$0xff] %v1594_v32 }
  0x69 PF: > { %v1453_v33 = vld [vmem:[%s1761_s8 + $0x38] sm:$0xff]  ;;  %v1452_v34 = vld [vmem:[%s1761_s8 + $0x30] sm:$0xff]  ;;  %v1451_v35 = vld [vmem:[%s1761_s8 + $0x28] sm:$0xff]  ;;  %p1427_p13 = scmp.ne.s32.totalorder %s1576_s20, 4 }
  0x6a   : > { %780 = vmatpush.bf16.msra.mxu0 %v1453_v33  ;;  %1454 = vmatpush.bf16.msra.mxu1 %v1453_v33  ;;  %v1450_v36 = vld [vmem:[%s1761_s8 + $0x20] sm:$0xff]  ;;  %v1449_v37 = vld [vmem:[%s1761_s8 + $0x18] sm:$0xff]  ;;  %v1448_v38 = vld [vmem:[%s1761_s8 + $0x10] sm:$0xff] }
  0x6b   : > { %1455 = vmatpush.bf16.msra.mxu2 %v1453_v33  ;;  %1456 = vmatpush.bf16.msra.mxu3 %v1453_v33  ;;  %v1447_v39 = vld [vmem:[%s1761_s8 + $0x8] sm:$0xff]  ;;  %v1446_v40 = vld [vmem:[%s1761_s8] sm:$0xff]  ;;  %v1432_v49 = vld [vmem:[%s1773_s21 + $0x10] sm:$0xff] }
  0x6c   : > { %v1430_v41 = vld [vmem:[%s1773_s21] sm:$0xff]  ;;  %v1431_v45 = vld [vmem:[%s1773_s21 + $0x8] sm:$0xff]  ;;  %v1436_v50 = vld [vmem:[%s1773_s21 + $0x30] sm:$0xff] }
  0x6d   : > { %v1434_v42 = vld [vmem:[%s1773_s21 + $0x20] sm:$0xff]  ;;  %v1435_v46 = vld [vmem:[%s1773_s21 + $0x28] sm:$0xff]  ;;  %v1440_v51 = vld [vmem:[%s1773_s21 + $0x50] sm:$0xff] }
  0x6e   : > { %781 = vmatpush.bf16.msra.mxu0 %v1452_v34  ;;  %1457 = vmatpush.bf16.msra.mxu1 %v1452_v34  ;;  %v1438_v43 = vld [vmem:[%s1773_s21 + $0x40] sm:$0xff]  ;;  %v1439_v47 = vld [vmem:[%s1773_s21 + $0x48] sm:$0xff]  ;;  %v1444_v52 = vld [vmem:[%s1773_s21 + $0x70] sm:$0xff] }
  0x6f   : > { %1458 = vmatpush.bf16.msra.mxu2 %v1452_v34  ;;  %1459 = vmatpush.bf16.msra.mxu3 %v1452_v34  ;;  %v1442_v44 = vld [vmem:[%s1773_s21 + $0x60] sm:$0xff]  ;;  %v1443_v48 = vld [vmem:[%s1773_s21 + $0x68] sm:$0xff]  ;;  %v1433_v53 = vld [vmem:[%s1773_s21 + $0x18] sm:$0xff] }
  0x70   : > { %v1437_v54 = vld [vmem:[%s1773_s21 + $0x38] sm:$0xff]  ;;  %v556_v57 = vld [vmem:[#allocation2 + $0xb0] sm:$0xff]  ;;  %v564_v58 = vld [vmem:[#allocation2 + $0x80] sm:$0xff] }
  0x71   : > { %v1441_v55 = vld [vmem:[%s1773_s21 + $0x58] sm:$0xff]  ;;  %v580_v0 = vld [vmem:[#allocation2 + $0xa8] sm:$0xff]  ;;  %v557_v1 = vld [vmem:[#allocation2] sm:$0xff] }
  0x72   : > { %782 = vmatpush.bf16.msra.mxu0 %v1451_v35  ;;  %1460 = vmatpush.bf16.msra.mxu1 %v1451_v35  ;;  %v1445_v56 = vld [vmem:[%s1773_s21 + $0x78] sm:$0xff]  ;;  %v565_v2 = vld [vmem:[#allocation2 + $0x88] sm:$0xff]  ;;  %v581_v12 = vld [vmem:[#allocation2 + $0xd0] sm:$0xff] }
  0x73   : > { %1461 = vmatpush.bf16.msra.mxu2 %v1451_v35  ;;  %1462 = vmatpush.bf16.msra.mxu3 %v1451_v35  ;;  %v572_v63 = vld [vmem:[#allocation2 + $0x38] sm:$0xff]  ;;  %v566_v14 = vld [vmem:[#allocation2 + $0xe8] sm:$0xff]  ;;  %v574_v23 = vld [vmem:[#allocation2 + $0x40] sm:$0xff] }
  0x74   : > { %v573_v11 = vld [vmem:[#allocation2 + $0x58] sm:$0xff]  ;;  %v582_v24 = vld [vmem:[#allocation2 + $0x10] sm:$0xff]  ;;  %v575_v35 = vld [vmem:[#allocation2 + $0xc8] sm:$0xff] }
  0x75   : > { %v558_v13 = vld [vmem:[#allocation2 + $0xd8] sm:$0xff] }
  0x76   : > { %783 = vmatpush.bf16.msra.mxu0 %v1450_v36  ;;  %1463 = vmatpush.bf16.msra.mxu1 %v1450_v36  ;;  %v559_v25 = vld [vmem:[#allocation2 + $0x18] sm:$0xff] }
  0x77   : > { %1464 = vmatpush.bf16.msra.mxu2 %v1450_v36  ;;  %1465 = vmatpush.bf16.msra.mxu3 %v1450_v36  ;;  %v567_v26 = vld [vmem:[#allocation2 + $0xb8] sm:$0xff]  ;;  %v583_v36 = vld [vmem:[#allocation2 + $0x28] sm:$0xff] }
  0x7a   : > { %784 = vmatpush.bf16.msra.mxu0 %v1449_v37  ;;  %1466 = vmatpush.bf16.msra.mxu1 %v1449_v37 }
  0x7b   : > { %1467 = vmatpush.bf16.msra.mxu2 %v1449_v37  ;;  %1468 = vmatpush.bf16.msra.mxu3 %v1449_v37  ;;  %v560_v37 = vld [vmem:[#allocation2 + $0x50] sm:$0xff] }
  0x7e   : > { %785 = vmatpush.bf16.msra.mxu0 %v1448_v38  ;;  %1469 = vmatpush.bf16.msra.mxu1 %v1448_v38 }
  0x7f   : > { %1470 = vmatpush.bf16.msra.mxu2 %v1448_v38  ;;  %1471 = vmatpush.bf16.msra.mxu3 %v1448_v38  ;;  %v568_v38 = vld [vmem:[#allocation2 + $0x60] sm:$0xff] }
  0x82   : > { %786 = vmatpush.bf16.msra.mxu0 %v1447_v39  ;;  %1472 = vmatpush.bf16.msra.mxu1 %v1447_v39 }
  0x83   : > { %1473 = vmatpush.bf16.msra.mxu2 %v1447_v39  ;;  %1474 = vmatpush.bf16.msra.mxu3 %v1447_v39 }
  0x86   : > { %787 = vmatpush.bf16.msra.mxu0 %v1446_v40  ;;  %1475 = vmatpush.bf16.msra.mxu1 %v1446_v40 }
  0x87   : > { %1476 = vmatpush.bf16.msra.mxu2 %v1446_v40  ;;  %1477 = vmatpush.bf16.msra.mxu3 %v1446_v40 }
  0x89   : > { %788 = vmatmul.bf16.vlgmr.msra.gmra.mxu0 %v1430_v41  ;;  %808 = vmatmul.bf16.vlgmr.msra.gmra.mxu1 %v1434_v42 }
  0x8a   : > { %828 = vmatmul.bf16.vlgmr.msra.gmra.mxu2 %v1438_v43  ;;  %848 = vmatmul.bf16.vlgmr.msra.gmra.mxu3 %v1442_v44 }
  0x99   : > { %793 = vmatmul.bf16.gmra.mxu0 %v1431_v45  ;;  %813 = vmatmul.bf16.gmra.mxu1 %v1435_v46 }
  0x9a   : > { %833 = vmatmul.bf16.gmra.mxu2 %v1439_v47  ;;  %853 = vmatmul.bf16.gmra.mxu3 %v1443_v48  ;;  %v576_v47 = vld [vmem:[#allocation2 + $0xe0] sm:$0xff] }
  0x9b   : > { %v584_v48 = vld [vmem:[#allocation2 + $0xa0] sm:$0xff] }
  0xa9   : > { %798 = vmatmul.bf16.gmra.mxu0 %v1432_v49  ;;  %818 = vmatmul.bf16.gmra.mxu1 %v1436_v50  ;;  %v561_v49 = vld [vmem:[#allocation2 + $0x68] sm:$0xff]  ;;  %v569_v50 = vld [vmem:[#allocation2 + $0xf0] sm:$0xff] }
  0xaa   : > { %838 = vmatmul.bf16.gmra.mxu2 %v1440_v51  ;;  %858 = vmatmul.bf16.gmra.mxu3 %v1444_v52 }
  0xb9   : > { %803 = vmatmul.bf16.gmra.mxu0 %v1433_v53  ;;  %823 = vmatmul.bf16.gmra.mxu1 %v1437_v54 }
  0xba   : > { %843 = vmatmul.bf16.gmra.mxu2 %v1441_v55  ;;  %863 = vmatmul.bf16.gmra.mxu3 %v1445_v56 }
 0x106   : > { %v789_v59 = vpop.f32.mrf.mxu0  ;;  %v809_v60 = vpop.f32.mrf.mxu1 }
 0x107   : > { %v869_v61 = vadd.f32 %v789_v59, %v556_v57  ;;  %v877_v62 = vadd.f32 %v809_v60, %v564_v58  ;;  %v577_v59 = vld [vmem:[#allocation2 + $0x90] sm:$0xff]  ;;  %v585_v60 = vld [vmem:[#allocation2 + $0xf8] sm:$0xff] }
 0x109   : > { %901 = vst [vmem:[#allocation2 + $0xb0] sm:$0xff] %v869_v61  ;;  %v562_v61 = vld [vmem:[#allocation2 + $0x30] sm:$0xff] }
 0x10a   : > { %909 = vst [vmem:[#allocation2 + $0x80] sm:$0xff] %v877_v62  ;;  %v570_v62 = vld [vmem:[#allocation2 + $0x8] sm:$0xff] }
 0x10d   : > { %v829_v3 = vpop.f32.mrf.mxu2  ;;  %v849_v4 = vpop.f32.mrf.mxu3 }
 0x10e   : > { %v885_v5 = vadd.f32 %v829_v3, %v572_v63  ;;  %v893_v6 = vadd.f32 %v849_v4, %v580_v0  ;;  %v791_v7 = vpop.f32.mrf.mxu0  ;;  %v811_v8 = vpop.f32.mrf.mxu1 }
 0x10f   : > { %v870_v9 = vadd.f32 %v791_v7, %v557_v1  ;;  %v878_v10 = vadd.f32 %v811_v8, %v565_v2  ;;  %v578_v7 = vld [vmem:[#allocation2 + $0x70] sm:$0xff]  ;;  %v586_v8 = vld [vmem:[#allocation2 + $0x20] sm:$0xff] }
 0x110   : > { %917 = vst [vmem:[#allocation2 + $0x38] sm:$0xff] %v885_v5 }
 0x111   : > { %925 = vst [vmem:[#allocation2 + $0xa8] sm:$0xff] %v893_v6 }
 0x112   : > { %902 = vst [vmem:[#allocation2] sm:$0xff] %v870_v9  ;;  %v563_v9 = vld [vmem:[#allocation2 + $0x48] sm:$0xff] }
 0x113   : > { %910 = vst [vmem:[#allocation2 + $0x88] sm:$0xff] %v878_v10  ;;  %v571_v10 = vld [vmem:[#allocation2 + $0x78] sm:$0xff] }
 0x115   : > { %v831_v15 = vpop.f32.mrf.mxu2  ;;  %v851_v16 = vpop.f32.mrf.mxu3 }
 0x116   : > { %v886_v17 = vadd.f32 %v831_v15, %v573_v11  ;;  %v894_v18 = vadd.f32 %v851_v16, %v581_v12  ;;  %v794_v19 = vpop.f32.mrf.mxu0  ;;  %v814_v20 = vpop.f32.mrf.mxu1 }
 0x117   : > { %v871_v21 = vadd.f32 %v794_v19, %v558_v13  ;;  %v879_v22 = vadd.f32 %v814_v20, %v566_v14  ;;  %v579_v19 = vld [vmem:[#allocation2 + $0xc0] sm:$0xff]  ;;  %v587_v20 = vld [vmem:[#allocation2 + $0x98] sm:$0xff] }
 0x118   : > { %918 = vst [vmem:[#allocation2 + $0x58] sm:$0xff] %v886_v17 }
 0x119   : > { %926 = vst [vmem:[#allocation2 + $0xd0] sm:$0xff] %v894_v18 }
 0x11a   : > { %903 = vst [vmem:[#allocation2 + $0xd8] sm:$0xff] %v871_v21 }
 0x11b   : > { %911 = vst [vmem:[#allocation2 + $0xe8] sm:$0xff] %v879_v22 }
 0x11d   : > { %v834_v27 = vpop.f32.mrf.mxu2  ;;  %v854_v28 = vpop.f32.mrf.mxu3 }
 0x11e   : > { %v887_v29 = vadd.f32 %v834_v27, %v574_v23  ;;  %v895_v30 = vadd.f32 %v854_v28, %v582_v24  ;;  %v796_v31 = vpop.f32.mrf.mxu0  ;;  %v816_v32 = vpop.f32.mrf.mxu1 }
 0x11f   : > { %v872_v33 = vadd.f32 %v796_v31, %v559_v25  ;;  %v880_v34 = vadd.f32 %v816_v32, %v567_v26 }
 0x120   : > { %919 = vst [vmem:[#allocation2 + $0x40] sm:$0xff] %v887_v29 }
 0x121   : > { %927 = vst [vmem:[#allocation2 + $0x10] sm:$0xff] %v895_v30 }
 0x122   : > { %904 = vst [vmem:[#allocation2 + $0x18] sm:$0xff] %v872_v33 }
 0x123   : > { %912 = vst [vmem:[#allocation2 + $0xb8] sm:$0xff] %v880_v34 }
 0x125   : > { %v836_v39 = vpop.f32.mrf.mxu2  ;;  %v856_v40 = vpop.f32.mrf.mxu3 }
 0x126   : > { %v888_v41 = vadd.f32 %v836_v39, %v575_v35  ;;  %v896_v42 = vadd.f32 %v856_v40, %v583_v36  ;;  %v799_v43 = vpop.f32.mrf.mxu0  ;;  %v819_v44 = vpop.f32.mrf.mxu1 }
 0x127   : > { %v873_v45 = vadd.f32 %v799_v43, %v560_v37  ;;  %v881_v46 = vadd.f32 %v819_v44, %v568_v38 }
 0x128   : > { %920 = vst [vmem:[#allocation2 + $0xc8] sm:$0xff] %v888_v41 }
 0x129   : > { %928 = vst [vmem:[#allocation2 + $0x28] sm:$0xff] %v896_v42 }
 0x12a   : > { %905 = vst [vmem:[#allocation2 + $0x50] sm:$0xff] %v873_v45 }
 0x12b   : > { %913 = vst [vmem:[#allocation2 + $0x60] sm:$0xff] %v881_v46 }
 0x12d   : > { %v839_v51 = vpop.f32.mrf.mxu2  ;;  %v859_v52 = vpop.f32.mrf.mxu3 }
 0x12e   : > { %v889_v53 = vadd.f32 %v839_v51, %v576_v47  ;;  %v897_v54 = vadd.f32 %v859_v52, %v584_v48  ;;  %v801_v55 = vpop.f32.mrf.mxu0  ;;  %v821_v56 = vpop.f32.mrf.mxu1 }
 0x12f   : > { %v874_v57 = vadd.f32 %v801_v55, %v561_v49  ;;  %v882_v58 = vadd.f32 %v821_v56, %v569_v50 }
 0x130   : > { %921 = vst [vmem:[#allocation2 + $0xe0] sm:$0xff] %v889_v53 }
 0x131   : > { %929 = vst [vmem:[#allocation2 + $0xa0] sm:$0xff] %v897_v54 }
 0x132   : > { %906 = vst [vmem:[#allocation2 + $0x68] sm:$0xff] %v874_v57 }
 0x133   : > { %914 = vst [vmem:[#allocation2 + $0xf0] sm:$0xff] %v882_v58 }
 0x135   : > { %v841_v63 = vpop.f32.mrf.mxu2  ;;  %v861_v0 = vpop.f32.mrf.mxu3 }
 0x136   : > { %v890_v1 = vadd.f32 %v841_v63, %v577_v59  ;;  %v898_v2 = vadd.f32 %v861_v0, %v585_v60  ;;  %v804_v3 = vpop.f32.mrf.mxu0  ;;  %v824_v4 = vpop.f32.mrf.mxu1 }
 0x137   : > { %v875_v5 = vadd.f32 %v804_v3, %v562_v61  ;;  %v883_v6 = vadd.f32 %v824_v4, %v570_v62 }
 0x138   : > { %922 = vst [vmem:[#allocation2 + $0x90] sm:$0xff] %v890_v1 }
 0x139   : > { %930 = vst [vmem:[#allocation2 + $0xf8] sm:$0xff] %v898_v2 }
 0x13a   : > { %907 = vst [vmem:[#allocation2 + $0x30] sm:$0xff] %v875_v5 }
 0x13b   : > { %915 = vst [vmem:[#allocation2 + $0x8] sm:$0xff] %v883_v6 }
 0x13d   : > { %v844_v11 = vpop.f32.mrf.mxu2  ;;  %v864_v12 = vpop.f32.mrf.mxu3 }
 0x13e   : > { %v891_v13 = vadd.f32 %v844_v11, %v578_v7  ;;  %v899_v14 = vadd.f32 %v864_v12, %v586_v8  ;;  %v806_v15 = vpop.f32.mrf.mxu0  ;;  %v826_v16 = vpop.f32.mrf.mxu1 }
 0x13f   : > { %v876_v17 = vadd.f32 %v806_v15, %v563_v9  ;;  %v884_v18 = vadd.f32 %v826_v16, %v571_v10 }
 0x140   : > { %923 = vst [vmem:[#allocation2 + $0x70] sm:$0xff] %v891_v13 }
 0x141   : > { %931 = vst [vmem:[#allocation2 + $0x20] sm:$0xff] %v899_v14 }
 0x142   : > { %908 = vst [vmem:[#allocation2 + $0x48] sm:$0xff] %v876_v17 }
 0x143   : > { %916 = vst [vmem:[#allocation2 + $0x78] sm:$0xff] %v884_v18 }
 0x145   : > { %v846_v21 = vpop.f32.mrf.mxu2  ;;  %v866_v22 = vpop.f32.mrf.mxu3  ;;  %936 = sbr.rel (%p1427_p13) target bundleno = 371 (0x173), region = 89 }
 0x146   : > { %v892_v23 = vadd.f32 %v846_v21, %v579_v19  ;;  %v900_v24 = vadd.f32 %v866_v22, %v587_v20 }
 0x148   : > { %924 = vst [vmem:[#allocation2 + $0xc0] sm:$0xff] %v892_v23 }
 0x149   : > { %932 = vst [vmem:[#allocation2 + $0x98] sm:$0xff] %v900_v24 }
 0x14a   : > { %v937_v25 = vld [vmem:[#allocation2 + $0xb0] sm:$0xff]  ;;  %v1804_v26 = vld [vmem:[%s1962_s2] ss:$0 sm:$0xff]  ;;  %v939_v30 = vld [vmem:[#allocation2 + $0xd8] sm:$0xff] }
 0x14b   : > { %v1809_v27 = vld [vmem:[%s1963_s3] ss:$0 sm:$0xff]  ;;  %v973_v28 = vmul.f32 %v1804_v26, %v937_v25  ;;  %v1042_v33 = vld [vmem:[%s1766_s12 + $0x8] sm:$0xff]  ;;  %v975_v34 = vmul.f32 %v1804_v26, %v939_v30  ;;  %v940_v35 = vld [vmem:[#allocation2 + $0x18] sm:$0xff] }
 0x14c   : > { %v938_v29 = vld [vmem:[#allocation2] sm:$0xff]  ;;  %v1043_v37 = vld [vmem:[%s1766_s12 + $0x10] sm:$0xff]  ;;  %v976_v38 = vmul.f32 %v1804_v26, %v940_v35  ;;  %v942_v40 = vld [vmem:[#allocation2 + $0x68] sm:$0xff] }
 0x14d   : > { %v1041_v31 = vld [vmem:[%s1766_s12] sm:$0xff]  ;;  %v974_v32 = vmul.f32 %v1804_v26, %v938_v29  ;;  %v1009_v36 = vadd.f32 %v1809_v27, %v973_v28  ;;  %v941_v39 = vld [vmem:[#allocation2 + $0x50] sm:$0xff]  ;;  %v1011_v42 = vadd.f32 %v1809_v27, %v975_v34  ;;  %v1044_v43 = vld [vmem:[%s1766_s12 + $0x18] sm:$0xff]  ;;  %v978_v45 = vmul.f32 %v1804_v26, %v942_v40 }
 0x14e   : > { %v977_v44 = vmul.f32 %v1804_v26, %v941_v39  ;;  %v943_v46 = vld [vmem:[#allocation2 + $0x30] sm:$0xff]  ;;  %v1012_v48 = vadd.f32 %v1809_v27, %v976_v38  ;;  %v1045_v49 = vld [vmem:[%s1766_s12 + $0x20] sm:$0xff]  ;;  %v1046_v50 = vld [vmem:[%s1766_s12 + $0x28] sm:$0xff] }
 0x14f   : > { %v1010_v41 = vadd.f32 %v1809_v27, %v974_v32  ;;  %v1073_v47 = vadd.f32 %v1041_v31, %v1009_v36  ;;  %v979_v51 = vmul.f32 %v1804_v26, %v943_v46  ;;  %v944_v52 = vld [vmem:[#allocation2 + $0x48] sm:$0xff]  ;;  %v1075_v54 = vadd.f32 %v1043_v37, %v1011_v42  ;;  %v1047_v57 = vld [vmem:[%s1766_s12 + $0x30] sm:$0xff]  ;;  %v945_v58 = vld [vmem:[#allocation2 + $0x80] sm:$0xff] }
 0x150   : > { %v1013_v55 = vadd.f32 %v1809_v27, %v977_v44  ;;  %v1014_v56 = vadd.f32 %v1809_v27, %v978_v45  ;;  %v1076_v60 = vadd.f32 %v1044_v43, %v1012_v48  ;;  %v980_v62 = vmul.f32 %v1804_v26, %v944_v52  ;;  %v946_v63 = vld [vmem:[#allocation2 + $0x88] sm:$0xff]  ;;  %v1048_v5 = vld [vmem:[%s1766_s12 + $0x38] sm:$0xff]  ;;  %v949_v11 = vld [vmem:[#allocation2 + $0x60] sm:$0xff] }
 0x151   : > { %v1074_v53 = vadd.f32 %v1042_v33, %v1010_v41  ;;  %v1105_v59 = vmax.f32 %v1073_v47, 0.0  ;;  %v1015_v61 = vadd.f32 %v1809_v27, %v979_v51  ;;  %v947_v0 = vld [vmem:[#allocation2 + $0xe8] sm:$0xff]  ;;  %v1107_v2 = vmax.f32 %v1075_v54, 0.0  ;;  %v948_v6 = vld [vmem:[#allocation2 + $0xb8] sm:$0xff]  ;;  %v950_v12 = vld [vmem:[#allocation2 + $0xf0] sm:$0xff] }
 0x152   : > { %v1077_v3 = vadd.f32 %v1045_v49, %v1013_v55  ;;  %v1078_v4 = vadd.f32 %v1046_v50, %v1014_v56  ;;  %v1108_v7 = vmax.f32 %v1076_v60, 0.0  ;;  %v1016_v9 = vadd.f32 %v1809_v27, %v980_v62  ;;  %v1049_v15 = vld [vmem:[%s1766_s12 + $0x40] sm:$0xff]  ;;  %v951_v18 = vld [vmem:[#allocation2 + $0x8] sm:$0xff]  ;;  %v1051_v23 = vld [vmem:[%s1766_s12 + $0x50] sm:$0xff] }
 0x153   : > { %v1106_v1 = vmax.f32 %v1074_v53, 0.0  ;;  %1137 = vst [vmem:[%s1771_s14] sm:$0xff] %v1105_v59  ;;  %v1079_v8 = vadd.f32 %v1047_v57, %v1015_v61  ;;  %v981_v10 = vmul.f32 %v1804_v26, %v945_v58  ;;  %v982_v16 = vmul.f32 %v1804_v26, %v946_v63  ;;  %v1050_v22 = vld [vmem:[%s1766_s12 + $0x48] sm:$0xff]  ;;  %v1052_v29 = vld [vmem:[%s1766_s12 + $0x58] sm:$0xff]  ;;  %v1053_v36 = vld [vmem:[%s1766_s12 + $0x60] sm:$0xff] }
 0x154   : > { %v1109_v13 = vmax.f32 %v1077_v3, 0.0  ;;  %v1110_v14 = vmax.f32 %v1078_v4, 0.0  ;;  %v983_v17 = vmul.f32 %v1804_v26, %v947_v0  ;;  %1139 = vst [vmem:[%s1771_s14 + $0x10] sm:$0xff] %v1107_v2  ;;  %v1080_v20 = vadd.f32 %v1048_v5, %v1016_v9  ;;  %v952_v32 = vld [vmem:[#allocation2 + $0x78] sm:$0xff]  ;;  %v1054_v37 = vld [vmem:[%s1766_s12 + $0x68] sm:$0xff]  ;;  %v1055_v43 = vld [vmem:[%s1766_s12 + $0x70] sm:$0xff] }
 0x155   : > { %1138 = vst [vmem:[%s1771_s14 + $0x8] sm:$0xff] %v1106_v1  ;;  %v1111_v19 = vmax.f32 %v1079_v8, 0.0  ;;  %v1017_v21 = vadd.f32 %v1809_v27, %v981_v10  ;;  %v984_v24 = vmul.f32 %v1804_v26, %v948_v6  ;;  %v1018_v25 = vadd.f32 %v1809_v27, %v982_v16  ;;  %v953_v44 = vld [vmem:[#allocation2 + $0x38] sm:$0xff]  ;;  %v955_v50 = vld [vmem:[#allocation2 + $0x40] sm:$0xff]  ;;  %v956_v56 = vld [vmem:[#allocation2 + $0xc8] sm:$0xff] }
 0x156   : > { %1140 = vst [vmem:[%s1771_s14 + $0x18] sm:$0xff] %v1108_v7  ;;  %v1019_v28 = vadd.f32 %v1809_v27, %v983_v17  ;;  %v985_v30 = vmul.f32 %v1804_v26, %v949_v11  ;;  %v986_v31 = vmul.f32 %v1804_v26, %v950_v12  ;;  %v1112_v33 = vmax.f32 %v1080_v20, 0.0  ;;  %v954_v49 = vld [vmem:[#allocation2 + $0x58] sm:$0xff]  ;;  %v957_v61 = vld [vmem:[#allocation2 + $0xe0] sm:$0xff]  ;;  %v958_v62 = vld [vmem:[#allocation2 + $0x90] sm:$0xff] }
 0x157   : > { %1141 = vst [vmem:[%s1771_s14 + $0x20] sm:$0xff] %v1109_v13  ;;  %v1081_v34 = vadd.f32 %v1049_v15, %v1017_v21  ;;  %v1020_v35 = vadd.f32 %v1809_v27, %v984_v24  ;;  %v987_v38 = vmul.f32 %v1804_v26, %v951_v18  ;;  %v1082_v39 = vadd.f32 %v1050_v22, %v1018_v25  ;;  %v1056_v55 = vld [vmem:[%s1766_s12 + $0x78] sm:$0xff]  ;;  %v1057_v1 = vld [vmem:[%s1766_s12 + $0x80] sm:$0xff]  ;;  %v959_v4 = vld [vmem:[#allocation2 + $0x70] sm:$0xff] }
 0x158   : > { %1142 = vst [vmem:[%s1771_s14 + $0x28] sm:$0xff] %v1110_v14  ;;  %v1083_v40 = vadd.f32 %v1051_v23, %v1019_v28  ;;  %v1021_v41 = vadd.f32 %v1809_v27, %v985_v30  ;;  %v1022_v42 = vadd.f32 %v1809_v27, %v986_v31  ;;  %v988_v48 = vmul.f32 %v1804_v26, %v952_v32  ;;  %v1058_v8 = vld [vmem:[%s1766_s12 + $0x88] sm:$0xff]  ;;  %v1059_v9 = vld [vmem:[%s1766_s12 + $0x90] sm:$0xff]  ;;  %v1060_v13 = vld [vmem:[%s1766_s12 + $0x98] sm:$0xff] }
 0x159   : > { %1143 = vst [vmem:[%s1771_s14 + $0x30] sm:$0xff] %v1111_v19  ;;  %v1113_v45 = vmax.f32 %v1081_v34, 0.0  ;;  %v1084_v46 = vadd.f32 %v1052_v29, %v1020_v35  ;;  %v1023_v47 = vadd.f32 %v1809_v27, %v987_v38  ;;  %v1114_v51 = vmax.f32 %v1082_v39, 0.0  ;;  %v960_v16 = vld [vmem:[#allocation2 + $0xc0] sm:$0xff]  ;;  %v1062_v21 = vld [vmem:[%s1766_s12 + $0xa8] sm:$0xff]  ;;  %v1063_v29 = vld [vmem:[%s1766_s12 + $0xb0] sm:$0xff] }
 0x15a   : > { %1144 = vst [vmem:[%s1771_s14 + $0x38] sm:$0xff] %v1112_v33  ;;  %v1115_v52 = vmax.f32 %v1083_v40, 0.0  ;;  %v1085_v53 = vadd.f32 %v1053_v36, %v1021_v41  ;;  %v1086_v54 = vadd.f32 %v1054_v37, %v1022_v42  ;;  %v1024_v59 = vadd.f32 %v1809_v27, %v988_v48  ;;  %v1061_v20 = vld [vmem:[%s1766_s12 + $0xa0] sm:$0xff]  ;;  %v961_v30 = vld [vmem:[#allocation2 + $0xa8] sm:$0xff]  ;;  %v962_v35 = vld [vmem:[#allocation2 + $0xd0] sm:$0xff] }
 0x15b   : > { %1145 = vst [vmem:[%s1771_s14 + $0x40] sm:$0xff] %v1113_v45  ;;  %v1116_v57 = vmax.f32 %v1084_v46, 0.0  ;;  %v1087_v58 = vadd.f32 %v1055_v43, %v1023_v47  ;;  %v989_v60 = vmul.f32 %v1804_v26, %v953_v44  ;;  %v990_v2 = vmul.f32 %v1804_v26, %v954_v49  ;;  %v963_v36 = vld [vmem:[#allocation2 + $0x10] sm:$0xff]  ;;  %v1064_v41 = vld [vmem:[%s1766_s12 + $0xb8] sm:$0xff]  ;;  %v964_v42 = vld [vmem:[#allocation2 + $0x28] sm:$0xff] }
 0x15c   : > { %1146 = vst [vmem:[%s1771_s14 + $0x48] sm:$0xff] %v1114_v51  ;;  %v1117_v63 = vmax.f32 %v1085_v53, 0.0  ;;  %v1118_v0 = vmax.f32 %v1086_v54, 0.0  ;;  %v991_v3 = vmul.f32 %v1804_v26, %v955_v50  ;;  %v1088_v6 = vadd.f32 %v1056_v55, %v1024_v59  ;;  %v965_v47 = vld [vmem:[#allocation2 + $0xa0] sm:$0xff]  ;;  %v966_v48 = vld [vmem:[#allocation2 + $0xf8] sm:$0xff]  ;;  %v1067_v59 = vld [vmem:[%s1766_s12 + $0xd0] sm:$0xff] }
 0x15d   : > { %1147 = vst [vmem:[%s1771_s14 + $0x50] sm:$0xff] %v1115_v52  ;;  %v1119_v5 = vmax.f32 %v1087_v58, 0.0  ;;  %v1025_v7 = vadd.f32 %v1809_v27, %v989_v60  ;;  %v992_v10 = vmul.f32 %v1804_v26, %v956_v56  ;;  %v1026_v11 = vadd.f32 %v1809_v27, %v990_v2  ;;  %v1065_v51 = vld [vmem:[%s1766_s12 + $0xc0] sm:$0xff]  ;;  %v1066_v58 = vld [vmem:[%s1766_s12 + $0xc8] sm:$0xff]  ;;  %v968_v2 = vld [vmem:[#allocation2 + $0x98] sm:$0xff] }
 0x15e   : > { %1148 = vst [vmem:[%s1771_s14 + $0x58] sm:$0xff] %v1116_v57  ;;  %v1027_v12 = vadd.f32 %v1809_v27, %v991_v3  ;;  %v993_v14 = vmul.f32 %v1804_v26, %v957_v61  ;;  %v994_v15 = vmul.f32 %v1804_v26, %v958_v62  ;;  %v1120_v17 = vmax.f32 %v1088_v6, 0.0  ;;  %v967_v54 = vld [vmem:[#allocation2 + $0x20] sm:$0xff] }
 0x15f   : > { %1149 = vst [vmem:[%s1771_s14 + $0x60] sm:$0xff] %v1117_v63  ;;  %v1089_v18 = vadd.f32 %v1057_v1, %v1025_v7  ;;  %v1028_v19 = vadd.f32 %v1809_v27, %v992_v10  ;;  %v995_v22 = vmul.f32 %v1804_v26, %v959_v4  ;;  %v1090_v23 = vadd.f32 %v1058_v8, %v1026_v11  ;;  %v1068_v63 = vld [vmem:[%s1766_s12 + $0xd8] sm:$0xff]  ;;  %v1069_v6 = vld [vmem:[%s1766_s12 + $0xe0] sm:$0xff]  ;;  %v1070_v7 = vld [vmem:[%s1766_s12 + $0xe8] sm:$0xff] }
 0x160   : > { %1150 = vst [vmem:[%s1771_s14 + $0x68] sm:$0xff] %v1118_v0  ;;  %v1091_v24 = vadd.f32 %v1059_v9, %v1027_v12  ;;  %v1029_v25 = vadd.f32 %v1809_v27, %v993_v14  ;;  %v1030_v28 = vadd.f32 %v1809_v27, %v994_v15  ;;  %v996_v34 = vmul.f32 %v1804_v26, %v960_v16 }
 0x161   : > { %1151 = vst [vmem:[%s1771_s14 + $0x70] sm:$0xff] %v1119_v5  ;;  %v1121_v31 = vmax.f32 %v1089_v18, 0.0  ;;  %v1092_v32 = vadd.f32 %v1060_v13, %v1028_v19  ;;  %v1031_v33 = vadd.f32 %v1809_v27, %v995_v22  ;;  %v1122_v37 = vmax.f32 %v1090_v23, 0.0  ;;  %v1071_v13 = vld [vmem:[%s1766_s12 + $0xf0] sm:$0xff]  ;;  %v1072_v22 = vld [vmem:[%s1766_s12 + $0xf8] sm:$0xff] }
 0x162   : > { %1152 = vst [vmem:[%s1771_s14 + $0x78] sm:$0xff] %v1120_v17  ;;  %v1123_v38 = vmax.f32 %v1091_v24, 0.0  ;;  %v1093_v39 = vadd.f32 %v1061_v20, %v1029_v25  ;;  %v1094_v40 = vadd.f32 %v1062_v21, %v1030_v28  ;;  %v1032_v45 = vadd.f32 %v1809_v27, %v996_v34 }
 0x163   : > { %1153 = vst [vmem:[%s1771_s14 + $0x80] sm:$0xff] %v1121_v31  ;;  %v1124_v43 = vmax.f32 %v1092_v32, 0.0  ;;  %v1095_v44 = vadd.f32 %v1063_v29, %v1031_v33  ;;  %v997_v46 = vmul.f32 %v1804_v26, %v961_v30  ;;  %v998_v52 = vmul.f32 %v1804_v26, %v962_v35 }
 0x164   : > { %1154 = vst [vmem:[%s1771_s14 + $0x88] sm:$0xff] %v1122_v37  ;;  %v1125_v49 = vmax.f32 %v1093_v39, 0.0  ;;  %v1126_v50 = vmax.f32 %v1094_v40, 0.0  ;;  %v999_v53 = vmul.f32 %v1804_v26, %v963_v36  ;;  %v1096_v56 = vadd.f32 %v1064_v41, %v1032_v45 }
 0x165   : > { %1155 = vst [vmem:[%s1771_s14 + $0x90] sm:$0xff] %v1123_v38  ;;  %v1127_v55 = vmax.f32 %v1095_v44, 0.0  ;;  %v1033_v57 = vadd.f32 %v1809_v27, %v997_v46  ;;  %v1000_v60 = vmul.f32 %v1804_v26, %v964_v42  ;;  %v1034_v61 = vadd.f32 %v1809_v27, %v998_v52 }
 0x166   : > { %1156 = vst [vmem:[%s1771_s14 + $0x98] sm:$0xff] %v1124_v43  ;;  %v1035_v62 = vadd.f32 %v1809_v27, %v999_v53  ;;  %v1001_v0 = vmul.f32 %v1804_v26, %v965_v47  ;;  %v1002_v1 = vmul.f32 %v1804_v26, %v966_v48  ;;  %v1128_v3 = vmax.f32 %v1096_v56, 0.0 }
 0x167   : > { %1157 = vst [vmem:[%s1771_s14 + $0xa0] sm:$0xff] %v1125_v49  ;;  %v1097_v4 = vadd.f32 %v1065_v51, %v1033_v57  ;;  %v1036_v5 = vadd.f32 %v1809_v27, %v1000_v60  ;;  %v1003_v8 = vmul.f32 %v1804_v26, %v967_v54  ;;  %v1098_v9 = vadd.f32 %v1066_v58, %v1034_v61 }
 0x168   : > { %1158 = vst [vmem:[%s1771_s14 + $0xa8] sm:$0xff] %v1126_v50  ;;  %v1099_v10 = vadd.f32 %v1067_v59, %v1035_v62  ;;  %v1037_v11 = vadd.f32 %v1809_v27, %v1001_v0  ;;  %v1038_v12 = vadd.f32 %v1809_v27, %v1002_v1  ;;  %v1004_v17 = vmul.f32 %v1804_v26, %v968_v2 }
 0x169   : > { %1159 = vst [vmem:[%s1771_s14 + $0xb0] sm:$0xff] %v1127_v55  ;;  %v1129_v14 = vmax.f32 %v1097_v4, 0.0  ;;  %v1100_v15 = vadd.f32 %v1068_v63, %v1036_v5  ;;  %v1039_v16 = vadd.f32 %v1809_v27, %v1003_v8  ;;  %v1130_v18 = vmax.f32 %v1098_v9, 0.0 }
 0x16a   : > { %1160 = vst [vmem:[%s1771_s14 + $0xb8] sm:$0xff] %v1128_v3  ;;  %v1131_v19 = vmax.f32 %v1099_v10, 0.0  ;;  %v1101_v20 = vadd.f32 %v1069_v6, %v1037_v11  ;;  %v1102_v21 = vadd.f32 %v1070_v7, %v1038_v12  ;;  %v1040_v25 = vadd.f32 %v1809_v27, %v1004_v17 }
 0x16b   : > { %1161 = vst [vmem:[%s1771_s14 + $0xc0] sm:$0xff] %v1129_v14  ;;  %v1132_v23 = vmax.f32 %v1100_v15, 0.0  ;;  %v1103_v24 = vadd.f32 %v1071_v13, %v1039_v16 }
 0x16c   : > { %1162 = vst [vmem:[%s1771_s14 + $0xc8] sm:$0xff] %v1130_v18  ;;  %v1133_v28 = vmax.f32 %v1101_v20, 0.0  ;;  %v1134_v29 = vmax.f32 %v1102_v21, 0.0  ;;  %v1104_v30 = vadd.f32 %v1072_v22, %v1040_v25 }
 0x16d   : > { %1163 = vst [vmem:[%s1771_s14 + $0xd0] sm:$0xff] %v1131_v19  ;;  %v1135_v26 = vmax.f32 %v1103_v24, 0.0 }
 0x16e   : > { %1164 = vst [vmem:[%s1771_s14 + $0xd8] sm:$0xff] %v1132_v23  ;;  %v1136_v31 = vmax.f32 %v1104_v30, 0.0 }
 0x16f   : > { %1165 = vst [vmem:[%s1771_s14 + $0xe0] sm:$0xff] %v1133_v28 }
 0x170   : > { %1166 = vst [vmem:[%s1771_s14 + $0xe8] sm:$0xff] %v1134_v29 }
 0x171   : > { %1167 = vst [vmem:[%s1771_s14 + $0xf0] sm:$0xff] %v1135_v26 }
 0x172   : > { %1168 = vst [vmem:[%s1771_s14 + $0xf8] sm:$0xff] %v1136_v31 }
 0x173 PF: > { %s15_s24 = sadd.s32 1, %s1592_s24   ;;  %s1966_s18 = smov %s1572_s19 }
 0x174   : > { %p12_p0 = scmp.ge.s32.totalorder %s15_s24, 12   ;;  %s1967_s19 = smov %s1676_s6 }
 0x175   : > { %s1968_s20 = smov %s1584_s22  ;;  %s1969_s21 = smov %s1588_s23 }
 0x176   : > { %s1970_s22 = smov %s1973_s25  ;;  %s1971_s23 = smov %s1977_s26 }
 0x177   :  { %14 = sbr.rel (!%p12_p0) target bundleno = 4 (0x4), region = 136 }

// kernel: _lambda_.17
= control target key start
LH: loop header
LB: loop body
LE: loop exit
PB: predicated region body
PF: predicated region fallthrough
CT: control target
= control target key end

     0   :  { %s1085_s15 = smov 0   ;;  %s1087_s16 = smov 0   ;;  %s1262_s0 = inlined_call_operand.vmem [shape: bf16[128,640], index: 0, kind: input, shape index: {}]   ;;  %s1263_s1 = inlined_call_operand.vmem [shape: bf16[640,128], index: 1, kind: input, shape index: {}]   ;;  %s1264_s2 = inlined_call_operand.vmem [shape: f32[1,128], index: 2, kind: input, shape index: {}]   ;;  %s1265_s3 = inlined_call_operand.vmem [shape: f32[1,128], index: 3, kind: input, shape index: {}]   ;;  %s1266_s4 = inlined_call_operand.vmem [shape: f32[128,128], index: 4, kind: output, shape index: {}]  }
   0x1   :  { %s1089_s17 = smov 0   ;;  %s1091_s18 = smov 0  }
   0x2   :  { %s1093_s19 = smov 0  }
   0x3 LB: > { %s26_s20 = sadd.s32 1, %s1053_s18  ;;  %p49_p1 = scmp.ne.s32.totalorder %s1045_s16, %s1041_s15  ;;  %s1057_s19 = sphi %s1093_s19, %s14_s19   ;;  %s1053_s18 = sphi %s1091_s18, %s1270_s18   ;;  %s1049_s17 = sphi %s1089_s17, %s1269_s17   ;;  %s1045_s16 = sphi %s1087_s16, %s1268_s16   ;;  %s1041_s15 = sphi %s1085_s15, %s1267_s15  }
   0x4   : > { %p27_p0 = scmp.ge.s32.totalorder %s26_s20, 5  ;;  %p50_p2 = scmp.eq.s32.totalorder %s1057_s19, 0 }
   0x5   : > { %s42_s22 = sadd.s32 1, %s1045_s16  ;;  %p859_p5 = scmp.ge.s32.totalorder %s1057_s19, 5 }
   0x6   : > { %s1272_s20 = smov (%p27_p0, %s26_s20), 0  ;;  %p51_p3 = por %p50_p2, %p49_p1 }
   0x7   : > { %s38_s21 = ssub.s32 %s1053_s18, %s1272_s20  ;;  %195 = sbr.rel (%p859_p5) target bundleno = 32 (0x20), region = 24 }
   0x8   : > { %p40_p4 = scmp.eq.s32.totalorder %s38_s21, 0 }
   0xa   : > { %s1120_s23 = scalar_select %p40_p4, %s1045_s16, %s42_s22  }
   0xc   : > { %198 = sbr.rel (!%p51_p3) target bundleno = 32 (0x20), region = 28  ;;  %s200_s24 = sand.u32 (%p51_p3), 1, %s1045_s16  }
   0xd   : > { %s861_s25 = sshll.u32 (%p51_p3), %s1053_s18, 2  ;;  %s860_s26 = sshll.u32 (%p51_p3), %s200_s24, 6 }
   0xe   : > { %s1128_s29 = scalar_lea.vmem (%p51_p3), %s1262_s0, %s861_s25  ;;  %s202_s30 = scalar_lea.vmem (%p51_p3), [#allocation3], %s860_s26 }
   0xf   : > { %v224_v0 = vld [vmem:[%s1128_s29] sm:$0xf] (%p51_p3)  ;;  %v226_v1 = vld [vmem:[%s1128_s29 + $0x14] sm:$0xf] (%p51_p3)  ;;  %v228_v2 = vld [vmem:[%s1128_s29 + $0x28] sm:$0xf] (%p51_p3) }
  0x10   : > { %225 = vst [vmem:[%s202_s30] sm:$0xf] (%p51_p3), %v224_v0  ;;  %v230_v3 = vld [vmem:[%s1128_s29 + $0x3c] sm:$0xf] (%p51_p3)  ;;  %v232_v4 = vld [vmem:[%s1128_s29 + $0x50] sm:$0xf] (%p51_p3) }
  0x11   : > { %227 = vst [vmem:[%s202_s30 + $0x4] sm:$0xf] %v226_v1  ;;  %v234_v5 = vld [vmem:[%s1128_s29 + $0x64] sm:$0xf]  ;;  %v236_v6 = vld [vmem:[%s1128_s29 + $0x78] sm:$0xf] }
  0x12   : > { %229 = vst [vmem:[%s202_s30 + $0x8] sm:$0xf] %v228_v2  ;;  %v238_v7 = vld [vmem:[%s1128_s29 + $0x8c] sm:$0xf]  ;;  %v240_v8 = vld [vmem:[%s1128_s29 + $0xa0] sm:$0xf] }
  0x13   : > { %231 = vst [vmem:[%s202_s30 + $0xc] sm:$0xf] %v230_v3  ;;  %v242_v9 = vld [vmem:[%s1128_s29 + $0xb4] sm:$0xf]  ;;  %v244_v10 = vld [vmem:[%s1128_s29 + $0xc8] sm:$0xf] }
  0x14   : > { %233 = vst [vmem:[%s202_s30 + $0x10] sm:$0xf] %v232_v4  ;;  %v246_v11 = vld [vmem:[%s1128_s29 + $0xdc] sm:$0xf]  ;;  %v248_v12 = vld [vmem:[%s1128_s29 + $0xf0] sm:$0xf] }
  0x15   : > { %235 = vst [vmem:[%s202_s30 + $0x14] sm:$0xf] %v234_v5  ;;  %v250_v13 = vld [vmem:[%s1128_s29 + $0x104] sm:$0xf]  ;;  %v252_v14 = vld [vmem:[%s1128_s29 + $0x118] sm:$0xf] }
  0x16   : > { %237 = vst [vmem:[%s202_s30 + $0x18] sm:$0xf] %v236_v6  ;;  %v254_v15 = vld [vmem:[%s1128_s29 + $0x12c] sm:$0xf] }
  0x17   : > { %239 = vst [vmem:[%s202_s30 + $0x1c] sm:$0xf] %v238_v7 }
  0x18   : > { %241 = vst [vmem:[%s202_s30 + $0x20] sm:$0xf] %v240_v8 }
  0x19   : > { %243 = vst [vmem:[%s202_s30 + $0x24] sm:$0xf] %v242_v9 }
  0x1a   : > { %245 = vst [vmem:[%s202_s30 + $0x28] sm:$0xf] %v244_v10 }
  0x1b   : > { %247 = vst [vmem:[%s202_s30 + $0x2c] sm:$0xf] %v246_v11 }
  0x1c   : > { %249 = vst [vmem:[%s202_s30 + $0x30] sm:$0xf] %v248_v12 }
  0x1d   : > { %251 = vst [vmem:[%s202_s30 + $0x34] sm:$0xf] %v250_v13 }
  0x1e   : > { %253 = vst [vmem:[%s202_s30 + $0x38] sm:$0xf] %v252_v14 }
  0x1f   : > { %255 = vst [vmem:[%s202_s30 + $0x3c] sm:$0xf] %v254_v15 }
  0x20 PF: > { %p862_p6 = scmp.ge.s32.totalorder %s1057_s19, 1  ;;  %p322_p7 = scmp.lt.s32.totalorder %s1057_s19, 6 }
  0x22   : > { %p323_p8 = pnand %p862_p6, %p322_p7 }
  0x23   : > { %s329_s5 = sand.u32 (!%p323_p8), 1, %s1041_s15   ;;  %s864_s6 = sshll.u32 (!%p323_p8), %s1049_s17, 4 }
  0x24   : > { %326 = sbr.rel (%p323_p8) target bundleno = 279 (0x117), region = 73  ;;  %s863_s7 = sshll.u32 (!%p323_p8), %s329_s5, 6 }
  0x25   : > { %p373_p9 = scmp.lt.s32.totalorder (!%p323_p8), %s864_s6, 79  ;;  %s1155_s12 = scalar_lea.vmem (!%p323_p8), [#allocation3], %s863_s7 }
  0x26   : > { %p866_p10 = scmp.ne.s32.totalorder (!%p323_p8), %s1049_s17, 0 }
  0x29   : > { %s1274_s6 = smov (!%p373_p9, %s864_s6), 79  ;;  %399 = sbr.rel (%p866_p10) target bundleno = 63 (0x3f), region = 81 }
  0x2a   : > { %s865_s8 = sshll.u32 %s1274_s6, 2 }
  0x2b   : > { %s1153_s11 = scalar_lea.vmem %s1263_s1, %s865_s8 }
  0x2e   : > { %v1059_v16 = vmov 0.0  }
  0x2f   : > { %400 = vst [vmem:[#allocation2 + $0x30] sm:$0xff] %v1059_v16 }
  0x30   : > { %401 = vst [vmem:[#allocation2] sm:$0xff] %v1059_v16 }
  0x31   : > { %402 = vst [vmem:[#allocation2 + $0x58] sm:$0xff] %v1059_v16 }
  0x32   : > { %403 = vst [vmem:[#allocation2 + $0x18] sm:$0xff] %v1059_v16 }
  0x33   : > { %404 = vst [vmem:[#allocation2 + $0x50] sm:$0xff] %v1059_v16 }
  0x34   : > { %405 = vst [vmem:[#allocation2 + $0x68] sm:$0xff] %v1059_v16 }
  0x35   : > { %406 = vst [vmem:[#allocation2 + $0x8] sm:$0xff] %v1059_v16 }
  0x36   : > { %407 = vst [vmem:[#allocation2 + $0x48] sm:$0xff] %v1059_v16 }
  0x37   : > { %408 = vst [vmem:[#allocation2 + $0x40] sm:$0xff] %v1059_v16 }
  0x38   : > { %409 = vst [vmem:[#allocation2 + $0x20] sm:$0xff] %v1059_v16 }
  0x39   : > { %410 = vst [vmem:[#allocation2 + $0x10] sm:$0xff] %v1059_v16 }
  0x3a   : > { %411 = vst [vmem:[#allocation2 + $0x38] sm:$0xff] %v1059_v16 }
  0x3b   : > { %412 = vst [vmem:[#allocation2 + $0x60] sm:$0xff] %v1059_v16 }
  0x3c   : > { %413 = vst [vmem:[#allocation2 + $0x70] sm:$0xff] %v1059_v16 }
  0x3d   : > { %414 = vst [vmem:[#allocation2 + $0x78] sm:$0xff] %v1059_v16 }
  0x3e   : > { %415 = vst [vmem:[#allocation2 + $0x28] sm:$0xff] %v1059_v16 }
  0x3f PF: > { %v951_v17 = vld [vmem:[%s1153_s11 + $0x38] sm:$0xff]  ;;  %v950_v18 = vld [vmem:[%s1153_s11 + $0x30] sm:$0xff]  ;;  %v949_v19 = vld [vmem:[%s1153_s11 + $0x28] sm:$0xff]  ;;  %p931_p11 = scmp.ne.s32.totalorder %s1049_s17, 4 }
  0x40   : > { %560 = vmatpush.bf16.msra.mxu0 %v951_v17  ;;  %952 = vmatpush.bf16.msra.mxu1 %v951_v17  ;;  %v948_v20 = vld [vmem:[%s1153_s11 + $0x20] sm:$0xff]  ;;  %v947_v21 = vld [vmem:[%s1153_s11 + $0x18] sm:$0xff]  ;;  %v946_v22 = vld [vmem:[%s1153_s11 + $0x10] sm:$0xff] }
  0x41   : > { %953 = vmatpush.bf16.msra.mxu2 %v951_v17  ;;  %954 = vmatpush.bf16.msra.mxu3 %v951_v17  ;;  %v945_v23 = vld [vmem:[%s1153_s11 + $0x8] sm:$0xff]  ;;  %v944_v24 = vld [vmem:[%s1153_s11] sm:$0xff]  ;;  %v938_v26 = vld [vmem:[%s1155_s12 + $0x10] sm:$0xff] }
  0x42   : > { %v936_v25 = vld [vmem:[%s1155_s12] sm:$0xff]  ;;  %v942_v28 = vld [vmem:[%s1155_s12 + $0x30] sm:$0xff]  ;;  %v937_v29 = vld [vmem:[%s1155_s12 + $0x8] sm:$0xff] }
  0x43   : > { %v940_v27 = vld [vmem:[%s1155_s12 + $0x20] sm:$0xff]  ;;  %v939_v30 = vld [vmem:[%s1155_s12 + $0x18] sm:$0xff]  ;;  %v941_v31 = vld [vmem:[%s1155_s12 + $0x28] sm:$0xff] }
  0x44   : > { %561 = vmatpush.bf16.msra.mxu0 %v950_v18  ;;  %955 = vmatpush.bf16.msra.mxu1 %v950_v18  ;;  %v943_v32 = vld [vmem:[%s1155_s12 + $0x38] sm:$0xff]  ;;  %v416_v33 = vld [vmem:[#allocation2 + $0x30] sm:$0xff]  ;;  %v424_v39 = vld [vmem:[#allocation2 + $0x40] sm:$0xff] }
  0x45   : > { %956 = vmatpush.bf16.msra.mxu2 %v950_v18  ;;  %957 = vmatpush.bf16.msra.mxu3 %v950_v18  ;;  %v420_v34 = vld [vmem:[#allocation2 + $0x50] sm:$0xff]  ;;  %v428_v40 = vld [vmem:[#allocation2 + $0x60] sm:$0xff]  ;;  %v421_v42 = vld [vmem:[#allocation2 + $0x68] sm:$0xff] }
  0x46   : > { %v417_v41 = vld [vmem:[#allocation2] sm:$0xff]  ;;  %v429_v52 = vld [vmem:[#allocation2 + $0x70] sm:$0xff]  ;;  %v418_v53 = vld [vmem:[#allocation2 + $0x58] sm:$0xff] }
  0x47   : > { %v425_v51 = vld [vmem:[#allocation2 + $0x20] sm:$0xff]  ;;  %v422_v54 = vld [vmem:[#allocation2 + $0x8] sm:$0xff]  ;;  %v426_v63 = vld [vmem:[#allocation2 + $0x10] sm:$0xff] }
  0x48   : > { %562 = vmatpush.bf16.msra.mxu0 %v949_v19  ;;  %958 = vmatpush.bf16.msra.mxu1 %v949_v19  ;;  %v430_v0 = vld [vmem:[#allocation2 + $0x78] sm:$0xff]  ;;  %v423_v2 = vld [vmem:[#allocation2 + $0x48] sm:$0xff] }
  0x49   : > { %959 = vmatpush.bf16.msra.mxu2 %v949_v19  ;;  %960 = vmatpush.bf16.msra.mxu3 %v949_v19  ;;  %v419_v1 = vld [vmem:[#allocation2 + $0x18] sm:$0xff]  ;;  %v431_v12 = vld [vmem:[#allocation2 + $0x28] sm:$0xff] }
  0x4a   : > { %v427_v11 = vld [vmem:[#allocation2 + $0x38] sm:$0xff] }
  0x4c   : > { %563 = vmatpush.bf16.msra.mxu0 %v948_v20  ;;  %961 = vmatpush.bf16.msra.mxu1 %v948_v20 }
  0x4d   : > { %962 = vmatpush.bf16.msra.mxu2 %v948_v20  ;;  %963 = vmatpush.bf16.msra.mxu3 %v948_v20 }
  0x50   : > { %564 = vmatpush.bf16.msra.mxu0 %v947_v21  ;;  %964 = vmatpush.bf16.msra.mxu1 %v947_v21 }
  0x51   : > { %965 = vmatpush.bf16.msra.mxu2 %v947_v21  ;;  %966 = vmatpush.bf16.msra.mxu3 %v947_v21 }
  0x54   : > { %565 = vmatpush.bf16.msra.mxu0 %v946_v22  ;;  %967 = vmatpush.bf16.msra.mxu1 %v946_v22 }
  0x55   : > { %968 = vmatpush.bf16.msra.mxu2 %v946_v22  ;;  %969 = vmatpush.bf16.msra.mxu3 %v946_v22 }
  0x58   : > { %566 = vmatpush.bf16.msra.mxu0 %v945_v23  ;;  %970 = vmatpush.bf16.msra.mxu1 %v945_v23 }
  0x59   : > { %971 = vmatpush.bf16.msra.mxu2 %v945_v23  ;;  %972 = vmatpush.bf16.msra.mxu3 %v945_v23 }
  0x5c   : > { %567 = vmatpush.bf16.msra.mxu0 %v944_v24  ;;  %973 = vmatpush.bf16.msra.mxu1 %v944_v24 }
  0x5d   : > { %974 = vmatpush.bf16.msra.mxu2 %v944_v24  ;;  %975 = vmatpush.bf16.msra.mxu3 %v944_v24 }
  0x5f   : > { %568 = vmatmul.bf16.vlgmr.msra.gmra.mxu0 %v936_v25  ;;  %578 = vmatmul.bf16.vlgmr.msra.gmra.mxu1 %v938_v26 }
  0x60   : > { %588 = vmatmul.bf16.vlgmr.msra.gmra.mxu2 %v940_v27  ;;  %598 = vmatmul.bf16.vlgmr.msra.gmra.mxu3 %v942_v28 }
  0x6f   : > { %573 = vmatmul.bf16.gmra.mxu0 %v937_v29  ;;  %583 = vmatmul.bf16.gmra.mxu1 %v939_v30 }
  0x70   : > { %593 = vmatmul.bf16.gmra.mxu2 %v941_v31  ;;  %603 = vmatmul.bf16.gmra.mxu3 %v943_v32 }
  0xdc   : > { %v569_v35 = vpop.f32.mrf.mxu0  ;;  %v579_v36 = vpop.f32.mrf.mxu1 }
  0xdd   : > { %v609_v37 = vadd.f32 %v569_v35, %v416_v33  ;;  %v613_v38 = vadd.f32 %v579_v36, %v420_v34 }
  0xdf   : > { %625 = vst [vmem:[#allocation2 + $0x30] sm:$0xff] %v609_v37 }
  0xe0   : > { %629 = vst [vmem:[#allocation2 + $0x50] sm:$0xff] %v613_v38 }
  0xe3   : > { %v589_v43 = vpop.f32.mrf.mxu2  ;;  %v599_v44 = vpop.f32.mrf.mxu3 }
  0xe4   : > { %v617_v45 = vadd.f32 %v589_v43, %v424_v39  ;;  %v621_v46 = vadd.f32 %v599_v44, %v428_v40  ;;  %v571_v47 = vpop.f32.mrf.mxu0  ;;  %v581_v48 = vpop.f32.mrf.mxu1 }
  0xe5   : > { %v610_v49 = vadd.f32 %v571_v47, %v417_v41  ;;  %v614_v50 = vadd.f32 %v581_v48, %v421_v42 }
  0xe6   : > { %633 = vst [vmem:[#allocation2 + $0x40] sm:$0xff] %v617_v45 }
  0xe7   : > { %637 = vst [vmem:[#allocation2 + $0x60] sm:$0xff] %v621_v46 }
  0xe8   : > { %626 = vst [vmem:[#allocation2] sm:$0xff] %v610_v49 }
  0xe9   : > { %630 = vst [vmem:[#allocation2 + $0x68] sm:$0xff] %v614_v50 }
  0xeb   : > { %v591_v55 = vpop.f32.mrf.mxu2  ;;  %v601_v56 = vpop.f32.mrf.mxu3 }
  0xec   : > { %v618_v57 = vadd.f32 %v591_v55, %v425_v51  ;;  %v622_v58 = vadd.f32 %v601_v56, %v429_v52  ;;  %v574_v59 = vpop.f32.mrf.mxu0  ;;  %v584_v60 = vpop.f32.mrf.mxu1 }
  0xed   : > { %v611_v61 = vadd.f32 %v574_v59, %v418_v53  ;;  %v615_v62 = vadd.f32 %v584_v60, %v422_v54 }
  0xee   : > { %634 = vst [vmem:[#allocation2 + $0x20] sm:$0xff] %v618_v57 }
  0xef   : > { %638 = vst [vmem:[#allocation2 + $0x70] sm:$0xff] %v622_v58 }
  0xf0   : > { %627 = vst [vmem:[#allocation2 + $0x58] sm:$0xff] %v611_v61 }
  0xf1   : > { %631 = vst [vmem:[#allocation2 + $0x8] sm:$0xff] %v615_v62 }
  0xf3   : > { %v594_v3 = vpop.f32.mrf.mxu2  ;;  %v604_v4 = vpop.f32.mrf.mxu3 }
  0xf4   : > { %v619_v5 = vadd.f32 %v594_v3, %v426_v63  ;;  %v623_v6 = vadd.f32 %v604_v4, %v430_v0  ;;  %v576_v7 = vpop.f32.mrf.mxu0  ;;  %v586_v8 = vpop.f32.mrf.mxu1 }
  0xf5   : > { %v612_v9 = vadd.f32 %v576_v7, %v419_v1  ;;  %v616_v10 = vadd.f32 %v586_v8, %v423_v2 }
  0xf6   : > { %635 = vst [vmem:[#allocation2 + $0x10] sm:$0xff] %v619_v5 }
  0xf7   : > { %639 = vst [vmem:[#allocation2 + $0x78] sm:$0xff] %v623_v6 }
  0xf8   : > { %628 = vst [vmem:[#allocation2 + $0x18] sm:$0xff] %v612_v9 }
  0xf9   : > { %632 = vst [vmem:[#allocation2 + $0x48] sm:$0xff] %v616_v10 }
  0xfb   : > { %v596_v13 = vpop.f32.mrf.mxu2  ;;  %v606_v14 = vpop.f32.mrf.mxu3  ;;  %644 = sbr.rel (%p931_p11) target bundleno = 279 (0x117), region = 85 }
  0xfc   : > { %v620_v15 = vadd.f32 %v596_v13, %v427_v11  ;;  %v624_v16 = vadd.f32 %v606_v14, %v431_v12 }
  0xfe   : > { %636 = vst [vmem:[#allocation2 + $0x38] sm:$0xff] %v620_v15 }
  0xff   : > { %640 = vst [vmem:[#allocation2 + $0x28] sm:$0xff] %v624_v16 }
 0x100   : > { %v645_v17 = vld [vmem:[#allocation2 + $0x30] sm:$0xff]  ;;  %v1017_v18 = vld [vmem:[%s1264_s2] ss:$0 sm:$0xff]  ;;  %v647_v23 = vld [vmem:[#allocation2 + $0x58] sm:$0xff] }
 0x101   : > { %v1181_v19 = vld [vmem:[%s1265_s3] ss:$0 sm:$0xff]  ;;  %v665_v21 = vmul.f32 %v1017_v18, %v645_v17  ;;  %v648_v24 = vld [vmem:[#allocation2 + $0x18] sm:$0xff]  ;;  %v649_v25 = vld [vmem:[#allocation2 + $0x50] sm:$0xff]  ;;  %v667_v26 = vmul.f32 %v1017_v18, %v647_v23 }
 0x102   : > { %v646_v20 = vld [vmem:[#allocation2] sm:$0xff]  ;;  %v668_v27 = vmul.f32 %v1017_v18, %v648_v24  ;;  %v669_v28 = vmul.f32 %v1017_v18, %v649_v25  ;;  %v650_v29 = vld [vmem:[#allocation2 + $0x68] sm:$0xff]  ;;  %v655_v46 = vld [vmem:[#allocation2 + $0x10] sm:$0xff] }
 0x103   : > { %v666_v22 = vmul.f32 %v1017_v18, %v646_v20  ;;  %v651_v30 = vld [vmem:[#allocation2 + $0x8] sm:$0xff]  ;;  %v685_v32 = vadd.f32 %v1181_v19, %v665_v21  ;;  %v670_v34 = vmul.f32 %v1017_v18, %v650_v29  ;;  %v687_v36 = vadd.f32 %v1181_v19, %v667_v26  ;;  %v653_v40 = vld [vmem:[#allocation2 + $0x40] sm:$0xff]  ;;  %v658_v52 = vld [vmem:[#allocation2 + $0x70] sm:$0xff] }
 0x104   : > { %v652_v31 = vld [vmem:[#allocation2 + $0x48] sm:$0xff]  ;;  %v671_v35 = vmul.f32 %v1017_v18, %v651_v30  ;;  %v688_v37 = vadd.f32 %v1181_v19, %v668_v27  ;;  %v689_v38 = vadd.f32 %v1181_v19, %v669_v28  ;;  %v654_v41 = vld [vmem:[#allocation2 + $0x20] sm:$0xff]  ;;  %v659_v53 = vld [vmem:[#allocation2 + $0x78] sm:$0xff]  ;;  %v673_v56 = vmul.f32 %v1017_v18, %v653_v40 }
 0x105   : > { %v686_v33 = vadd.f32 %v1181_v19, %v666_v22  ;;  %v672_v39 = vmul.f32 %v1017_v18, %v652_v31  ;;  %v701_v42 = vmax.f32 %v685_v32, 0.0  ;;  %v690_v44 = vadd.f32 %v1181_v19, %v670_v34  ;;  %v656_v47 = vld [vmem:[#allocation2 + $0x38] sm:$0xff]  ;;  %v657_v48 = vld [vmem:[#allocation2 + $0x60] sm:$0xff] }
 0x106   : > { %v691_v45 = vadd.f32 %v1181_v19, %v671_v35  ;;  %v703_v49 = vmax.f32 %v687_v36, 0.0  ;;  %v704_v50 = vmax.f32 %v688_v37, 0.0  ;;  %v705_v54 = vmax.f32 %v689_v38, 0.0  ;;  %v660_v58 = vld [vmem:[#allocation2 + $0x28] sm:$0xff] }
 0x107   : > { %v702_v43 = vmax.f32 %v686_v33, 0.0  ;;  %v692_v51 = vadd.f32 %v1181_v19, %v672_v39  ;;  %717 = vst [vmem:[%s1266_s4] sm:$0xff] %v701_v42  ;;  %v706_v55 = vmax.f32 %v690_v44, 0.0  ;;  %v674_v57 = vmul.f32 %v1017_v18, %v654_v41 }
 0x108   : > { %v707_v59 = vmax.f32 %v691_v45, 0.0  ;;  %v675_v60 = vmul.f32 %v1017_v18, %v655_v46  ;;  %v676_v61 = vmul.f32 %v1017_v18, %v656_v47  ;;  %v677_v62 = vmul.f32 %v1017_v18, %v657_v48  ;;  %719 = vst [vmem:[%s1266_s4 + $0x10] sm:$0xff] %v703_v49 }
 0x109   : > { %718 = vst [vmem:[%s1266_s4 + $0x8] sm:$0xff] %v702_v43  ;;  %v693_v63 = vadd.f32 %v1181_v19, %v673_v56  ;;  %v694_v0 = vadd.f32 %v1181_v19, %v674_v57  ;;  %v678_v1 = vmul.f32 %v1017_v18, %v658_v52  ;;  %v679_v2 = vmul.f32 %v1017_v18, %v659_v53 }
 0x10a   : > { %720 = vst [vmem:[%s1266_s4 + $0x18] sm:$0xff] %v704_v50  ;;  %v708_v3 = vmax.f32 %v692_v51, 0.0  ;;  %v695_v4 = vadd.f32 %v1181_v19, %v675_v60  ;;  %v696_v5 = vadd.f32 %v1181_v19, %v676_v61  ;;  %v680_v6 = vmul.f32 %v1017_v18, %v660_v58 }
 0x10b   : > { %721 = vst [vmem:[%s1266_s4 + $0x20] sm:$0xff] %v705_v54  ;;  %v709_v7 = vmax.f32 %v693_v63, 0.0  ;;  %v697_v8 = vadd.f32 %v1181_v19, %v677_v62  ;;  %v710_v9 = vmax.f32 %v694_v0, 0.0  ;;  %v698_v10 = vadd.f32 %v1181_v19, %v678_v1 }
 0x10c   : > { %722 = vst [vmem:[%s1266_s4 + $0x28] sm:$0xff] %v706_v55  ;;  %v711_v11 = vmax.f32 %v695_v4, 0.0  ;;  %v699_v12 = vadd.f32 %v1181_v19, %v679_v2  ;;  %v712_v13 = vmax.f32 %v696_v5, 0.0  ;;  %v700_v14 = vadd.f32 %v1181_v19, %v680_v6 }
 0x10d   : > { %723 = vst [vmem:[%s1266_s4 + $0x30] sm:$0xff] %v707_v59  ;;  %v713_v15 = vmax.f32 %v697_v8, 0.0  ;;  %v714_v16 = vmax.f32 %v698_v10, 0.0 }
 0x10e   : > { %724 = vst [vmem:[%s1266_s4 + $0x38] sm:$0xff] %v708_v3  ;;  %v715_v17 = vmax.f32 %v699_v12, 0.0  ;;  %v716_v18 = vmax.f32 %v700_v14, 0.0 }
 0x10f   : > { %725 = vst [vmem:[%s1266_s4 + $0x40] sm:$0xff] %v709_v7 }
 0x110   : > { %726 = vst [vmem:[%s1266_s4 + $0x48] sm:$0xff] %v710_v9 }
 0x111   : > { %727 = vst [vmem:[%s1266_s4 + $0x50] sm:$0xff] %v711_v11 }
 0x112   : > { %728 = vst [vmem:[%s1266_s4 + $0x58] sm:$0xff] %v712_v13 }
 0x113   : > { %729 = vst [vmem:[%s1266_s4 + $0x60] sm:$0xff] %v713_v15 }
 0x114   : > { %730 = vst [vmem:[%s1266_s4 + $0x68] sm:$0xff] %v714_v16 }
 0x115   : > { %731 = vst [vmem:[%s1266_s4 + $0x70] sm:$0xff] %v715_v17 }
 0x116   : > { %732 = vst [vmem:[%s1266_s4 + $0x78] sm:$0xff] %v716_v18 }
 0x117 PF: > { %s14_s19 = sadd.s32 1, %s1057_s19   ;;  %s1267_s15 = smov %s1045_s16 }
 0x118   : > { %p11_p12 = scmp.ge.s32.totalorder %s14_s19, 7   ;;  %s1268_s16 = smov %s1120_s23 }
 0x119   : > { %s1269_s17 = smov %s1053_s18  ;;  %s1270_s18 = smov %s1272_s20 }
 0x11a   :  { %13 = sbr.rel (!%p11_p12) target bundleno = 3 (0x3), region = 129 }

// kernel: _lambda_.16
= control target key start
LH: loop header
LB: loop body
LE: loop exit
PB: predicated region body
PF: predicated region fallthrough
CT: control target
= control target key end

     0   :  { %s592_s1 = inlined_call_operand.vmem [shape: bf16[128,128], index: 1, kind: input, shape index: {}]   ;;  %s593_s2 = inlined_call_operand.vmem [shape: f32[1,128], index: 2, kind: input, shape index: {}]   ;;  %s594_s3 = inlined_call_operand.vmem [shape: f32[1,128], index: 3, kind: input, shape index: {}]   ;;  %s595_s0 = inlined_call_operand.vmem [shape: bf16[128,128], index: 0, kind: input, shape index: {}]   ;;  %s596_s4 = inlined_call_operand.vmem [shape: f32[128,128], index: 4, kind: output, shape index: {}]  }
   0x1   :  { %v420_v0 = vld [vmem:[%s592_s1 + $0x38] sm:$0xff]  ;;  %v419_v1 = vld [vmem:[%s592_s1 + $0x30] sm:$0xff]  ;;  %v418_v2 = vld [vmem:[%s592_s1 + $0x28] sm:$0xff] }
   0x2   :  { %181 = vmatpush.bf16.msra.mxu0 %v420_v0  ;;  %421 = vmatpush.bf16.msra.mxu1 %v420_v0  ;;  %v417_v3 = vld [vmem:[%s592_s1 + $0x20] sm:$0xff]  ;;  %v416_v4 = vld [vmem:[%s592_s1 + $0x18] sm:$0xff]  ;;  %v415_v5 = vld [vmem:[%s592_s1 + $0x10] sm:$0xff] }
   0x3   :  { %422 = vmatpush.bf16.msra.mxu2 %v420_v0  ;;  %423 = vmatpush.bf16.msra.mxu3 %v420_v0  ;;  %v414_v6 = vld [vmem:[%s592_s1 + $0x8] sm:$0xff]  ;;  %v413_v7 = vld [vmem:[%s592_s1] sm:$0xff]  ;;  %v407_v9 = vld [vmem:[%s595_s0 + $0x10] sm:$0xff] }
   0x4   :  { %v405_v8 = vld [vmem:[%s595_s0] sm:$0xff]  ;;  %v411_v11 = vld [vmem:[%s595_s0 + $0x30] sm:$0xff]  ;;  %v406_v12 = vld [vmem:[%s595_s0 + $0x8] sm:$0xff] }
   0x5   :  { %v409_v10 = vld [vmem:[%s595_s0 + $0x20] sm:$0xff]  ;;  %v408_v13 = vld [vmem:[%s595_s0 + $0x18] sm:$0xff]  ;;  %v410_v14 = vld [vmem:[%s595_s0 + $0x28] sm:$0xff] }
   0x6   :  { %182 = vmatpush.bf16.msra.mxu0 %v419_v1  ;;  %424 = vmatpush.bf16.msra.mxu1 %v419_v1  ;;  %v412_v15 = vld [vmem:[%s595_s0 + $0x38] sm:$0xff]  ;;  %v445_v16 = vld [vmem:[%s593_s2] ss:$0 sm:$0xff] }
   0x7   :  { %425 = vmatpush.bf16.msra.mxu2 %v419_v1  ;;  %426 = vmatpush.bf16.msra.mxu3 %v419_v1  ;;  %v526_v17 = vld [vmem:[%s594_s3] ss:$0 sm:$0xff] }
   0xa   :  { %183 = vmatpush.bf16.msra.mxu0 %v418_v2  ;;  %427 = vmatpush.bf16.msra.mxu1 %v418_v2 }
   0xb   :  { %428 = vmatpush.bf16.msra.mxu2 %v418_v2  ;;  %429 = vmatpush.bf16.msra.mxu3 %v418_v2 }
   0xe   :  { %184 = vmatpush.bf16.msra.mxu0 %v417_v3  ;;  %430 = vmatpush.bf16.msra.mxu1 %v417_v3 }
   0xf   :  { %431 = vmatpush.bf16.msra.mxu2 %v417_v3  ;;  %432 = vmatpush.bf16.msra.mxu3 %v417_v3 }
  0x12   :  { %185 = vmatpush.bf16.msra.mxu0 %v416_v4  ;;  %433 = vmatpush.bf16.msra.mxu1 %v416_v4 }
  0x13   :  { %434 = vmatpush.bf16.msra.mxu2 %v416_v4  ;;  %435 = vmatpush.bf16.msra.mxu3 %v416_v4 }
  0x16   :  { %186 = vmatpush.bf16.msra.mxu0 %v415_v5  ;;  %436 = vmatpush.bf16.msra.mxu1 %v415_v5 }
  0x17   :  { %437 = vmatpush.bf16.msra.mxu2 %v415_v5  ;;  %438 = vmatpush.bf16.msra.mxu3 %v415_v5 }
  0x1a   :  { %187 = vmatpush.bf16.msra.mxu0 %v414_v6  ;;  %439 = vmatpush.bf16.msra.mxu1 %v414_v6 }
  0x1b   :  { %440 = vmatpush.bf16.msra.mxu2 %v414_v6  ;;  %441 = vmatpush.bf16.msra.mxu3 %v414_v6 }
  0x1e   :  { %188 = vmatpush.bf16.msra.mxu0 %v413_v7  ;;  %442 = vmatpush.bf16.msra.mxu1 %v413_v7 }
  0x1f   :  { %443 = vmatpush.bf16.msra.mxu2 %v413_v7  ;;  %444 = vmatpush.bf16.msra.mxu3 %v413_v7 }
  0x21   :  { %189 = vmatmul.bf16.vlgmr.msra.gmra.mxu0 %v405_v8  ;;  %199 = vmatmul.bf16.vlgmr.msra.gmra.mxu1 %v407_v9 }
  0x22   :  { %209 = vmatmul.bf16.vlgmr.msra.gmra.mxu2 %v409_v10  ;;  %219 = vmatmul.bf16.vlgmr.msra.gmra.mxu3 %v411_v11 }
  0x31   :  { %194 = vmatmul.bf16.gmra.mxu0 %v406_v12  ;;  %204 = vmatmul.bf16.gmra.mxu1 %v408_v13 }
  0x32   :  { %214 = vmatmul.bf16.gmra.mxu2 %v410_v14  ;;  %224 = vmatmul.bf16.gmra.mxu3 %v412_v15 }
  0x9e   :  { %v190_v18 = vpop.f32.mrf.mxu0  ;;  %v200_v19 = vpop.f32.mrf.mxu1 }
  0x9f   :  { %v285_v20 = vmul.f32 %v445_v16, %v190_v18  ;;  %v289_v21 = vmul.f32 %v445_v16, %v200_v19 }
  0xa1   :  { %v305_v22 = vadd.f32 %v526_v17, %v285_v20  ;;  %v309_v23 = vadd.f32 %v526_v17, %v289_v21 }
  0xa3   :  { %321 = vst [vmem:[%s596_s4] sm:$0xff] %v305_v22 }
  0xa4   :  { %325 = vst [vmem:[%s596_s4 + $0x20] sm:$0xff] %v309_v23 }
  0xa5   :  { %v210_v24 = vpop.f32.mrf.mxu2  ;;  %v220_v25 = vpop.f32.mrf.mxu3 }
  0xa6   :  { %v293_v26 = vmul.f32 %v445_v16, %v210_v24  ;;  %v297_v27 = vmul.f32 %v445_v16, %v220_v25  ;;  %v192_v28 = vpop.f32.mrf.mxu0  ;;  %v202_v29 = vpop.f32.mrf.mxu1 }
  0xa7   :  { %v286_v30 = vmul.f32 %v445_v16, %v192_v28  ;;  %v290_v31 = vmul.f32 %v445_v16, %v202_v29 }
  0xa8   :  { %v313_v32 = vadd.f32 %v526_v17, %v293_v26  ;;  %v317_v33 = vadd.f32 %v526_v17, %v297_v27 }
  0xa9   :  { %v306_v34 = vadd.f32 %v526_v17, %v286_v30  ;;  %v310_v35 = vadd.f32 %v526_v17, %v290_v31 }
  0xaa   :  { %329 = vst [vmem:[%s596_s4 + $0x40] sm:$0xff] %v313_v32 }
  0xab   :  { %333 = vst [vmem:[%s596_s4 + $0x60] sm:$0xff] %v317_v33 }
  0xac   :  { %322 = vst [vmem:[%s596_s4 + $0x8] sm:$0xff] %v306_v34 }
  0xad   :  { %326 = vst [vmem:[%s596_s4 + $0x28] sm:$0xff] %v310_v35  ;;  %v212_v36 = vpop.f32.mrf.mxu2  ;;  %v222_v37 = vpop.f32.mrf.mxu3 }
  0xae   :  { %v294_v38 = vmul.f32 %v445_v16, %v212_v36  ;;  %v298_v39 = vmul.f32 %v445_v16, %v222_v37  ;;  %v195_v40 = vpop.f32.mrf.mxu0  ;;  %v205_v41 = vpop.f32.mrf.mxu1 }
  0xaf   :  { %v287_v42 = vmul.f32 %v445_v16, %v195_v40  ;;  %v291_v43 = vmul.f32 %v445_v16, %v205_v41 }
  0xb0   :  { %v314_v44 = vadd.f32 %v526_v17, %v294_v38  ;;  %v318_v45 = vadd.f32 %v526_v17, %v298_v39 }
  0xb1   :  { %v307_v46 = vadd.f32 %v526_v17, %v287_v42  ;;  %v311_v47 = vadd.f32 %v526_v17, %v291_v43 }
  0xb2   :  { %330 = vst [vmem:[%s596_s4 + $0x48] sm:$0xff] %v314_v44 }
  0xb3   :  { %334 = vst [vmem:[%s596_s4 + $0x68] sm:$0xff] %v318_v45 }
  0xb4   :  { %323 = vst [vmem:[%s596_s4 + $0x10] sm:$0xff] %v307_v46 }
  0xb5   :  { %327 = vst [vmem:[%s596_s4 + $0x30] sm:$0xff] %v311_v47  ;;  %v215_v48 = vpop.f32.mrf.mxu2  ;;  %v225_v49 = vpop.f32.mrf.mxu3 }
  0xb6   :  { %v295_v50 = vmul.f32 %v445_v16, %v215_v48  ;;  %v299_v51 = vmul.f32 %v445_v16, %v225_v49  ;;  %v197_v52 = vpop.f32.mrf.mxu0  ;;  %v207_v53 = vpop.f32.mrf.mxu1 }
  0xb7   :  { %v288_v54 = vmul.f32 %v445_v16, %v197_v52  ;;  %v292_v55 = vmul.f32 %v445_v16, %v207_v53 }
  0xb8   :  { %v315_v56 = vadd.f32 %v526_v17, %v295_v50  ;;  %v319_v57 = vadd.f32 %v526_v17, %v299_v51 }
  0xb9   :  { %v308_v58 = vadd.f32 %v526_v17, %v288_v54  ;;  %v312_v59 = vadd.f32 %v526_v17, %v292_v55 }
  0xba   :  { %331 = vst [vmem:[%s596_s4 + $0x50] sm:$0xff] %v315_v56 }
  0xbb   :  { %335 = vst [vmem:[%s596_s4 + $0x70] sm:$0xff] %v319_v57 }
  0xbc   :  { %324 = vst [vmem:[%s596_s4 + $0x18] sm:$0xff] %v308_v58 }
  0xbd   :  { %328 = vst [vmem:[%s596_s4 + $0x38] sm:$0xff] %v312_v59  ;;  %v217_v60 = vpop.f32.mrf.mxu2  ;;  %v227_v61 = vpop.f32.mrf.mxu3 }
  0xbe   :  { %v296_v62 = vmul.f32 %v445_v16, %v217_v60  ;;  %v300_v63 = vmul.f32 %v445_v16, %v227_v61 }
  0xc0   :  { %v316_v0 = vadd.f32 %v526_v17, %v296_v62  ;;  %v320_v1 = vadd.f32 %v526_v17, %v300_v63 }
  0xc2   :  { %332 = vst [vmem:[%s596_s4 + $0x58] sm:$0xff] %v316_v0 }
  0xc3   :  { %336 = vst [vmem:[%s596_s4 + $0x78] sm:$0xff] %v320_v1 }

// kernel: _lambda_.18
= control target key start
LH: loop header
LB: loop body
LE: loop exit
PB: predicated region body
PF: predicated region fallthrough
CT: control target
= control target key end

     0   :  { %s1201_s18 = smov 0   ;;  %s1203_s19 = smov 0   ;;  %s1444_s0 = inlined_call_operand.vmem [shape: bf16[128,1152], index: 0, kind: input, shape index: {}]   ;;  %s1445_s1 = inlined_call_operand.vmem [shape: bf16[1152,128], index: 1, kind: input, shape index: {}]   ;;  %s1446_s2 = inlined_call_operand.vmem [shape: f32[1,128], index: 2, kind: input, shape index: {}]   ;;  %s1447_s3 = inlined_call_operand.vmem [shape: f32[1,128], index: 3, kind: input, shape index: {}]   ;;  %s1448_s4 = inlined_call_operand.vmem [shape: f32[128,128], index: 4, kind: input, shape index: {}]   ;;  %s1449_s5 = inlined_call_operand.vmem [shape: f32[128,128], index: 5, kind: output, shape index: {}]  }
   0x1   :  { %s1205_s20 = smov 0   ;;  %s1207_s21 = smov 0  }
   0x2   :  { %s1209_s22 = smov 0  }
   0x3 LB: > { %s27_s23 = sadd.s32 1, %s1164_s21  ;;  %p50_p1 = scmp.ne.s32.totalorder %s1156_s19, %s1152_s18  ;;  %s1168_s22 = sphi %s1209_s22, %s15_s22   ;;  %s1164_s21 = sphi %s1207_s21, %s1453_s21   ;;  %s1160_s20 = sphi %s1205_s20, %s1452_s20   ;;  %s1156_s19 = sphi %s1203_s19, %s1451_s19   ;;  %s1152_s18 = sphi %s1201_s18, %s1450_s18  }
   0x4   : > { %p28_p0 = scmp.ge.s32.totalorder %s27_s23, 9  ;;  %p51_p2 = scmp.eq.s32.totalorder %s1168_s22, 0 }
   0x5   : > { %s43_s25 = sadd.s32 1, %s1156_s19  ;;  %p970_p5 = scmp.ge.s32.totalorder %s1168_s22, 9 }
   0x6   : > { %s1455_s23 = smov (%p28_p0, %s27_s23), 0  ;;  %p52_p3 = por %p51_p2, %p50_p1 }
   0x7   : > { %s39_s24 = ssub.s32 %s1164_s21, %s1455_s23  ;;  %236 = sbr.rel (%p970_p5) target bundleno = 32 (0x20), region = 28 }
   0x8   : > { %p41_p4 = scmp.eq.s32.totalorder %s39_s24, 0 }
   0xa   : > { %s1236_s26 = scalar_select %p41_p4, %s1156_s19, %s43_s25  }
   0xc   : > { %239 = sbr.rel (!%p52_p3) target bundleno = 32 (0x20), region = 32  ;;  %s241_s27 = sand.u32 (%p52_p3), 1, %s1156_s19  }
   0xd   : > { %s972_s28 = sshll.u32 (%p52_p3), %s1164_s21, 2  ;;  %s971_s29 = sshll.u32 (%p52_p3), %s241_s27, 6 }
   0xe   : > { %s1244_s7 = scalar_lea.vmem (%p52_p3), %s1444_s0, %s972_s28  ;;  %s243_s8 = scalar_lea.vmem (%p52_p3), [#allocation3], %s971_s29 }
   0xf   : > { %v265_v0 = vld [vmem:[%s1244_s7] sm:$0xf] (%p52_p3)  ;;  %v267_v1 = vld [vmem:[%s1244_s7 + $0x24] sm:$0xf] (%p52_p3)  ;;  %v269_v2 = vld [vmem:[%s1244_s7 + $0x48] sm:$0xf] (%p52_p3) }
  0x10   : > { %266 = vst [vmem:[%s243_s8] sm:$0xf] (%p52_p3), %v265_v0  ;;  %v271_v3 = vld [vmem:[%s1244_s7 + $0x6c] sm:$0xf] (%p52_p3)  ;;  %v273_v4 = vld [vmem:[%s1244_s7 + $0x90] sm:$0xf] (%p52_p3) }
  0x11   : > { %268 = vst [vmem:[%s243_s8 + $0x4] sm:$0xf] %v267_v1  ;;  %v275_v5 = vld [vmem:[%s1244_s7 + $0xb4] sm:$0xf]  ;;  %v277_v6 = vld [vmem:[%s1244_s7 + $0xd8] sm:$0xf] }
  0x12   : > { %270 = vst [vmem:[%s243_s8 + $0x8] sm:$0xf] %v269_v2  ;;  %v279_v7 = vld [vmem:[%s1244_s7 + $0xfc] sm:$0xf]  ;;  %v281_v8 = vld [vmem:[%s1244_s7 + $0x120] sm:$0xf] }
  0x13   : > { %272 = vst [vmem:[%s243_s8 + $0xc] sm:$0xf] %v271_v3  ;;  %v283_v9 = vld [vmem:[%s1244_s7 + $0x144] sm:$0xf]  ;;  %v285_v10 = vld [vmem:[%s1244_s7 + $0x168] sm:$0xf] }
  0x14   : > { %274 = vst [vmem:[%s243_s8 + $0x10] sm:$0xf] %v273_v4  ;;  %v287_v11 = vld [vmem:[%s1244_s7 + $0x18c] sm:$0xf]  ;;  %v289_v12 = vld [vmem:[%s1244_s7 + $0x1b0] sm:$0xf] }
  0x15   : > { %276 = vst [vmem:[%s243_s8 + $0x14] sm:$0xf] %v275_v5  ;;  %v291_v13 = vld [vmem:[%s1244_s7 + $0x1d4] sm:$0xf]  ;;  %v293_v14 = vld [vmem:[%s1244_s7 + $0x1f8] sm:$0xf] }
  0x16   : > { %278 = vst [vmem:[%s243_s8 + $0x18] sm:$0xf] %v277_v6  ;;  %v295_v15 = vld [vmem:[%s1244_s7 + $0x21c] sm:$0xf] }
  0x17   : > { %280 = vst [vmem:[%s243_s8 + $0x1c] sm:$0xf] %v279_v7 }
  0x18   : > { %282 = vst [vmem:[%s243_s8 + $0x20] sm:$0xf] %v281_v8 }
  0x19   : > { %284 = vst [vmem:[%s243_s8 + $0x24] sm:$0xf] %v283_v9 }
  0x1a   : > { %286 = vst [vmem:[%s243_s8 + $0x28] sm:$0xf] %v285_v10 }
  0x1b   : > { %288 = vst [vmem:[%s243_s8 + $0x2c] sm:$0xf] %v287_v11 }
  0x1c   : > { %290 = vst [vmem:[%s243_s8 + $0x30] sm:$0xf] %v289_v12 }
  0x1d   : > { %292 = vst [vmem:[%s243_s8 + $0x34] sm:$0xf] %v291_v13 }
  0x1e   : > { %294 = vst [vmem:[%s243_s8 + $0x38] sm:$0xf] %v293_v14 }
  0x1f   : > { %296 = vst [vmem:[%s243_s8 + $0x3c] sm:$0xf] %v295_v15 }
  0x20 PF: > { %p973_p6 = scmp.ge.s32.totalorder %s1168_s22, 1  ;;  %p363_p7 = scmp.lt.s32.totalorder %s1168_s22, 10 }
  0x22   : > { %p364_p8 = pnand %p973_p6, %p363_p7 }
  0x23   : > { %s370_s9 = sand.u32 (!%p364_p8), 1, %s1152_s18   ;;  %s975_s10 = sshll.u32 (!%p364_p8), %s1160_s20, 4 }
  0x24   : > { %367 = sbr.rel (%p364_p8) target bundleno = 281 (0x119), region = 77  ;;  %s974_s11 = sshll.u32 (!%p364_p8), %s370_s9, 6 }
  0x25   : > { %p424_p9 = scmp.lt.s32.totalorder (!%p364_p8), %s975_s10, 143  ;;  %s1271_s16 = scalar_lea.vmem (!%p364_p8), [#allocation3], %s974_s11 }
  0x26   : > { %p977_p10 = scmp.ne.s32.totalorder (!%p364_p8), %s1160_s20, 0 }
  0x29   : > { %s1457_s10 = smov (!%p424_p9, %s975_s10), 143  ;;  %459 = sbr.rel (%p977_p10) target bundleno = 63 (0x3f), region = 85 }
  0x2a   : > { %s976_s12 = sshll.u32 %s1457_s10, 2 }
  0x2b   : > { %s1269_s15 = scalar_lea.vmem %s1445_s1, %s976_s12 }
  0x2e   : > { %v1170_v16 = vmov 0.0  }
  0x2f   : > { %460 = vst [vmem:[#allocation2 + $0x30] sm:$0xff] %v1170_v16 }
  0x30   : > { %461 = vst [vmem:[#allocation2] sm:$0xff] %v1170_v16 }
  0x31   : > { %462 = vst [vmem:[#allocation2 + $0x58] sm:$0xff] %v1170_v16 }
  0x32   : > { %463 = vst [vmem:[#allocation2 + $0x18] sm:$0xff] %v1170_v16 }
  0x33   : > { %464 = vst [vmem:[#allocation2 + $0x50] sm:$0xff] %v1170_v16 }
  0x34   : > { %465 = vst [vmem:[#allocation2 + $0x68] sm:$0xff] %v1170_v16 }
  0x35   : > { %466 = vst [vmem:[#allocation2 + $0x8] sm:$0xff] %v1170_v16 }
  0x36   : > { %467 = vst [vmem:[#allocation2 + $0x48] sm:$0xff] %v1170_v16 }
  0x37   : > { %468 = vst [vmem:[#allocation2 + $0x40] sm:$0xff] %v1170_v16 }
  0x38   : > { %469 = vst [vmem:[#allocation2 + $0x20] sm:$0xff] %v1170_v16 }
  0x39   : > { %470 = vst [vmem:[#allocation2 + $0x10] sm:$0xff] %v1170_v16 }
  0x3a   : > { %471 = vst [vmem:[#allocation2 + $0x38] sm:$0xff] %v1170_v16 }
  0x3b   : > { %472 = vst [vmem:[#allocation2 + $0x60] sm:$0xff] %v1170_v16 }
  0x3c   : > { %473 = vst [vmem:[#allocation2 + $0x70] sm:$0xff] %v1170_v16 }
  0x3d   : > { %474 = vst [vmem:[#allocation2 + $0x78] sm:$0xff] %v1170_v16 }
  0x3e   : > { %475 = vst [vmem:[#allocation2 + $0x28] sm:$0xff] %v1170_v16 }
  0x3f PF: > { %v1062_v17 = vld [vmem:[%s1269_s15 + $0x38] sm:$0xff]  ;;  %v1061_v18 = vld [vmem:[%s1269_s15 + $0x30] sm:$0xff]  ;;  %v1060_v19 = vld [vmem:[%s1269_s15 + $0x28] sm:$0xff]  ;;  %p1042_p11 = scmp.ne.s32.totalorder %s1160_s20, 8 }
  0x40   : > { %620 = vmatpush.bf16.msra.mxu0 %v1062_v17  ;;  %1063 = vmatpush.bf16.msra.mxu1 %v1062_v17  ;;  %v1059_v20 = vld [vmem:[%s1269_s15 + $0x20] sm:$0xff]  ;;  %v1058_v21 = vld [vmem:[%s1269_s15 + $0x18] sm:$0xff]  ;;  %v1057_v22 = vld [vmem:[%s1269_s15 + $0x10] sm:$0xff] }
  0x41   : > { %1064 = vmatpush.bf16.msra.mxu2 %v1062_v17  ;;  %1065 = vmatpush.bf16.msra.mxu3 %v1062_v17  ;;  %v1056_v23 = vld [vmem:[%s1269_s15 + $0x8] sm:$0xff]  ;;  %v1055_v24 = vld [vmem:[%s1269_s15] sm:$0xff]  ;;  %v1049_v26 = vld [vmem:[%s1271_s16 + $0x10] sm:$0xff] }
  0x42   : > { %v1047_v25 = vld [vmem:[%s1271_s16] sm:$0xff]  ;;  %v1053_v28 = vld [vmem:[%s1271_s16 + $0x30] sm:$0xff]  ;;  %v1048_v29 = vld [vmem:[%s1271_s16 + $0x8] sm:$0xff] }
  0x43   : > { %v1051_v27 = vld [vmem:[%s1271_s16 + $0x20] sm:$0xff]  ;;  %v1050_v30 = vld [vmem:[%s1271_s16 + $0x18] sm:$0xff]  ;;  %v1052_v31 = vld [vmem:[%s1271_s16 + $0x28] sm:$0xff] }
  0x44   : > { %621 = vmatpush.bf16.msra.mxu0 %v1061_v18  ;;  %1066 = vmatpush.bf16.msra.mxu1 %v1061_v18  ;;  %v1054_v32 = vld [vmem:[%s1271_s16 + $0x38] sm:$0xff]  ;;  %v476_v33 = vld [vmem:[#allocation2 + $0x30] sm:$0xff]  ;;  %v484_v39 = vld [vmem:[#allocation2 + $0x40] sm:$0xff] }
  0x45   : > { %1067 = vmatpush.bf16.msra.mxu2 %v1061_v18  ;;  %1068 = vmatpush.bf16.msra.mxu3 %v1061_v18  ;;  %v480_v34 = vld [vmem:[#allocation2 + $0x50] sm:$0xff]  ;;  %v488_v40 = vld [vmem:[#allocation2 + $0x60] sm:$0xff]  ;;  %v481_v42 = vld [vmem:[#allocation2 + $0x68] sm:$0xff] }
  0x46   : > { %v477_v41 = vld [vmem:[#allocation2] sm:$0xff]  ;;  %v489_v52 = vld [vmem:[#allocation2 + $0x70] sm:$0xff]  ;;  %v478_v53 = vld [vmem:[#allocation2 + $0x58] sm:$0xff] }
  0x47   : > { %v485_v51 = vld [vmem:[#allocation2 + $0x20] sm:$0xff]  ;;  %v482_v54 = vld [vmem:[#allocation2 + $0x8] sm:$0xff]  ;;  %v486_v63 = vld [vmem:[#allocation2 + $0x10] sm:$0xff] }
  0x48   : > { %622 = vmatpush.bf16.msra.mxu0 %v1060_v19  ;;  %1069 = vmatpush.bf16.msra.mxu1 %v1060_v19  ;;  %v490_v0 = vld [vmem:[#allocation2 + $0x78] sm:$0xff]  ;;  %v483_v2 = vld [vmem:[#allocation2 + $0x48] sm:$0xff] }
  0x49   : > { %1070 = vmatpush.bf16.msra.mxu2 %v1060_v19  ;;  %1071 = vmatpush.bf16.msra.mxu3 %v1060_v19  ;;  %v479_v1 = vld [vmem:[#allocation2 + $0x18] sm:$0xff]  ;;  %v491_v12 = vld [vmem:[#allocation2 + $0x28] sm:$0xff] }
  0x4a   : > { %v487_v11 = vld [vmem:[#allocation2 + $0x38] sm:$0xff] }
  0x4c   : > { %623 = vmatpush.bf16.msra.mxu0 %v1059_v20  ;;  %1072 = vmatpush.bf16.msra.mxu1 %v1059_v20 }
  0x4d   : > { %1073 = vmatpush.bf16.msra.mxu2 %v1059_v20  ;;  %1074 = vmatpush.bf16.msra.mxu3 %v1059_v20 }
  0x50   : > { %624 = vmatpush.bf16.msra.mxu0 %v1058_v21  ;;  %1075 = vmatpush.bf16.msra.mxu1 %v1058_v21 }
  0x51   : > { %1076 = vmatpush.bf16.msra.mxu2 %v1058_v21  ;;  %1077 = vmatpush.bf16.msra.mxu3 %v1058_v21 }
  0x54   : > { %625 = vmatpush.bf16.msra.mxu0 %v1057_v22  ;;  %1078 = vmatpush.bf16.msra.mxu1 %v1057_v22 }
  0x55   : > { %1079 = vmatpush.bf16.msra.mxu2 %v1057_v22  ;;  %1080 = vmatpush.bf16.msra.mxu3 %v1057_v22 }
  0x58   : > { %626 = vmatpush.bf16.msra.mxu0 %v1056_v23  ;;  %1081 = vmatpush.bf16.msra.mxu1 %v1056_v23 }
  0x59   : > { %1082 = vmatpush.bf16.msra.mxu2 %v1056_v23  ;;  %1083 = vmatpush.bf16.msra.mxu3 %v1056_v23 }
  0x5c   : > { %627 = vmatpush.bf16.msra.mxu0 %v1055_v24  ;;  %1084 = vmatpush.bf16.msra.mxu1 %v1055_v24 }
  0x5d   : > { %1085 = vmatpush.bf16.msra.mxu2 %v1055_v24  ;;  %1086 = vmatpush.bf16.msra.mxu3 %v1055_v24 }
  0x5f   : > { %628 = vmatmul.bf16.vlgmr.msra.gmra.mxu0 %v1047_v25  ;;  %638 = vmatmul.bf16.vlgmr.msra.gmra.mxu1 %v1049_v26 }
  0x60   : > { %648 = vmatmul.bf16.vlgmr.msra.gmra.mxu2 %v1051_v27  ;;  %658 = vmatmul.bf16.vlgmr.msra.gmra.mxu3 %v1053_v28 }
  0x6f   : > { %633 = vmatmul.bf16.gmra.mxu0 %v1048_v29  ;;  %643 = vmatmul.bf16.gmra.mxu1 %v1050_v30 }
  0x70   : > { %653 = vmatmul.bf16.gmra.mxu2 %v1052_v31  ;;  %663 = vmatmul.bf16.gmra.mxu3 %v1054_v32 }
  0xdc   : > { %v629_v35 = vpop.f32.mrf.mxu0  ;;  %v639_v36 = vpop.f32.mrf.mxu1 }
  0xdd   : > { %v669_v37 = vadd.f32 %v629_v35, %v476_v33  ;;  %v673_v38 = vadd.f32 %v639_v36, %v480_v34 }
  0xdf   : > { %685 = vst [vmem:[#allocation2 + $0x30] sm:$0xff] %v669_v37 }
  0xe0   : > { %689 = vst [vmem:[#allocation2 + $0x50] sm:$0xff] %v673_v38 }
  0xe3   : > { %v649_v43 = vpop.f32.mrf.mxu2  ;;  %v659_v44 = vpop.f32.mrf.mxu3 }
  0xe4   : > { %v677_v45 = vadd.f32 %v649_v43, %v484_v39  ;;  %v681_v46 = vadd.f32 %v659_v44, %v488_v40  ;;  %v631_v47 = vpop.f32.mrf.mxu0  ;;  %v641_v48 = vpop.f32.mrf.mxu1 }
  0xe5   : > { %v670_v49 = vadd.f32 %v631_v47, %v477_v41  ;;  %v674_v50 = vadd.f32 %v641_v48, %v481_v42 }
  0xe6   : > { %693 = vst [vmem:[#allocation2 + $0x40] sm:$0xff] %v677_v45 }
  0xe7   : > { %697 = vst [vmem:[#allocation2 + $0x60] sm:$0xff] %v681_v46 }
  0xe8   : > { %686 = vst [vmem:[#allocation2] sm:$0xff] %v670_v49 }
  0xe9   : > { %690 = vst [vmem:[#allocation2 + $0x68] sm:$0xff] %v674_v50 }
  0xeb   : > { %v651_v55 = vpop.f32.mrf.mxu2  ;;  %v661_v56 = vpop.f32.mrf.mxu3 }
  0xec   : > { %v678_v57 = vadd.f32 %v651_v55, %v485_v51  ;;  %v682_v58 = vadd.f32 %v661_v56, %v489_v52  ;;  %v634_v59 = vpop.f32.mrf.mxu0  ;;  %v644_v60 = vpop.f32.mrf.mxu1 }
  0xed   : > { %v671_v61 = vadd.f32 %v634_v59, %v478_v53  ;;  %v675_v62 = vadd.f32 %v644_v60, %v482_v54 }
  0xee   : > { %694 = vst [vmem:[#allocation2 + $0x20] sm:$0xff] %v678_v57 }
  0xef   : > { %698 = vst [vmem:[#allocation2 + $0x70] sm:$0xff] %v682_v58 }
  0xf0   : > { %687 = vst [vmem:[#allocation2 + $0x58] sm:$0xff] %v671_v61 }
  0xf1   : > { %691 = vst [vmem:[#allocation2 + $0x8] sm:$0xff] %v675_v62 }
  0xf3   : > { %v654_v3 = vpop.f32.mrf.mxu2  ;;  %v664_v4 = vpop.f32.mrf.mxu3 }
  0xf4   : > { %v679_v5 = vadd.f32 %v654_v3, %v486_v63  ;;  %v683_v6 = vadd.f32 %v664_v4, %v490_v0  ;;  %v636_v7 = vpop.f32.mrf.mxu0  ;;  %v646_v8 = vpop.f32.mrf.mxu1 }
  0xf5   : > { %v672_v9 = vadd.f32 %v636_v7, %v479_v1  ;;  %v676_v10 = vadd.f32 %v646_v8, %v483_v2 }
  0xf6   : > { %695 = vst [vmem:[#allocation2 + $0x10] sm:$0xff] %v679_v5 }
  0xf7   : > { %699 = vst [vmem:[#allocation2 + $0x78] sm:$0xff] %v683_v6 }
  0xf8   : > { %688 = vst [vmem:[#allocation2 + $0x18] sm:$0xff] %v672_v9 }
  0xf9   : > { %692 = vst [vmem:[#allocation2 + $0x48] sm:$0xff] %v676_v10 }
  0xfb   : > { %v656_v13 = vpop.f32.mrf.mxu2  ;;  %v666_v14 = vpop.f32.mrf.mxu3  ;;  %704 = sbr.rel (%p1042_p11) target bundleno = 281 (0x119), region = 89 }
  0xfc   : > { %v680_v15 = vadd.f32 %v656_v13, %v487_v11  ;;  %v684_v16 = vadd.f32 %v666_v14, %v491_v12 }
  0xfe   : > { %696 = vst [vmem:[#allocation2 + $0x38] sm:$0xff] %v680_v15 }
  0xff   : > { %700 = vst [vmem:[#allocation2 + $0x28] sm:$0xff] %v684_v16 }
 0x100   : > { %v705_v17 = vld [vmem:[#allocation2 + $0x30] sm:$0xff]  ;;  %v1294_v18 = vld [vmem:[%s1446_s2] ss:$0 sm:$0xff]  ;;  %v707_v22 = vld [vmem:[#allocation2 + $0x58] sm:$0xff] }
 0x101   : > { %v1299_v19 = vld [vmem:[%s1447_s3] ss:$0 sm:$0xff]  ;;  %v725_v20 = vmul.f32 %v1294_v18, %v705_v17  ;;  %v762_v25 = vld [vmem:[%s1448_s4 + $0x8] sm:$0xff]  ;;  %v727_v26 = vmul.f32 %v1294_v18, %v707_v22  ;;  %v708_v27 = vld [vmem:[#allocation2 + $0x18] sm:$0xff] }
 0x102   : > { %v706_v21 = vld [vmem:[#allocation2] sm:$0xff]  ;;  %v763_v29 = vld [vmem:[%s1448_s4 + $0x10] sm:$0xff]  ;;  %v728_v30 = vmul.f32 %v1294_v18, %v708_v27  ;;  %v710_v32 = vld [vmem:[#allocation2 + $0x68] sm:$0xff] }
 0x103   : > { %v761_v23 = vld [vmem:[%s1448_s4] sm:$0xff]  ;;  %v726_v24 = vmul.f32 %v1294_v18, %v706_v21  ;;  %v745_v28 = vadd.f32 %v1299_v19, %v725_v20  ;;  %v709_v31 = vld [vmem:[#allocation2 + $0x50] sm:$0xff]  ;;  %v747_v34 = vadd.f32 %v1299_v19, %v727_v26  ;;  %v764_v35 = vld [vmem:[%s1448_s4 + $0x18] sm:$0xff]  ;;  %v730_v37 = vmul.f32 %v1294_v18, %v710_v32 }
 0x104   : > { %v729_v36 = vmul.f32 %v1294_v18, %v709_v31  ;;  %v711_v38 = vld [vmem:[#allocation2 + $0x8] sm:$0xff]  ;;  %v748_v40 = vadd.f32 %v1299_v19, %v728_v30  ;;  %v765_v41 = vld [vmem:[%s1448_s4 + $0x20] sm:$0xff]  ;;  %v767_v49 = vld [vmem:[%s1448_s4 + $0x30] sm:$0xff] }
 0x105   : > { %v746_v33 = vadd.f32 %v1299_v19, %v726_v24  ;;  %v777_v39 = vadd.f32 %v761_v23, %v745_v28  ;;  %v766_v42 = vld [vmem:[%s1448_s4 + $0x28] sm:$0xff]  ;;  %v731_v43 = vmul.f32 %v1294_v18, %v711_v38  ;;  %v779_v46 = vadd.f32 %v763_v29, %v747_v34  ;;  %v713_v50 = vld [vmem:[#allocation2 + $0x40] sm:$0xff]  ;;  %v715_v56 = vld [vmem:[#allocation2 + $0x10] sm:$0xff] }
 0x106   : > { %v712_v44 = vld [vmem:[#allocation2 + $0x48] sm:$0xff]  ;;  %v749_v47 = vadd.f32 %v1299_v19, %v729_v36  ;;  %v750_v48 = vadd.f32 %v1299_v19, %v730_v37  ;;  %v780_v52 = vadd.f32 %v764_v35, %v748_v40  ;;  %v714_v55 = vld [vmem:[#allocation2 + $0x20] sm:$0xff]  ;;  %v768_v61 = vld [vmem:[%s1448_s4 + $0x38] sm:$0xff]  ;;  %v733_v2 = vmul.f32 %v1294_v18, %v713_v50 }
 0x107   : > { %v778_v45 = vadd.f32 %v762_v25, %v746_v33  ;;  %v793_v51 = vmax.f32 %v777_v39, 0.0  ;;  %v751_v53 = vadd.f32 %v1299_v19, %v731_v43  ;;  %v732_v54 = vmul.f32 %v1294_v18, %v712_v44  ;;  %v716_v62 = vld [vmem:[#allocation2 + $0x38] sm:$0xff]  ;;  %v717_v3 = vld [vmem:[#allocation2 + $0x60] sm:$0xff]  ;;  %v718_v4 = vld [vmem:[#allocation2 + $0x70] sm:$0xff] }
 0x108   : > { %v795_v58 = vmax.f32 %v779_v46, 0.0  ;;  %v781_v59 = vadd.f32 %v765_v41, %v749_v47  ;;  %v782_v60 = vadd.f32 %v766_v42, %v750_v48  ;;  %v796_v63 = vmax.f32 %v780_v52, 0.0  ;;  %v769_v7 = vld [vmem:[%s1448_s4 + $0x40] sm:$0xff]  ;;  %v719_v10 = vld [vmem:[#allocation2 + $0x78] sm:$0xff]  ;;  %v770_v14 = vld [vmem:[%s1448_s4 + $0x48] sm:$0xff] }
 0x109   : > { %v794_v57 = vmax.f32 %v778_v45, 0.0  ;;  %809 = vst [vmem:[%s1449_s5] sm:$0xff] %v793_v51  ;;  %v783_v0 = vadd.f32 %v767_v49, %v751_v53  ;;  %v752_v1 = vadd.f32 %v1299_v19, %v732_v54  ;;  %v734_v8 = vmul.f32 %v1294_v18, %v714_v55  ;;  %v771_v15 = vld [vmem:[%s1448_s4 + $0x50] sm:$0xff]  ;;  %v772_v21 = vld [vmem:[%s1448_s4 + $0x58] sm:$0xff]  ;;  %v720_v24 = vld [vmem:[#allocation2 + $0x28] sm:$0xff] }
 0x10a   : > { %v797_v5 = vmax.f32 %v781_v59, 0.0  ;;  %v798_v6 = vmax.f32 %v782_v60, 0.0  ;;  %v735_v9 = vmul.f32 %v1294_v18, %v715_v56  ;;  %811 = vst [vmem:[%s1449_s5 + $0x10] sm:$0xff] %v795_v58  ;;  %v753_v13 = vadd.f32 %v1299_v19, %v733_v2  ;;  %v773_v28 = vld [vmem:[%s1448_s4 + $0x60] sm:$0xff]  ;;  %v774_v29 = vld [vmem:[%s1448_s4 + $0x68] sm:$0xff]  ;;  %v775_v35 = vld [vmem:[%s1448_s4 + $0x70] sm:$0xff] }
 0x10b   : > { %810 = vst [vmem:[%s1449_s5 + $0x8] sm:$0xff] %v794_v57  ;;  %v799_v11 = vmax.f32 %v783_v0, 0.0  ;;  %v784_v12 = vadd.f32 %v768_v61, %v752_v1  ;;  %v736_v16 = vmul.f32 %v1294_v18, %v716_v62  ;;  %v754_v17 = vadd.f32 %v1299_v19, %v734_v8  ;;  %v776_v44 = vld [vmem:[%s1448_s4 + $0x78] sm:$0xff] }
 0x10c   : > { %812 = vst [vmem:[%s1449_s5 + $0x18] sm:$0xff] %v796_v63  ;;  %v755_v20 = vadd.f32 %v1299_v19, %v735_v9  ;;  %v737_v22 = vmul.f32 %v1294_v18, %v717_v3  ;;  %v738_v23 = vmul.f32 %v1294_v18, %v718_v4  ;;  %v785_v26 = vadd.f32 %v769_v7, %v753_v13 }
 0x10d   : > { %813 = vst [vmem:[%s1449_s5 + $0x20] sm:$0xff] %v797_v5  ;;  %v800_v25 = vmax.f32 %v784_v12, 0.0  ;;  %v756_v27 = vadd.f32 %v1299_v19, %v736_v16  ;;  %v739_v30 = vmul.f32 %v1294_v18, %v719_v10  ;;  %v786_v31 = vadd.f32 %v770_v14, %v754_v17 }
 0x10e   : > { %814 = vst [vmem:[%s1449_s5 + $0x28] sm:$0xff] %v798_v6  ;;  %v787_v32 = vadd.f32 %v771_v15, %v755_v20  ;;  %v757_v33 = vadd.f32 %v1299_v19, %v737_v22  ;;  %v758_v34 = vadd.f32 %v1299_v19, %v738_v23  ;;  %v801_v36 = vmax.f32 %v785_v26, 0.0 }
 0x10f   : > { %815 = vst [vmem:[%s1449_s5 + $0x30] sm:$0xff] %v799_v11  ;;  %v788_v37 = vadd.f32 %v772_v21, %v756_v27  ;;  %v759_v38 = vadd.f32 %v1299_v19, %v739_v30  ;;  %v740_v39 = vmul.f32 %v1294_v18, %v720_v24  ;;  %v802_v40 = vmax.f32 %v786_v31, 0.0 }
 0x110   : > { %816 = vst [vmem:[%s1449_s5 + $0x38] sm:$0xff] %v800_v25  ;;  %v803_v41 = vmax.f32 %v787_v32, 0.0  ;;  %v789_v42 = vadd.f32 %v773_v28, %v757_v33  ;;  %v790_v43 = vadd.f32 %v774_v29, %v758_v34 }
 0x111   : > { %817 = vst [vmem:[%s1449_s5 + $0x40] sm:$0xff] %v801_v36  ;;  %v804_v45 = vmax.f32 %v788_v37, 0.0  ;;  %v791_v46 = vadd.f32 %v775_v35, %v759_v38  ;;  %v760_v18 = vadd.f32 %v1299_v19, %v740_v39 }
 0x112   : > { %818 = vst [vmem:[%s1449_s5 + $0x48] sm:$0xff] %v802_v40  ;;  %v805_v47 = vmax.f32 %v789_v42, 0.0  ;;  %v806_v48 = vmax.f32 %v790_v43, 0.0 }
 0x113   : > { %819 = vst [vmem:[%s1449_s5 + $0x50] sm:$0xff] %v803_v41  ;;  %v807_v49 = vmax.f32 %v791_v46, 0.0  ;;  %v792_v50 = vadd.f32 %v776_v44, %v760_v18 }
 0x114   : > { %820 = vst [vmem:[%s1449_s5 + $0x58] sm:$0xff] %v804_v45 }
 0x115   : > { %821 = vst [vmem:[%s1449_s5 + $0x60] sm:$0xff] %v805_v47  ;;  %v808_v19 = vmax.f32 %v792_v50, 0.0 }
 0x116   : > { %822 = vst [vmem:[%s1449_s5 + $0x68] sm:$0xff] %v806_v48 }
 0x117   : > { %823 = vst [vmem:[%s1449_s5 + $0x70] sm:$0xff] %v807_v49 }
 0x118   : > { %824 = vst [vmem:[%s1449_s5 + $0x78] sm:$0xff] %v808_v19 }
 0x119 PF: > { %s15_s22 = sadd.s32 1, %s1168_s22   ;;  %s1450_s18 = smov %s1156_s19 }
 0x11a   : > { %p12_p12 = scmp.ge.s32.totalorder %s15_s22, 11   ;;  %s1451_s19 = smov %s1236_s26 }
 0x11b   : > { %s1452_s20 = smov %s1164_s21  ;;  %s1453_s21 = smov %s1455_s23 }
 0x11c   :  { %14 = sbr.rel (!%p12_p12) target bundleno = 3 (0x3), region = 136 }

// kernel: _lambda_.20
= control target key start
LH: loop header
LB: loop body
LE: loop exit
PB: predicated region body
PF: predicated region fallthrough
CT: control target
= control target key end

     0   :  { %s979_s15 = smov 0   ;;  %s981_s16 = smov 0   ;;  %s1117_s0 = inlined_call_operand.vmem [shape: bf16[32,1152], index: 0, kind: input, shape index: {}]   ;;  %s1118_s1 = inlined_call_operand.vmem [shape: bf16[1152,256], index: 1, kind: input, shape index: {}]   ;;  %s1119_s2 = inlined_call_operand.vmem [shape: f32[1,256], index: 2, kind: input, shape index: {}]   ;;  %s1120_s3 = inlined_call_operand.vmem [shape: f32[1,256], index: 3, kind: input, shape index: {}]   ;;  %s1121_s4 = inlined_call_operand.vmem [shape: f32[32,256], index: 4, kind: output, shape index: {}]  }
   0x1   :  { %s983_s17 = smov 0   ;;  %s985_s18 = smov 0  }
   0x2   :  { %s987_s19 = smov 0  }
   0x3 LB: > { %s26_s20 = sadd.s32 1, %s947_s18  ;;  %p49_p1 = scmp.ne.s32.totalorder %s939_s16, %s935_s15  ;;  %s951_s19 = sphi %s987_s19, %s14_s19   ;;  %s947_s18 = sphi %s985_s18, %s1125_s18   ;;  %s943_s17 = sphi %s983_s17, %s1124_s17   ;;  %s939_s16 = sphi %s981_s16, %s1123_s16   ;;  %s935_s15 = sphi %s979_s15, %s1122_s15  }
   0x4   : > { %p27_p0 = scmp.ge.s32.totalorder %s26_s20, 9  ;;  %p50_p2 = scmp.eq.s32.totalorder %s951_s19, 0 }
   0x5   : > { %s42_s22 = sadd.s32 1, %s939_s16  ;;  %p751_p5 = scmp.ge.s32.totalorder %s951_s19, 9 }
   0x6   : > { %s1127_s20 = smov (%p27_p0, %s26_s20), 0  ;;  %p51_p3 = por %p50_p2, %p49_p1 }
   0x7   : > { %s38_s21 = ssub.s32 %s947_s18, %s1127_s20  ;;  %199 = sbr.rel (%p751_p5) target bundleno = 20 (0x14), region = 24 }
   0x8   : > { %p40_p4 = scmp.eq.s32.totalorder %s38_s21, 0 }
   0xa   : > { %s1014_s23 = scalar_select %p40_p4, %s939_s16, %s42_s22  }
   0xc   : > { %202 = sbr.rel (!%p51_p3) target bundleno = 20 (0x14), region = 28  ;;  %s204_s24 = sand.u32 (%p51_p3), 1, %s939_s16  }
   0xd   : > { %s753_s25 = sshll.u32 (%p51_p3), %s947_s18, 2  ;;  %s752_s26 = sshll.u32 (%p51_p3), %s204_s24, 4 }
   0xe   : > { %s211_s29 = scalar_lea.vmem (%p51_p3), %s1117_s0, %s753_s25  ;;  %s206_s30 = scalar_lea.vmem (%p51_p3), [#allocation3], %s752_s26 }
   0xf   : > { %v228_v0 = vld [vmem:[%s211_s29] sm:$0xf] (%p51_p3)  ;;  %v230_v1 = vld [vmem:[%s211_s29 + $0x24] sm:$0xf] (%p51_p3)  ;;  %v232_v2 = vld [vmem:[%s211_s29 + $0x48] sm:$0xf] (%p51_p3) }
  0x10   : > { %229 = vst [vmem:[%s206_s30] sm:$0xf] (%p51_p3), %v228_v0  ;;  %v234_v3 = vld [vmem:[%s211_s29 + $0x6c] sm:$0xf] (%p51_p3) }
  0x11   : > { %231 = vst [vmem:[%s206_s30 + $0x4] sm:$0xf] %v230_v1 }
  0x12   : > { %233 = vst [vmem:[%s206_s30 + $0x8] sm:$0xf] %v232_v2 }
  0x13   : > { %235 = vst [vmem:[%s206_s30 + $0xc] sm:$0xf] %v234_v3 }
  0x14 PF: > { %p754_p6 = scmp.ge.s32.totalorder %s951_s19, 1  ;;  %p281_p7 = scmp.lt.s32.totalorder %s951_s19, 10 }
  0x16   : > { %p282_p8 = pnand %p754_p6, %p281_p7 }
  0x17   : > { %s288_s5 = sand.u32 (!%p282_p8), 1, %s935_s15   ;;  %s756_s6 = sshll.u32 (!%p282_p8), %s943_s17, 4 }
  0x18   : > { %285 = sbr.rel (%p282_p8) target bundleno = 238 (0xee), region = 73  ;;  %s1026_s7 = sshll.u32 (!%p282_p8), %s288_s5, 4 }
  0x19   : > { %p339_p9 = scmp.lt.s32.totalorder (!%p282_p8), %s756_s6, 143  ;;  %s290_s12 = scalar_lea.vmem (!%p282_p8), [#allocation3], %s1026_s7 }
  0x1a   : > { %p759_p10 = scmp.ne.s32.totalorder (!%p282_p8), %s943_s17, 0 }
  0x1d   : > { %s1129_s6 = smov (!%p339_p9, %s756_s6), 143  ;;  %374 = sbr.rel (%p759_p10) target bundleno = 43 (0x2b), region = 81 }
  0x1e   : > { %s837_s8 = sshll.u32 %s1129_s6, 3 }
  0x1f   : > { %s1031_s11 = scalar_lea.vmem %s1118_s1, %s837_s8 }
  0x22   : > { %v953_v4 = vmov 0.0  }
  0x23   : > { %375 = vst [vmem:[#allocation2 + $0x30] sm:$0xff] %v953_v4 }
  0x24   : > { %376 = vst [vmem:[#allocation2] sm:$0xff] %v953_v4 }
  0x25   : > { %377 = vst [vmem:[#allocation2 + $0x18] sm:$0xff] %v953_v4 }
  0x26   : > { %378 = vst [vmem:[#allocation2 + $0x10] sm:$0xff] %v953_v4 }
  0x27   : > { %379 = vst [vmem:[#allocation2 + $0x8] sm:$0xff] %v953_v4 }
  0x28   : > { %380 = vst [vmem:[#allocation2 + $0x20] sm:$0xff] %v953_v4 }
  0x29   : > { %381 = vst [vmem:[#allocation2 + $0x28] sm:$0xff] %v953_v4 }
  0x2a   : > { %382 = vst [vmem:[#allocation2 + $0x38] sm:$0xff] %v953_v4 }
  0x2b PF: > { %v826_v5 = vld [vmem:[%s1031_s11 + $0x70] sm:$0xf]  ;;  %v855_v6 = vld [vmem:[%s1031_s11 + $0x74] sm:$0xf0]  ;;  %v854_v7 = vld [vmem:[%s1031_s11 + $0x74] sm:$0xf] }
  0x2c   : > { %v827_v8 = vor.u32 %v855_v6, %v826_v5  ;;  %v828_v9 = vld [vmem:[%s1031_s11 + $0x78] sm:$0xf0]  ;;  %v818_v10 = vld [vmem:[%s1031_s11 + $0x60] sm:$0xf]  ;;  %v853_v11 = vld [vmem:[%s1031_s11 + $0x64] sm:$0xf0] }
  0x2d   : > { %v831_v12 = vor.u32 %v854_v7, %v828_v9  ;;  %v852_v13 = vld [vmem:[%s1031_s11 + $0x64] sm:$0xf]  ;;  %v820_v14 = vld [vmem:[%s1031_s11 + $0x68] sm:$0xf0]  ;;  %v819_v15 = vor.u32 %v853_v11, %v818_v10  ;;  %v810_v17 = vld [vmem:[%s1031_s11 + $0x50] sm:$0xf] }
  0x2e   : > { %503 = vmatpush.bf16.msra.mxu0 %v827_v8  ;;  %856 = vmatpush.bf16.msra.mxu2 %v827_v8  ;;  %v823_v16 = vor.u32 %v852_v13, %v820_v14  ;;  %v851_v18 = vld [vmem:[%s1031_s11 + $0x54] sm:$0xf0]  ;;  %v850_v19 = vld [vmem:[%s1031_s11 + $0x54] sm:$0xf]  ;;  %v812_v20 = vld [vmem:[%s1031_s11 + $0x58] sm:$0xf0] }
  0x2f   : > { %522 = vmatpush.bf16.msra.mxu1 %v831_v12  ;;  %864 = vmatpush.bf16.msra.mxu3 %v831_v12  ;;  %v811_v21 = vor.u32 %v851_v18, %v810_v17  ;;  %v815_v22 = vor.u32 %v850_v19, %v812_v20  ;;  %v802_v23 = vld [vmem:[%s1031_s11 + $0x40] sm:$0xf]  ;;  %v849_v24 = vld [vmem:[%s1031_s11 + $0x44] sm:$0xf0]  ;;  %v848_v25 = vld [vmem:[%s1031_s11 + $0x44] sm:$0xf] }
  0x30   : > { %v804_v26 = vld [vmem:[%s1031_s11 + $0x48] sm:$0xf0]  ;;  %v803_v27 = vor.u32 %v849_v24, %v802_v23  ;;  %v794_v29 = vld [vmem:[%s1031_s11 + $0x30] sm:$0xf]  ;;  %v847_v30 = vld [vmem:[%s1031_s11 + $0x34] sm:$0xf0] }
  0x31   : > { %v807_v28 = vor.u32 %v848_v25, %v804_v26  ;;  %v846_v31 = vld [vmem:[%s1031_s11 + $0x34] sm:$0xf]  ;;  %v796_v32 = vld [vmem:[%s1031_s11 + $0x38] sm:$0xf0]  ;;  %v795_v33 = vor.u32 %v847_v30, %v794_v29  ;;  %v786_v35 = vld [vmem:[%s1031_s11 + $0x20] sm:$0xf] }
  0x32   : > { %504 = vmatpush.bf16.msra.mxu0 %v819_v15  ;;  %857 = vmatpush.bf16.msra.mxu2 %v819_v15  ;;  %v799_v34 = vor.u32 %v846_v31, %v796_v32  ;;  %v845_v36 = vld [vmem:[%s1031_s11 + $0x24] sm:$0xf0]  ;;  %v844_v37 = vld [vmem:[%s1031_s11 + $0x24] sm:$0xf]  ;;  %v788_v38 = vld [vmem:[%s1031_s11 + $0x28] sm:$0xf0] }
  0x33   : > { %523 = vmatpush.bf16.msra.mxu1 %v823_v16  ;;  %865 = vmatpush.bf16.msra.mxu3 %v823_v16  ;;  %v787_v39 = vor.u32 %v845_v36, %v786_v35  ;;  %v791_v40 = vor.u32 %v844_v37, %v788_v38  ;;  %v778_v41 = vld [vmem:[%s1031_s11 + $0x10] sm:$0xf]  ;;  %v843_v42 = vld [vmem:[%s1031_s11 + $0x14] sm:$0xf0]  ;;  %v842_v43 = vld [vmem:[%s1031_s11 + $0x14] sm:$0xf] }
  0x34   : > { %v780_v44 = vld [vmem:[%s1031_s11 + $0x18] sm:$0xf0]  ;;  %v779_v45 = vor.u32 %v843_v42, %v778_v41  ;;  %v770_v47 = vld [vmem:[%s1031_s11] sm:$0xf]  ;;  %v841_v48 = vld [vmem:[%s1031_s11 + $0x4] sm:$0xf0] }
  0x35   : > { %v783_v46 = vor.u32 %v842_v43, %v780_v44  ;;  %v840_v49 = vld [vmem:[%s1031_s11 + $0x4] sm:$0xf]  ;;  %v772_v50 = vld [vmem:[%s1031_s11 + $0x8] sm:$0xf0]  ;;  %v771_v51 = vor.u32 %v841_v48, %v770_v47  ;;  %v383_v55 = vld [vmem:[#allocation2 + $0x30] sm:$0xff]  ;;  %p832_p11 = scmp.ne.s32.totalorder %s943_s17, 8 }
  0x36   : > { %505 = vmatpush.bf16.msra.mxu0 %v811_v21  ;;  %858 = vmatpush.bf16.msra.mxu2 %v811_v21  ;;  %v775_v52 = vor.u32 %v840_v49, %v772_v50  ;;  %v838_v53 = vld [vmem:[%s290_s12] sm:$0xff]  ;;  %v839_v54 = vld [vmem:[%s290_s12 + $0x8] sm:$0xff] }
  0x37   : > { %524 = vmatpush.bf16.msra.mxu1 %v815_v22  ;;  %866 = vmatpush.bf16.msra.mxu3 %v815_v22  ;;  %v384_v56 = vld [vmem:[#allocation2] sm:$0xff]  ;;  %v387_v61 = vld [vmem:[#allocation2 + $0x8] sm:$0xff]  ;;  %v385_v0 = vld [vmem:[#allocation2 + $0x18] sm:$0xff] }
  0x38   : > { %v388_v62 = vld [vmem:[#allocation2 + $0x20] sm:$0xff]  ;;  %v386_v3 = vld [vmem:[#allocation2 + $0x10] sm:$0xff]  ;;  %v389_v9 = vld [vmem:[#allocation2 + $0x28] sm:$0xff] }
  0x39   : > { %v390_v10 = vld [vmem:[#allocation2 + $0x38] sm:$0xff] }
  0x3a   : > { %506 = vmatpush.bf16.msra.mxu0 %v803_v27  ;;  %859 = vmatpush.bf16.msra.mxu2 %v803_v27 }
  0x3b   : > { %525 = vmatpush.bf16.msra.mxu1 %v807_v28  ;;  %867 = vmatpush.bf16.msra.mxu3 %v807_v28 }
  0x3e   : > { %507 = vmatpush.bf16.msra.mxu0 %v795_v33  ;;  %860 = vmatpush.bf16.msra.mxu2 %v795_v33 }
  0x3f   : > { %526 = vmatpush.bf16.msra.mxu1 %v799_v34  ;;  %868 = vmatpush.bf16.msra.mxu3 %v799_v34 }
  0x42   : > { %508 = vmatpush.bf16.msra.mxu0 %v787_v39  ;;  %861 = vmatpush.bf16.msra.mxu2 %v787_v39 }
  0x43   : > { %527 = vmatpush.bf16.msra.mxu1 %v791_v40  ;;  %869 = vmatpush.bf16.msra.mxu3 %v791_v40 }
  0x46   : > { %509 = vmatpush.bf16.msra.mxu0 %v779_v45  ;;  %862 = vmatpush.bf16.msra.mxu2 %v779_v45 }
  0x47   : > { %528 = vmatpush.bf16.msra.mxu1 %v783_v46  ;;  %870 = vmatpush.bf16.msra.mxu3 %v783_v46 }
  0x4a   : > { %510 = vmatpush.bf16.msra.mxu0 %v771_v51  ;;  %863 = vmatpush.bf16.msra.mxu2 %v771_v51 }
  0x4b   : > { %529 = vmatpush.bf16.msra.mxu1 %v775_v52  ;;  %871 = vmatpush.bf16.msra.mxu3 %v775_v52 }
  0x4d   : > { %511 = vmatmul.bf16.vlgmr.msra.gmra.mxu0 %v838_v53  ;;  %516 = vmatmul.bf16.vlgmr.msra.gmra.mxu2 %v839_v54 }
  0x4e   : > { %530 = vmatmul.bf16.vlgmr.msra.gmra.mxu1 %v838_v53  ;;  %535 = vmatmul.bf16.vlgmr.msra.gmra.mxu3 %v839_v54 }
  0xca   : > { %v512_v57 = vpop.f32.mrf.mxu0 }
  0xcb   : > { %v541_v58 = vadd.f32 %v512_v57, %v383_v55  ;;  %v531_v59 = vpop.f32.mrf.mxu1 }
  0xcc   : > { %v542_v60 = vadd.f32 %v531_v59, %v384_v56 }
  0xcd   : > { %549 = vst [vmem:[#allocation2 + $0x30] sm:$0xff] %v541_v58 }
  0xce   : > { %550 = vst [vmem:[#allocation2] sm:$0xff] %v542_v60 }
  0xd0   : > { %v517_v63 = vpop.f32.mrf.mxu2 }
  0xd1   : > { %v545_v1 = vadd.f32 %v517_v63, %v387_v61  ;;  %v536_v2 = vpop.f32.mrf.mxu3 }
  0xd2   : > { %v546_v4 = vadd.f32 %v536_v2, %v388_v62  ;;  %v514_v5 = vpop.f32.mrf.mxu0 }
  0xd3   : > { %553 = vst [vmem:[#allocation2 + $0x8] sm:$0xff] %v545_v1  ;;  %v543_v6 = vadd.f32 %v514_v5, %v385_v0  ;;  %v533_v7 = vpop.f32.mrf.mxu1 }
  0xd4   : > { %554 = vst [vmem:[#allocation2 + $0x20] sm:$0xff] %v546_v4  ;;  %v544_v8 = vadd.f32 %v533_v7, %v386_v3 }
  0xd5   : > { %551 = vst [vmem:[#allocation2 + $0x18] sm:$0xff] %v543_v6 }
  0xd6   : > { %552 = vst [vmem:[#allocation2 + $0x10] sm:$0xff] %v544_v8 }
  0xd8   : > { %v519_v11 = vpop.f32.mrf.mxu2  ;;  %560 = sbr.rel (%p832_p11) target bundleno = 238 (0xee), region = 85 }
  0xd9   : > { %v547_v12 = vadd.f32 %v519_v11, %v389_v9  ;;  %v538_v13 = vpop.f32.mrf.mxu3 }
  0xda   : > { %v548_v14 = vadd.f32 %v538_v13, %v390_v10 }
  0xdb   : > { %555 = vst [vmem:[#allocation2 + $0x28] sm:$0xff] %v547_v12 }
  0xdc   : > { %556 = vst [vmem:[#allocation2 + $0x38] sm:$0xff] %v548_v14 }
  0xdd   : > { %v561_v15 = vld [vmem:[#allocation2 + $0x30] sm:$0xff]  ;;  %v569_v16 = vld [vmem:[%s1119_s2] sm:$0x3]  ;;  %v563_v23 = vld [vmem:[#allocation2 + $0x18] sm:$0xff] }
  0xde   : > { %v583_v17 = vld [vmem:[%s1120_s3] sm:$0x3]  ;;  %v571_v18 = vperm.slane %v569_v16, 0  ;;  %v572_v21 = vperm.slane %v569_v16, 1  ;;  %v564_v24 = vld [vmem:[#allocation2 + $0x10] sm:$0xff]  ;;  %v565_v25 = vld [vmem:[#allocation2 + $0x8] sm:$0xff] }
  0xdf   : > { %v585_v19 = vperm.slane %v583_v17, 0  ;;  %v562_v20 = vld [vmem:[#allocation2] sm:$0xff]  ;;  %v586_v22 = vperm.slane %v583_v17, 1 }
  0xe0   : > { %v566_v26 = vld [vmem:[#allocation2 + $0x20] sm:$0xff]  ;;  %v575_v27 = vmul.f32 %v571_v18, %v561_v15  ;;  %v576_v28 = vmul.f32 %v572_v21, %v562_v20  ;;  %v577_v29 = vmul.f32 %v571_v18, %v563_v23  ;;  %v578_v30 = vmul.f32 %v572_v21, %v564_v24 }
  0xe1   : > { %v579_v33 = vmul.f32 %v571_v18, %v565_v25  ;;  %v580_v34 = vmul.f32 %v572_v21, %v566_v26 }
  0xe2   : > { %v567_v31 = vld [vmem:[#allocation2 + $0x28] sm:$0xff]  ;;  %v589_v37 = vadd.f32 %v585_v19, %v575_v27  ;;  %v590_v38 = vadd.f32 %v586_v22, %v576_v28  ;;  %v591_v39 = vadd.f32 %v585_v19, %v577_v29  ;;  %v592_v40 = vadd.f32 %v586_v22, %v578_v30 }
  0xe3   : > { %v568_v32 = vld [vmem:[#allocation2 + $0x38] sm:$0xff]  ;;  %v581_v35 = vmul.f32 %v571_v18, %v567_v31  ;;  %v593_v41 = vadd.f32 %v585_v19, %v579_v33  ;;  %v594_v42 = vadd.f32 %v586_v22, %v580_v34 }
  0xe4   : > { %v582_v36 = vmul.f32 %v572_v21, %v568_v32  ;;  %v597_v43 = vmax.f32 %v589_v37, 0.0  ;;  %v598_v44 = vmax.f32 %v590_v38, 0.0  ;;  %v599_v45 = vmax.f32 %v591_v39, 0.0 }
  0xe5   : > { %v595_v46 = vadd.f32 %v585_v19, %v581_v35  ;;  %v600_v47 = vmax.f32 %v592_v40, 0.0  ;;  %v601_v49 = vmax.f32 %v593_v41, 0.0  ;;  %v602_v50 = vmax.f32 %v594_v42, 0.0 }
  0xe6   : > { %v596_v48 = vadd.f32 %v586_v22, %v582_v36  ;;  %605 = vst [vmem:[%s1121_s4] sm:$0xff] %v597_v43 }
  0xe7   : > { %606 = vst [vmem:[%s1121_s4 + $0x8] sm:$0xff] %v598_v44  ;;  %v603_v51 = vmax.f32 %v595_v46, 0.0 }
  0xe8   : > { %607 = vst [vmem:[%s1121_s4 + $0x10] sm:$0xff] %v599_v45  ;;  %v604_v52 = vmax.f32 %v596_v48, 0.0 }
  0xe9   : > { %608 = vst [vmem:[%s1121_s4 + $0x18] sm:$0xff] %v600_v47 }
  0xea   : > { %609 = vst [vmem:[%s1121_s4 + $0x20] sm:$0xff] %v601_v49 }
  0xeb   : > { %610 = vst [vmem:[%s1121_s4 + $0x28] sm:$0xff] %v602_v50 }
  0xec   : > { %611 = vst [vmem:[%s1121_s4 + $0x30] sm:$0xff] %v603_v51 }
  0xed   : > { %612 = vst [vmem:[%s1121_s4 + $0x38] sm:$0xff] %v604_v52 }
  0xee PF: > { %s14_s19 = sadd.s32 1, %s951_s19   ;;  %s1122_s15 = smov %s939_s16 }
  0xef   : > { %p11_p12 = scmp.ge.s32.totalorder %s14_s19, 11   ;;  %s1123_s16 = smov %s1014_s23 }
  0xf0   : > { %s1124_s17 = smov %s947_s18  ;;  %s1125_s18 = smov %s1127_s20 }
  0xf1   :  { %13 = sbr.rel (!%p11_p12) target bundleno = 3 (0x3), region = 129 }

// kernel: _lambda_.19
= control target key start
LH: loop header
LB: loop body
LE: loop exit
PB: predicated region body
PF: predicated region fallthrough
CT: control target
= control target key end

     0   :  { %s517_s1 = inlined_call_operand.vmem [shape: bf16[128,256], index: 1, kind: input, shape index: {}]   ;;  %s518_s0 = inlined_call_operand.vmem [shape: bf16[32,128], index: 0, kind: input, shape index: {}]   ;;  %s519_s2 = inlined_call_operand.vmem [shape: f32[1,256], index: 2, kind: input, shape index: {}]   ;;  %s520_s3 = inlined_call_operand.vmem [shape: f32[1,256], index: 3, kind: input, shape index: {}]   ;;  %s521_s4 = inlined_call_operand.vmem [shape: f32[32,256], index: 4, kind: output, shape index: {}]  }
   0x1   :  { %v320_v0 = vld [vmem:[%s517_s1 + $0x70] sm:$0xf]  ;;  %v343_v1 = vld [vmem:[%s517_s1 + $0x74] sm:$0xf0]  ;;  %v342_v2 = vld [vmem:[%s517_s1 + $0x74] sm:$0xf] }
   0x2   :  { %v321_v3 = vor.u32 %v343_v1, %v320_v0  ;;  %v322_v4 = vld [vmem:[%s517_s1 + $0x78] sm:$0xf0]  ;;  %v312_v5 = vld [vmem:[%s517_s1 + $0x60] sm:$0xf]  ;;  %v341_v6 = vld [vmem:[%s517_s1 + $0x64] sm:$0xf0] }
   0x3   :  { %v325_v7 = vor.u32 %v342_v2, %v322_v4  ;;  %v340_v8 = vld [vmem:[%s517_s1 + $0x64] sm:$0xf]  ;;  %v314_v9 = vld [vmem:[%s517_s1 + $0x68] sm:$0xf0]  ;;  %v313_v10 = vor.u32 %v341_v6, %v312_v5  ;;  %v304_v12 = vld [vmem:[%s517_s1 + $0x50] sm:$0xf] }
   0x4   :  { %149 = vmatpush.bf16.msra.mxu0 %v321_v3  ;;  %344 = vmatpush.bf16.msra.mxu2 %v321_v3  ;;  %v317_v11 = vor.u32 %v340_v8, %v314_v9  ;;  %v339_v13 = vld [vmem:[%s517_s1 + $0x54] sm:$0xf0]  ;;  %v338_v14 = vld [vmem:[%s517_s1 + $0x54] sm:$0xf]  ;;  %v306_v15 = vld [vmem:[%s517_s1 + $0x58] sm:$0xf0] }
   0x5   :  { %168 = vmatpush.bf16.msra.mxu1 %v325_v7  ;;  %352 = vmatpush.bf16.msra.mxu3 %v325_v7  ;;  %v305_v16 = vor.u32 %v339_v13, %v304_v12  ;;  %v309_v17 = vor.u32 %v338_v14, %v306_v15  ;;  %v296_v18 = vld [vmem:[%s517_s1 + $0x40] sm:$0xf]  ;;  %v337_v19 = vld [vmem:[%s517_s1 + $0x44] sm:$0xf0]  ;;  %v336_v20 = vld [vmem:[%s517_s1 + $0x44] sm:$0xf] }
   0x6   :  { %v298_v21 = vld [vmem:[%s517_s1 + $0x48] sm:$0xf0]  ;;  %v297_v22 = vor.u32 %v337_v19, %v296_v18  ;;  %v288_v24 = vld [vmem:[%s517_s1 + $0x30] sm:$0xf]  ;;  %v335_v25 = vld [vmem:[%s517_s1 + $0x34] sm:$0xf0] }
   0x7   :  { %v301_v23 = vor.u32 %v336_v20, %v298_v21  ;;  %v334_v26 = vld [vmem:[%s517_s1 + $0x34] sm:$0xf]  ;;  %v290_v27 = vld [vmem:[%s517_s1 + $0x38] sm:$0xf0]  ;;  %v289_v28 = vor.u32 %v335_v25, %v288_v24  ;;  %v280_v30 = vld [vmem:[%s517_s1 + $0x20] sm:$0xf] }
   0x8   :  { %150 = vmatpush.bf16.msra.mxu0 %v313_v10  ;;  %345 = vmatpush.bf16.msra.mxu2 %v313_v10  ;;  %v293_v29 = vor.u32 %v334_v26, %v290_v27  ;;  %v333_v31 = vld [vmem:[%s517_s1 + $0x24] sm:$0xf0]  ;;  %v332_v32 = vld [vmem:[%s517_s1 + $0x24] sm:$0xf]  ;;  %v282_v33 = vld [vmem:[%s517_s1 + $0x28] sm:$0xf0] }
   0x9   :  { %169 = vmatpush.bf16.msra.mxu1 %v317_v11  ;;  %353 = vmatpush.bf16.msra.mxu3 %v317_v11  ;;  %v281_v34 = vor.u32 %v333_v31, %v280_v30  ;;  %v285_v35 = vor.u32 %v332_v32, %v282_v33  ;;  %v272_v36 = vld [vmem:[%s517_s1 + $0x10] sm:$0xf]  ;;  %v331_v37 = vld [vmem:[%s517_s1 + $0x14] sm:$0xf0]  ;;  %v330_v38 = vld [vmem:[%s517_s1 + $0x14] sm:$0xf] }
   0xa   :  { %v274_v39 = vld [vmem:[%s517_s1 + $0x18] sm:$0xf0]  ;;  %v273_v40 = vor.u32 %v331_v37, %v272_v36  ;;  %v264_v42 = vld [vmem:[%s517_s1] sm:$0xf]  ;;  %v329_v43 = vld [vmem:[%s517_s1 + $0x4] sm:$0xf0] }
   0xb   :  { %v277_v41 = vor.u32 %v330_v38, %v274_v39  ;;  %v328_v44 = vld [vmem:[%s517_s1 + $0x4] sm:$0xf]  ;;  %v266_v45 = vld [vmem:[%s517_s1 + $0x8] sm:$0xf0]  ;;  %v265_v46 = vor.u32 %v329_v43, %v264_v42  ;;  %v214_v50 = vld [vmem:[%s519_s2] sm:$0x3] }
   0xc   :  { %151 = vmatpush.bf16.msra.mxu0 %v305_v16  ;;  %346 = vmatpush.bf16.msra.mxu2 %v305_v16  ;;  %v269_v47 = vor.u32 %v328_v44, %v266_v45  ;;  %v326_v48 = vld [vmem:[%s518_s0] sm:$0xff]  ;;  %v327_v49 = vld [vmem:[%s518_s0 + $0x8] sm:$0xff]  ;;  %v216_v52 = vperm.slane %v214_v50, 0  ;;  %v217_v53 = vperm.slane %v214_v50, 1 }
   0xd   :  { %170 = vmatpush.bf16.msra.mxu1 %v309_v17  ;;  %354 = vmatpush.bf16.msra.mxu3 %v309_v17  ;;  %v228_v51 = vld [vmem:[%s520_s3] sm:$0x3] }
   0xe   :  { %v230_v54 = vperm.slane %v228_v51, 0  ;;  %v231_v56 = vperm.slane %v228_v51, 1 }
  0x10   :  { %152 = vmatpush.bf16.msra.mxu0 %v297_v22  ;;  %347 = vmatpush.bf16.msra.mxu2 %v297_v22 }
  0x11   :  { %171 = vmatpush.bf16.msra.mxu1 %v301_v23  ;;  %355 = vmatpush.bf16.msra.mxu3 %v301_v23 }
  0x14   :  { %153 = vmatpush.bf16.msra.mxu0 %v289_v28  ;;  %348 = vmatpush.bf16.msra.mxu2 %v289_v28 }
  0x15   :  { %172 = vmatpush.bf16.msra.mxu1 %v293_v29  ;;  %356 = vmatpush.bf16.msra.mxu3 %v293_v29 }
  0x18   :  { %154 = vmatpush.bf16.msra.mxu0 %v281_v34  ;;  %349 = vmatpush.bf16.msra.mxu2 %v281_v34 }
  0x19   :  { %173 = vmatpush.bf16.msra.mxu1 %v285_v35  ;;  %357 = vmatpush.bf16.msra.mxu3 %v285_v35 }
  0x1c   :  { %155 = vmatpush.bf16.msra.mxu0 %v273_v40  ;;  %350 = vmatpush.bf16.msra.mxu2 %v273_v40 }
  0x1d   :  { %174 = vmatpush.bf16.msra.mxu1 %v277_v41  ;;  %358 = vmatpush.bf16.msra.mxu3 %v277_v41 }
  0x20   :  { %156 = vmatpush.bf16.msra.mxu0 %v265_v46  ;;  %351 = vmatpush.bf16.msra.mxu2 %v265_v46 }
  0x21   :  { %175 = vmatpush.bf16.msra.mxu1 %v269_v47  ;;  %359 = vmatpush.bf16.msra.mxu3 %v269_v47 }
  0x23   :  { %157 = vmatmul.bf16.vlgmr.msra.gmra.mxu0 %v326_v48  ;;  %162 = vmatmul.bf16.vlgmr.msra.gmra.mxu2 %v327_v49 }
  0x24   :  { %176 = vmatmul.bf16.vlgmr.msra.gmra.mxu1 %v326_v48  ;;  %181 = vmatmul.bf16.vlgmr.msra.gmra.mxu3 %v327_v49 }
  0xa0   :  { %v158_v55 = vpop.f32.mrf.mxu0 }
  0xa1   :  { %v220_v57 = vmul.f32 %v216_v52, %v158_v55  ;;  %v177_v58 = vpop.f32.mrf.mxu1 }
  0xa2   :  { %v221_v59 = vmul.f32 %v217_v53, %v177_v58 }
  0xa3   :  { %v234_v60 = vadd.f32 %v230_v54, %v220_v57 }
  0xa4   :  { %v235_v61 = vadd.f32 %v231_v56, %v221_v59 }
  0xa5   :  { %242 = vst [vmem:[%s521_s4] sm:$0xff] %v234_v60 }
  0xa6   :  { %243 = vst [vmem:[%s521_s4 + $0x8] sm:$0xff] %v235_v61  ;;  %v163_v62 = vpop.f32.mrf.mxu2 }
  0xa7   :  { %v224_v63 = vmul.f32 %v216_v52, %v163_v62  ;;  %v182_v0 = vpop.f32.mrf.mxu3 }
  0xa8   :  { %v225_v1 = vmul.f32 %v217_v53, %v182_v0  ;;  %v160_v2 = vpop.f32.mrf.mxu0 }
  0xa9   :  { %v238_v3 = vadd.f32 %v230_v54, %v224_v63  ;;  %v222_v4 = vmul.f32 %v216_v52, %v160_v2  ;;  %v179_v5 = vpop.f32.mrf.mxu1 }
  0xaa   :  { %v239_v6 = vadd.f32 %v231_v56, %v225_v1  ;;  %v223_v7 = vmul.f32 %v217_v53, %v179_v5 }
  0xab   :  { %246 = vst [vmem:[%s521_s4 + $0x20] sm:$0xff] %v238_v3  ;;  %v236_v8 = vadd.f32 %v230_v54, %v222_v4 }
  0xac   :  { %247 = vst [vmem:[%s521_s4 + $0x28] sm:$0xff] %v239_v6  ;;  %v237_v9 = vadd.f32 %v231_v56, %v223_v7 }
  0xad   :  { %244 = vst [vmem:[%s521_s4 + $0x10] sm:$0xff] %v236_v8 }
  0xae   :  { %245 = vst [vmem:[%s521_s4 + $0x18] sm:$0xff] %v237_v9  ;;  %v165_v10 = vpop.f32.mrf.mxu2 }
  0xaf   :  { %v226_v11 = vmul.f32 %v216_v52, %v165_v10  ;;  %v184_v12 = vpop.f32.mrf.mxu3 }
  0xb0   :  { %v227_v13 = vmul.f32 %v217_v53, %v184_v12 }
  0xb1   :  { %v240_v14 = vadd.f32 %v230_v54, %v226_v11 }
  0xb2   :  { %v241_v15 = vadd.f32 %v231_v56, %v227_v13 }
  0xb3   :  { %248 = vst [vmem:[%s521_s4 + $0x30] sm:$0xff] %v240_v14 }
  0xb4   :  { %249 = vst [vmem:[%s521_s4 + $0x38] sm:$0xff] %v241_v15 }

// kernel: _lambda_.21
= control target key start
LH: loop header
LB: loop body
LE: loop exit
PB: predicated region body
PF: predicated region fallthrough
CT: control target
= control target key end

     0   :  { %s1303_s18 = smov 0   ;;  %s1305_s19 = smov 0   ;;  %s1500_s0 = inlined_call_operand.vmem [shape: bf16[32,2304], index: 0, kind: input, shape index: {}]   ;;  %s1501_s1 = inlined_call_operand.vmem [shape: bf16[2304,256], index: 1, kind: input, shape index: {}]   ;;  %s1502_s2 = inlined_call_operand.vmem [shape: f32[1,256], index: 2, kind: input, shape index: {}]   ;;  %s1503_s3 = inlined_call_operand.vmem [shape: f32[1,256], index: 3, kind: input, shape index: {}]   ;;  %s1504_s4 = inlined_call_operand.vmem [shape: f32[32,256], index: 4, kind: input, shape index: {}]   ;;  %s1505_s5 = inlined_call_operand.vmem [shape: f32[32,256], index: 5, kind: output, shape index: {}]  }
   0x1   :  { %s1307_s20 = smov 0   ;;  %s1309_s21 = smov 0  }
   0x2   :  { %s1311_s22 = smov 0  }
   0x3 LB: > { %s27_s23 = sadd.s32 1, %s1266_s21  ;;  %p50_p1 = scmp.ne.s32.totalorder %s1258_s19, %s1254_s18  ;;  %s1270_s22 = sphi %s1311_s22, %s15_s22   ;;  %s1266_s21 = sphi %s1309_s21, %s1509_s21   ;;  %s1262_s20 = sphi %s1307_s20, %s1508_s20   ;;  %s1258_s19 = sphi %s1305_s19, %s1507_s19   ;;  %s1254_s18 = sphi %s1303_s18, %s1506_s18  }
   0x4   : > { %p28_p0 = scmp.ge.s32.totalorder %s27_s23, 9  ;;  %p51_p2 = scmp.eq.s32.totalorder %s1270_s22, 0 }
   0x5   : > { %s43_s25 = sadd.s32 1, %s1258_s19  ;;  %p994_p5 = scmp.ge.s32.totalorder %s1270_s22, 9 }
   0x6   : > { %s1511_s23 = smov (%p28_p0, %s27_s23), 0  ;;  %p52_p3 = por %p51_p2, %p50_p1 }
   0x7   : > { %s39_s24 = ssub.s32 %s1266_s21, %s1511_s23  ;;  %243 = sbr.rel (%p994_p5) target bundleno = 20 (0x14), region = 28 }
   0x8   : > { %p41_p4 = scmp.eq.s32.totalorder %s39_s24, 0 }
   0xa   : > { %s1338_s26 = scalar_select %p41_p4, %s1258_s19, %s43_s25  }
   0xc   : > { %246 = sbr.rel (!%p52_p3) target bundleno = 20 (0x14), region = 32  ;;  %s248_s27 = sand.u32 (%p52_p3), 1, %s1258_s19  }
   0xd   : > { %s1153_s28 = sshll.u32 (%p52_p3), %s1266_s21, 3  ;;  %s995_s29 = sshll.u32 (%p52_p3), %s248_s27, 5 }
   0xe   : > { %s256_s7 = scalar_lea.vmem (%p52_p3), %s1500_s0, %s1153_s28  ;;  %s250_s8 = scalar_lea.vmem (%p52_p3), [#allocation3], %s995_s29 }
   0xf   : > { %v291_v0 = vld [vmem:[%s256_s7] sm:$0xff] (%p52_p3)  ;;  %v293_v1 = vld [vmem:[%s256_s7 + $0x48] sm:$0xff] (%p52_p3)  ;;  %v295_v2 = vld [vmem:[%s256_s7 + $0x90] sm:$0xff] (%p52_p3) }
  0x10   : > { %292 = vst [vmem:[%s250_s8] sm:$0xff] (%p52_p3), %v291_v0  ;;  %v297_v3 = vld [vmem:[%s256_s7 + $0xd8] sm:$0xff] (%p52_p3) }
  0x11   : > { %294 = vst [vmem:[%s250_s8 + $0x8] sm:$0xff] %v293_v1 }
  0x12   : > { %296 = vst [vmem:[%s250_s8 + $0x10] sm:$0xff] %v295_v2 }
  0x13   : > { %298 = vst [vmem:[%s250_s8 + $0x18] sm:$0xff] %v297_v3 }
  0x14 PF: > { %p998_p6 = scmp.ge.s32.totalorder %s1270_s22, 1  ;;  %p318_p7 = scmp.lt.s32.totalorder %s1270_s22, 10 }
  0x16   : > { %p319_p8 = pnand %p998_p6, %p318_p7 }
  0x17   : > { %s325_s9 = sand.u32 (!%p319_p8), 1, %s1254_s18   ;;  %s1000_s10 = sshll.u32 (!%p319_p8), %s1262_s20, 5 }
  0x18   : > { %322 = sbr.rel (%p319_p8) target bundleno = 259 (0x103), region = 74  ;;  %s999_s11 = sshll.u32 (!%p319_p8), %s325_s9, 5 }
  0x19   : > { %p389_p9 = scmp.lt.s32.totalorder (!%p319_p8), %s1000_s10, 287  ;;  %s1355_s16 = scalar_lea.vmem (!%p319_p8), [#allocation3], %s999_s11 }
  0x1a   : > { %p1003_p10 = scmp.ne.s32.totalorder (!%p319_p8), %s1262_s20, 0 }
  0x1d   : > { %s1513_s10 = smov (!%p389_p9, %s1000_s10), 287  ;;  %436 = sbr.rel (%p1003_p10) target bundleno = 43 (0x2b), region = 82 }
  0x1e   : > { %s1154_s12 = sshll.u32 %s1513_s10, 3 }
  0x1f   : > { %s1353_s15 = scalar_lea.vmem %s1501_s1, %s1154_s12 }
  0x22   : > { %v1272_v4 = vmov 0.0  }
  0x23   : > { %437 = vst [vmem:[#allocation2 + $0x30] sm:$0xff] %v1272_v4 }
  0x24   : > { %438 = vst [vmem:[#allocation2] sm:$0xff] %v1272_v4 }
  0x25   : > { %439 = vst [vmem:[#allocation2 + $0x18] sm:$0xff] %v1272_v4 }
  0x26   : > { %440 = vst [vmem:[#allocation2 + $0x10] sm:$0xff] %v1272_v4 }
  0x27   : > { %441 = vst [vmem:[#allocation2 + $0x8] sm:$0xff] %v1272_v4 }
  0x28   : > { %442 = vst [vmem:[#allocation2 + $0x20] sm:$0xff] %v1272_v4 }
  0x29   : > { %443 = vst [vmem:[#allocation2 + $0x28] sm:$0xff] %v1272_v4 }
  0x2a   : > { %444 = vst [vmem:[#allocation2 + $0x38] sm:$0xff] %v1272_v4 }
  0x2b PF: > { %v1078_v5 = vld [vmem:[%s1353_s15 + $0x70] sm:$0xf]  ;;  %v1174_v6 = vld [vmem:[%s1353_s15 + $0x74] sm:$0xf0]  ;;  %v1173_v10 = vld [vmem:[%s1353_s15 + $0x74] sm:$0xf] }
  0x2c   : > { %v1142_v7 = vld [vmem:[%s1353_s15 + $0xf0] sm:$0xf]  ;;  %v1079_v8 = vor.u32 %v1174_v6, %v1078_v5  ;;  %v1190_v9 = vld [vmem:[%s1353_s15 + $0xf4] sm:$0xf0]  ;;  %v1080_v11 = vld [vmem:[%s1353_s15 + $0x78] sm:$0xf0] }
  0x2d   : > { %v1143_v12 = vor.u32 %v1190_v9, %v1142_v7  ;;  %v1083_v13 = vor.u32 %v1173_v10, %v1080_v11  ;;  %v1189_v14 = vld [vmem:[%s1353_s15 + $0xf4] sm:$0xf]  ;;  %v1144_v15 = vld [vmem:[%s1353_s15 + $0xf8] sm:$0xf0]  ;;  %v1070_v16 = vld [vmem:[%s1353_s15 + $0x60] sm:$0xf] }
  0x2e   : > { %669 = vmatpush.bf16.msra.mxu0 %v1079_v8  ;;  %v1147_v17 = vor.u32 %v1189_v14, %v1144_v15  ;;  %v1172_v18 = vld [vmem:[%s1353_s15 + $0x64] sm:$0xf0]  ;;  %v1134_v19 = vld [vmem:[%s1353_s15 + $0xe0] sm:$0xf]  ;;  %v1171_v23 = vld [vmem:[%s1353_s15 + $0x64] sm:$0xf] }
  0x2f   : > { %v1188_v20 = vld [vmem:[%s1353_s15 + $0xe4] sm:$0xf0]  ;;  %688 = vmatpush.bf16.msra.mxu1 %v1143_v12  ;;  %707 = vmatpush.bf16.msra.mxu2 %v1083_v13  ;;  %v1071_v21 = vor.u32 %v1172_v18, %v1070_v16  ;;  %v1072_v24 = vld [vmem:[%s1353_s15 + $0x68] sm:$0xf0]  ;;  %v1187_v25 = vld [vmem:[%s1353_s15 + $0xe4] sm:$0xf] }
  0x30   : > { %v1135_v22 = vor.u32 %v1188_v20, %v1134_v19  ;;  %726 = vmatpush.bf16.msra.mxu3 %v1147_v17  ;;  %v1075_v26 = vor.u32 %v1171_v23, %v1072_v24  ;;  %v1136_v27 = vld [vmem:[%s1353_s15 + $0xe8] sm:$0xf0]  ;;  %v1062_v28 = vld [vmem:[%s1353_s15 + $0x50] sm:$0xf]  ;;  %v1170_v29 = vld [vmem:[%s1353_s15 + $0x54] sm:$0xf0] }
  0x31   : > { %v1139_v30 = vor.u32 %v1187_v25, %v1136_v27  ;;  %v1126_v31 = vld [vmem:[%s1353_s15 + $0xd0] sm:$0xf]  ;;  %v1186_v32 = vld [vmem:[%s1353_s15 + $0xd4] sm:$0xf0]  ;;  %v1169_v33 = vld [vmem:[%s1353_s15 + $0x54] sm:$0xf]  ;;  %v1063_v34 = vor.u32 %v1170_v29, %v1062_v28 }
  0x32   : > { %670 = vmatpush.bf16.msra.mxu0 %v1071_v21  ;;  %v1064_v35 = vld [vmem:[%s1353_s15 + $0x58] sm:$0xf0]  ;;  %v1185_v36 = vld [vmem:[%s1353_s15 + $0xd4] sm:$0xf]  ;;  %v1127_v38 = vor.u32 %v1186_v32, %v1126_v31  ;;  %v1054_v40 = vld [vmem:[%s1353_s15 + $0x40] sm:$0xf] }
  0x33   : > { %v1128_v37 = vld [vmem:[%s1353_s15 + $0xd8] sm:$0xf0]  ;;  %689 = vmatpush.bf16.msra.mxu1 %v1135_v22  ;;  %708 = vmatpush.bf16.msra.mxu2 %v1075_v26  ;;  %v1067_v39 = vor.u32 %v1169_v33, %v1064_v35  ;;  %v1168_v41 = vld [vmem:[%s1353_s15 + $0x44] sm:$0xf0]  ;;  %v1118_v42 = vld [vmem:[%s1353_s15 + $0xc0] sm:$0xf] }
  0x34   : > { %727 = vmatpush.bf16.msra.mxu3 %v1139_v30  ;;  %v1131_v43 = vor.u32 %v1185_v36, %v1128_v37  ;;  %v1184_v44 = vld [vmem:[%s1353_s15 + $0xc4] sm:$0xf0]  ;;  %v1167_v45 = vld [vmem:[%s1353_s15 + $0x44] sm:$0xf]  ;;  %v1056_v46 = vld [vmem:[%s1353_s15 + $0x48] sm:$0xf0]  ;;  %v1055_v49 = vor.u32 %v1168_v41, %v1054_v40 }
  0x35   : > { %v1183_v47 = vld [vmem:[%s1353_s15 + $0xc4] sm:$0xf]  ;;  %v1120_v48 = vld [vmem:[%s1353_s15 + $0xc8] sm:$0xf0]  ;;  %v1119_v50 = vor.u32 %v1184_v44, %v1118_v42  ;;  %v1059_v51 = vor.u32 %v1167_v45, %v1056_v46  ;;  %v1046_v52 = vld [vmem:[%s1353_s15 + $0x30] sm:$0xf] }
  0x36   : > { %671 = vmatpush.bf16.msra.mxu0 %v1063_v34  ;;  %v1166_v53 = vld [vmem:[%s1353_s15 + $0x34] sm:$0xf0]  ;;  %v1110_v54 = vld [vmem:[%s1353_s15 + $0xb0] sm:$0xf]  ;;  %v1123_v55 = vor.u32 %v1183_v47, %v1120_v48  ;;  %v1165_v57 = vld [vmem:[%s1353_s15 + $0x34] sm:$0xf] }
  0x37   : > { %690 = vmatpush.bf16.msra.mxu1 %v1127_v38  ;;  %709 = vmatpush.bf16.msra.mxu2 %v1067_v39  ;;  %v1182_v56 = vld [vmem:[%s1353_s15 + $0xb4] sm:$0xf0]  ;;  %v1048_v58 = vld [vmem:[%s1353_s15 + $0x38] sm:$0xf0]  ;;  %v1181_v59 = vld [vmem:[%s1353_s15 + $0xb4] sm:$0xf]  ;;  %v1047_v61 = vor.u32 %v1166_v53, %v1046_v52 }
  0x38   : > { %728 = vmatpush.bf16.msra.mxu3 %v1131_v43  ;;  %v1112_v60 = vld [vmem:[%s1353_s15 + $0xb8] sm:$0xf0]  ;;  %v1111_v62 = vor.u32 %v1182_v56, %v1110_v54  ;;  %v1051_v63 = vor.u32 %v1165_v57, %v1048_v58  ;;  %v1038_v0 = vld [vmem:[%s1353_s15 + $0x20] sm:$0xf]  ;;  %v1164_v1 = vld [vmem:[%s1353_s15 + $0x24] sm:$0xf0] }
  0x39   : > { %v1102_v2 = vld [vmem:[%s1353_s15 + $0xa0] sm:$0xf]  ;;  %v1115_v3 = vor.u32 %v1181_v59, %v1112_v60  ;;  %v1180_v4 = vld [vmem:[%s1353_s15 + $0xa4] sm:$0xf0]  ;;  %v1163_v5 = vld [vmem:[%s1353_s15 + $0x24] sm:$0xf]  ;;  %v1039_v9 = vor.u32 %v1164_v1, %v1038_v0 }
  0x3a   : > { %672 = vmatpush.bf16.msra.mxu0 %v1055_v49  ;;  %v1040_v6 = vld [vmem:[%s1353_s15 + $0x28] sm:$0xf0]  ;;  %v1179_v7 = vld [vmem:[%s1353_s15 + $0xa4] sm:$0xf]  ;;  %v1103_v10 = vor.u32 %v1180_v4, %v1102_v2  ;;  %v1030_v12 = vld [vmem:[%s1353_s15 + $0x10] sm:$0xf] }
  0x3b   : > { %691 = vmatpush.bf16.msra.mxu1 %v1119_v50  ;;  %710 = vmatpush.bf16.msra.mxu2 %v1059_v51  ;;  %v1104_v8 = vld [vmem:[%s1353_s15 + $0xa8] sm:$0xf0]  ;;  %v1043_v11 = vor.u32 %v1163_v5, %v1040_v6  ;;  %v1162_v13 = vld [vmem:[%s1353_s15 + $0x14] sm:$0xf0]  ;;  %v1094_v14 = vld [vmem:[%s1353_s15 + $0x90] sm:$0xf] }
  0x3c   : > { %729 = vmatpush.bf16.msra.mxu3 %v1123_v55  ;;  %v1107_v15 = vor.u32 %v1179_v7, %v1104_v8  ;;  %v1178_v16 = vld [vmem:[%s1353_s15 + $0x94] sm:$0xf0]  ;;  %v1161_v17 = vld [vmem:[%s1353_s15 + $0x14] sm:$0xf]  ;;  %v1032_v18 = vld [vmem:[%s1353_s15 + $0x18] sm:$0xf0]  ;;  %v1031_v21 = vor.u32 %v1162_v13, %v1030_v12 }
  0x3d   : > { %v1177_v19 = vld [vmem:[%s1353_s15 + $0x94] sm:$0xf]  ;;  %v1096_v20 = vld [vmem:[%s1353_s15 + $0x98] sm:$0xf0]  ;;  %v1095_v22 = vor.u32 %v1178_v16, %v1094_v14  ;;  %v1035_v23 = vor.u32 %v1161_v17, %v1032_v18  ;;  %v1022_v24 = vld [vmem:[%s1353_s15] sm:$0xf] }
  0x3e   : > { %673 = vmatpush.bf16.msra.mxu0 %v1047_v61  ;;  %v1160_v25 = vld [vmem:[%s1353_s15 + $0x4] sm:$0xf0]  ;;  %v1086_v26 = vld [vmem:[%s1353_s15 + $0x80] sm:$0xf]  ;;  %v1099_v27 = vor.u32 %v1177_v19, %v1096_v20  ;;  %v1159_v29 = vld [vmem:[%s1353_s15 + $0x4] sm:$0xf] }
  0x3f   : > { %692 = vmatpush.bf16.msra.mxu1 %v1111_v62  ;;  %711 = vmatpush.bf16.msra.mxu2 %v1051_v63  ;;  %v1176_v28 = vld [vmem:[%s1353_s15 + $0x84] sm:$0xf0]  ;;  %v1024_v30 = vld [vmem:[%s1353_s15 + $0x8] sm:$0xf0]  ;;  %v1175_v31 = vld [vmem:[%s1353_s15 + $0x84] sm:$0xf]  ;;  %v1023_v33 = vor.u32 %v1160_v25, %v1022_v24 }
  0x40   : > { %730 = vmatpush.bf16.msra.mxu3 %v1115_v3  ;;  %v1088_v32 = vld [vmem:[%s1353_s15 + $0x88] sm:$0xf0]  ;;  %v1006_v34 = vld [vmem:[%s1355_s16] sm:$0xf]  ;;  %v1156_v35 = vld [vmem:[%s1355_s16 + $0x4] sm:$0xf0]  ;;  %v1087_v36 = vor.u32 %v1176_v28, %v1086_v26  ;;  %v1027_v37 = vor.u32 %v1159_v29, %v1024_v30 }
  0x41   : > { %v1155_v38 = vld [vmem:[%s1355_s16 + $0x4] sm:$0xf]  ;;  %v1008_v39 = vld [vmem:[%s1355_s16 + $0x8] sm:$0xf0]  ;;  %v1091_v40 = vor.u32 %v1175_v31, %v1088_v32  ;;  %v1007_v41 = vor.u32 %v1156_v35, %v1006_v34  ;;  %v1014_v43 = vld [vmem:[%s1355_s16 + $0x10] sm:$0xf] }
  0x42   : > { %674 = vmatpush.bf16.msra.mxu0 %v1039_v9  ;;  %v1011_v42 = vor.u32 %v1155_v38, %v1008_v39  ;;  %v1158_v44 = vld [vmem:[%s1355_s16 + $0x14] sm:$0xf0]  ;;  %v1157_v45 = vld [vmem:[%s1355_s16 + $0x14] sm:$0xf]  ;;  %v1016_v46 = vld [vmem:[%s1355_s16 + $0x18] sm:$0xf0] }
  0x43   : > { %693 = vmatpush.bf16.msra.mxu1 %v1103_v10  ;;  %712 = vmatpush.bf16.msra.mxu2 %v1043_v11  ;;  %v1015_v47 = vor.u32 %v1158_v44, %v1014_v43  ;;  %v1019_v48 = vor.u32 %v1157_v45, %v1016_v46  ;;  %v445_v50 = vld [vmem:[#allocation2 + $0x30] sm:$0xff]  ;;  %v446_v55 = vld [vmem:[#allocation2] sm:$0xff]  ;;  %v447_v59 = vld [vmem:[#allocation2 + $0x18] sm:$0xff]  ;;  %p1148_p11 = scmp.ne.s32.totalorder %s1262_s20, 8 }
  0x44   : > { %731 = vmatpush.bf16.msra.mxu3 %v1107_v15  ;;  %v448_v1 = vld [vmem:[#allocation2 + $0x10] sm:$0xff]  ;;  %v449_v5 = vld [vmem:[#allocation2 + $0x8] sm:$0xff]  ;;  %v450_v11 = vld [vmem:[#allocation2 + $0x20] sm:$0xff] }
  0x45   : > { %v451_v15 = vld [vmem:[#allocation2 + $0x28] sm:$0xff] }
  0x46   : > { %675 = vmatpush.bf16.msra.mxu0 %v1031_v21  ;;  %v452_v21 = vld [vmem:[#allocation2 + $0x38] sm:$0xff] }
  0x47   : > { %694 = vmatpush.bf16.msra.mxu1 %v1095_v22  ;;  %713 = vmatpush.bf16.msra.mxu2 %v1035_v23 }
  0x48   : > { %732 = vmatpush.bf16.msra.mxu3 %v1099_v27 }
  0x4a   : > { %676 = vmatpush.bf16.msra.mxu0 %v1023_v33 }
  0x4b   : > { %695 = vmatpush.bf16.msra.mxu1 %v1087_v36  ;;  %714 = vmatpush.bf16.msra.mxu2 %v1027_v37 }
  0x4c   : > { %733 = vmatpush.bf16.msra.mxu3 %v1091_v40 }
  0x4d   : > { %677 = vmatmul.bf16.vlgmr.msra.gmra.mxu0 %v1007_v41 }
  0x4e   : > { %696 = vmatmul.bf16.vlgmr.msra.gmra.mxu1 %v1011_v42  ;;  %715 = vmatmul.bf16.vlgmr.msra.gmra.mxu2 %v1007_v41 }
  0x4f   : > { %734 = vmatmul.bf16.vlgmr.msra.gmra.mxu3 %v1011_v42 }
  0x5d   : > { %682 = vmatmul.bf16.gmra.mxu0 %v1015_v47 }
  0x5e   : > { %701 = vmatmul.bf16.gmra.mxu1 %v1019_v48  ;;  %720 = vmatmul.bf16.gmra.mxu2 %v1015_v47 }
  0x5f   : > { %739 = vmatmul.bf16.gmra.mxu3 %v1019_v48 }
  0xca   : > { %v678_v49 = vpop.f32.mrf.mxu0 }
  0xcb   : > { %v697_v51 = vpop.f32.mrf.mxu1 }
  0xcc   : > { %v698_v52 = vadd.f32 %v697_v51, %v678_v49 }
  0xce   : > { %v745_v53 = vadd.f32 %v698_v52, %v445_v50 }
  0xd0   : > { %753 = vst [vmem:[#allocation2 + $0x30] sm:$0xff] %v745_v53 }
  0xd1   : > { %v716_v54 = vpop.f32.mrf.mxu2 }
  0xd2   : > { %v735_v56 = vpop.f32.mrf.mxu3  ;;  %v680_v57 = vpop.f32.mrf.mxu0 }
  0xd3   : > { %v736_v58 = vadd.f32 %v735_v56, %v716_v54  ;;  %v699_v60 = vpop.f32.mrf.mxu1 }
  0xd4   : > { %v700_v61 = vadd.f32 %v699_v60, %v680_v57 }
  0xd5   : > { %v746_v62 = vadd.f32 %v736_v58, %v446_v55 }
  0xd6   : > { %v747_v63 = vadd.f32 %v700_v61, %v447_v59 }
  0xd7   : > { %754 = vst [vmem:[#allocation2] sm:$0xff] %v746_v62 }
  0xd8   : > { %755 = vst [vmem:[#allocation2 + $0x18] sm:$0xff] %v747_v63 }
  0xd9   : > { %v718_v0 = vpop.f32.mrf.mxu2 }
  0xda   : > { %v737_v2 = vpop.f32.mrf.mxu3  ;;  %v683_v3 = vpop.f32.mrf.mxu0 }
  0xdb   : > { %v738_v4 = vadd.f32 %v737_v2, %v718_v0  ;;  %v702_v6 = vpop.f32.mrf.mxu1 }
  0xdc   : > { %v703_v7 = vadd.f32 %v702_v6, %v683_v3 }
  0xdd   : > { %v748_v8 = vadd.f32 %v738_v4, %v448_v1 }
  0xde   : > { %v749_v9 = vadd.f32 %v703_v7, %v449_v5 }
  0xdf   : > { %756 = vst [vmem:[#allocation2 + $0x10] sm:$0xff] %v748_v8 }
  0xe0   : > { %757 = vst [vmem:[#allocation2 + $0x8] sm:$0xff] %v749_v9 }
  0xe1   : > { %v721_v10 = vpop.f32.mrf.mxu2 }
  0xe2   : > { %v740_v12 = vpop.f32.mrf.mxu3  ;;  %v685_v13 = vpop.f32.mrf.mxu0 }
  0xe3   : > { %v741_v14 = vadd.f32 %v740_v12, %v721_v10  ;;  %v704_v16 = vpop.f32.mrf.mxu1 }
  0xe4   : > { %v705_v17 = vadd.f32 %v704_v16, %v685_v13 }
  0xe5   : > { %v750_v18 = vadd.f32 %v741_v14, %v450_v11 }
  0xe6   : > { %v751_v19 = vadd.f32 %v705_v17, %v451_v15 }
  0xe7   : > { %758 = vst [vmem:[#allocation2 + $0x20] sm:$0xff] %v750_v18 }
  0xe8   : > { %759 = vst [vmem:[#allocation2 + $0x28] sm:$0xff] %v751_v19 }
  0xe9   : > { %v723_v20 = vpop.f32.mrf.mxu2 }
  0xea   : > { %v742_v22 = vpop.f32.mrf.mxu3 }
  0xeb   : > { %v743_v23 = vadd.f32 %v742_v22, %v723_v20  ;;  %764 = sbr.rel (%p1148_p11) target bundleno = 259 (0x103), region = 86 }
  0xed   : > { %v752_v24 = vadd.f32 %v743_v23, %v452_v21 }
  0xef   : > { %760 = vst [vmem:[#allocation2 + $0x38] sm:$0xff] %v752_v24 }
  0xf0   : > { %v765_v25 = vld [vmem:[#allocation2 + $0x30] sm:$0xff]  ;;  %v773_v26 = vld [vmem:[%s1502_s2] sm:$0x3]  ;;  %v767_v34 = vld [vmem:[#allocation2 + $0x18] sm:$0xff] }
  0xf1   : > { %v787_v27 = vld [vmem:[%s1503_s3] sm:$0x3]  ;;  %v775_v28 = vperm.slane %v773_v26, 0  ;;  %v776_v31 = vperm.slane %v773_v26, 1  ;;  %v802_v37 = vld [vmem:[%s1504_s4 + $0x8] sm:$0xff]  ;;  %v768_v39 = vld [vmem:[#allocation2 + $0x10] sm:$0xff] }
  0xf2   : > { %v789_v29 = vperm.slane %v787_v27, 0  ;;  %v766_v30 = vld [vmem:[#allocation2] sm:$0xff]  ;;  %v790_v32 = vperm.slane %v787_v27, 1  ;;  %v769_v40 = vld [vmem:[#allocation2 + $0x8] sm:$0xff]  ;;  %v803_v41 = vld [vmem:[%s1504_s4 + $0x10] sm:$0xff] }
  0xf3   : > { %v801_v33 = vld [vmem:[%s1504_s4] sm:$0xff]  ;;  %v779_v35 = vmul.f32 %v775_v28, %v765_v25  ;;  %v780_v36 = vmul.f32 %v776_v31, %v766_v30  ;;  %v781_v38 = vmul.f32 %v775_v28, %v767_v34  ;;  %v782_v42 = vmul.f32 %v776_v31, %v768_v39  ;;  %v804_v43 = vld [vmem:[%s1504_s4 + $0x18] sm:$0xff]  ;;  %v771_v51 = vld [vmem:[#allocation2 + $0x28] sm:$0xff] }
  0xf4   : > { %v783_v44 = vmul.f32 %v775_v28, %v769_v40  ;;  %v770_v45 = vld [vmem:[#allocation2 + $0x20] sm:$0xff]  ;;  %v806_v55 = vld [vmem:[%s1504_s4 + $0x28] sm:$0xff]  ;;  %v785_v56 = vmul.f32 %v775_v28, %v771_v51  ;;  %v807_v62 = vld [vmem:[%s1504_s4 + $0x30] sm:$0xff] }
  0xf5   : > { %v793_v46 = vadd.f32 %v789_v29, %v779_v35  ;;  %v794_v47 = vadd.f32 %v790_v32, %v780_v36  ;;  %v795_v48 = vadd.f32 %v789_v29, %v781_v38  ;;  %v805_v49 = vld [vmem:[%s1504_s4 + $0x20] sm:$0xff]  ;;  %v784_v50 = vmul.f32 %v776_v31, %v770_v45  ;;  %v808_v63 = vld [vmem:[%s1504_s4 + $0x38] sm:$0xff] }
  0xf6   : > { %v772_v52 = vld [vmem:[#allocation2 + $0x38] sm:$0xff]  ;;  %v796_v53 = vadd.f32 %v790_v32, %v782_v42  ;;  %v797_v54 = vadd.f32 %v789_v29, %v783_v44  ;;  %v799_v2 = vadd.f32 %v789_v29, %v785_v56 }
  0xf7   : > { %v786_v57 = vmul.f32 %v776_v31, %v772_v52  ;;  %v809_v58 = vadd.f32 %v801_v33, %v793_v46  ;;  %v810_v59 = vadd.f32 %v802_v37, %v794_v47  ;;  %v811_v60 = vadd.f32 %v803_v41, %v795_v48 }
  0xf8   : > { %v798_v61 = vadd.f32 %v790_v32, %v784_v50  ;;  %v812_v0 = vadd.f32 %v804_v43, %v796_v53  ;;  %v813_v1 = vadd.f32 %v805_v49, %v797_v54  ;;  %v815_v9 = vadd.f32 %v807_v62, %v799_v2 }
  0xf9   : > { %v800_v3 = vadd.f32 %v790_v32, %v786_v57  ;;  %v817_v4 = vmax.f32 %v809_v58, 0.0  ;;  %v818_v5 = vmax.f32 %v810_v59, 0.0  ;;  %v819_v6 = vmax.f32 %v811_v60, 0.0 }
  0xfa   : > { %v814_v7 = vadd.f32 %v806_v55, %v798_v61  ;;  %v820_v8 = vmax.f32 %v812_v0, 0.0  ;;  %v821_v11 = vmax.f32 %v813_v1, 0.0  ;;  %v823_v13 = vmax.f32 %v815_v9, 0.0 }
  0xfb   : > { %v816_v10 = vadd.f32 %v808_v63, %v800_v3  ;;  %825 = vst [vmem:[%s1505_s5] sm:$0xff] %v817_v4 }
  0xfc   : > { %826 = vst [vmem:[%s1505_s5 + $0x8] sm:$0xff] %v818_v5  ;;  %v822_v12 = vmax.f32 %v814_v7, 0.0 }
  0xfd   : > { %827 = vst [vmem:[%s1505_s5 + $0x10] sm:$0xff] %v819_v6  ;;  %v824_v14 = vmax.f32 %v816_v10, 0.0 }
  0xfe   : > { %828 = vst [vmem:[%s1505_s5 + $0x18] sm:$0xff] %v820_v8 }
  0xff   : > { %829 = vst [vmem:[%s1505_s5 + $0x20] sm:$0xff] %v821_v11 }
 0x100   : > { %830 = vst [vmem:[%s1505_s5 + $0x28] sm:$0xff] %v822_v12 }
 0x101   : > { %831 = vst [vmem:[%s1505_s5 + $0x30] sm:$0xff] %v823_v13 }
 0x102   : > { %832 = vst [vmem:[%s1505_s5 + $0x38] sm:$0xff] %v824_v14 }
 0x103 PF: > { %s15_s22 = sadd.s32 1, %s1270_s22   ;;  %s1506_s18 = smov %s1258_s19 }
 0x104   : > { %p12_p12 = scmp.ge.s32.totalorder %s15_s22, 11   ;;  %s1507_s19 = smov %s1338_s26 }
 0x105   : > { %s1508_s20 = smov %s1266_s21  ;;  %s1509_s21 = smov %s1511_s23 }
 0x106   :  { %14 = sbr.rel (!%p12_p12) target bundleno = 3 (0x3), region = 133 }

// kernel: _lambda_.23
= control target key start
LH: loop header
LB: loop body
LE: loop exit
PB: predicated region body
PF: predicated region fallthrough
CT: control target
= control target key end

     0   :  { %s1212_s15 = smov 0   ;;  %s1214_s16 = smov 0   ;;  %s1468_s0 = inlined_call_operand.vmem [shape: bf16[8,2304], index: 0, kind: input, shape index: {}]   ;;  %s1469_s1 = inlined_call_operand.vmem [shape: bf16[2304,512], index: 1, kind: input, shape index: {}]   ;;  %s1470_s2 = inlined_call_operand.vmem [shape: f32[1,512], index: 2, kind: input, shape index: {}]   ;;  %s1471_s3 = inlined_call_operand.vmem [shape: f32[1,512], index: 3, kind: input, shape index: {}]   ;;  %s1472_s4 = inlined_call_operand.vmem [shape: f32[8,512], index: 4, kind: output, shape index: {}]  }
   0x1   :  { %s1216_s17 = smov 0   ;;  %s1218_s18 = smov 0  }
   0x2   :  { %s1220_s19 = smov 0   ;;  %s1222_s20 = smov 0  }
   0x3   :  { %s1224_s21 = smov 0  }
   0x4 LB: > { %s26_s22 = sadd.s32 1, %s1176_s19  ;;  %s29_s23 = sadd.s32 1, %s1180_s20  ;;  %s1184_s21 = sphi %s1224_s21, %s14_s21   ;;  %s1180_s20 = sphi %s1222_s20, %s1478_s20   ;;  %s1176_s19 = sphi %s1220_s19, %s1477_s19   ;;  %s1172_s18 = sphi %s1218_s18, %s1476_s18   ;;  %s1168_s17 = sphi %s1216_s17, %s1475_s17   ;;  %s1164_s16 = sphi %s1214_s16, %s1474_s16   ;;  %s1160_s15 = sphi %s1212_s15, %s1473_s15  }
   0x5   : > { %p27_p0 = scmp.ge.s32.totalorder %s26_s22, 9  ;;  %p77_p1 = scmp.ne.s32.totalorder %s1164_s16, %s1160_s15 }
   0x6   : > { %p78_p2 = scmp.eq.s32.totalorder %s1184_s21, 0  ;;  %s70_s27 = sadd.s32 1, %s1164_s16 }
   0x7   : > { %s1480_s22 = smov (%p27_p0, %s26_s22), 0  ;;  %s1482_s23 = smov (!%p27_p0, %s29_s23), %s1180_s20 }
   0x8   : > { %p79_p3 = por %p78_p2, %p77_p1  ;;  %p31_p4 = scmp.ge.s32.totalorder %s1482_s23, 2 }
   0x9   : > { %s65_s24 = ssub.s32 %s1176_s19, %s1480_s22  ;;  %p894_p6 = scmp.ge.s32.totalorder %s1184_s21, 18 }
   0xa   : > { %s1484_s23 = smov (%p31_p4, %s1482_s23), 0 }
   0xb   : > { %s66_s25 = ssub.s32 %s1180_s20, %s1484_s23  ;;  %183 = sbr.rel (%p894_p6) target bundleno = 55 (0x37), region = 16 }
   0xc   : > { %s67_s26 = sor.u32 %s66_s25, %s65_s24 }
   0xd   : > { %p68_p5 = scmp.eq.s32.totalorder %s67_s26, 0 }
   0xf   : > { %s1263_s28 = scalar_select %p68_p5, %s1164_s16, %s70_s27  }
  0x10   : > { %199 = sbr.rel (!%p79_p3) target bundleno = 55 (0x37), region = 24  ;;  %s201_s29 = sand.u32 (%p79_p3), 1, %s1164_s16  }
  0x11   : > { %s897_s30 = sshll.u32 (%p79_p3), %s1180_s20, 1  ;;  %s895_s5 = sshll.u32 (%p79_p3), %s201_s29, 8 }
  0x12   : > { %s1040_s6 = sshll.u32 (%p79_p3), %s1176_s19, 7  ;;  %s1277_s12 = scalar_lea.vmem (%p79_p3), [#allocation3], %s895_s5 }
  0x13   : > { %s207_s7 = sadd.s32 (%p79_p3), %s1040_s6, %s897_s30 }
  0x14   : > { %s899_s8 = sshll.u32 (%p79_p3), %s207_s7, 2 }
  0x15   : > { %s1272_s11 = scalar_lea.vmem %s1469_s1, %s899_s8 }
  0x16   : > { %v300_v0 = vld [vmem:[%s1272_s11] sm:$0xff]  ;;  %v302_v1 = vld [vmem:[%s1272_s11 + $0x10] sm:$0xff] }
  0x17   : > { %v304_v2 = vld [vmem:[%s1272_s11 + $0x20] sm:$0xff]  ;;  %301 = vst [vmem:[%s1277_s12] sm:$0xff] %v300_v0  ;;  %v306_v3 = vld [vmem:[%s1272_s11 + $0x30] sm:$0xff] }
  0x18   : > { %303 = vst [vmem:[%s1277_s12 + $0x8] sm:$0xff] %v302_v1  ;;  %v308_v4 = vld [vmem:[%s1272_s11 + $0x40] sm:$0xff]  ;;  %v310_v5 = vld [vmem:[%s1272_s11 + $0x50] sm:$0xff] }
  0x19   : > { %305 = vst [vmem:[%s1277_s12 + $0x10] sm:$0xff] %v304_v2  ;;  %v312_v6 = vld [vmem:[%s1272_s11 + $0x60] sm:$0xff]  ;;  %v314_v7 = vld [vmem:[%s1272_s11 + $0x70] sm:$0xff] }
  0x1a   : > { %307 = vst [vmem:[%s1277_s12 + $0x18] sm:$0xff] %v306_v3  ;;  %v316_v8 = vld [vmem:[%s1272_s11 + $0x80] sm:$0xff]  ;;  %v318_v9 = vld [vmem:[%s1272_s11 + $0x90] sm:$0xff] }
  0x1b   : > { %309 = vst [vmem:[%s1277_s12 + $0x20] sm:$0xff] %v308_v4  ;;  %v320_v10 = vld [vmem:[%s1272_s11 + $0xa0] sm:$0xff]  ;;  %v322_v11 = vld [vmem:[%s1272_s11 + $0xb0] sm:$0xff] }
  0x1c   : > { %311 = vst [vmem:[%s1277_s12 + $0x28] sm:$0xff] %v310_v5  ;;  %v324_v12 = vld [vmem:[%s1272_s11 + $0xc0] sm:$0xff]  ;;  %v326_v13 = vld [vmem:[%s1272_s11 + $0xd0] sm:$0xff] }
  0x1d   : > { %313 = vst [vmem:[%s1277_s12 + $0x30] sm:$0xff] %v312_v6  ;;  %v328_v14 = vld [vmem:[%s1272_s11 + $0xe0] sm:$0xff]  ;;  %v330_v15 = vld [vmem:[%s1272_s11 + $0xf0] sm:$0xff] }
  0x1e   : > { %315 = vst [vmem:[%s1277_s12 + $0x38] sm:$0xff] %v314_v7  ;;  %v332_v16 = vld [vmem:[%s1272_s11 + $0x100] sm:$0xff]  ;;  %v334_v17 = vld [vmem:[%s1272_s11 + $0x110] sm:$0xff] }
  0x1f   : > { %317 = vst [vmem:[%s1277_s12 + $0x40] sm:$0xff] %v316_v8  ;;  %v336_v18 = vld [vmem:[%s1272_s11 + $0x120] sm:$0xff]  ;;  %v338_v19 = vld [vmem:[%s1272_s11 + $0x130] sm:$0xff] }
  0x20   : > { %319 = vst [vmem:[%s1277_s12 + $0x48] sm:$0xff] %v318_v9  ;;  %v340_v20 = vld [vmem:[%s1272_s11 + $0x140] sm:$0xff]  ;;  %v342_v21 = vld [vmem:[%s1272_s11 + $0x150] sm:$0xff] }
  0x21   : > { %321 = vst [vmem:[%s1277_s12 + $0x50] sm:$0xff] %v320_v10  ;;  %v344_v22 = vld [vmem:[%s1272_s11 + $0x160] sm:$0xff]  ;;  %v346_v23 = vld [vmem:[%s1272_s11 + $0x170] sm:$0xff] }
  0x22   : > { %323 = vst [vmem:[%s1277_s12 + $0x58] sm:$0xff] %v322_v11  ;;  %v348_v24 = vld [vmem:[%s1272_s11 + $0x180] sm:$0xff]  ;;  %v350_v25 = vld [vmem:[%s1272_s11 + $0x190] sm:$0xff] }
  0x23   : > { %325 = vst [vmem:[%s1277_s12 + $0x60] sm:$0xff] %v324_v12  ;;  %v352_v26 = vld [vmem:[%s1272_s11 + $0x1a0] sm:$0xff]  ;;  %v354_v27 = vld [vmem:[%s1272_s11 + $0x1b0] sm:$0xff] }
  0x24   : > { %327 = vst [vmem:[%s1277_s12 + $0x68] sm:$0xff] %v326_v13  ;;  %v356_v28 = vld [vmem:[%s1272_s11 + $0x1c0] sm:$0xff]  ;;  %v358_v29 = vld [vmem:[%s1272_s11 + $0x1d0] sm:$0xff] }
  0x25   : > { %329 = vst [vmem:[%s1277_s12 + $0x70] sm:$0xff] %v328_v14  ;;  %v360_v30 = vld [vmem:[%s1272_s11 + $0x1e0] sm:$0xff]  ;;  %v362_v31 = vld [vmem:[%s1272_s11 + $0x1f0] sm:$0xff] }
  0x26   : > { %331 = vst [vmem:[%s1277_s12 + $0x78] sm:$0xff] %v330_v15 }
  0x27   : > { %333 = vst [vmem:[%s1277_s12 + $0x80] sm:$0xff] %v332_v16 }
  0x28   : > { %335 = vst [vmem:[%s1277_s12 + $0x88] sm:$0xff] %v334_v17 }
  0x29   : > { %337 = vst [vmem:[%s1277_s12 + $0x90] sm:$0xff] %v336_v18 }
  0x2a   : > { %339 = vst [vmem:[%s1277_s12 + $0x98] sm:$0xff] %v338_v19 }
  0x2b   : > { %341 = vst [vmem:[%s1277_s12 + $0xa0] sm:$0xff] %v340_v20 }
  0x2c   : > { %343 = vst [vmem:[%s1277_s12 + $0xa8] sm:$0xff] %v342_v21 }
  0x2d   : > { %345 = vst [vmem:[%s1277_s12 + $0xb0] sm:$0xff] %v344_v22 }
  0x2e   : > { %347 = vst [vmem:[%s1277_s12 + $0xb8] sm:$0xff] %v346_v23 }
  0x2f   : > { %349 = vst [vmem:[%s1277_s12 + $0xc0] sm:$0xff] %v348_v24 }
  0x30   : > { %351 = vst [vmem:[%s1277_s12 + $0xc8] sm:$0xff] %v350_v25 }
  0x31   : > { %353 = vst [vmem:[%s1277_s12 + $0xd0] sm:$0xff] %v352_v26 }
  0x32   : > { %355 = vst [vmem:[%s1277_s12 + $0xd8] sm:$0xff] %v354_v27 }
  0x33   : > { %357 = vst [vmem:[%s1277_s12 + $0xe0] sm:$0xff] %v356_v28 }
  0x34   : > { %359 = vst [vmem:[%s1277_s12 + $0xe8] sm:$0xff] %v358_v29 }
  0x35   : > { %361 = vst [vmem:[%s1277_s12 + $0xf0] sm:$0xff] %v360_v30 }
  0x36   : > { %363 = vst [vmem:[%s1277_s12 + $0xf8] sm:$0xff] %v362_v31 }
  0x37 PF: > { %p900_p7 = scmp.ge.s32.totalorder %s1184_s21, 1  ;;  %p384_p8 = scmp.lt.s32.totalorder %s1184_s21, 19 }
  0x39   : > { %p385_p9 = pnand %p900_p7, %p384_p8 }
  0x3a   : > { %s391_s13 = sand.u32 (!%p385_p9), 1, %s1160_s15   ;;  %s902_s14 = sshll.u32 (!%p385_p9), %s1168_s17, 1 }
  0x3b   : > { %388 = sbr.rel (%p385_p9) target bundleno = 263 (0x107), region = 70  ;;  %s901_s24 = sshll.u32 (!%p385_p9), %s391_s13, 8 }
  0x3c   : > { %p440_p10 = scmp.lt.s32.totalorder (!%p385_p9), %s902_s14, 17  ;;  %s904_s25 = sshll.u32 (!%p385_p9), %s1172_s18, 1 }
  0x3d   : > { %p450_p11 = scmp.lt.s32.totalorder (!%p385_p9), %s904_s25, 3  ;;  %s1366_s13 = scalar_lea.vmem (!%p385_p9), [#allocation3], %s901_s24 }
  0x3e   : > { %p908_p12 = scmp.ne.s32.totalorder (!%p385_p9), %s1168_s17, 0 }
  0x40   : > { %s1486_s14 = smov (!%p440_p10, %s902_s14), 17  ;;  %s1488_s25 = smov (!%p450_p11, %s904_s25), 3 }
  0x41   : > { %s903_s26 = sshll.u32 %s1486_s14, 2  ;;  %s452_s15 = scalar_lea.vmem %s1470_s2, %s1488_s25 }
  0x42   : > { %s1348_s30 = scalar_lea.vmem %s1468_s0, %s903_s26  ;;  %s457_s18 = scalar_lea.vmem %s1471_s3, %s1488_s25 }
  0x43   : > { %s907_s9 = sshll.u32 %s1488_s25, 3  ;;  %472 = sbr.rel (%p908_p12) target bundleno = 75 (0x4b), region = 78 }
  0x44   : > { %s1364_s12 = scalar_lea.vmem %s1472_s4, %s907_s9 }
  0x48   : > { %v1186_v32 = vmov 0.0  }
  0x49   : > { %473 = vst [vmem:[#allocation2] sm:$0xff] %v1186_v32 }
  0x4a   : > { %474 = vst [vmem:[#allocation2 + $0x8] sm:$0xff] %v1186_v32 }
  0x4b PF: > { %v967_v33 = vld [vmem:[%s1366_s13 + $0x70] sm:$0xf]  ;;  %v1056_v34 = vld [vmem:[%s1366_s13 + $0x74] sm:$0xf0]  ;;  %v1055_v38 = vld [vmem:[%s1366_s13 + $0x74] sm:$0xf] }
  0x4c   : > { %v1031_v35 = vld [vmem:[%s1366_s13 + $0xf0] sm:$0xf]  ;;  %v968_v36 = vor.u32 %v1056_v34, %v967_v33  ;;  %v1072_v37 = vld [vmem:[%s1366_s13 + $0xf4] sm:$0xf0]  ;;  %v969_v39 = vld [vmem:[%s1366_s13 + $0x78] sm:$0xf0] }
  0x4d   : > { %v1032_v40 = vor.u32 %v1072_v37, %v1031_v35  ;;  %v972_v41 = vor.u32 %v1055_v38, %v969_v39  ;;  %v1071_v42 = vld [vmem:[%s1366_s13 + $0xf4] sm:$0xf]  ;;  %v1033_v43 = vld [vmem:[%s1366_s13 + $0xf8] sm:$0xf0]  ;;  %v959_v44 = vld [vmem:[%s1366_s13 + $0x60] sm:$0xf] }
  0x4e   : > { %677 = vmatpush.bf16.msra.mxu0 %v968_v36  ;;  %v1036_v45 = vor.u32 %v1071_v42, %v1033_v43  ;;  %v1054_v46 = vld [vmem:[%s1366_s13 + $0x64] sm:$0xf0]  ;;  %v1023_v47 = vld [vmem:[%s1366_s13 + $0xe0] sm:$0xf]  ;;  %v1053_v51 = vld [vmem:[%s1366_s13 + $0x64] sm:$0xf] }
  0x4f   : > { %v1070_v48 = vld [vmem:[%s1366_s13 + $0xe4] sm:$0xf0]  ;;  %690 = vmatpush.bf16.msra.mxu1 %v1032_v40  ;;  %703 = vmatpush.bf16.msra.mxu2 %v972_v41  ;;  %v960_v49 = vor.u32 %v1054_v46, %v959_v44  ;;  %v961_v52 = vld [vmem:[%s1366_s13 + $0x68] sm:$0xf0]  ;;  %v1069_v53 = vld [vmem:[%s1366_s13 + $0xe4] sm:$0xf] }
  0x50   : > { %v1024_v50 = vor.u32 %v1070_v48, %v1023_v47  ;;  %716 = vmatpush.bf16.msra.mxu3 %v1036_v45  ;;  %v964_v54 = vor.u32 %v1053_v51, %v961_v52  ;;  %v1025_v55 = vld [vmem:[%s1366_s13 + $0xe8] sm:$0xf0]  ;;  %v951_v56 = vld [vmem:[%s1366_s13 + $0x50] sm:$0xf]  ;;  %v1052_v57 = vld [vmem:[%s1366_s13 + $0x54] sm:$0xf0] }
  0x51   : > { %v1028_v58 = vor.u32 %v1069_v53, %v1025_v55  ;;  %v1015_v59 = vld [vmem:[%s1366_s13 + $0xd0] sm:$0xf]  ;;  %v1068_v60 = vld [vmem:[%s1366_s13 + $0xd4] sm:$0xf0]  ;;  %v1051_v61 = vld [vmem:[%s1366_s13 + $0x54] sm:$0xf]  ;;  %v952_v62 = vor.u32 %v1052_v57, %v951_v56 }
  0x52   : > { %678 = vmatpush.bf16.msra.mxu0 %v960_v49  ;;  %v953_v63 = vld [vmem:[%s1366_s13 + $0x58] sm:$0xf0]  ;;  %v1067_v0 = vld [vmem:[%s1366_s13 + $0xd4] sm:$0xf]  ;;  %v1016_v2 = vor.u32 %v1068_v60, %v1015_v59  ;;  %v943_v4 = vld [vmem:[%s1366_s13 + $0x40] sm:$0xf] }
  0x53   : > { %v1017_v1 = vld [vmem:[%s1366_s13 + $0xd8] sm:$0xf0]  ;;  %691 = vmatpush.bf16.msra.mxu1 %v1024_v50  ;;  %704 = vmatpush.bf16.msra.mxu2 %v964_v54  ;;  %v956_v3 = vor.u32 %v1051_v61, %v953_v63  ;;  %v1050_v5 = vld [vmem:[%s1366_s13 + $0x44] sm:$0xf0]  ;;  %v1007_v6 = vld [vmem:[%s1366_s13 + $0xc0] sm:$0xf] }
  0x54   : > { %717 = vmatpush.bf16.msra.mxu3 %v1028_v58  ;;  %v1020_v7 = vor.u32 %v1067_v0, %v1017_v1  ;;  %v1066_v8 = vld [vmem:[%s1366_s13 + $0xc4] sm:$0xf0]  ;;  %v1049_v9 = vld [vmem:[%s1366_s13 + $0x44] sm:$0xf]  ;;  %v945_v10 = vld [vmem:[%s1366_s13 + $0x48] sm:$0xf0]  ;;  %v944_v13 = vor.u32 %v1050_v5, %v943_v4 }
  0x55   : > { %v1065_v11 = vld [vmem:[%s1366_s13 + $0xc4] sm:$0xf]  ;;  %v1009_v12 = vld [vmem:[%s1366_s13 + $0xc8] sm:$0xf0]  ;;  %v1008_v14 = vor.u32 %v1066_v8, %v1007_v6  ;;  %v948_v15 = vor.u32 %v1049_v9, %v945_v10  ;;  %v935_v16 = vld [vmem:[%s1366_s13 + $0x30] sm:$0xf] }
  0x56   : > { %679 = vmatpush.bf16.msra.mxu0 %v952_v62  ;;  %v1048_v17 = vld [vmem:[%s1366_s13 + $0x34] sm:$0xf0]  ;;  %v999_v18 = vld [vmem:[%s1366_s13 + $0xb0] sm:$0xf]  ;;  %v1012_v19 = vor.u32 %v1065_v11, %v1009_v12  ;;  %v1047_v21 = vld [vmem:[%s1366_s13 + $0x34] sm:$0xf] }
  0x57   : > { %692 = vmatpush.bf16.msra.mxu1 %v1016_v2  ;;  %705 = vmatpush.bf16.msra.mxu2 %v956_v3  ;;  %v1064_v20 = vld [vmem:[%s1366_s13 + $0xb4] sm:$0xf0]  ;;  %v937_v22 = vld [vmem:[%s1366_s13 + $0x38] sm:$0xf0]  ;;  %v1063_v23 = vld [vmem:[%s1366_s13 + $0xb4] sm:$0xf]  ;;  %v936_v25 = vor.u32 %v1048_v17, %v935_v16 }
  0x58   : > { %718 = vmatpush.bf16.msra.mxu3 %v1020_v7  ;;  %v1001_v24 = vld [vmem:[%s1366_s13 + $0xb8] sm:$0xf0]  ;;  %v1000_v26 = vor.u32 %v1064_v20, %v999_v18  ;;  %v940_v27 = vor.u32 %v1047_v21, %v937_v22  ;;  %v927_v28 = vld [vmem:[%s1366_s13 + $0x20] sm:$0xf]  ;;  %v1046_v29 = vld [vmem:[%s1366_s13 + $0x24] sm:$0xf0] }
  0x59   : > { %v991_v30 = vld [vmem:[%s1366_s13 + $0xa0] sm:$0xf]  ;;  %v1004_v31 = vor.u32 %v1063_v23, %v1001_v24  ;;  %v1062_v32 = vld [vmem:[%s1366_s13 + $0xa4] sm:$0xf0]  ;;  %v1045_v33 = vld [vmem:[%s1366_s13 + $0x24] sm:$0xf]  ;;  %v928_v37 = vor.u32 %v1046_v29, %v927_v28 }
  0x5a   : > { %680 = vmatpush.bf16.msra.mxu0 %v944_v13  ;;  %v929_v34 = vld [vmem:[%s1366_s13 + $0x28] sm:$0xf0]  ;;  %v1061_v35 = vld [vmem:[%s1366_s13 + $0xa4] sm:$0xf]  ;;  %v992_v38 = vor.u32 %v1062_v32, %v991_v30  ;;  %v919_v40 = vld [vmem:[%s1366_s13 + $0x10] sm:$0xf] }
  0x5b   : > { %693 = vmatpush.bf16.msra.mxu1 %v1008_v14  ;;  %706 = vmatpush.bf16.msra.mxu2 %v948_v15  ;;  %v993_v36 = vld [vmem:[%s1366_s13 + $0xa8] sm:$0xf0]  ;;  %v932_v39 = vor.u32 %v1045_v33, %v929_v34  ;;  %v1044_v41 = vld [vmem:[%s1366_s13 + $0x14] sm:$0xf0]  ;;  %v983_v42 = vld [vmem:[%s1366_s13 + $0x90] sm:$0xf] }
  0x5c   : > { %719 = vmatpush.bf16.msra.mxu3 %v1012_v19  ;;  %v996_v43 = vor.u32 %v1061_v35, %v993_v36  ;;  %v1060_v44 = vld [vmem:[%s1366_s13 + $0x94] sm:$0xf0]  ;;  %v1043_v45 = vld [vmem:[%s1366_s13 + $0x14] sm:$0xf]  ;;  %v921_v46 = vld [vmem:[%s1366_s13 + $0x18] sm:$0xf0]  ;;  %v920_v49 = vor.u32 %v1044_v41, %v919_v40 }
  0x5d   : > { %v1059_v47 = vld [vmem:[%s1366_s13 + $0x94] sm:$0xf]  ;;  %v985_v48 = vld [vmem:[%s1366_s13 + $0x98] sm:$0xf0]  ;;  %v984_v51 = vor.u32 %v1060_v44, %v983_v42  ;;  %v924_v52 = vor.u32 %v1043_v45, %v921_v46  ;;  %v911_v53 = vld [vmem:[%s1366_s13] sm:$0xf] }
  0x5e   : > { %681 = vmatpush.bf16.msra.mxu0 %v936_v25  ;;  %v477_v50 = vld [vmem:[%s1348_s30] sm:$0xff]  ;;  %v1042_v54 = vld [vmem:[%s1366_s13 + $0x4] sm:$0xf0]  ;;  %v975_v55 = vld [vmem:[%s1366_s13 + $0x80] sm:$0xf]  ;;  %v988_v56 = vor.u32 %v1059_v47, %v985_v48  ;;  %p1037_p13 = scmp.ne.s32.totalorder %s1168_s17, 8 }
  0x5f   : > { %694 = vmatpush.bf16.msra.mxu1 %v1000_v26  ;;  %707 = vmatpush.bf16.msra.mxu2 %v940_v27  ;;  %v1058_v57 = vld [vmem:[%s1366_s13 + $0x84] sm:$0xf0]  ;;  %v1041_v58 = vld [vmem:[%s1366_s13 + $0x4] sm:$0xf]  ;;  %v913_v59 = vld [vmem:[%s1366_s13 + $0x8] sm:$0xf0]  ;;  %v511_v62 = vunpack.c.l.b16 %v477_v50  ;;  %v912_v63 = vor.u32 %v1042_v54, %v911_v53  ;;  %v512_v0 = vunpack.c.h.b16 %v477_v50 }
  0x60   : > { %720 = vmatpush.bf16.msra.mxu3 %v1004_v31  ;;  %v1057_v60 = vld [vmem:[%s1366_s13 + $0x84] sm:$0xf]  ;;  %v977_v61 = vld [vmem:[%s1366_s13 + $0x88] sm:$0xf0]  ;;  %v976_v1 = vor.u32 %v1058_v57, %v975_v55  ;;  %v916_v2 = vor.u32 %v1041_v58, %v913_v59  ;;  %v475_v7 = vld [vmem:[#allocation2] sm:$0xff] }
  0x61   : > { %v980_v3 = vor.u32 %v1057_v60, %v977_v61  ;;  %v513_v4 = vpack.c.b16 %v511_v62, %v511_v62  ;;  %v514_v5 = vpack.c.b16 %v512_v0, %v512_v0  ;;  %v476_v12 = vld [vmem:[#allocation2 + $0x8] sm:$0xff] }
  0x62   : > { %682 = vmatpush.bf16.msra.mxu0 %v928_v37 }
  0x63   : > { %695 = vmatpush.bf16.msra.mxu1 %v992_v38  ;;  %708 = vmatpush.bf16.msra.mxu2 %v932_v39 }
  0x64   : > { %721 = vmatpush.bf16.msra.mxu3 %v996_v43 }
  0x66   : > { %683 = vmatpush.bf16.msra.mxu0 %v920_v49 }
  0x67   : > { %696 = vmatpush.bf16.msra.mxu1 %v984_v51  ;;  %709 = vmatpush.bf16.msra.mxu2 %v924_v52 }
  0x68   : > { %722 = vmatpush.bf16.msra.mxu3 %v988_v56 }
  0x6a   : > { %684 = vmatpush.bf16.msra.mxu0 %v912_v63 }
  0x6b   : > { %697 = vmatpush.bf16.msra.mxu1 %v976_v1  ;;  %710 = vmatpush.bf16.msra.mxu2 %v916_v2 }
  0x6c   : > { %723 = vmatpush.bf16.msra.mxu3 %v980_v3 }
  0x6d   : > { %685 = vmatmul.bf16.vlgmr.msra.gmra.mxu0 %v513_v4 }
  0x6e   : > { %698 = vmatmul.bf16.vlgmr.msra.gmra.mxu1 %v514_v5  ;;  %711 = vmatmul.bf16.vlgmr.msra.gmra.mxu2 %v513_v4 }
  0x6f   : > { %724 = vmatmul.bf16.vlgmr.msra.gmra.mxu3 %v514_v5 }
  0xea   : > { %v686_v6 = vpop.f32.mrf.mxu0 }
  0xeb   : > { %v699_v8 = vpop.f32.mrf.mxu1 }
  0xec   : > { %v700_v9 = vadd.f32 %v699_v8, %v686_v6 }
  0xee   : > { %v729_v10 = vadd.f32 %v700_v9, %v475_v7 }
  0xf0   : > { %731 = vst [vmem:[#allocation2] sm:$0xff] %v729_v10 }
  0xf1   : > { %v712_v11 = vpop.f32.mrf.mxu2 }
  0xf2   : > { %v725_v13 = vpop.f32.mrf.mxu3  ;;  %v688_v14 = vpop.f32.mrf.mxu0 }
  0xf3   : > { %v726_v15 = vadd.f32 %v725_v13, %v712_v11  ;;  %v701_v16 = vpop.f32.mrf.mxu1 }
  0xf5   : > { %v730_v17 = vadd.f32 %v726_v15, %v476_v12 }
  0xf6   : > { %736 = sbr.rel (%p1037_p13) target bundleno = 263 (0x107), region = 82 }
  0xf7   : > { %732 = vst [vmem:[#allocation2 + $0x8] sm:$0xff] %v730_v17 }
  0xf9   : > { %v714_v18 = vpop.f32.mrf.mxu2 }
  0xfa   : > { %v727_v19 = vpop.f32.mrf.mxu3 }
  0xfb   : > { %v737_v20 = vld [vmem:[#allocation2] sm:$0xff] }
  0xfc   : > { %v739_v21 = vld [vmem:[%s452_s15] sm:$0x3] }
  0xfd   : > { %v747_v22 = vld [vmem:[%s457_s18] sm:$0x3]  ;;  %v741_v23 = vperm.slane %v739_v21, 0  ;;  %v742_v26 = vperm.slane %v739_v21, 1 }
  0xfe   : > { %v749_v24 = vperm.slane %v747_v22, 0  ;;  %v738_v25 = vld [vmem:[#allocation2 + $0x8] sm:$0xff]  ;;  %v750_v27 = vperm.slane %v747_v22, 1 }
  0xff   : > { %v745_v28 = vmul.f32 %v741_v23, %v737_v20  ;;  %v746_v29 = vmul.f32 %v742_v26, %v738_v25 }
 0x101   : > { %v753_v30 = vadd.f32 %v749_v24, %v745_v28  ;;  %v754_v31 = vadd.f32 %v750_v27, %v746_v29 }
 0x103   : > { %v755_v32 = vmax.f32 %v753_v30, 0.0  ;;  %v756_v33 = vmax.f32 %v754_v31, 0.0 }
 0x105   : > { %757 = vst [vmem:[%s1364_s12] sm:$0xff] %v755_v32 }
 0x106   : > { %758 = vst [vmem:[%s1364_s12 + $0x8] sm:$0xff] %v756_v33 }
 0x107 PF: > { %s14_s21 = sadd.s32 1, %s1184_s21   ;;  %s1473_s15 = smov %s1164_s16 }
 0x108   : > { %p11_p0 = scmp.ge.s32.totalorder %s14_s21, 20   ;;  %s1474_s16 = smov %s1263_s28 }
 0x109   : > { %s1475_s17 = smov %s1176_s19  ;;  %s1476_s18 = smov %s1180_s20 }
 0x10a   : > { %s1477_s19 = smov %s1480_s22  ;;  %s1478_s20 = smov %s1484_s23 }
 0x10b   :  { %13 = sbr.rel (!%p11_p0) target bundleno = 4 (0x4), region = 126 }

// kernel: _lambda_.22
= control target key start
LH: loop header
LB: loop body
LE: loop exit
PB: predicated region body
PF: predicated region fallthrough
CT: control target
= control target key end

     0   :  { %s1170_s15 = smov 0   ;;  %s1172_s16 = smov 0   ;;  %s1378_s0 = inlined_call_operand.vmem [shape: bf16[8,256], index: 0, kind: input, shape index: {}]   ;;  %s1379_s1 = inlined_call_operand.vmem [shape: bf16[256,512], index: 1, kind: input, shape index: {}]   ;;  %s1380_s2 = inlined_call_operand.vmem [shape: f32[1,512], index: 2, kind: input, shape index: {}]   ;;  %s1381_s3 = inlined_call_operand.vmem [shape: f32[1,512], index: 3, kind: input, shape index: {}]   ;;  %s1382_s4 = inlined_call_operand.vmem [shape: f32[8,512], index: 4, kind: output, shape index: {}]  }
   0x1   :  { %s1174_s17 = smov 0   ;;  %s1176_s18 = smov 0  }
   0x2   :  { %s1178_s19 = smov 0  }
   0x3 LB: > { %s29_s20 = sadd.s32 1, %s1139_s18  ;;  %p77_p1 = scmp.ne.s32.totalorder %s1131_s16, %s1127_s15  ;;  %s1143_s19 = sphi %s1178_s19, %s14_s19   ;;  %s1139_s18 = sphi %s1176_s18, %s1386_s18   ;;  %s1135_s17 = sphi %s1174_s17, %s1385_s17   ;;  %s1131_s16 = sphi %s1172_s16, %s1384_s16   ;;  %s1127_s15 = sphi %s1170_s15, %s1383_s15  }
   0x4   : > { %p31_p0 = scmp.ge.s32.totalorder %s29_s20, 2  ;;  %p78_p2 = scmp.eq.s32.totalorder %s1143_s19, 0 }
   0x5   : > { %s70_s22 = sadd.s32 1, %s1131_s16  ;;  %p892_p5 = scmp.ge.s32.totalorder %s1143_s19, 2 }
   0x6   : > { %s1388_s20 = smov (%p31_p0, %s29_s20), 0  ;;  %p79_p3 = por %p78_p2, %p77_p1 }
   0x7   : > { %s66_s21 = ssub.s32 %s1139_s18, %s1388_s20  ;;  %196 = sbr.rel (%p892_p5) target bundleno = 48 (0x30), region = 20 }
   0x8   : > { %p68_p4 = scmp.eq.s32.totalorder %s66_s21, 0 }
   0xa   : > { %s1205_s23 = scalar_select %p68_p4, %s1131_s16, %s70_s22  }
   0xc   : > { %199 = sbr.rel (!%p79_p3) target bundleno = 48 (0x30), region = 24  ;;  %s201_s24 = sand.u32 (%p79_p3), 1, %s1131_s16  }
   0xd   : > { %s1032_s25 = sshll.u32 (%p79_p3), %s1139_s18, 3  ;;  %s893_s26 = sshll.u32 (%p79_p3), %s201_s24, 8 }
   0xe   : > { %s1213_s29 = scalar_lea.vmem (%p79_p3), %s1379_s1, %s1032_s25  ;;  %s1218_s30 = scalar_lea.vmem (%p79_p3), [#allocation3], %s893_s26 }
   0xf   : > { %v300_v0 = vld [vmem:[%s1213_s29] sm:$0xff] (%p79_p3)  ;;  %v302_v1 = vld [vmem:[%s1213_s29 + $0x10] sm:$0xff] (%p79_p3) }
  0x10   : > { %v304_v2 = vld [vmem:[%s1213_s29 + $0x20] sm:$0xff] (%p79_p3)  ;;  %301 = vst [vmem:[%s1218_s30] sm:$0xff] (%p79_p3), %v300_v0  ;;  %v306_v3 = vld [vmem:[%s1213_s29 + $0x30] sm:$0xff] (%p79_p3) }
  0x11   : > { %303 = vst [vmem:[%s1218_s30 + $0x8] sm:$0xff] %v302_v1  ;;  %v308_v4 = vld [vmem:[%s1213_s29 + $0x40] sm:$0xff]  ;;  %v310_v5 = vld [vmem:[%s1213_s29 + $0x50] sm:$0xff] }
  0x12   : > { %305 = vst [vmem:[%s1218_s30 + $0x10] sm:$0xff] %v304_v2  ;;  %v312_v6 = vld [vmem:[%s1213_s29 + $0x60] sm:$0xff]  ;;  %v314_v7 = vld [vmem:[%s1213_s29 + $0x70] sm:$0xff] }
  0x13   : > { %307 = vst [vmem:[%s1218_s30 + $0x18] sm:$0xff] %v306_v3  ;;  %v316_v8 = vld [vmem:[%s1213_s29 + $0x80] sm:$0xff]  ;;  %v318_v9 = vld [vmem:[%s1213_s29 + $0x90] sm:$0xff] }
  0x14   : > { %309 = vst [vmem:[%s1218_s30 + $0x20] sm:$0xff] %v308_v4  ;;  %v320_v10 = vld [vmem:[%s1213_s29 + $0xa0] sm:$0xff]  ;;  %v322_v11 = vld [vmem:[%s1213_s29 + $0xb0] sm:$0xff] }
  0x15   : > { %311 = vst [vmem:[%s1218_s30 + $0x28] sm:$0xff] %v310_v5  ;;  %v324_v12 = vld [vmem:[%s1213_s29 + $0xc0] sm:$0xff]  ;;  %v326_v13 = vld [vmem:[%s1213_s29 + $0xd0] sm:$0xff] }
  0x16   : > { %313 = vst [vmem:[%s1218_s30 + $0x30] sm:$0xff] %v312_v6  ;;  %v328_v14 = vld [vmem:[%s1213_s29 + $0xe0] sm:$0xff]  ;;  %v330_v15 = vld [vmem:[%s1213_s29 + $0xf0] sm:$0xff] }
  0x17   : > { %315 = vst [vmem:[%s1218_s30 + $0x38] sm:$0xff] %v314_v7  ;;  %v332_v16 = vld [vmem:[%s1213_s29 + $0x100] sm:$0xff]  ;;  %v334_v17 = vld [vmem:[%s1213_s29 + $0x110] sm:$0xff] }
  0x18   : > { %317 = vst [vmem:[%s1218_s30 + $0x40] sm:$0xff] %v316_v8  ;;  %v336_v18 = vld [vmem:[%s1213_s29 + $0x120] sm:$0xff]  ;;  %v338_v19 = vld [vmem:[%s1213_s29 + $0x130] sm:$0xff] }
  0x19   : > { %319 = vst [vmem:[%s1218_s30 + $0x48] sm:$0xff] %v318_v9  ;;  %v340_v20 = vld [vmem:[%s1213_s29 + $0x140] sm:$0xff]  ;;  %v342_v21 = vld [vmem:[%s1213_s29 + $0x150] sm:$0xff] }
  0x1a   : > { %321 = vst [vmem:[%s1218_s30 + $0x50] sm:$0xff] %v320_v10  ;;  %v344_v22 = vld [vmem:[%s1213_s29 + $0x160] sm:$0xff]  ;;  %v346_v23 = vld [vmem:[%s1213_s29 + $0x170] sm:$0xff] }
  0x1b   : > { %323 = vst [vmem:[%s1218_s30 + $0x58] sm:$0xff] %v322_v11  ;;  %v348_v24 = vld [vmem:[%s1213_s29 + $0x180] sm:$0xff]  ;;  %v350_v25 = vld [vmem:[%s1213_s29 + $0x190] sm:$0xff] }
  0x1c   : > { %325 = vst [vmem:[%s1218_s30 + $0x60] sm:$0xff] %v324_v12  ;;  %v352_v26 = vld [vmem:[%s1213_s29 + $0x1a0] sm:$0xff]  ;;  %v354_v27 = vld [vmem:[%s1213_s29 + $0x1b0] sm:$0xff] }
  0x1d   : > { %327 = vst [vmem:[%s1218_s30 + $0x68] sm:$0xff] %v326_v13  ;;  %v356_v28 = vld [vmem:[%s1213_s29 + $0x1c0] sm:$0xff]  ;;  %v358_v29 = vld [vmem:[%s1213_s29 + $0x1d0] sm:$0xff] }
  0x1e   : > { %329 = vst [vmem:[%s1218_s30 + $0x70] sm:$0xff] %v328_v14  ;;  %v360_v30 = vld [vmem:[%s1213_s29 + $0x1e0] sm:$0xff]  ;;  %v362_v31 = vld [vmem:[%s1213_s29 + $0x1f0] sm:$0xff] }
  0x1f   : > { %331 = vst [vmem:[%s1218_s30 + $0x78] sm:$0xff] %v330_v15 }
  0x20   : > { %333 = vst [vmem:[%s1218_s30 + $0x80] sm:$0xff] %v332_v16 }
  0x21   : > { %335 = vst [vmem:[%s1218_s30 + $0x88] sm:$0xff] %v334_v17 }
  0x22   : > { %337 = vst [vmem:[%s1218_s30 + $0x90] sm:$0xff] %v336_v18 }
  0x23   : > { %339 = vst [vmem:[%s1218_s30 + $0x98] sm:$0xff] %v338_v19 }
  0x24   : > { %341 = vst [vmem:[%s1218_s30 + $0xa0] sm:$0xff] %v340_v20 }
  0x25   : > { %343 = vst [vmem:[%s1218_s30 + $0xa8] sm:$0xff] %v342_v21 }
  0x26   : > { %345 = vst [vmem:[%s1218_s30 + $0xb0] sm:$0xff] %v344_v22 }
  0x27   : > { %347 = vst [vmem:[%s1218_s30 + $0xb8] sm:$0xff] %v346_v23 }
  0x28   : > { %349 = vst [vmem:[%s1218_s30 + $0xc0] sm:$0xff] %v348_v24 }
  0x29   : > { %351 = vst [vmem:[%s1218_s30 + $0xc8] sm:$0xff] %v350_v25 }
  0x2a   : > { %353 = vst [vmem:[%s1218_s30 + $0xd0] sm:$0xff] %v352_v26 }
  0x2b   : > { %355 = vst [vmem:[%s1218_s30 + $0xd8] sm:$0xff] %v354_v27 }
  0x2c   : > { %357 = vst [vmem:[%s1218_s30 + $0xe0] sm:$0xff] %v356_v28 }
  0x2d   : > { %359 = vst [vmem:[%s1218_s30 + $0xe8] sm:$0xff] %v358_v29 }
  0x2e   : > { %361 = vst [vmem:[%s1218_s30 + $0xf0] sm:$0xff] %v360_v30 }
  0x2f   : > { %363 = vst [vmem:[%s1218_s30 + $0xf8] sm:$0xff] %v362_v31 }
  0x30 PF: > { %p896_p6 = scmp.ge.s32.totalorder %s1143_s19, 1  ;;  %p384_p7 = scmp.lt.s32.totalorder %s1143_s19, 3 }
  0x32   : > { %p385_p8 = pnand %p896_p6, %p384_p7 }
  0x33   : > { %s391_s5 = sand.u32 (!%p385_p8), 1, %s1127_s15   ;;  %s898_s10 = sshll.u32 (!%p385_p8), %s1135_s17, 1 }
  0x34   : > { %388 = sbr.rel (%p385_p8) target bundleno = 233 (0xe9), region = 70  ;;  %s897_s6 = sshll.u32 (!%p385_p8), %s391_s5, 8 }
  0x35   : > { %s1284_s7 = scalar_lea.vmem (!%p385_p8), [#allocation3], %s897_s6  ;;  %p450_p9 = scmp.lt.s32.totalorder (!%p385_p8), %s898_s10, 3 }
  0x39   : > { %v960_v32 = vld [vmem:[%s1284_s7 + $0x70] sm:$0xf]  ;;  %v1048_v33 = vld [vmem:[%s1284_s7 + $0x74] sm:$0xf0]  ;;  %v1047_v37 = vld [vmem:[%s1284_s7 + $0x74] sm:$0xf] }
  0x3a   : > { %v1024_v34 = vld [vmem:[%s1284_s7 + $0xf0] sm:$0xf]  ;;  %v961_v35 = vor.u32 %v1048_v33, %v960_v32  ;;  %v1064_v36 = vld [vmem:[%s1284_s7 + $0xf4] sm:$0xf0]  ;;  %v962_v38 = vld [vmem:[%s1284_s7 + $0x78] sm:$0xf0] }
  0x3b   : > { %v1025_v39 = vor.u32 %v1064_v36, %v1024_v34  ;;  %v965_v40 = vor.u32 %v1047_v37, %v962_v38  ;;  %v1063_v41 = vld [vmem:[%s1284_s7 + $0xf4] sm:$0xf]  ;;  %v1026_v42 = vld [vmem:[%s1284_s7 + $0xf8] sm:$0xf0]  ;;  %v952_v43 = vld [vmem:[%s1284_s7 + $0x60] sm:$0xf] }
  0x3c   : > { %677 = vmatpush.bf16.msra.mxu0 %v961_v35  ;;  %v1029_v44 = vor.u32 %v1063_v41, %v1026_v42  ;;  %v1046_v45 = vld [vmem:[%s1284_s7 + $0x64] sm:$0xf0]  ;;  %v1016_v46 = vld [vmem:[%s1284_s7 + $0xe0] sm:$0xf]  ;;  %v1045_v50 = vld [vmem:[%s1284_s7 + $0x64] sm:$0xf] }
  0x3d   : > { %v1062_v47 = vld [vmem:[%s1284_s7 + $0xe4] sm:$0xf0]  ;;  %690 = vmatpush.bf16.msra.mxu1 %v1025_v39  ;;  %703 = vmatpush.bf16.msra.mxu2 %v965_v40  ;;  %v953_v48 = vor.u32 %v1046_v45, %v952_v43  ;;  %v954_v51 = vld [vmem:[%s1284_s7 + $0x68] sm:$0xf0]  ;;  %v1061_v52 = vld [vmem:[%s1284_s7 + $0xe4] sm:$0xf] }
  0x3e   : > { %v1017_v49 = vor.u32 %v1062_v47, %v1016_v46  ;;  %716 = vmatpush.bf16.msra.mxu3 %v1029_v44  ;;  %v957_v53 = vor.u32 %v1045_v50, %v954_v51  ;;  %v1018_v54 = vld [vmem:[%s1284_s7 + $0xe8] sm:$0xf0]  ;;  %v944_v55 = vld [vmem:[%s1284_s7 + $0x50] sm:$0xf]  ;;  %v1044_v56 = vld [vmem:[%s1284_s7 + $0x54] sm:$0xf0] }
  0x3f   : > { %v1021_v57 = vor.u32 %v1061_v52, %v1018_v54  ;;  %v1008_v58 = vld [vmem:[%s1284_s7 + $0xd0] sm:$0xf]  ;;  %v1060_v59 = vld [vmem:[%s1284_s7 + $0xd4] sm:$0xf0]  ;;  %v1043_v60 = vld [vmem:[%s1284_s7 + $0x54] sm:$0xf]  ;;  %v945_v61 = vor.u32 %v1044_v56, %v944_v55 }
  0x40   : > { %678 = vmatpush.bf16.msra.mxu0 %v953_v48  ;;  %v946_v62 = vld [vmem:[%s1284_s7 + $0x58] sm:$0xf0]  ;;  %v1059_v63 = vld [vmem:[%s1284_s7 + $0xd4] sm:$0xf]  ;;  %v1009_v1 = vor.u32 %v1060_v59, %v1008_v58  ;;  %v936_v3 = vld [vmem:[%s1284_s7 + $0x40] sm:$0xf] }
  0x41   : > { %v1010_v0 = vld [vmem:[%s1284_s7 + $0xd8] sm:$0xf0]  ;;  %691 = vmatpush.bf16.msra.mxu1 %v1017_v49  ;;  %704 = vmatpush.bf16.msra.mxu2 %v957_v53  ;;  %v949_v2 = vor.u32 %v1043_v60, %v946_v62  ;;  %v1042_v4 = vld [vmem:[%s1284_s7 + $0x44] sm:$0xf0]  ;;  %v1000_v5 = vld [vmem:[%s1284_s7 + $0xc0] sm:$0xf] }
  0x42   : > { %717 = vmatpush.bf16.msra.mxu3 %v1021_v57  ;;  %v1013_v6 = vor.u32 %v1059_v63, %v1010_v0  ;;  %v1058_v7 = vld [vmem:[%s1284_s7 + $0xc4] sm:$0xf0]  ;;  %v1041_v8 = vld [vmem:[%s1284_s7 + $0x44] sm:$0xf]  ;;  %v938_v9 = vld [vmem:[%s1284_s7 + $0x48] sm:$0xf0]  ;;  %v937_v12 = vor.u32 %v1042_v4, %v936_v3 }
  0x43   : > { %v1057_v10 = vld [vmem:[%s1284_s7 + $0xc4] sm:$0xf]  ;;  %v1002_v11 = vld [vmem:[%s1284_s7 + $0xc8] sm:$0xf0]  ;;  %v1001_v13 = vor.u32 %v1058_v7, %v1000_v5  ;;  %v941_v14 = vor.u32 %v1041_v8, %v938_v9  ;;  %v928_v15 = vld [vmem:[%s1284_s7 + $0x30] sm:$0xf] }
  0x44   : > { %679 = vmatpush.bf16.msra.mxu0 %v945_v61  ;;  %v1040_v16 = vld [vmem:[%s1284_s7 + $0x34] sm:$0xf0]  ;;  %v992_v17 = vld [vmem:[%s1284_s7 + $0xb0] sm:$0xf]  ;;  %v1005_v18 = vor.u32 %v1057_v10, %v1002_v11  ;;  %v1039_v20 = vld [vmem:[%s1284_s7 + $0x34] sm:$0xf] }
  0x45   : > { %692 = vmatpush.bf16.msra.mxu1 %v1009_v1  ;;  %705 = vmatpush.bf16.msra.mxu2 %v949_v2  ;;  %v1056_v19 = vld [vmem:[%s1284_s7 + $0xb4] sm:$0xf0]  ;;  %v930_v21 = vld [vmem:[%s1284_s7 + $0x38] sm:$0xf0]  ;;  %v1055_v22 = vld [vmem:[%s1284_s7 + $0xb4] sm:$0xf]  ;;  %v929_v24 = vor.u32 %v1040_v16, %v928_v15 }
  0x46   : > { %718 = vmatpush.bf16.msra.mxu3 %v1013_v6  ;;  %v994_v23 = vld [vmem:[%s1284_s7 + $0xb8] sm:$0xf0]  ;;  %v993_v25 = vor.u32 %v1056_v19, %v992_v17  ;;  %v933_v26 = vor.u32 %v1039_v20, %v930_v21  ;;  %v920_v27 = vld [vmem:[%s1284_s7 + $0x20] sm:$0xf]  ;;  %v1038_v28 = vld [vmem:[%s1284_s7 + $0x24] sm:$0xf0] }
  0x47   : > { %v984_v29 = vld [vmem:[%s1284_s7 + $0xa0] sm:$0xf]  ;;  %v997_v30 = vor.u32 %v1055_v22, %v994_v23  ;;  %v1054_v31 = vld [vmem:[%s1284_s7 + $0xa4] sm:$0xf0]  ;;  %v1037_v32 = vld [vmem:[%s1284_s7 + $0x24] sm:$0xf]  ;;  %v921_v36 = vor.u32 %v1038_v28, %v920_v27 }
  0x48   : > { %680 = vmatpush.bf16.msra.mxu0 %v937_v12  ;;  %v922_v33 = vld [vmem:[%s1284_s7 + $0x28] sm:$0xf0]  ;;  %v1053_v34 = vld [vmem:[%s1284_s7 + $0xa4] sm:$0xf]  ;;  %v985_v37 = vor.u32 %v1054_v31, %v984_v29  ;;  %v912_v39 = vld [vmem:[%s1284_s7 + $0x10] sm:$0xf] }
  0x49   : > { %693 = vmatpush.bf16.msra.mxu1 %v1001_v13  ;;  %706 = vmatpush.bf16.msra.mxu2 %v941_v14  ;;  %v986_v35 = vld [vmem:[%s1284_s7 + $0xa8] sm:$0xf0]  ;;  %v925_v38 = vor.u32 %v1037_v32, %v922_v33  ;;  %v1036_v40 = vld [vmem:[%s1284_s7 + $0x14] sm:$0xf0]  ;;  %v976_v41 = vld [vmem:[%s1284_s7 + $0x90] sm:$0xf] }
  0x4a   : > { %719 = vmatpush.bf16.msra.mxu3 %v1005_v18  ;;  %v989_v42 = vor.u32 %v1053_v34, %v986_v35  ;;  %v1052_v43 = vld [vmem:[%s1284_s7 + $0x94] sm:$0xf0]  ;;  %v1035_v44 = vld [vmem:[%s1284_s7 + $0x14] sm:$0xf]  ;;  %v914_v45 = vld [vmem:[%s1284_s7 + $0x18] sm:$0xf0]  ;;  %v913_v48 = vor.u32 %v1036_v40, %v912_v39 }
  0x4b   : > { %v1051_v46 = vld [vmem:[%s1284_s7 + $0x94] sm:$0xf]  ;;  %v978_v47 = vld [vmem:[%s1284_s7 + $0x98] sm:$0xf0]  ;;  %v477_v49 = vld [vmem:[%s1378_s0] sm:$0xff]  ;;  %v977_v50 = vor.u32 %v1052_v43, %v976_v41  ;;  %v917_v51 = vor.u32 %v1035_v44, %v914_v45  ;;  %s1390_s10 = smov (!%p450_p9, %s898_s10), 3 }
  0x4c   : > { %681 = vmatpush.bf16.msra.mxu0 %v929_v24  ;;  %v904_v52 = vld [vmem:[%s1284_s7] sm:$0xf]  ;;  %v1034_v53 = vld [vmem:[%s1284_s7 + $0x4] sm:$0xf0]  ;;  %v981_v55 = vor.u32 %v1051_v46, %v978_v47  ;;  %v1033_v57 = vld [vmem:[%s1284_s7 + $0x4] sm:$0xf]  ;;  %v511_v61 = vunpack.c.l.b16 %v477_v49  ;;  %v512_v63 = vunpack.c.h.b16 %v477_v49  ;;  %s452_s13 = scalar_lea.vmem %s1380_s2, %s1390_s10  ;;  %s457_s21 = scalar_lea.vmem %s1381_s3, %s1390_s10 }
  0x4d   : > { %694 = vmatpush.bf16.msra.mxu1 %v993_v25  ;;  %707 = vmatpush.bf16.msra.mxu2 %v933_v26  ;;  %v968_v54 = vld [vmem:[%s1284_s7 + $0x80] sm:$0xf]  ;;  %v1050_v56 = vld [vmem:[%s1284_s7 + $0x84] sm:$0xf0]  ;;  %v906_v58 = vld [vmem:[%s1284_s7 + $0x8] sm:$0xf0]  ;;  %v905_v62 = vor.u32 %v1034_v53, %v904_v52 }
  0x4e   : > { %720 = vmatpush.bf16.msra.mxu3 %v997_v30  ;;  %v1049_v59 = vld [vmem:[%s1284_s7 + $0x84] sm:$0xf]  ;;  %v970_v60 = vld [vmem:[%s1284_s7 + $0x88] sm:$0xf0]  ;;  %v969_v0 = vor.u32 %v1050_v56, %v968_v54  ;;  %v909_v1 = vor.u32 %v1033_v57, %v906_v58  ;;  %v513_v3 = vpack.c.b16 %v511_v61, %v511_v61  ;;  %v514_v4 = vpack.c.b16 %v512_v63, %v512_v63  ;;  %v738_v5 = vld [vmem:[%s452_s13] sm:$0x3] }
  0x4f   : > { %v973_v2 = vor.u32 %v1049_v59, %v970_v60  ;;  %v746_v6 = vld [vmem:[%s457_s21] sm:$0x3]  ;;  %v740_v8 = vperm.slane %v738_v5, 0  ;;  %s901_s22 = sshll.u32 %s1390_s10, 3  ;;  %v741_v15 = vperm.slane %v738_v5, 1 }
  0x50   : > { %682 = vmatpush.bf16.msra.mxu0 %v921_v36  ;;  %v748_v11 = vperm.slane %v746_v6, 0  ;;  %s467_s25 = scalar_lea.vmem %s1382_s4, %s901_s22  ;;  %v749_v19 = vperm.slane %v746_v6, 1 }
  0x51   : > { %695 = vmatpush.bf16.msra.mxu1 %v985_v37  ;;  %708 = vmatpush.bf16.msra.mxu2 %v925_v38 }
  0x52   : > { %721 = vmatpush.bf16.msra.mxu3 %v989_v42 }
  0x54   : > { %683 = vmatpush.bf16.msra.mxu0 %v913_v48 }
  0x55   : > { %696 = vmatpush.bf16.msra.mxu1 %v977_v50  ;;  %709 = vmatpush.bf16.msra.mxu2 %v917_v51 }
  0x56   : > { %722 = vmatpush.bf16.msra.mxu3 %v981_v55 }
  0x58   : > { %684 = vmatpush.bf16.msra.mxu0 %v905_v62 }
  0x59   : > { %697 = vmatpush.bf16.msra.mxu1 %v969_v0  ;;  %710 = vmatpush.bf16.msra.mxu2 %v909_v1 }
  0x5a   : > { %723 = vmatpush.bf16.msra.mxu3 %v973_v2 }
  0x5b   : > { %685 = vmatmul.bf16.vlgmr.msra.gmra.mxu0 %v513_v3 }
  0x5c   : > { %698 = vmatmul.bf16.vlgmr.msra.gmra.mxu1 %v514_v4  ;;  %711 = vmatmul.bf16.vlgmr.msra.gmra.mxu2 %v513_v3 }
  0x5d   : > { %724 = vmatmul.bf16.vlgmr.msra.gmra.mxu3 %v514_v4 }
  0xd8   : > { %v686_v7 = vpop.f32.mrf.mxu0 }
  0xd9   : > { %v699_v9 = vpop.f32.mrf.mxu1 }
  0xda   : > { %v700_v10 = vadd.f32 %v699_v9, %v686_v7 }
  0xdc   : > { %v744_v12 = vmul.f32 %v740_v8, %v700_v10 }
  0xde   : > { %v752_v13 = vadd.f32 %v748_v11, %v744_v12 }
  0xdf   : > { %v712_v14 = vpop.f32.mrf.mxu2 }
  0xe0   : > { %754 = vst [vmem:[%s467_s25] sm:$0xff] %v752_v13  ;;  %v725_v16 = vpop.f32.mrf.mxu3  ;;  %v688_v17 = vpop.f32.mrf.mxu0 }
  0xe1   : > { %v726_v18 = vadd.f32 %v725_v16, %v712_v14  ;;  %v701_v20 = vpop.f32.mrf.mxu1 }
  0xe3   : > { %v745_v21 = vmul.f32 %v741_v15, %v726_v18 }
  0xe5   : > { %v753_v22 = vadd.f32 %v749_v19, %v745_v21 }
  0xe7   : > { %755 = vst [vmem:[%s467_s25 + $0x8] sm:$0xff] %v753_v22  ;;  %v714_v23 = vpop.f32.mrf.mxu2 }
  0xe8   : > { %v727_v24 = vpop.f32.mrf.mxu3 }
  0xe9 PF: > { %s14_s19 = sadd.s32 1, %s1143_s19   ;;  %s1383_s15 = smov %s1131_s16 }
  0xea   : > { %p11_p10 = scmp.ge.s32.totalorder %s14_s19, 4   ;;  %s1384_s16 = smov %s1205_s23 }
  0xeb   : > { %s1385_s17 = smov %s1139_s18  ;;  %s1386_s18 = smov %s1388_s20 }
  0xec   :  { %13 = sbr.rel (!%p11_p10) target bundleno = 3 (0x3), region = 126 }

// kernel: _lambda_.24
= control target key start
LH: loop header
LB: loop body
LE: loop exit
PB: predicated region body
PF: predicated region fallthrough
CT: control target
= control target key end

     0   :  { %s1844_s18 = smov 0   ;;  %s1846_s19 = smov 0   ;;  %s2252_s0 = inlined_call_operand.vmem [shape: bf16[8,4608], index: 0, kind: input, shape index: {}]   ;;  %s2253_s1 = inlined_call_operand.vmem [shape: bf16[4608,512], index: 1, kind: input, shape index: {}]   ;;  %s2254_s2 = inlined_call_operand.vmem [shape: f32[1,512], index: 2, kind: input, shape index: {}]   ;;  %s2255_s3 = inlined_call_operand.vmem [shape: f32[1,512], index: 3, kind: input, shape index: {}]   ;;  %s2256_s4 = inlined_call_operand.vmem [shape: f32[8,512], index: 4, kind: input, shape index: {}]   ;;  %s2257_s5 = inlined_call_operand.vmem [shape: f32[8,512], index: 5, kind: output, shape index: {}]  }
   0x1   :  { %s1848_s20 = smov 0   ;;  %s1850_s21 = smov 0  }
   0x2   :  { %s1852_s22 = smov 0   ;;  %s1854_s23 = smov 0  }
   0x3   :  { %s1856_s24 = smov 0  }
   0x4 LB: > { %s27_s25 = sadd.s32 1, %s1803_s22  ;;  %s30_s26 = sadd.s32 1, %s1807_s23  ;;  %s1811_s24 = sphi %s1856_s24, %s15_s24   ;;  %s1807_s23 = sphi %s1854_s23, %s2263_s23   ;;  %s1803_s22 = sphi %s1852_s22, %s2262_s22   ;;  %s1799_s21 = sphi %s1850_s21, %s2261_s21   ;;  %s1795_s20 = sphi %s1848_s20, %s2260_s20   ;;  %s1791_s19 = sphi %s1846_s19, %s2259_s19   ;;  %s1787_s18 = sphi %s1844_s18, %s2258_s18  }
   0x5   : > { %p28_p0 = scmp.ge.s32.totalorder %s27_s25, 9  ;;  %p78_p1 = scmp.ne.s32.totalorder %s1791_s19, %s1787_s18 }
   0x6   : > { %p79_p2 = scmp.eq.s32.totalorder %s1811_s24, 0  ;;  %s71_s30 = sadd.s32 1, %s1791_s19 }
   0x7   : > { %s2265_s25 = smov (%p28_p0, %s27_s25), 0  ;;  %s2267_s26 = smov (!%p28_p0, %s30_s26), %s1807_s23 }
   0x8   : > { %p80_p3 = por %p79_p2, %p78_p1  ;;  %p32_p4 = scmp.ge.s32.totalorder %s2267_s26, 2 }
   0x9   : > { %s66_s27 = ssub.s32 %s1803_s22, %s2265_s25  ;;  %p1359_p6 = scmp.ge.s32.totalorder %s1811_s24, 18 }
   0xa   : > { %s2269_s26 = smov (%p32_p4, %s2267_s26), 0 }
   0xb   : > { %s67_s28 = ssub.s32 %s1807_s23, %s2269_s26  ;;  %212 = sbr.rel (%p1359_p6) target bundleno = 87 (0x57), region = 16 }
   0xc   : > { %s68_s29 = sor.u32 %s67_s28, %s66_s27 }
   0xd   : > { %p69_p5 = scmp.eq.s32.totalorder %s68_s29, 0 }
   0xf   : > { %s1895_s6 = scalar_select %p69_p5, %s1791_s19, %s71_s30  }
  0x10   : > { %228 = sbr.rel (!%p80_p3) target bundleno = 87 (0x57), region = 24  ;;  %s230_s7 = sand.u32 (%p80_p3), 1, %s1791_s19  }
  0x11   : > { %s1362_s8 = sshll.u32 (%p80_p3), %s1807_s23, 1  ;;  %s1360_s9 = sshll.u32 (%p80_p3), %s230_s7, 9 }
  0x12   : > { %s1635_s10 = sshll.u32 (%p80_p3), %s1803_s22, 8  ;;  %s1909_s16 = scalar_lea.vmem (%p80_p3), [#allocation3], %s1360_s9 }
  0x13   : > { %s236_s11 = sadd.s32 (%p80_p3), %s1635_s10, %s1362_s8 }
  0x14   : > { %s1364_s12 = sshll.u32 (%p80_p3), %s236_s11, 2 }
  0x15   : > { %s1904_s15 = scalar_lea.vmem %s2253_s1, %s1364_s12 }
  0x16   : > { %v393_v0 = vld [vmem:[%s1904_s15] sm:$0xff]  ;;  %v395_v1 = vld [vmem:[%s1904_s15 + $0x10] sm:$0xff] }
  0x17   : > { %v397_v2 = vld [vmem:[%s1904_s15 + $0x20] sm:$0xff]  ;;  %394 = vst [vmem:[%s1909_s16] sm:$0xff] %v393_v0  ;;  %v399_v3 = vld [vmem:[%s1904_s15 + $0x30] sm:$0xff] }
  0x18   : > { %396 = vst [vmem:[%s1909_s16 + $0x8] sm:$0xff] %v395_v1  ;;  %v401_v4 = vld [vmem:[%s1904_s15 + $0x40] sm:$0xff]  ;;  %v403_v5 = vld [vmem:[%s1904_s15 + $0x50] sm:$0xff] }
  0x19   : > { %398 = vst [vmem:[%s1909_s16 + $0x10] sm:$0xff] %v397_v2  ;;  %v405_v6 = vld [vmem:[%s1904_s15 + $0x60] sm:$0xff]  ;;  %v407_v7 = vld [vmem:[%s1904_s15 + $0x70] sm:$0xff] }
  0x1a   : > { %400 = vst [vmem:[%s1909_s16 + $0x18] sm:$0xff] %v399_v3  ;;  %v409_v8 = vld [vmem:[%s1904_s15 + $0x80] sm:$0xff]  ;;  %v411_v9 = vld [vmem:[%s1904_s15 + $0x90] sm:$0xff] }
  0x1b   : > { %402 = vst [vmem:[%s1909_s16 + $0x20] sm:$0xff] %v401_v4  ;;  %v413_v10 = vld [vmem:[%s1904_s15 + $0xa0] sm:$0xff]  ;;  %v415_v11 = vld [vmem:[%s1904_s15 + $0xb0] sm:$0xff] }
  0x1c   : > { %404 = vst [vmem:[%s1909_s16 + $0x28] sm:$0xff] %v403_v5  ;;  %v417_v12 = vld [vmem:[%s1904_s15 + $0xc0] sm:$0xff]  ;;  %v419_v13 = vld [vmem:[%s1904_s15 + $0xd0] sm:$0xff] }
  0x1d   : > { %406 = vst [vmem:[%s1909_s16 + $0x30] sm:$0xff] %v405_v6  ;;  %v421_v14 = vld [vmem:[%s1904_s15 + $0xe0] sm:$0xff]  ;;  %v423_v15 = vld [vmem:[%s1904_s15 + $0xf0] sm:$0xff] }
  0x1e   : > { %408 = vst [vmem:[%s1909_s16 + $0x38] sm:$0xff] %v407_v7  ;;  %v425_v16 = vld [vmem:[%s1904_s15 + $0x100] sm:$0xff]  ;;  %v427_v17 = vld [vmem:[%s1904_s15 + $0x110] sm:$0xff] }
  0x1f   : > { %410 = vst [vmem:[%s1909_s16 + $0x40] sm:$0xff] %v409_v8  ;;  %v429_v18 = vld [vmem:[%s1904_s15 + $0x120] sm:$0xff]  ;;  %v431_v19 = vld [vmem:[%s1904_s15 + $0x130] sm:$0xff] }
  0x20   : > { %412 = vst [vmem:[%s1909_s16 + $0x48] sm:$0xff] %v411_v9  ;;  %v433_v20 = vld [vmem:[%s1904_s15 + $0x140] sm:$0xff]  ;;  %v435_v21 = vld [vmem:[%s1904_s15 + $0x150] sm:$0xff] }
  0x21   : > { %414 = vst [vmem:[%s1909_s16 + $0x50] sm:$0xff] %v413_v10  ;;  %v437_v22 = vld [vmem:[%s1904_s15 + $0x160] sm:$0xff]  ;;  %v439_v23 = vld [vmem:[%s1904_s15 + $0x170] sm:$0xff] }
  0x22   : > { %416 = vst [vmem:[%s1909_s16 + $0x58] sm:$0xff] %v415_v11  ;;  %v441_v24 = vld [vmem:[%s1904_s15 + $0x180] sm:$0xff]  ;;  %v443_v25 = vld [vmem:[%s1904_s15 + $0x190] sm:$0xff] }
  0x23   : > { %418 = vst [vmem:[%s1909_s16 + $0x60] sm:$0xff] %v417_v12  ;;  %v445_v26 = vld [vmem:[%s1904_s15 + $0x1a0] sm:$0xff]  ;;  %v447_v27 = vld [vmem:[%s1904_s15 + $0x1b0] sm:$0xff] }
  0x24   : > { %420 = vst [vmem:[%s1909_s16 + $0x68] sm:$0xff] %v419_v13  ;;  %v449_v28 = vld [vmem:[%s1904_s15 + $0x1c0] sm:$0xff]  ;;  %v451_v29 = vld [vmem:[%s1904_s15 + $0x1d0] sm:$0xff] }
  0x25   : > { %422 = vst [vmem:[%s1909_s16 + $0x70] sm:$0xff] %v421_v14  ;;  %v453_v30 = vld [vmem:[%s1904_s15 + $0x1e0] sm:$0xff]  ;;  %v455_v31 = vld [vmem:[%s1904_s15 + $0x1f0] sm:$0xff] }
  0x26   : > { %424 = vst [vmem:[%s1909_s16 + $0x78] sm:$0xff] %v423_v15  ;;  %v457_v32 = vld [vmem:[%s1904_s15 + $0x200] sm:$0xff]  ;;  %v459_v33 = vld [vmem:[%s1904_s15 + $0x210] sm:$0xff] }
  0x27   : > { %426 = vst [vmem:[%s1909_s16 + $0x80] sm:$0xff] %v425_v16  ;;  %v461_v34 = vld [vmem:[%s1904_s15 + $0x220] sm:$0xff]  ;;  %v463_v35 = vld [vmem:[%s1904_s15 + $0x230] sm:$0xff] }
  0x28   : > { %428 = vst [vmem:[%s1909_s16 + $0x88] sm:$0xff] %v427_v17  ;;  %v465_v36 = vld [vmem:[%s1904_s15 + $0x240] sm:$0xff]  ;;  %v467_v37 = vld [vmem:[%s1904_s15 + $0x250] sm:$0xff] }
  0x29   : > { %430 = vst [vmem:[%s1909_s16 + $0x90] sm:$0xff] %v429_v18  ;;  %v469_v38 = vld [vmem:[%s1904_s15 + $0x260] sm:$0xff]  ;;  %v471_v39 = vld [vmem:[%s1904_s15 + $0x270] sm:$0xff] }
  0x2a   : > { %432 = vst [vmem:[%s1909_s16 + $0x98] sm:$0xff] %v431_v19  ;;  %v473_v40 = vld [vmem:[%s1904_s15 + $0x280] sm:$0xff]  ;;  %v475_v41 = vld [vmem:[%s1904_s15 + $0x290] sm:$0xff] }
  0x2b   : > { %434 = vst [vmem:[%s1909_s16 + $0xa0] sm:$0xff] %v433_v20  ;;  %v477_v42 = vld [vmem:[%s1904_s15 + $0x2a0] sm:$0xff]  ;;  %v479_v43 = vld [vmem:[%s1904_s15 + $0x2b0] sm:$0xff] }
  0x2c   : > { %436 = vst [vmem:[%s1909_s16 + $0xa8] sm:$0xff] %v435_v21  ;;  %v481_v44 = vld [vmem:[%s1904_s15 + $0x2c0] sm:$0xff]  ;;  %v483_v45 = vld [vmem:[%s1904_s15 + $0x2d0] sm:$0xff] }
  0x2d   : > { %438 = vst [vmem:[%s1909_s16 + $0xb0] sm:$0xff] %v437_v22  ;;  %v485_v46 = vld [vmem:[%s1904_s15 + $0x2e0] sm:$0xff]  ;;  %v487_v47 = vld [vmem:[%s1904_s15 + $0x2f0] sm:$0xff] }
  0x2e   : > { %440 = vst [vmem:[%s1909_s16 + $0xb8] sm:$0xff] %v439_v23  ;;  %v489_v48 = vld [vmem:[%s1904_s15 + $0x300] sm:$0xff]  ;;  %v491_v49 = vld [vmem:[%s1904_s15 + $0x310] sm:$0xff] }
  0x2f   : > { %442 = vst [vmem:[%s1909_s16 + $0xc0] sm:$0xff] %v441_v24  ;;  %v493_v50 = vld [vmem:[%s1904_s15 + $0x320] sm:$0xff]  ;;  %v495_v51 = vld [vmem:[%s1904_s15 + $0x330] sm:$0xff] }
  0x30   : > { %444 = vst [vmem:[%s1909_s16 + $0xc8] sm:$0xff] %v443_v25  ;;  %v497_v52 = vld [vmem:[%s1904_s15 + $0x340] sm:$0xff]  ;;  %v499_v53 = vld [vmem:[%s1904_s15 + $0x350] sm:$0xff] }
  0x31   : > { %446 = vst [vmem:[%s1909_s16 + $0xd0] sm:$0xff] %v445_v26  ;;  %v501_v54 = vld [vmem:[%s1904_s15 + $0x360] sm:$0xff]  ;;  %v503_v55 = vld [vmem:[%s1904_s15 + $0x370] sm:$0xff] }
  0x32   : > { %448 = vst [vmem:[%s1909_s16 + $0xd8] sm:$0xff] %v447_v27  ;;  %v505_v56 = vld [vmem:[%s1904_s15 + $0x380] sm:$0xff]  ;;  %v507_v57 = vld [vmem:[%s1904_s15 + $0x390] sm:$0xff] }
  0x33   : > { %450 = vst [vmem:[%s1909_s16 + $0xe0] sm:$0xff] %v449_v28  ;;  %v509_v58 = vld [vmem:[%s1904_s15 + $0x3a0] sm:$0xff]  ;;  %v511_v59 = vld [vmem:[%s1904_s15 + $0x3b0] sm:$0xff] }
  0x34   : > { %452 = vst [vmem:[%s1909_s16 + $0xe8] sm:$0xff] %v451_v29  ;;  %v513_v60 = vld [vmem:[%s1904_s15 + $0x3c0] sm:$0xff]  ;;  %v515_v61 = vld [vmem:[%s1904_s15 + $0x3d0] sm:$0xff] }
  0x35   : > { %454 = vst [vmem:[%s1909_s16 + $0xf0] sm:$0xff] %v453_v30  ;;  %v517_v62 = vld [vmem:[%s1904_s15 + $0x3e0] sm:$0xff]  ;;  %v519_v63 = vld [vmem:[%s1904_s15 + $0x3f0] sm:$0xff] }
  0x36   : > { %456 = vst [vmem:[%s1909_s16 + $0xf8] sm:$0xff] %v455_v31 }
  0x37   : > { %458 = vst [vmem:[%s1909_s16 + $0x100] sm:$0xff] %v457_v32 }
  0x38   : > { %460 = vst [vmem:[%s1909_s16 + $0x108] sm:$0xff] %v459_v33 }
  0x39   : > { %462 = vst [vmem:[%s1909_s16 + $0x110] sm:$0xff] %v461_v34 }
  0x3a   : > { %464 = vst [vmem:[%s1909_s16 + $0x118] sm:$0xff] %v463_v35 }
  0x3b   : > { %466 = vst [vmem:[%s1909_s16 + $0x120] sm:$0xff] %v465_v36 }
  0x3c   : > { %468 = vst [vmem:[%s1909_s16 + $0x128] sm:$0xff] %v467_v37 }
  0x3d   : > { %470 = vst [vmem:[%s1909_s16 + $0x130] sm:$0xff] %v469_v38 }
  0x3e   : > { %472 = vst [vmem:[%s1909_s16 + $0x138] sm:$0xff] %v471_v39 }
  0x3f   : > { %474 = vst [vmem:[%s1909_s16 + $0x140] sm:$0xff] %v473_v40 }
  0x40   : > { %476 = vst [vmem:[%s1909_s16 + $0x148] sm:$0xff] %v475_v41 }
  0x41   : > { %478 = vst [vmem:[%s1909_s16 + $0x150] sm:$0xff] %v477_v42 }
  0x42   : > { %480 = vst [vmem:[%s1909_s16 + $0x158] sm:$0xff] %v479_v43 }
  0x43   : > { %482 = vst [vmem:[%s1909_s16 + $0x160] sm:$0xff] %v481_v44 }
  0x44   : > { %484 = vst [vmem:[%s1909_s16 + $0x168] sm:$0xff] %v483_v45 }
  0x45   : > { %486 = vst [vmem:[%s1909_s16 + $0x170] sm:$0xff] %v485_v46 }
  0x46   : > { %488 = vst [vmem:[%s1909_s16 + $0x178] sm:$0xff] %v487_v47 }
  0x47   : > { %490 = vst [vmem:[%s1909_s16 + $0x180] sm:$0xff] %v489_v48 }
  0x48   : > { %492 = vst [vmem:[%s1909_s16 + $0x188] sm:$0xff] %v491_v49 }
  0x49   : > { %494 = vst [vmem:[%s1909_s16 + $0x190] sm:$0xff] %v493_v50 }
  0x4a   : > { %496 = vst [vmem:[%s1909_s16 + $0x198] sm:$0xff] %v495_v51 }
  0x4b   : > { %498 = vst [vmem:[%s1909_s16 + $0x1a0] sm:$0xff] %v497_v52 }
  0x4c   : > { %500 = vst [vmem:[%s1909_s16 + $0x1a8] sm:$0xff] %v499_v53 }
  0x4d   : > { %502 = vst [vmem:[%s1909_s16 + $0x1b0] sm:$0xff] %v501_v54 }
  0x4e   : > { %504 = vst [vmem:[%s1909_s16 + $0x1b8] sm:$0xff] %v503_v55 }
  0x4f   : > { %506 = vst [vmem:[%s1909_s16 + $0x1c0] sm:$0xff] %v505_v56 }
  0x50   : > { %508 = vst [vmem:[%s1909_s16 + $0x1c8] sm:$0xff] %v507_v57 }
  0x51   : > { %510 = vst [vmem:[%s1909_s16 + $0x1d0] sm:$0xff] %v509_v58 }
  0x52   : > { %512 = vst [vmem:[%s1909_s16 + $0x1d8] sm:$0xff] %v511_v59 }
  0x53   : > { %514 = vst [vmem:[%s1909_s16 + $0x1e0] sm:$0xff] %v513_v60 }
  0x54   : > { %516 = vst [vmem:[%s1909_s16 + $0x1e8] sm:$0xff] %v515_v61 }
  0x55   : > { %518 = vst [vmem:[%s1909_s16 + $0x1f0] sm:$0xff] %v517_v62 }
  0x56   : > { %520 = vst [vmem:[%s1909_s16 + $0x1f8] sm:$0xff] %v519_v63 }
  0x57 PF: > { %p1365_p7 = scmp.ge.s32.totalorder %s1811_s24, 1  ;;  %p554_p8 = scmp.lt.s32.totalorder %s1811_s24, 19 }
  0x59   : > { %p555_p9 = pnand %p1365_p7, %p554_p8 }
  0x5a   : > { %s561_s17 = sand.u32 (!%p555_p9), 1, %s1787_s18   ;;  %s1367_s27 = sshll.u32 (!%p555_p9), %s1795_s20, 2 }
  0x5b   : > { %558 = sbr.rel (%p555_p9) target bundleno = 330 (0x14a), region = 74  ;;  %s1366_s28 = sshll.u32 (!%p555_p9), %s561_s17, 9 }
  0x5c   : > { %p621_p10 = scmp.lt.s32.totalorder (!%p555_p9), %s1367_s27, 35  ;;  %s1369_s29 = sshll.u32 (!%p555_p9), %s1799_s21, 1 }
  0x5d   : > { %p631_p11 = scmp.lt.s32.totalorder (!%p555_p9), %s1369_s29, 3  ;;  %s2067_s8 = scalar_lea.vmem (!%p555_p9), [#allocation3], %s1366_s28 }
  0x5e   : > { %p1375_p12 = scmp.ne.s32.totalorder (!%p555_p9), %s1795_s20, 0 }
  0x60   : > { %s2271_s27 = smov (!%p621_p10, %s1367_s27), 35  ;;  %s2273_s29 = smov (!%p631_p11, %s1369_s29), 3 }
  0x61   : > { %s1368_s30 = sshll.u32 %s2271_s27, 2  ;;  %s633_s18 = scalar_lea.vmem %s2254_s2, %s2273_s29 }
  0x62   : > { %s2044_s9 = scalar_lea.vmem %s2252_s0, %s1368_s30  ;;  %s638_s21 = scalar_lea.vmem %s2255_s3, %s2273_s29 }
  0x63   : > { %s1372_s14 = sshll.u32 %s2273_s29, 3  ;;  %663 = sbr.rel (%p1375_p12) target bundleno = 107 (0x6b), region = 82 }
  0x64   : > { %s2060_s17 = scalar_lea.vmem %s2256_s4, %s1372_s14  ;;  %s2065_s7 = scalar_lea.vmem %s2257_s5, %s1372_s14 }
  0x68   : > { %v1813_v0 = vmov 0.0  }
  0x69   : > { %664 = vst [vmem:[#allocation2] sm:$0xff] %v1813_v0 }
  0x6a   : > { %665 = vst [vmem:[#allocation2 + $0x8] sm:$0xff] %v1813_v0 }
  0x6b PF: > { %v1434_v1 = vld [vmem:[%s2067_s8 + $0x70] sm:$0xf]  ;;  %v1651_v2 = vld [vmem:[%s2067_s8 + $0x74] sm:$0xf0]  ;;  %v1426_v12 = vld [vmem:[%s2067_s8 + $0x60] sm:$0xf] }
  0x6c   : > { %v1498_v3 = vld [vmem:[%s2067_s8 + $0xf0] sm:$0xf]  ;;  %v1435_v4 = vor.u32 %v1651_v2, %v1434_v1  ;;  %v1667_v5 = vld [vmem:[%s2067_s8 + $0xf4] sm:$0xf0]  ;;  %v1649_v14 = vld [vmem:[%s2067_s8 + $0x64] sm:$0xf0] }
  0x6d   : > { %v1562_v6 = vld [vmem:[%s2067_s8 + $0x170] sm:$0xf]  ;;  %v1683_v7 = vld [vmem:[%s2067_s8 + $0x174] sm:$0xf0]  ;;  %v1499_v8 = vor.u32 %v1667_v5, %v1498_v3  ;;  %v1490_v15 = vld [vmem:[%s2067_s8 + $0xe0] sm:$0xf]  ;;  %v1427_v17 = vor.u32 %v1649_v14, %v1426_v12 }
  0x6e   : > { %v1563_v9 = vor.u32 %v1683_v7, %v1562_v6  ;;  %v1626_v10 = vld [vmem:[%s2067_s8 + $0x1f0] sm:$0xf]  ;;  %v1699_v11 = vld [vmem:[%s2067_s8 + $0x1f4] sm:$0xf0]  ;;  %1068 = vmatpush.bf16.msra.mxu0 %v1435_v4  ;;  %v1665_v16 = vld [vmem:[%s2067_s8 + $0xe4] sm:$0xf0] }
  0x6f   : > { %v1627_v13 = vor.u32 %v1699_v11, %v1626_v10  ;;  %1081 = vmatpush.bf16.msra.mxu1 %v1499_v8  ;;  %v1491_v18 = vor.u32 %v1665_v16, %v1490_v15  ;;  %v1554_v19 = vld [vmem:[%s2067_s8 + $0x160] sm:$0xf]  ;;  %v1681_v20 = vld [vmem:[%s2067_s8 + $0x164] sm:$0xf0]  ;;  %v1418_v24 = vld [vmem:[%s2067_s8 + $0x50] sm:$0xf] }
  0x70   : > { %1094 = vmatpush.bf16.msra.mxu2 %v1563_v9  ;;  %v1618_v21 = vld [vmem:[%s2067_s8 + $0x1e0] sm:$0xf]  ;;  %v1555_v22 = vor.u32 %v1681_v20, %v1554_v19  ;;  %v1697_v23 = vld [vmem:[%s2067_s8 + $0x1e4] sm:$0xf0]  ;;  %v1647_v25 = vld [vmem:[%s2067_s8 + $0x54] sm:$0xf0] }
  0x71   : > { %1107 = vmatpush.bf16.msra.mxu3 %v1627_v13  ;;  %v1619_v26 = vor.u32 %v1697_v23, %v1618_v21  ;;  %v1482_v27 = vld [vmem:[%s2067_s8 + $0xd0] sm:$0xf]  ;;  %v1663_v28 = vld [vmem:[%s2067_s8 + $0xd4] sm:$0xf0]  ;;  %v1419_v30 = vor.u32 %v1647_v25, %v1418_v24  ;;  %v1410_v36 = vld [vmem:[%s2067_s8 + $0x40] sm:$0xf] }
  0x72   : > { %v1546_v29 = vld [vmem:[%s2067_s8 + $0x150] sm:$0xf]  ;;  %1069 = vmatpush.bf16.msra.mxu0 %v1427_v17  ;;  %v1679_v31 = vld [vmem:[%s2067_s8 + $0x154] sm:$0xf0]  ;;  %v1483_v34 = vor.u32 %v1663_v28, %v1482_v27  ;;  %v1645_v37 = vld [vmem:[%s2067_s8 + $0x44] sm:$0xf0] }
  0x73   : > { %v1610_v32 = vld [vmem:[%s2067_s8 + $0x1d0] sm:$0xf]  ;;  %v1695_v33 = vld [vmem:[%s2067_s8 + $0x1d4] sm:$0xf0]  ;;  %1082 = vmatpush.bf16.msra.mxu1 %v1491_v18  ;;  %v1547_v35 = vor.u32 %v1679_v31, %v1546_v29  ;;  %v1474_v38 = vld [vmem:[%s2067_s8 + $0xc0] sm:$0xf]  ;;  %v1411_v45 = vor.u32 %v1645_v37, %v1410_v36 }
  0x74   : > { %1095 = vmatpush.bf16.msra.mxu2 %v1555_v22  ;;  %v1611_v39 = vor.u32 %v1695_v33, %v1610_v32  ;;  %v1661_v40 = vld [vmem:[%s2067_s8 + $0xc4] sm:$0xf0]  ;;  %v1538_v41 = vld [vmem:[%s2067_s8 + $0x140] sm:$0xf]  ;;  %v1402_v48 = vld [vmem:[%s2067_s8 + $0x30] sm:$0xf] }
  0x75   : > { %1108 = vmatpush.bf16.msra.mxu3 %v1619_v26  ;;  %v1677_v42 = vld [vmem:[%s2067_s8 + $0x144] sm:$0xf0]  ;;  %v1602_v43 = vld [vmem:[%s2067_s8 + $0x1c0] sm:$0xf]  ;;  %v1475_v46 = vor.u32 %v1661_v40, %v1474_v38  ;;  %v1643_v49 = vld [vmem:[%s2067_s8 + $0x34] sm:$0xf0] }
  0x76   : > { %v1693_v44 = vld [vmem:[%s2067_s8 + $0x1c4] sm:$0xf0]  ;;  %1070 = vmatpush.bf16.msra.mxu0 %v1419_v30  ;;  %v1539_v47 = vor.u32 %v1677_v42, %v1538_v41  ;;  %v1466_v50 = vld [vmem:[%s2067_s8 + $0xb0] sm:$0xf]  ;;  %v1659_v52 = vld [vmem:[%s2067_s8 + $0xb4] sm:$0xf0]  ;;  %v1403_v57 = vor.u32 %v1643_v49, %v1402_v48 }
  0x77   : > { %1083 = vmatpush.bf16.msra.mxu1 %v1483_v34  ;;  %v1603_v51 = vor.u32 %v1693_v44, %v1602_v43  ;;  %v1530_v53 = vld [vmem:[%s2067_s8 + $0x130] sm:$0xf]  ;;  %v1675_v54 = vld [vmem:[%s2067_s8 + $0x134] sm:$0xf0]  ;;  %v1467_v58 = vor.u32 %v1659_v52, %v1466_v50  ;;  %v1394_v60 = vld [vmem:[%s2067_s8 + $0x20] sm:$0xf] }
  0x78   : > { %1096 = vmatpush.bf16.msra.mxu2 %v1547_v35  ;;  %v1594_v55 = vld [vmem:[%s2067_s8 + $0x1b0] sm:$0xf]  ;;  %v1691_v56 = vld [vmem:[%s2067_s8 + $0x1b4] sm:$0xf0]  ;;  %v1531_v59 = vor.u32 %v1675_v54, %v1530_v53  ;;  %v1641_v61 = vld [vmem:[%s2067_s8 + $0x24] sm:$0xf0] }
  0x79   : > { %1109 = vmatpush.bf16.msra.mxu3 %v1611_v39  ;;  %v1458_v62 = vld [vmem:[%s2067_s8 + $0xa0] sm:$0xf]  ;;  %v1595_v63 = vor.u32 %v1691_v56, %v1594_v55  ;;  %v1657_v0 = vld [vmem:[%s2067_s8 + $0xa4] sm:$0xf0]  ;;  %v1395_v5 = vor.u32 %v1641_v61, %v1394_v60  ;;  %v1386_v8 = vld [vmem:[%s2067_s8 + $0x10] sm:$0xf] }
  0x7a   : > { %1071 = vmatpush.bf16.msra.mxu0 %v1411_v45  ;;  %v1522_v1 = vld [vmem:[%s2067_s8 + $0x120] sm:$0xf]  ;;  %v1673_v2 = vld [vmem:[%s2067_s8 + $0x124] sm:$0xf0]  ;;  %v1459_v6 = vor.u32 %v1657_v0, %v1458_v62  ;;  %v1639_v9 = vld [vmem:[%s2067_s8 + $0x14] sm:$0xf0] }
  0x7b   : > { %1084 = vmatpush.bf16.msra.mxu1 %v1475_v46  ;;  %v1586_v3 = vld [vmem:[%s2067_s8 + $0x1a0] sm:$0xf]  ;;  %v1689_v4 = vld [vmem:[%s2067_s8 + $0x1a4] sm:$0xf0]  ;;  %v1523_v7 = vor.u32 %v1673_v2, %v1522_v1  ;;  %v1450_v10 = vld [vmem:[%s2067_s8 + $0x90] sm:$0xf]  ;;  %v1387_v17 = vor.u32 %v1639_v9, %v1386_v8 }
  0x7c   : > { %1097 = vmatpush.bf16.msra.mxu2 %v1539_v47  ;;  %v1587_v11 = vor.u32 %v1689_v4, %v1586_v3  ;;  %v1655_v12 = vld [vmem:[%s2067_s8 + $0x94] sm:$0xf0]  ;;  %v1514_v13 = vld [vmem:[%s2067_s8 + $0x110] sm:$0xf]  ;;  %v1378_v18 = vld [vmem:[%s2067_s8] sm:$0xf] }
  0x7d   : > { %1110 = vmatpush.bf16.msra.mxu3 %v1603_v51  ;;  %v1671_v14 = vld [vmem:[%s2067_s8 + $0x114] sm:$0xf0]  ;;  %v1578_v15 = vld [vmem:[%s2067_s8 + $0x190] sm:$0xf]  ;;  %v1637_v19 = vld [vmem:[%s2067_s8 + $0x4] sm:$0xf0]  ;;  %v1451_v21 = vor.u32 %v1655_v12, %v1450_v10 }
  0x7e   : > { %1072 = vmatpush.bf16.msra.mxu0 %v1403_v57  ;;  %v1687_v16 = vld [vmem:[%s2067_s8 + $0x194] sm:$0xf0]  ;;  %v1442_v20 = vld [vmem:[%s2067_s8 + $0x80] sm:$0xf]  ;;  %v1515_v22 = vor.u32 %v1671_v14, %v1514_v13  ;;  %v1653_v23 = vld [vmem:[%s2067_s8 + $0x84] sm:$0xf0]  ;;  %v1379_v33 = vor.u32 %v1637_v19, %v1378_v18 }
  0x7f   : > { %1085 = vmatpush.bf16.msra.mxu1 %v1467_v58  ;;  %v1506_v24 = vld [vmem:[%s2067_s8 + $0x100] sm:$0xf]  ;;  %v1669_v25 = vld [vmem:[%s2067_s8 + $0x104] sm:$0xf0]  ;;  %v1579_v26 = vor.u32 %v1687_v16, %v1578_v15  ;;  %v1650_v29 = vld [vmem:[%s2067_s8 + $0x74] sm:$0xf]  ;;  %v1443_v38 = vor.u32 %v1653_v23, %v1442_v20 }
  0x80   : > { %1098 = vmatpush.bf16.msra.mxu2 %v1531_v59  ;;  %v1570_v27 = vld [vmem:[%s2067_s8 + $0x180] sm:$0xf]  ;;  %v1685_v28 = vld [vmem:[%s2067_s8 + $0x184] sm:$0xf0]  ;;  %v1436_v30 = vld [vmem:[%s2067_s8 + $0x78] sm:$0xf0]  ;;  %v1507_v39 = vor.u32 %v1669_v25, %v1506_v24 }
  0x81   : > { %1111 = vmatpush.bf16.msra.mxu3 %v1595_v63  ;;  %v1666_v31 = vld [vmem:[%s2067_s8 + $0xf4] sm:$0xf]  ;;  %v669_v32 = vld [vmem:[%s2044_s9 + $0x8] sm:$0xff]  ;;  %v1571_v43 = vor.u32 %v1685_v28, %v1570_v27  ;;  %v1439_v44 = vor.u32 %v1650_v29, %v1436_v30  ;;  %v1648_v48 = vld [vmem:[%s2067_s8 + $0x64] sm:$0xf]  ;;  %p1632_p13 = scmp.ne.s32.totalorder %s1795_s20, 8 }
  0x82   : > { %1073 = vmatpush.bf16.msra.mxu0 %v1395_v5  ;;  %v1500_v34 = vld [vmem:[%s2067_s8 + $0xf8] sm:$0xf0]  ;;  %v1682_v35 = vld [vmem:[%s2067_s8 + $0x174] sm:$0xf]  ;;  %v738_v37 = vunpack.c.l.b16 %v669_v32  ;;  %v739_v42 = vunpack.c.h.b16 %v669_v32  ;;  %v1428_v49 = vld [vmem:[%s2067_s8 + $0x68] sm:$0xf0] }
  0x83   : > { %1086 = vmatpush.bf16.msra.mxu1 %v1459_v6  ;;  %v1564_v36 = vld [vmem:[%s2067_s8 + $0x178] sm:$0xf0]  ;;  %v1698_v40 = vld [vmem:[%s2067_s8 + $0x1f4] sm:$0xf]  ;;  %v1503_v46 = vor.u32 %v1666_v31, %v1500_v34  ;;  %v1664_v50 = vld [vmem:[%s2067_s8 + $0xe4] sm:$0xf]  ;;  %v1431_v62 = vor.u32 %v1648_v48, %v1428_v49 }
  0x84   : > { %1099 = vmatpush.bf16.msra.mxu2 %v1523_v7  ;;  %v1628_v41 = vld [vmem:[%s2067_s8 + $0x1f8] sm:$0xf0]  ;;  %v668_v45 = vld [vmem:[%s2044_s9] sm:$0xff]  ;;  %v1567_v47 = vor.u32 %v1682_v35, %v1564_v36  ;;  %v1492_v54 = vld [vmem:[%s2067_s8 + $0xe8] sm:$0xf0]  ;;  %v2150_v57 = vpack.c.b16 %v738_v37, %v738_v37  ;;  %v2154_v60 = vpack.c.b16 %v739_v42, %v739_v42 }
  0x85   : > { %1112 = vmatpush.bf16.msra.mxu3 %v1587_v11  ;;  %v736_v51 = vunpack.c.l.b16 %v668_v45  ;;  %v737_v52 = vunpack.c.h.b16 %v668_v45  ;;  %v1631_v53 = vor.u32 %v1698_v40, %v1628_v41  ;;  %v1680_v55 = vld [vmem:[%s2067_s8 + $0x164] sm:$0xf]  ;;  %v1556_v56 = vld [vmem:[%s2067_s8 + $0x168] sm:$0xf0]  ;;  %v1495_v0 = vor.u32 %v1664_v50, %v1492_v54  ;;  %v1646_v2 = vld [vmem:[%s2067_s8 + $0x54] sm:$0xf] }
  0x86   : > { %1074 = vmatpush.bf16.msra.mxu0 %v1387_v17  ;;  %v1696_v58 = vld [vmem:[%s2067_s8 + $0x1e4] sm:$0xf]  ;;  %v1620_v59 = vld [vmem:[%s2067_s8 + $0x1e8] sm:$0xf0]  ;;  %v1559_v1 = vor.u32 %v1680_v55, %v1556_v56  ;;  %v1420_v3 = vld [vmem:[%s2067_s8 + $0x58] sm:$0xf0] }
  0x87   : > { %1087 = vmatpush.bf16.msra.mxu1 %v1451_v21  ;;  %v2156_v61 = vpack.c.b16 %v736_v51, %v736_v51  ;;  %v2158_v63 = vpack.c.b16 %v737_v52, %v737_v52  ;;  %v1662_v4 = vld [vmem:[%s2067_s8 + $0xd4] sm:$0xf]  ;;  %v1623_v5 = vor.u32 %v1696_v58, %v1620_v59  ;;  %v1484_v6 = vld [vmem:[%s2067_s8 + $0xd8] sm:$0xf0]  ;;  %v1423_v11 = vor.u32 %v1646_v2, %v1420_v3  ;;  %v1644_v14 = vld [vmem:[%s2067_s8 + $0x44] sm:$0xf] }
  0x88   : > { %1100 = vmatpush.bf16.msra.mxu2 %v1515_v22  ;;  %v1678_v7 = vld [vmem:[%s2067_s8 + $0x154] sm:$0xf]  ;;  %v1548_v8 = vld [vmem:[%s2067_s8 + $0x158] sm:$0xf0]  ;;  %v1487_v12 = vor.u32 %v1662_v4, %v1484_v6  ;;  %v1412_v15 = vld [vmem:[%s2067_s8 + $0x48] sm:$0xf0] }
  0x89   : > { %1113 = vmatpush.bf16.msra.mxu3 %v1579_v26  ;;  %v1694_v9 = vld [vmem:[%s2067_s8 + $0x1d4] sm:$0xf]  ;;  %v1612_v10 = vld [vmem:[%s2067_s8 + $0x1d8] sm:$0xf0]  ;;  %v1551_v13 = vor.u32 %v1678_v7, %v1548_v8  ;;  %v1660_v16 = vld [vmem:[%s2067_s8 + $0xc4] sm:$0xf]  ;;  %v1415_v23 = vor.u32 %v1644_v14, %v1412_v15 }
  0x8a   : > { %1075 = vmatpush.bf16.msra.mxu0 %v1379_v33  ;;  %v1615_v17 = vor.u32 %v1694_v9, %v1612_v10  ;;  %v1476_v18 = vld [vmem:[%s2067_s8 + $0xc8] sm:$0xf0]  ;;  %v1676_v19 = vld [vmem:[%s2067_s8 + $0x144] sm:$0xf]  ;;  %v1642_v26 = vld [vmem:[%s2067_s8 + $0x34] sm:$0xf] }
  0x8b   : > { %1088 = vmatpush.bf16.msra.mxu1 %v1443_v38  ;;  %v1540_v20 = vld [vmem:[%s2067_s8 + $0x148] sm:$0xf0]  ;;  %v1692_v21 = vld [vmem:[%s2067_s8 + $0x1c4] sm:$0xf]  ;;  %v1479_v24 = vor.u32 %v1660_v16, %v1476_v18  ;;  %v1404_v27 = vld [vmem:[%s2067_s8 + $0x38] sm:$0xf0] }
  0x8c   : > { %1101 = vmatpush.bf16.msra.mxu2 %v1507_v39  ;;  %v1604_v22 = vld [vmem:[%s2067_s8 + $0x1c8] sm:$0xf0]  ;;  %v1543_v25 = vor.u32 %v1676_v19, %v1540_v20  ;;  %v1658_v28 = vld [vmem:[%s2067_s8 + $0xb4] sm:$0xf]  ;;  %v1468_v30 = vld [vmem:[%s2067_s8 + $0xb8] sm:$0xf0]  ;;  %v1407_v35 = vor.u32 %v1642_v26, %v1404_v27 }
  0x8d   : > { %1114 = vmatpush.bf16.msra.mxu3 %v1571_v43  ;;  %1076 = vmatmul.bf16.vlgmr.msra.gmra.mxu0 %v2156_v61  ;;  %v1607_v29 = vor.u32 %v1692_v21, %v1604_v22  ;;  %v1674_v31 = vld [vmem:[%s2067_s8 + $0x134] sm:$0xf]  ;;  %v1532_v32 = vld [vmem:[%s2067_s8 + $0x138] sm:$0xf0]  ;;  %v1471_v36 = vor.u32 %v1658_v28, %v1468_v30  ;;  %v1640_v38 = vld [vmem:[%s2067_s8 + $0x24] sm:$0xf] }
  0x8e   : > { %1120 = vmatpush.bf16.msrb.mxu0 %v1439_v44  ;;  %1089 = vmatmul.bf16.vlgmr.msra.gmra.mxu1 %v2158_v63  ;;  %v1690_v33 = vld [vmem:[%s2067_s8 + $0x1b4] sm:$0xf]  ;;  %v1596_v34 = vld [vmem:[%s2067_s8 + $0x1b8] sm:$0xf0]  ;;  %v1535_v37 = vor.u32 %v1674_v31, %v1532_v32  ;;  %v1396_v39 = vld [vmem:[%s2067_s8 + $0x28] sm:$0xf0] }
  0x8f   : > { %1133 = vmatpush.bf16.msrb.mxu1 %v1503_v46  ;;  %1102 = vmatmul.bf16.vlgmr.msra.gmra.mxu2 %v2150_v57  ;;  %v1656_v40 = vld [vmem:[%s2067_s8 + $0xa4] sm:$0xf]  ;;  %v1599_v41 = vor.u32 %v1690_v33, %v1596_v34  ;;  %v1460_v42 = vld [vmem:[%s2067_s8 + $0xa8] sm:$0xf0]  ;;  %v1638_v50 = vld [vmem:[%s2067_s8 + $0x14] sm:$0xf] }
  0x90   : > { %1146 = vmatpush.bf16.msrb.mxu2 %v1567_v47  ;;  %1115 = vmatmul.bf16.vlgmr.msra.gmra.mxu3 %v2154_v60  ;;  %v1672_v43 = vld [vmem:[%s2067_s8 + $0x124] sm:$0xf]  ;;  %v1524_v44 = vld [vmem:[%s2067_s8 + $0x128] sm:$0xf0]  ;;  %v1399_v47 = vor.u32 %v1640_v38, %v1396_v39  ;;  %v1463_v48 = vor.u32 %v1656_v40, %v1460_v42  ;;  %v1388_v51 = vld [vmem:[%s2067_s8 + $0x18] sm:$0xf0] }
  0x91   : > { %1159 = vmatpush.bf16.msrb.mxu3 %v1631_v53  ;;  %v1688_v45 = vld [vmem:[%s2067_s8 + $0x1a4] sm:$0xf]  ;;  %v1588_v46 = vld [vmem:[%s2067_s8 + $0x1a8] sm:$0xf0]  ;;  %v1527_v49 = vor.u32 %v1672_v43, %v1524_v44  ;;  %v1654_v52 = vld [vmem:[%s2067_s8 + $0x94] sm:$0xf] }
  0x92   : > { %1121 = vmatpush.bf16.msrb.mxu0 %v1431_v62  ;;  %v1591_v53 = vor.u32 %v1688_v45, %v1588_v46  ;;  %v1452_v54 = vld [vmem:[%s2067_s8 + $0x98] sm:$0xf0]  ;;  %v1670_v55 = vld [vmem:[%s2067_s8 + $0x114] sm:$0xf]  ;;  %v1391_v62 = vor.u32 %v1638_v50, %v1388_v51  ;;  %v1636_v2 = vld [vmem:[%s2067_s8 + $0x4] sm:$0xf] }
  0x93   : > { %1134 = vmatpush.bf16.msrb.mxu1 %v1495_v0  ;;  %v1516_v56 = vld [vmem:[%s2067_s8 + $0x118] sm:$0xf0]  ;;  %v1686_v58 = vld [vmem:[%s2067_s8 + $0x194] sm:$0xf]  ;;  %v1455_v0 = vor.u32 %v1654_v52, %v1452_v54  ;;  %v1380_v3 = vld [vmem:[%s2067_s8 + $0x8] sm:$0xf0] }
  0x94   : > { %1147 = vmatpush.bf16.msrb.mxu2 %v1559_v1  ;;  %v1580_v59 = vld [vmem:[%s2067_s8 + $0x198] sm:$0xf0]  ;;  %v1519_v1 = vor.u32 %v1670_v55, %v1516_v56  ;;  %v1652_v4 = vld [vmem:[%s2067_s8 + $0x84] sm:$0xf]  ;;  %v1444_v6 = vld [vmem:[%s2067_s8 + $0x88] sm:$0xf0] }
  0x95   : > { %1160 = vmatpush.bf16.msrb.mxu3 %v1623_v5  ;;  %v1583_v5 = vor.u32 %v1686_v58, %v1580_v59  ;;  %v1668_v7 = vld [vmem:[%s2067_s8 + $0x104] sm:$0xf]  ;;  %v1508_v8 = vld [vmem:[%s2067_s8 + $0x108] sm:$0xf0]  ;;  %v666_v21 = vld [vmem:[#allocation2] sm:$0xff] }
  0x96   : > { %1122 = vmatpush.bf16.msrb.mxu0 %v1423_v11  ;;  %v1684_v9 = vld [vmem:[%s2067_s8 + $0x184] sm:$0xf]  ;;  %v1572_v10 = vld [vmem:[%s2067_s8 + $0x188] sm:$0xf0]  ;;  %v1383_v11 = vor.u32 %v1636_v2, %v1380_v3  ;;  %v667_v31 = vld [vmem:[#allocation2 + $0x8] sm:$0xff] }
  0x97   : > { %1135 = vmatpush.bf16.msrb.mxu1 %v1487_v12  ;;  %v1447_v12 = vor.u32 %v1652_v4, %v1444_v6  ;;  %v1575_v14 = vor.u32 %v1684_v9, %v1572_v10 }
  0x98   : > { %1148 = vmatpush.bf16.msrb.mxu2 %v1551_v13  ;;  %v1511_v13 = vor.u32 %v1668_v7, %v1508_v8 }
  0x99   : > { %1161 = vmatpush.bf16.msrb.mxu3 %v1615_v17 }
  0x9a   : > { %1123 = vmatpush.bf16.msrb.mxu0 %v1415_v23 }
  0x9b   : > { %1136 = vmatpush.bf16.msrb.mxu1 %v1479_v24 }
  0x9c   : > { %1149 = vmatpush.bf16.msrb.mxu2 %v1543_v25 }
  0x9d   : > { %1162 = vmatpush.bf16.msrb.mxu3 %v1607_v29 }
  0x9e   : > { %1124 = vmatpush.bf16.msrb.mxu0 %v1407_v35 }
  0x9f   : > { %1137 = vmatpush.bf16.msrb.mxu1 %v1471_v36 }
  0xa0   : > { %1150 = vmatpush.bf16.msrb.mxu2 %v1535_v37 }
  0xa1   : > { %1163 = vmatpush.bf16.msrb.mxu3 %v1599_v41 }
  0xa2   : > { %1125 = vmatpush.bf16.msrb.mxu0 %v1399_v47 }
  0xa3   : > { %1138 = vmatpush.bf16.msrb.mxu1 %v1463_v48 }
  0xa4   : > { %1151 = vmatpush.bf16.msrb.mxu2 %v1527_v49 }
  0xa5   : > { %1164 = vmatpush.bf16.msrb.mxu3 %v1591_v53 }
  0xa6   : > { %1126 = vmatpush.bf16.msrb.mxu0 %v1391_v62 }
  0xa7   : > { %1139 = vmatpush.bf16.msrb.mxu1 %v1455_v0 }
  0xa8   : > { %1152 = vmatpush.bf16.msrb.mxu2 %v1519_v1 }
  0xa9   : > { %1165 = vmatpush.bf16.msrb.mxu3 %v1583_v5 }
  0xaa   : > { %1127 = vmatpush.bf16.msrb.mxu0 %v1383_v11 }
  0xab   : > { %1140 = vmatpush.bf16.msrb.mxu1 %v1447_v12 }
  0xac   : > { %1153 = vmatpush.bf16.msrb.mxu2 %v1511_v13 }
  0xad   : > { %1166 = vmatpush.bf16.msrb.mxu3 %v1575_v14  ;;  %1128 = vmatmul.bf16.vlgmr.msrb.gmra.mxu0 %v2156_v61 }
  0xae   : > { %1141 = vmatmul.bf16.vlgmr.msrb.gmra.mxu1 %v2158_v63 }
  0xaf   : > { %1154 = vmatmul.bf16.vlgmr.msrb.gmra.mxu2 %v2150_v57 }
  0xb0   : > { %1167 = vmatmul.bf16.vlgmr.msrb.gmra.mxu3 %v2154_v60 }
 0x10a   : > { %v1077_v15 = vpop.f32.mrf.mxu0 }
 0x10b   : > { %v1090_v16 = vpop.f32.mrf.mxu1 }
 0x10c   : > { %v1091_v17 = vadd.f32 %v1090_v16, %v1077_v15 }
 0x112   : > { %v1103_v18 = vpop.f32.mrf.mxu2  ;;  %v1079_v23 = vpop.f32.mrf.mxu0 }
 0x113   : > { %v1104_v19 = vadd.f32 %v1103_v18, %v1091_v17  ;;  %v1116_v20 = vpop.f32.mrf.mxu3  ;;  %v1092_v24 = vpop.f32.mrf.mxu1 }
 0x115   : > { %v1117_v22 = vadd.f32 %v1116_v20, %v1104_v19 }
 0x117   : > { %v1172_v25 = vadd.f32 %v1117_v22, %v666_v21 }
 0x119   : > { %1174 = vst [vmem:[#allocation2] sm:$0xff] %v1172_v25 }
 0x11a   : > { %v1105_v26 = vpop.f32.mrf.mxu2 }
 0x11b   : > { %v1118_v61 = vpop.f32.mrf.mxu3 }
 0x12a   : > { %v1129_v27 = vpop.f32.mrf.mxu0 }
 0x12b   : > { %v1142_v63 = vpop.f32.mrf.mxu1 }
 0x12c   : > { %v1143_v28 = vadd.f32 %v1142_v63, %v1129_v27 }
 0x132   : > { %v1155_v57 = vpop.f32.mrf.mxu2  ;;  %v1131_v30 = vpop.f32.mrf.mxu0 }
 0x133   : > { %v1156_v29 = vadd.f32 %v1155_v57, %v1143_v28  ;;  %v1168_v60 = vpop.f32.mrf.mxu3  ;;  %v1144_v32 = vpop.f32.mrf.mxu1 }
 0x135   : > { %v1169_v33 = vadd.f32 %v1168_v60, %v1156_v29 }
 0x137   : > { %v1173_v34 = vadd.f32 %v1169_v33, %v667_v31  ;;  %1179 = sbr.rel (%p1632_p13) target bundleno = 330 (0x14a), region = 86 }
 0x139   : > { %1175 = vst [vmem:[#allocation2 + $0x8] sm:$0xff] %v1173_v34 }
 0x13a   : > { %v1157_v35 = vpop.f32.mrf.mxu2 }
 0x13b   : > { %v1170_v36 = vpop.f32.mrf.mxu3 }
 0x13c   : > { %v1180_v37 = vld [vmem:[#allocation2] sm:$0xff]  ;;  %v1199_v48 = vld [vmem:[%s2060_s17 + $0x8] sm:$0xff] }
 0x13d   : > { %v1182_v38 = vld [vmem:[%s633_s18] sm:$0x3] }
 0x13e   : > { %v1190_v39 = vld [vmem:[%s638_s21] sm:$0x3]  ;;  %v1184_v40 = vperm.slane %v1182_v38, 0  ;;  %v1185_v43 = vperm.slane %v1182_v38, 1 }
 0x13f   : > { %v1192_v41 = vperm.slane %v1190_v39, 0  ;;  %v1193_v44 = vperm.slane %v1190_v39, 1  ;;  %v1198_v47 = vld [vmem:[%s2060_s17] sm:$0xff] }
 0x140   : > { %v1181_v42 = vld [vmem:[#allocation2 + $0x8] sm:$0xff]  ;;  %v1188_v45 = vmul.f32 %v1184_v40, %v1180_v37 }
 0x141   : > { %v1189_v46 = vmul.f32 %v1185_v43, %v1181_v42 }
 0x142   : > { %v1196_v49 = vadd.f32 %v1192_v41, %v1188_v45 }
 0x143   : > { %v1197_v50 = vadd.f32 %v1193_v44, %v1189_v46 }
 0x144   : > { %v1200_v51 = vadd.f32 %v1198_v47, %v1196_v49 }
 0x145   : > { %v1201_v52 = vadd.f32 %v1199_v48, %v1197_v50 }
 0x146   : > { %v1202_v53 = vmax.f32 %v1200_v51, 0.0 }
 0x147   : > { %v1203_v54 = vmax.f32 %v1201_v52, 0.0 }
 0x148   : > { %1204 = vst [vmem:[%s2065_s7] sm:$0xff] %v1202_v53 }
 0x149   : > { %1205 = vst [vmem:[%s2065_s7 + $0x8] sm:$0xff] %v1203_v54 }
 0x14a PF: > { %s15_s24 = sadd.s32 1, %s1811_s24   ;;  %s2258_s18 = smov %s1791_s19 }
 0x14b   : > { %p12_p0 = scmp.ge.s32.totalorder %s15_s24, 20   ;;  %s2259_s19 = smov %s1895_s6 }
 0x14c   : > { %s2260_s20 = smov %s1803_s22  ;;  %s2261_s21 = smov %s1807_s23 }
 0x14d   : > { %s2262_s22 = smov %s2265_s25  ;;  %s2263_s23 = smov %s2269_s26 }
 0x14e   :  { %14 = sbr.rel (!%p12_p0) target bundleno = 4 (0x4), region = 133 }

// kernel: _lambda_.25
= control target key start
LH: loop header
LB: loop body
LE: loop exit
PB: predicated region body
PF: predicated region fallthrough
CT: control target
= control target key end

     0   :  { %v675_v4 = vmov 4.0   ;;  %s842_s0 = inlined_call_operand.vmem [shape: f32[2,4,512], index: 0, kind: input, shape index: {}]   ;;  %s843_s1 = inlined_call_operand.vmem [shape: bf16[512,128], index: 1, kind: input, shape index: {}]   ;;  %s844_s2 = inlined_call_operand.vmem [shape: f32[1,128], index: 2, kind: input, shape index: {}]   ;;  %s845_s3 = inlined_call_operand.hbm [shape: f32[2,128], index: 3, kind: output, shape index: {}]  }
   0x1   :  { %v619_v0 = vld [vmem:[%s843_s1 + $0x38] sm:$0xff]  ;;  %647 = vrcp.f32 %v675_v4  ;;  %v618_v5 = vld [vmem:[%s843_s1 + $0x30] sm:$0xff]  ;;  %v617_v9 = vld [vmem:[%s843_s1 + $0x28] sm:$0xff] }
   0x2   :  { %v627_v1 = vld [vmem:[%s843_s1 + $0x78] sm:$0xff]  ;;  %415 = vmatpush.bf16.msra.mxu0 %v619_v0  ;;  %v626_v6 = vld [vmem:[%s843_s1 + $0x70] sm:$0xff]  ;;  %v625_v10 = vld [vmem:[%s843_s1 + $0x68] sm:$0xff] }
   0x3   :  { %v635_v2 = vld [vmem:[%s843_s1 + $0xb8] sm:$0xff]  ;;  %428 = vmatpush.bf16.msra.mxu1 %v627_v1  ;;  %v634_v7 = vld [vmem:[%s843_s1 + $0xb0] sm:$0xff]  ;;  %v633_v12 = vld [vmem:[%s843_s1 + $0xa8] sm:$0xff] }
   0x4   :  { %v643_v3 = vld [vmem:[%s843_s1 + $0xf8] sm:$0xff]  ;;  %441 = vmatpush.bf16.msra.mxu2 %v635_v2  ;;  %v642_v8 = vld [vmem:[%s843_s1 + $0xf0] sm:$0xff]  ;;  %v641_v13 = vld [vmem:[%s843_s1 + $0xe8] sm:$0xff] }
   0x5   :  { %454 = vmatpush.bf16.msra.mxu3 %v643_v3  ;;  %v616_v15 = vld [vmem:[%s843_s1 + $0x20] sm:$0xff]  ;;  %v17_v20 = vld [vmem:[%s842_s0 + $0x10] sm:$0xff]  ;;  %v16_v22 = vld [vmem:[%s842_s0 + $0x8] sm:$0xff] }
   0x6   :  { %416 = vmatpush.bf16.msra.mxu0 %v618_v5  ;;  %v624_v16 = vld [vmem:[%s843_s1 + $0x60] sm:$0xff]  ;;  %v18_v23 = vld [vmem:[%s842_s0 + $0x18] sm:$0xff]  ;;  %31 = vst [vmem:[#allocation1 + $0x20] ss:$2 sm:$0xff] %v17_v20 }
   0x7   :  { %429 = vmatpush.bf16.msra.mxu1 %v626_v6  ;;  %v727_v11 = vpop.eup %647  ;;  %v632_v17 = vld [vmem:[%s843_s1 + $0xa0] sm:$0xff] }
   0x8   :  { %442 = vmatpush.bf16.msra.mxu2 %v634_v7  ;;  %v104_v14 = vmul.f32 4.0, %v727_v11  ;;  %v640_v18 = vld [vmem:[%s843_s1 + $0xe0] sm:$0xff] }
   0x9   :  { %455 = vmatpush.bf16.msra.mxu3 %v642_v8  ;;  %v15_v19 = vld [vmem:[%s842_s0] sm:$0xff] }
   0xa   :  { %417 = vmatpush.bf16.msra.mxu0 %v617_v9  ;;  %23 = vst [vmem:[#allocation1] ss:$2 sm:$0xff] %v15_v19  ;;  %v105_v21 = vsub.f32 1.0, %v104_v14 }
   0xb   :  { %430 = vmatpush.bf16.msra.mxu1 %v625_v10 }
   0xc   :  { %443 = vmatpush.bf16.msra.mxu2 %v633_v12 }
   0xd   :  { %456 = vmatpush.bf16.msra.mxu3 %v641_v13 }
   0xe   :  { %8 = vsyncpa [#allocation3], 0  ;;  %25 = vst [vmem:[#allocation1 + $0x10] ss:$2 sm:$0xff] %v16_v22  ;;  %418 = vmatpush.bf16.msra.mxu0 %v616_v15  ;;  %v615_v24 = vld [vmem:[%s843_s1 + $0x18] sm:$0xff]  ;;  %v106_v28 = vmul.f32 %v727_v11, %v105_v21  ;;  %vm46_vm0 = vcmask 1043456   ;;  %vm108_vm1 = vweird.f32 %v727_v11 }
   0xf   :  { %431 = vmatpush.bf16.msra.mxu1 %v624_v16  ;;  %v623_v25 = vld [vmem:[%s843_s1 + $0x58] sm:$0xff]  ;;  %33 = vst [vmem:[#allocation1 + $0x30] ss:$2 sm:$0xff] %v18_v23  ;;  %v614_v29 = vld [vmem:[%s843_s1 + $0x10] sm:$0xff]  ;;  %v613_v39 = vld [vmem:[%s843_s1 + $0x8] sm:$0xff]  ;;  %vm210_vm2 = vcmask 1041409  }
  0x10   :  { %444 = vmatpush.bf16.msra.mxu2 %v632_v17  ;;  %v631_v26 = vld [vmem:[%s843_s1 + $0x98] sm:$0xff]  ;;  %v622_v30 = vld [vmem:[%s843_s1 + $0x50] sm:$0xff]  ;;  %v34_v35 = vld.sshfl [vmem:[#allocation1 + $0x20] sm:$0xff pattern:$0x75316420]  ;;  %v107_v37 = vadd.f32 %v727_v11, %v106_v28  ;;  %s676_s30 = smov [#allocation2]  }
  0x11   :  { %457 = vmatpush.bf16.msra.mxu3 %v640_v18  ;;  %v639_v27 = vld [vmem:[%s843_s1 + $0xd8] sm:$0xff]  ;;  %v630_v31 = vld [vmem:[%s843_s1 + $0x90] sm:$0xff]  ;;  %v26_v32 = vld.sshfl [vmem:[#allocation1] sm:$0xff pattern:$0x75316420]  ;;  %v75_v41 = vsel %vm46_vm0, %v34_v35, 0.0 }
  0x12   :  { %419 = vmatpush.bf16.msra.mxu0 %v615_v24  ;;  %v27_v33 = vld.sshfl [vmem:[#allocation1 + $0x8] sm:$0xff pattern:$0x75316420]  ;;  %v638_v34 = vld [vmem:[%s843_s1 + $0xd0] sm:$0xff]  ;;  %v47_v36 = vsel %vm46_vm0, %v26_v32, 0.0  ;;  %v76_v45 = vrot.slane %v75_v41, 4  ;;  %v807_v56 = vsel %vm108_vm1, %v727_v11, %v107_v37 }
  0x13   :  { %432 = vmatpush.bf16.msra.mxu1 %v623_v25  ;;  %v54_v38 = vsel %vm46_vm0, %v27_v33, 0.0  ;;  %v48_v40 = vrot.slane %v47_v36, 4  ;;  %v35_v42 = vld.sshfl [vmem:[#allocation1 + $0x28] sm:$0xff pattern:$0x75316420]  ;;  %v612_v5 = vld [vmem:[%s843_s1] sm:$0xff] }
  0x14   :  { %445 = vmatpush.bf16.msra.mxu2 %v631_v26  ;;  %v55_v43 = vrot.slane %v54_v38, 4  ;;  %v621_v44 = vld [vmem:[%s843_s1 + $0x48] sm:$0xff]  ;;  %v82_v46 = vsel %vm46_vm0, %v35_v42, 0.0  ;;  %v77_v55 = vadd.f32 %v76_v45, %v75_v41  ;;  %v620_v6 = vld [vmem:[%s843_s1 + $0x40] sm:$0xff]  ;;  %s473_s0 = sshll.u32 %s676_s30, 4  ;;  %s475_s6 = sshll.u32 %s845_s3, 4  ;;  %s474_s0 = int_to_ptr.vmem [resolvable:$true] %s473_s0  ;;  %s476_s6 = int_to_ptr.hbm [resolvable:$true] %s475_s6 }
  0x15   :  { %458 = vmatpush.bf16.msra.mxu3 %v639_v27  ;;  %v28_v47 = vld.sshfl [vmem:[#allocation1 + $0x10] sm:$0xff pattern:$0x75316420]  ;;  %v629_v48 = vld [vmem:[%s843_s1 + $0x88] sm:$0xff]  ;;  %v49_v49 = vadd.f32 %v48_v40, %v47_v36  ;;  %v83_v51 = vrot.slane %v82_v46, 4  ;;  %v628_v11 = vld [vmem:[%s843_s1 + $0x80] sm:$0xff] }
  0x16   :  { %420 = vmatpush.bf16.msra.mxu0 %v614_v29  ;;  %v56_v50 = vadd.f32 %v55_v43, %v54_v38  ;;  %v36_v52 = vld.sshfl [vmem:[#allocation1 + $0x30] sm:$0xff pattern:$0x75316420]  ;;  %v61_v53 = vsel %vm46_vm0, %v28_v47, 0.0  ;;  %v637_v54 = vld [vmem:[%s843_s1 + $0xc8] sm:$0xff]  ;;  %v78_v1 = vrot.slane %v77_v55, 2 }
  0x17   :  { %433 = vmatpush.bf16.msra.mxu1 %v622_v30  ;;  %v62_v57 = vrot.slane %v61_v53, 4  ;;  %v89_v58 = vsel %vm46_vm0, %v36_v52, 0.0  ;;  %v29_v59 = vld.sshfl [vmem:[#allocation1 + $0x18] sm:$0xff pattern:$0x75316420]  ;;  %v50_v60 = vrot.slane %v49_v49, 2  ;;  %v84_v62 = vadd.f32 %v83_v51, %v82_v46 }
  0x18   :  { %446 = vmatpush.bf16.msra.mxu2 %v630_v31  ;;  %v57_v61 = vrot.slane %v56_v50, 2  ;;  %v90_v63 = vrot.slane %v89_v58, 4  ;;  %v37_v0 = vld.sshfl [vmem:[#allocation1 + $0x38] sm:$0xff pattern:$0x75316420]  ;;  %v68_v3 = vsel %vm46_vm0, %v29_v59, 0.0  ;;  %v79_v13 = vadd.f32 %v78_v1, %v77_v55 }
  0x19   :  { %459 = vmatpush.bf16.msra.mxu3 %v638_v34  ;;  %v63_v2 = vadd.f32 %v62_v57, %v61_v53  ;;  %v96_v4 = vsel %vm46_vm0, %v37_v0, 0.0  ;;  %v51_v7 = vadd.f32 %v50_v60, %v49_v49  ;;  %v85_v9 = vrot.slane %v84_v62, 2  ;;  %v636_v12 = vld [vmem:[%s843_s1 + $0xc0] sm:$0xff] }
  0x1a   :  { %421 = vmatpush.bf16.msra.mxu0 %v613_v39  ;;  %v58_v8 = vadd.f32 %v57_v61, %v56_v50  ;;  %v91_v10 = vadd.f32 %v90_v63, %v89_v58  ;;  %v69_v15 = vrot.slane %v68_v3, 4  ;;  %v97_v16 = vrot.slane %v96_v4, 4 }
  0x1b   :  { %434 = vmatpush.bf16.msra.mxu1 %v621_v44  ;;  %v64_v14 = vrot.slane %v63_v2, 2  ;;  %v52_v17 = vrot.slane %v51_v7, 1  ;;  %v86_v19 = vadd.f32 %v85_v9, %v84_v62  ;;  %v80_v21 = vrot.slane %v79_v13, 1 }
  0x1c   :  { %447 = vmatpush.bf16.msra.mxu2 %v629_v48  ;;  %v59_v18 = vrot.slane %v58_v8, 1  ;;  %v92_v20 = vrot.slane %v91_v10, 2  ;;  %v70_v23 = vadd.f32 %v69_v15, %v68_v3  ;;  %v98_v24 = vadd.f32 %v97_v16, %v96_v4 }
  0x1d   :  { %460 = vmatpush.bf16.msra.mxu3 %v637_v54  ;;  %v65_v22 = vadd.f32 %v64_v14, %v63_v2  ;;  %v53_v25 = vadd.f32 %v52_v17, %v51_v7  ;;  %v87_v27 = vrot.slane %v86_v19, 1  ;;  %v81_v29 = vadd.f32 %v80_v21, %v79_v13 }
  0x1e   :  { %422 = vmatpush.bf16.msra.mxu0 %v612_v5  ;;  %v60_v26 = vadd.f32 %v59_v18, %v58_v8  ;;  %v93_v28 = vadd.f32 %v92_v20, %v91_v10  ;;  %v71_v31 = vrot.slane %v70_v23, 2  ;;  %v99_v32 = vrot.slane %v98_v24, 2 }
  0x1f   :  { %435 = vmatpush.bf16.msra.mxu1 %v620_v6  ;;  %v66_v30 = vrot.slane %v65_v22, 1  ;;  %v110_v33 = vmul.f32 %v807_v56, %v53_v25  ;;  %v88_v34 = vadd.f32 %v87_v27, %v86_v19  ;;  %v114_v37 = vmul.f32 %v807_v56, %v81_v29 }
  0x20   :  { %448 = vmatpush.bf16.msra.mxu2 %v628_v11  ;;  %v111_v35 = vmul.f32 %v807_v56, %v60_v26  ;;  %v94_v36 = vrot.slane %v93_v28, 1  ;;  %v72_v39 = vadd.f32 %v71_v31, %v70_v23  ;;  %v100_v40 = vadd.f32 %v99_v32, %v98_v24 }
  0x21   :  { %461 = vmatpush.bf16.msra.mxu3 %v636_v12  ;;  %v67_v38 = vadd.f32 %v66_v30, %v65_v22  ;;  %v118_v41 = vpack.c.bf16 %v110_v33, %v110_v33  ;;  %v115_v42 = vmul.f32 %v807_v56, %v88_v34  ;;  %v122_v45 = vpack.c.bf16 %v114_v37, %v114_v37 }
  0x22   :  { %v119_v43 = vpack.c.bf16 %v111_v35, %v111_v35  ;;  %v95_v44 = vadd.f32 %v94_v36, %v93_v28  ;;  %v73_v47 = vrot.slane %v72_v39, 1  ;;  %v101_v48 = vrot.slane %v100_v40, 1 }
  0x23   :  { %v112_v46 = vmul.f32 %v807_v56, %v67_v38  ;;  %v202_v49 = vunpack.c.l.b16 %v118_v41  ;;  %v123_v50 = vpack.c.bf16 %v115_v42, %v115_v42  ;;  %v206_v53 = vunpack.c.l.b16 %v122_v45 }
  0x24   :  { %v203_v51 = vunpack.c.l.b16 %v119_v43  ;;  %v116_v52 = vmul.f32 %v807_v56, %v95_v44  ;;  %v74_v55 = vadd.f32 %v73_v47, %v72_v39  ;;  %v102_v57 = vadd.f32 %v101_v48, %v100_v40 }
  0x25   :  { %v120_v54 = vpack.c.bf16 %v112_v46, %v112_v46  ;;  %v207_v58 = vunpack.c.l.b16 %v123_v50  ;;  %v211_v60 = vsel %vm210_vm2, %v206_v53, %v202_v49 }
  0x26   :  { %v124_v59 = vpack.c.bf16 %v116_v52, %v116_v52  ;;  %v113_v62 = vmul.f32 %v807_v56, %v74_v55  ;;  %v117_v63 = vmul.f32 %v807_v56, %v102_v57  ;;  %v215_v0 = vpack.c.b16 %v211_v60, %v211_v60  ;;  %v646_v56 = vld [vmem:[%s844_s2] ss:$0 sm:$0xff] }
  0x27   :  { %v204_v61 = vunpack.c.l.b16 %v120_v54  ;;  %v212_v1 = vsel %vm210_vm2, %v207_v58, %v203_v51 }
  0x28   :  { %v208_v2 = vunpack.c.l.b16 %v124_v59  ;;  %v216_v3 = vpack.c.b16 %v212_v1, %v212_v1  ;;  %v121_v4 = vpack.c.bf16 %v113_v62, %v113_v62  ;;  %v125_v5 = vpack.c.bf16 %v117_v63, %v117_v63  ;;  %423 = vmatmul.bf16.vlgmr.msra.gmra.mxu0 %v215_v0 }
  0x2a   :  { %v213_v6 = vsel %vm210_vm2, %v208_v2, %v204_v61  ;;  %436 = vmatmul.bf16.vlgmr.msra.gmra.mxu1 %v216_v3  ;;  %v205_v8 = vunpack.c.l.b16 %v121_v4  ;;  %v209_v9 = vunpack.c.l.b16 %v125_v5 }
  0x2b   :  { %v217_v7 = vpack.c.b16 %v213_v6, %v213_v6 }
  0x2c   :  { %v214_v10 = vsel %vm210_vm2, %v209_v9, %v205_v8 }
  0x2d   :  { %449 = vmatmul.bf16.vlgmr.msra.gmra.mxu2 %v217_v7  ;;  %v218_v11 = vpack.c.b16 %v214_v10, %v214_v10 }
  0x2f   :  { %462 = vmatmul.bf16.vlgmr.msra.gmra.mxu3 %v218_v11 }
  0xa5   :  { %v424_v12 = vpop.f32.mrf.mxu0 }
  0xa6   :  { %v425_v14 = vadd.f32 %v646_v56, %v424_v12 }
  0xa7   :  { %v437_v13 = vpop.f32.mrf.mxu1 }
  0xa8   :  { %v438_v15 = vadd.f32 %v437_v13, %v425_v14 }
  0xad   :  { %v426_v16 = vpop.f32.mrf.mxu0 }
  0xaf   :  { %v439_v18 = vpop.f32.mrf.mxu1 }
  0xb0   :  { %v450_v17 = vpop.f32.mrf.mxu2 }
  0xb1   :  { %v451_v19 = vadd.f32 %v450_v17, %v438_v15 }
  0xb2   :  { %v463_v20 = vpop.f32.mrf.mxu3 }
  0xb3   :  { %v464_v21 = vadd.f32 %v463_v20, %v451_v19 }
  0xb5   :  { %467 = vst [vmem:[#allocation2] sm:$0x3] %v464_v21 }
  0xb6   :  { %478 = dma.vmem_to_hbm [thread:$0]  %s474_s0, 32, %s476_s6, [#allocation3]  }
  0xb8   :  { %v452_v22 = vpop.f32.mrf.mxu2 }
  0xba   :  { %v465_v23 = vpop.f32.mrf.mxu3 }
  0xbb   :  { %673 = dma.done.wait [#allocation3], 32  }
  0xbc   :  { %674 = vsyncadd [#allocation3], 4294967264 }
  0xbd   :  { %483 = vsyncpa [#allocation3], 1 }

</bundles_post_ra>
